<compile_context>
chip_gen: v7x
topology: tpu7x:2x2x1
jax: 0.10.0
libtpu: 0.0.40
codegen_flags: <defaults>
</compile_context>

<pallas_src>
import jax
import jax.numpy as jnp
from jax.experimental import pallas as pl
from jax.experimental.pallas import tpu as pltpu

V_THRESHOLD = 1.0
V_RESET = 0.0


# ----------------------------------------------------------------------------
# Pallas kernel: for one M-block, run all T timesteps of
#   I_t = W @ patches_t + b            (MXU, bf16 in / f32 accumulate)
#   v += I_t ; spike = v >= 1 ; v -> 0 where spiked   (IF neuron, f32)
# The membrane potential v is a loop carry; it never leaves the kernel.
# ----------------------------------------------------------------------------
def _stream_matmul_if_kernel(p_ref, w_ref, b_ref, s_ref):
    # p: [T, K, Mb] bf16   w: [N, K] bf16   b: [N, 1] f32   s(out): [T, N, Mb] bf16
    T = p_ref.shape[0]
    N, Mb = s_ref.shape[1], s_ref.shape[2]
    w = w_ref[...]                                      # hoisted weight load
    bias = jnp.broadcast_to(b_ref[...], (N, Mb))        # hoisted broadcast
    v = jnp.zeros((N, Mb), jnp.float32)
    for t in range(T):                                  # static unroll (T small)
        i_t = jnp.dot(w, p_ref[t], preferred_element_type=jnp.float32) + bias
        v = v + i_t                                     # neuronal charge
        fired = v >= V_THRESHOLD                        # fire (Heaviside fwd)
        s_ref[t] = jnp.where(fired, 1.0, 0.0).astype(s_ref.dtype)
        v = jnp.where(fired, V_RESET, v)                # hard reset


# ----------------------------------------------------------------------------
# Pallas kernel: fused classifier head.  All T timesteps of
#   I_t = W @ x_t + b ; IF fire/reset ; spike-count accumulation,
# emitting only the time-averaged output [10, B] (no per-t spike writeback).
# ----------------------------------------------------------------------------
def _final_linear_if_mean_kernel(x_ref, w_ref, b_ref, o_ref):
    # x: [T, K, B] bf16   w: [10, K] bf16   b: [10, 1] f32   o(out): [10, B] f32
    T = x_ref.shape[0]
    N, Bm = o_ref.shape
    w = w_ref[...]
    bias = jnp.broadcast_to(b_ref[...], (N, Bm))
    inv_t = jnp.float32(1.0 / T)
    v = jnp.zeros((N, Bm), jnp.float32)
    acc = jnp.zeros((N, Bm), jnp.float32)
    for t in range(T):
        i_t = jnp.dot(w, x_ref[t], preferred_element_type=jnp.float32) + bias
        v = v + i_t
        fired = v >= V_THRESHOLD
        acc = acc + fired.astype(jnp.float32)
        v = jnp.where(fired, V_RESET, v)
    o_ref[...] = acc * inv_t


def _pick_m_block(M, N):
    """Lane-dim block size: multiple of 128 that divides M, sized so the f32
    working set (v / I_t / bias) stays around 8 vregs per array."""
    if M % 128 != 0:
        return M                       # tiny tail layers: whole array, grid=(1,)
    if M % 512 == 0 and N <= 16:
        return 512
    if M % 256 == 0:
        return 256
    return 128


def _if_layer_stream(patches, w2, b2):
    """patches:[T,K,M] bf16, w2:[N,K] bf16, b2:[N,1] f32 -> spikes [T,N,M] bf16."""
    T, K, M = patches.shape
    N = w2.shape[0]
    m_blk = _pick_m_block(M, N)
    return pl.pallas_call(
        _stream_matmul_if_kernel,
        out_shape=jax.ShapeDtypeStruct((T, N, M), jnp.bfloat16),
        grid=(M // m_blk,),
        in_specs=[
            pl.BlockSpec((T, K, m_blk), lambda i: (0, 0, i)),
            pl.BlockSpec((N, K), lambda i: (0, 0)),
            pl.BlockSpec((N, 1), lambda i: (0, 0)),
        ],
        out_specs=pl.BlockSpec((T, N, m_blk), lambda i: (0, 0, i)),
        compiler_params=pltpu.CompilerParams(
            dimension_semantics=("parallel",)),
    )(patches, w2, b2)


def _final_layer_stream(x_lin, lw2, lb2):
    """x_lin:[T,64,B] bf16, lw2:[10,64] bf16, lb2:[10,1] f32 -> mean spikes [10,B] f32."""
    T, K, Bm = x_lin.shape
    N = lw2.shape[0]
    return pl.pallas_call(
        _final_linear_if_mean_kernel,
        out_shape=jax.ShapeDtypeStruct((N, Bm), jnp.float32),
        grid=(1,),
        in_specs=[
            pl.BlockSpec((T, K, Bm), lambda i: (0, 0, 0)),
            pl.BlockSpec((N, K), lambda i: (0, 0)),
            pl.BlockSpec((N, 1), lambda i: (0, 0)),
        ],
        out_specs=pl.BlockSpec((N, Bm), lambda i: (0, 0)),
    )(x_lin, lw2, lb2)


# ----------------------------------------------------------------------------
# JAX glue: im2col for 3x3 / stride 2 / pad 1 in channel-major (transposed)
# layout, batched over all T timesteps at once.
# ----------------------------------------------------------------------------
def _im2col_s2_p1(s):
    """s: [T, Cin, B, H, W] -> patches [T, Cin*9, B*OH*OW] (K order = torch flatten)."""
    T, C, B, H, W = s.shape
    OH, OW = (H - 1) // 2 + 1, (W - 1) // 2 + 1
    sp = jnp.pad(s, ((0, 0), (0, 0), (0, 0), (1, 1), (1, 1)))
    cols = [sp[:, :, :, kh:kh + 2 * OH:2, kw:kw + 2 * OW:2]
            for kh in range(3) for kw in range(3)]
    p = jnp.stack(cols, axis=2)                         # [T, C, 9, B, OH, OW]
    return p.reshape(T, C * 9, B * OH * OW), OH, OW


# ----------------------------------------------------------------------------
# Deterministic parameter init (mimics PyTorch default U(-1/sqrt(fan_in), ...))
# ----------------------------------------------------------------------------
_CONV_SPECS = [(16, 2), (32, 16), (32, 32), (64, 32), (64, 64), (64, 64)]


def init_params(key):
    keys = jax.random.split(key, 2 * len(_CONV_SPECS) + 2)
    convs = []
    k = 0
    for cout, cin in _CONV_SPECS:
        bound = 1.0 / float(cin * 9) ** 0.5
        w = jax.random.uniform(keys[k], (cout, cin, 3, 3), jnp.float32, -bound, bound)
        bb = jax.random.uniform(keys[k + 1], (cout,), jnp.float32, -bound, bound)
        convs.append((w, bb))
        k += 2
    bound = 1.0 / 64.0 ** 0.5
    lw = jax.random.uniform(keys[k], (10, 64), jnp.float32, -bound, bound)
    lb = jax.random.uniform(keys[k + 1], (10,), jnp.float32, -bound, bound)
    return convs, (lw, lb)


# ----------------------------------------------------------------------------
# Full forward pass: layer-outer / time-inner; 7 pallas_calls total.
# ----------------------------------------------------------------------------
@jax.jit
def dvs_event_net_forward(x_all, convs, linear):
    """x_all: [B, T, 2, H, W] -> [B, 10] (time-averaged output spikes)."""
    B, T = x_all.shape[0], x_all.shape[1]
    # [B,T,2,H,W] -> channel-major stream [T, Cin, B, H, W]; events are 0/1 so
    # the bf16 cast is lossless.
    s = jnp.transpose(x_all, (1, 2, 0, 3, 4)).astype(jnp.bfloat16)
    for w, bb in convs:
        cout, cin = w.shape[0], w.shape[1]
        patches, oh, ow = _im2col_s2_p1(s)
        w2 = w.reshape(cout, cin * 9).astype(jnp.bfloat16)   # [N, K], torch order
        b2 = bb.reshape(cout, 1).astype(jnp.float32)
        spikes = _if_layer_stream(patches, w2, b2)           # [T, Cout, B*OH*OW]
        s = spikes.reshape(T, cout, B, oh, ow)               # free reshape
    # s: [T, 64, B, 1, 1] -> fused linear(64->10) + IF + temporal mean.
    lw, lb = linear
    x_lin = s.reshape(T, 64, B)                              # [T, K=64, M=B]
    out_mean = _final_layer_stream(x_lin, lw.astype(jnp.bfloat16),
                                   lb.reshape(10, 1).astype(jnp.float32))  # [10, B]
    return out_mean.T                                        # [B, 10]


if __name__ == "__main__":
    key = jax.random.PRNGKey(0)
    kp, kx = jax.random.split(key)
    convs, linear = init_params(kp)

    B, T, H = 2, 4, 64   # H=64 so six stride-2 convs reach 1x1 (64*1*1 -> linear)
    x_all = jax.random.bernoulli(kx, 0.3, (B, T, 2, H, H)).astype(jnp.float32)

    out = dvs_event_net_forward(x_all, convs, linear)
    out = jax.block_until_ready(out)
    assert out.shape == (B, 10) and out.dtype == jnp.float32
    assert bool(jnp.all(jnp.isfinite(out)))
    print("KERNEL_OK")
</pallas_src>

<mosaic_0001>
module attributes {stable_mosaic.version = 11 : i64} {
  func.func @_stream_matmul_if_kernel(%arg0: i32, %arg1: memref<4x18x512xbf16, #tpu.memory_space<vmem>>, %arg2: memref<16x18xbf16, #tpu.memory_space<vmem>>, %arg3: memref<16x1xf32, #tpu.memory_space<vmem>>, %arg4: memref<4x16x512xbf16, #tpu.memory_space<vmem>>) attributes {dimension_semantics = [#tpu.dimension_semantics<parallel>], iteration_bounds = array<i64: 4>, scalar_prefetch = 0 : i64, scratch_operands = 0 : i64, tpu.core_type = #tpu.core_type<tc>, window_params = [{transform_indices = @transform_0, window_bounds = array<i64: 4, 18, 512>}, {pipeline_mode = #tpu.pipeline_mode<synchronous>, transform_indices = @transform_1, window_bounds = array<i64: 16, 18>}, {pipeline_mode = #tpu.pipeline_mode<synchronous>, transform_indices = @transform_2, window_bounds = array<i64: 16, 1>}, {transform_indices = @transform_3, window_bounds = array<i64: 4, 16, 512>}]} {
    %c0 = arith.constant 0 : index
    %c0_0 = arith.constant 0 : index
    %0 = vector.load %arg2[%c0, %c0_0] : memref<16x18xbf16, #tpu.memory_space<vmem>>, vector<16x18xbf16>
    %c0_1 = arith.constant 0 : index
    %c0_2 = arith.constant 0 : index
    %1 = vector.load %arg3[%c0_1, %c0_2] : memref<16x1xf32, #tpu.memory_space<vmem>>, vector<16x1xf32>
    %2 = vector.shape_cast %1 : vector<16x1xf32> to vector<16x1xf32>
    %3 = vector.broadcast %2 : vector<16x1xf32> to vector<16x512xf32>
    %cst = arith.constant 0.000000e+00 : f32
    %4 = vector.broadcast %cst : f32 to vector<16x512xf32>
    %c0_3 = arith.constant 0 : index
    %c0_4 = arith.constant 0 : index
    %c0_5 = arith.constant 0 : index
    %5 = vector.load %arg1[%c0_3, %c0_4, %c0_5] : memref<4x18x512xbf16, #tpu.memory_space<vmem>>, vector<1x18x512xbf16>
    %6 = vector.shape_cast %5 : vector<1x18x512xbf16> to vector<18x512xbf16>
    %cst_6 = arith.constant dense<0.000000e+00> : vector<16x512xf32>
    %7 = tpu.matmul %0, %6, %cst_6 {dimension_numbers = #tpu.dot_dimension_numbers<[1], [0], [0], [1], [0, 0, 1, 1], [], []>} : vector<16x18xbf16>, vector<18x512xbf16>, vector<16x512xf32> -> vector<16x512xf32>
    %8 = arith.addf %7, %3 : vector<16x512xf32>
    %9 = arith.addf %4, %8 : vector<16x512xf32>
    %cst_7 = arith.constant 1.000000e+00 : f32
    %10 = vector.broadcast %cst_7 : f32 to vector<16x512xf32>
    %11 = arith.cmpf oge, %9, %10 : vector<16x512xf32>
    %cst_8 = arith.constant 1.000000e+00 : f32
    %cst_9 = arith.constant 0.000000e+00 : f32
    %12 = vector.broadcast %cst_8 : f32 to vector<16x512xf32>
    %13 = vector.broadcast %cst_9 : f32 to vector<16x512xf32>
    %14 = arith.select %11, %12, %13 : vector<16x512xi1>, vector<16x512xf32>
    %15 = arith.truncf %14 : vector<16x512xf32> to vector<16x512xbf16>
    %c0_10 = arith.constant 0 : index
    %c0_11 = arith.constant 0 : index
    %c0_12 = arith.constant 0 : index
    %16 = vector.load %arg4[%c0_10, %c0_11, %c0_12] : memref<4x16x512xbf16, #tpu.memory_space<vmem>>, vector<1x16x512xbf16>
    %17 = vector.shape_cast %16 : vector<1x16x512xbf16> to vector<16x512xbf16>
    %18 = vector.shape_cast %15 : vector<16x512xbf16> to vector<1x16x512xbf16>
    tpu.vector_store %arg4[%c0_10, %c0_11, %c0_12], %18 {strides = array<i32>} : memref<4x16x512xbf16, #tpu.memory_space<vmem>>, vector<1x16x512xbf16>,
    %cst_13 = arith.constant 0.000000e+00 : f32
    %19 = vector.broadcast %cst_13 : f32 to vector<16x512xf32>
    %20 = arith.select %11, %19, %9 : vector<16x512xi1>, vector<16x512xf32>
    %c1 = arith.constant 1 : index
    %c0_14 = arith.constant 0 : index
    %c0_15 = arith.constant 0 : index
    %21 = vector.load %arg1[%c1, %c0_14, %c0_15] : memref<4x18x512xbf16, #tpu.memory_space<vmem>>, vector<1x18x512xbf16>
    %22 = vector.shape_cast %21 : vector<1x18x512xbf16> to vector<18x512xbf16>
    %cst_16 = arith.constant dense<0.000000e+00> : vector<16x512xf32>
    %23 = tpu.matmul %0, %22, %cst_16 {dimension_numbers = #tpu.dot_dimension_numbers<[1], [0], [0], [1], [0, 0, 1, 1], [], []>} : vector<16x18xbf16>, vector<18x512xbf16>, vector<16x512xf32> -> vector<16x512xf32>
    %24 = arith.addf %23, %3 : vector<16x512xf32>
    %25 = arith.addf %20, %24 : vector<16x512xf32>
    %cst_17 = arith.constant 1.000000e+00 : f32
    %26 = vector.broadcast %cst_17 : f32 to vector<16x512xf32>
    %27 = arith.cmpf oge, %25, %26 : vector<16x512xf32>
    %cst_18 = arith.constant 1.000000e+00 : f32
    %cst_19 = arith.constant 0.000000e+00 : f32
    %28 = vector.broadcast %cst_18 : f32 to vector<16x512xf32>
    %29 = vector.broadcast %cst_19 : f32 to vector<16x512xf32>
    %30 = arith.select %27, %28, %29 : vector<16x512xi1>, vector<16x512xf32>
    %31 = arith.truncf %30 : vector<16x512xf32> to vector<16x512xbf16>
    %c1_20 = arith.constant 1 : index
    %c0_21 = arith.constant 0 : index
    %c0_22 = arith.constant 0 : index
    %32 = vector.load %arg4[%c1_20, %c0_21, %c0_22] : memref<4x16x512xbf16, #tpu.memory_space<vmem>>, vector<1x16x512xbf16>
    %33 = vector.shape_cast %32 : vector<1x16x512xbf16> to vector<16x512xbf16>
    %34 = vector.shape_cast %31 : vector<16x512xbf16> to vector<1x16x512xbf16>
    tpu.vector_store %arg4[%c1_20, %c0_21, %c0_22], %34 {strides = array<i32>} : memref<4x16x512xbf16, #tpu.memory_space<vmem>>, vector<1x16x512xbf16>,
    %cst_23 = arith.constant 0.000000e+00 : f32
    %35 = vector.broadcast %cst_23 : f32 to vector<16x512xf32>
    %36 = arith.select %27, %35, %25 : vector<16x512xi1>, vector<16x512xf32>
    %c2 = arith.constant 2 : index
    %c0_24 = arith.constant 0 : index
    %c0_25 = arith.constant 0 : index
    %37 = vector.load %arg1[%c2, %c0_24, %c0_25] : memref<4x18x512xbf16, #tpu.memory_space<vmem>>, vector<1x18x512xbf16>
    %38 = vector.shape_cast %37 : vector<1x18x512xbf16> to vector<18x512xbf16>
    %cst_26 = arith.constant dense<0.000000e+00> : vector<16x512xf32>
    %39 = tpu.matmul %0, %38, %cst_26 {dimension_numbers = #tpu.dot_dimension_numbers<[1], [0], [0], [1], [0, 0, 1, 1], [], []>} : vector<16x18xbf16>, vector<18x512xbf16>, vector<16x512xf32> -> vector<16x512xf32>
    %40 = arith.addf %39, %3 : vector<16x512xf32>
    %41 = arith.addf %36, %40 : vector<16x512xf32>
    %cst_27 = arith.constant 1.000000e+00 : f32
    %42 = vector.broadcast %cst_27 : f32 to vector<16x512xf32>
    %43 = arith.cmpf oge, %41, %42 : vector<16x512xf32>
    %cst_28 = arith.constant 1.000000e+00 : f32
    %cst_29 = arith.constant 0.000000e+00 : f32
    %44 = vector.broadcast %cst_28 : f32 to vector<16x512xf32>
    %45 = vector.broadcast %cst_29 : f32 to vector<16x512xf32>
    %46 = arith.select %43, %44, %45 : vector<16x512xi1>, vector<16x512xf32>
    %47 = arith.truncf %46 : vector<16x512xf32> to vector<16x512xbf16>
    %c2_30 = arith.constant 2 : index
    %c0_31 = arith.constant 0 : index
    %c0_32 = arith.constant 0 : index
    %48 = vector.load %arg4[%c2_30, %c0_31, %c0_32] : memref<4x16x512xbf16, #tpu.memory_space<vmem>>, vector<1x16x512xbf16>
    %49 = vector.shape_cast %48 : vector<1x16x512xbf16> to vector<16x512xbf16>
    %50 = vector.shape_cast %47 : vector<16x512xbf16> to vector<1x16x512xbf16>
    tpu.vector_store %arg4[%c2_30, %c0_31, %c0_32], %50 {strides = array<i32>} : memref<4x16x512xbf16, #tpu.memory_space<vmem>>, vector<1x16x512xbf16>,
    %cst_33 = arith.constant 0.000000e+00 : f32
    %51 = vector.broadcast %cst_33 : f32 to vector<16x512xf32>
    %52 = arith.select %43, %51, %41 : vector<16x512xi1>, vector<16x512xf32>
    %c3 = arith.constant 3 : index
    %c0_34 = arith.constant 0 : index
    %c0_35 = arith.constant 0 : index
    %53 = vector.load %arg1[%c3, %c0_34, %c0_35] : memref<4x18x512xbf16, #tpu.memory_space<vmem>>, vector<1x18x512xbf16>
    %54 = vector.shape_cast %53 : vector<1x18x512xbf16> to vector<18x512xbf16>
    %cst_36 = arith.constant dense<0.000000e+00> : vector<16x512xf32>
    %55 = tpu.matmul %0, %54, %cst_36 {dimension_numbers = #tpu.dot_dimension_numbers<[1], [0], [0], [1], [0, 0, 1, 1], [], []>} : vector<16x18xbf16>, vector<18x512xbf16>, vector<16x512xf32> -> vector<16x512xf32>
    %56 = arith.addf %55, %3 : vector<16x512xf32>
    %57 = arith.addf %52, %56 : vector<16x512xf32>
    %cst_37 = arith.constant 1.000000e+00 : f32
    %58 = vector.broadcast %cst_37 : f32 to vector<16x512xf32>
    %59 = arith.cmpf oge, %57, %58 : vector<16x512xf32>
    %cst_38 = arith.constant 1.000000e+00 : f32
    %cst_39 = arith.constant 0.000000e+00 : f32
    %60 = vector.broadcast %cst_38 : f32 to vector<16x512xf32>
    %61 = vector.broadcast %cst_39 : f32 to vector<16x512xf32>
    %62 = arith.select %59, %60, %61 : vector<16x512xi1>, vector<16x512xf32>
    %63 = arith.truncf %62 : vector<16x512xf32> to vector<16x512xbf16>
    %c3_40 = arith.constant 3 : index
    %c0_41 = arith.constant 0 : index
    %c0_42 = arith.constant 0 : index
    %64 = vector.load %arg4[%c3_40, %c0_41, %c0_42] : memref<4x16x512xbf16, #tpu.memory_space<vmem>>, vector<1x16x512xbf16>
    %65 = vector.shape_cast %64 : vector<1x16x512xbf16> to vector<16x512xbf16>
    %66 = vector.shape_cast %63 : vector<16x512xbf16> to vector<1x16x512xbf16>
    tpu.vector_store %arg4[%c3_40, %c0_41, %c0_42], %66 {strides = array<i32>} : memref<4x16x512xbf16, #tpu.memory_space<vmem>>, vector<1x16x512xbf16>,
    return
  }
  func.func @transform_0(%arg0: i32) -> (i32, i32, i32) {
    %c0_i32 = arith.constant 0 : i32
    %c0_i32_0 = arith.constant 0 : i32
    %c0_i32_1 = arith.constant 0 : i32
    return %c0_i32, %c0_i32_0, %arg0 : i32, i32, i32
  }
  func.func @transform_1(%arg0: i32) -> (i32, i32) {
    %c0_i32 = arith.constant 0 : i32
    %c0_i32_0 = arith.constant 0 : i32
    %c0_i32_1 = arith.constant 0 : i32
    return %c0_i32, %c0_i32_0 : i32, i32
  }
  func.func @transform_2(%arg0: i32) -> (i32, i32) {
    %c0_i32 = arith.constant 0 : i32
    %c0_i32_0 = arith.constant 0 : i32
    %c0_i32_1 = arith.constant 0 : i32
    return %c0_i32, %c0_i32_0 : i32, i32
  }
  func.func @transform_3(%arg0: i32) -> (i32, i32, i32) {
    %c0_i32 = arith.constant 0 : i32
    %c0_i32_0 = arith.constant 0 : i32
    %c0_i32_1 = arith.constant 0 : i32
    return %c0_i32, %c0_i32_0, %arg0 : i32, i32, i32
  }
}

module attributes {stable_mosaic.version = 11 : i64} {
  func.func @_stream_matmul_if_kernel(%arg0: i32, %arg1: memref<4x144x256xbf16, #tpu.memory_space<vmem>>, %arg2: memref<32x144xbf16, #tpu.memory_space<vmem>>, %arg3: memref<32x1xf32, #tpu.memory_space<vmem>>, %arg4: memref<4x32x256xbf16, #tpu.memory_space<vmem>>) attributes {dimension_semantics = [#tpu.dimension_semantics<parallel>], iteration_bounds = array<i64: 2>, scalar_prefetch = 0 : i64, scratch_operands = 0 : i64, tpu.core_type = #tpu.core_type<tc>, window_params = [{transform_indices = @transform_0, window_bounds = array<i64: 4, 144, 256>}, {pipeline_mode = #tpu.pipeline_mode<synchronous>, transform_indices = @transform_1, window_bounds = array<i64: 32, 144>}, {pipeline_mode = #tpu.pipeline_mode<synchronous>, transform_indices = @transform_2, window_bounds = array<i64: 32, 1>}, {transform_indices = @transform_3, window_bounds = array<i64: 4, 32, 256>}]} {
    %c0 = arith.constant 0 : index
    %c0_0 = arith.constant 0 : index
    %0 = vector.load %arg2[%c0, %c0_0] : memref<32x144xbf16, #tpu.memory_space<vmem>>, vector<32x144xbf16>
    %c0_1 = arith.constant 0 : index
    %c0_2 = arith.constant 0 : index
    %1 = vector.load %arg3[%c0_1, %c0_2] : memref<32x1xf32, #tpu.memory_space<vmem>>, vector<32x1xf32>
    %2 = vector.shape_cast %1 : vector<32x1xf32> to vector<32x1xf32>
    %3 = vector.broadcast %2 : vector<32x1xf32> to vector<32x256xf32>
    %cst = arith.constant 0.000000e+00 : f32
    %4 = vector.broadcast %cst : f32 to vector<32x256xf32>
    %c0_3 = arith.constant 0 : index
    %c0_4 = arith.constant 0 : index
    %c0_5 = arith.constant 0 : index
    %5 = vector.load %arg1[%c0_3, %c0_4, %c0_5] : memref<4x144x256xbf16, #tpu.memory_space<vmem>>, vector<1x144x256xbf16>
    %6 = vector.shape_cast %5 : vector<1x144x256xbf16> to vector<144x256xbf16>
    %cst_6 = arith.constant dense<0.000000e+00> : vector<32x256xf32>
    %7 = tpu.matmul %0, %6, %cst_6 {dimension_numbers = #tpu.dot_dimension_numbers<[1], [0], [0], [1], [0, 0, 1, 1], [], []>} : vector<32x144xbf16>, vector<144x256xbf16>, vector<32x256xf32> -> vector<32x256xf32>
    %8 = arith.addf %7, %3 : vector<32x256xf32>
    %9 = arith.addf %4, %8 : vector<32x256xf32>
    %cst_7 = arith.constant 1.000000e+00 : f32
    %10 = vector.broadcast %cst_7 : f32 to vector<32x256xf32>
    %11 = arith.cmpf oge, %9, %10 : vector<32x256xf32>
    %cst_8 = arith.constant 1.000000e+00 : f32
    %cst_9 = arith.constant 0.000000e+00 : f32
    %12 = vector.broadcast %cst_8 : f32 to vector<32x256xf32>
    %13 = vector.broadcast %cst_9 : f32 to vector<32x256xf32>
    %14 = arith.select %11, %12, %13 : vector<32x256xi1>, vector<32x256xf32>
    %15 = arith.truncf %14 : vector<32x256xf32> to vector<32x256xbf16>
    %c0_10 = arith.constant 0 : index
    %c0_11 = arith.constant 0 : index
    %c0_12 = arith.constant 0 : index
    %16 = vector.load %arg4[%c0_10, %c0_11, %c0_12] : memref<4x32x256xbf16, #tpu.memory_space<vmem>>, vector<1x32x256xbf16>
    %17 = vector.shape_cast %16 : vector<1x32x256xbf16> to vector<32x256xbf16>
    %18 = vector.shape_cast %15 : vector<32x256xbf16> to vector<1x32x256xbf16>
    tpu.vector_store %arg4[%c0_10, %c0_11, %c0_12], %18 {strides = array<i32>} : memref<4x32x256xbf16, #tpu.memory_space<vmem>>, vector<1x32x256xbf16>,
    %cst_13 = arith.constant 0.000000e+00 : f32
    %19 = vector.broadcast %cst_13 : f32 to vector<32x256xf32>
    %20 = arith.select %11, %19, %9 : vector<32x256xi1>, vector<32x256xf32>
    %c1 = arith.constant 1 : index
    %c0_14 = arith.constant 0 : index
    %c0_15 = arith.constant 0 : index
    %21 = vector.load %arg1[%c1, %c0_14, %c0_15] : memref<4x144x256xbf16, #tpu.memory_space<vmem>>, vector<1x144x256xbf16>
    %22 = vector.shape_cast %21 : vector<1x144x256xbf16> to vector<144x256xbf16>
    %cst_16 = arith.constant dense<0.000000e+00> : vector<32x256xf32>
    %23 = tpu.matmul %0, %22, %cst_16 {dimension_numbers = #tpu.dot_dimension_numbers<[1], [0], [0], [1], [0, 0, 1, 1], [], []>} : vector<32x144xbf16>, vector<144x256xbf16>, vector<32x256xf32> -> vector<32x256xf32>
    %24 = arith.addf %23, %3 : vector<32x256xf32>
    %25 = arith.addf %20, %24 : vector<32x256xf32>
    %cst_17 = arith.constant 1.000000e+00 : f32
    %26 = vector.broadcast %cst_17 : f32 to vector<32x256xf32>
    %27 = arith.cmpf oge, %25, %26 : vector<32x256xf32>
    %cst_18 = arith.constant 1.000000e+00 : f32
    %cst_19 = arith.constant 0.000000e+00 : f32
    %28 = vector.broadcast %cst_18 : f32 to vector<32x256xf32>
    %29 = vector.broadcast %cst_19 : f32 to vector<32x256xf32>
    %30 = arith.select %27, %28, %29 : vector<32x256xi1>, vector<32x256xf32>
    %31 = arith.truncf %30 : vector<32x256xf32> to vector<32x256xbf16>
    %c1_20 = arith.constant 1 : index
    %c0_21 = arith.constant 0 : index
    %c0_22 = arith.constant 0 : index
    %32 = vector.load %arg4[%c1_20, %c0_21, %c0_22] : memref<4x32x256xbf16, #tpu.memory_space<vmem>>, vector<1x32x256xbf16>
    %33 = vector.shape_cast %32 : vector<1x32x256xbf16> to vector<32x256xbf16>
    %34 = vector.shape_cast %31 : vector<32x256xbf16> to vector<1x32x256xbf16>
    tpu.vector_store %arg4[%c1_20, %c0_21, %c0_22], %34 {strides = array<i32>} : memref<4x32x256xbf16, #tpu.memory_space<vmem>>, vector<1x32x256xbf16>,
    %cst_23 = arith.constant 0.000000e+00 : f32
    %35 = vector.broadcast %cst_23 : f32 to vector<32x256xf32>
    %36 = arith.select %27, %35, %25 : vector<32x256xi1>, vector<32x256xf32>
    %c2 = arith.constant 2 : index
    %c0_24 = arith.constant 0 : index
    %c0_25 = arith.constant 0 : index
    %37 = vector.load %arg1[%c2, %c0_24, %c0_25] : memref<4x144x256xbf16, #tpu.memory_space<vmem>>, vector<1x144x256xbf16>
    %38 = vector.shape_cast %37 : vector<1x144x256xbf16> to vector<144x256xbf16>
    %cst_26 = arith.constant dense<0.000000e+00> : vector<32x256xf32>
    %39 = tpu.matmul %0, %38, %cst_26 {dimension_numbers = #tpu.dot_dimension_numbers<[1], [0], [0], [1], [0, 0, 1, 1], [], []>} : vector<32x144xbf16>, vector<144x256xbf16>, vector<32x256xf32> -> vector<32x256xf32>
    %40 = arith.addf %39, %3 : vector<32x256xf32>
    %41 = arith.addf %36, %40 : vector<32x256xf32>
    %cst_27 = arith.constant 1.000000e+00 : f32
    %42 = vector.broadcast %cst_27 : f32 to vector<32x256xf32>
    %43 = arith.cmpf oge, %41, %42 : vector<32x256xf32>
    %cst_28 = arith.constant 1.000000e+00 : f32
    %cst_29 = arith.constant 0.000000e+00 : f32
    %44 = vector.broadcast %cst_28 : f32 to vector<32x256xf32>
    %45 = vector.broadcast %cst_29 : f32 to vector<32x256xf32>
    %46 = arith.select %43, %44, %45 : vector<32x256xi1>, vector<32x256xf32>
    %47 = arith.truncf %46 : vector<32x256xf32> to vector<32x256xbf16>
    %c2_30 = arith.constant 2 : index
    %c0_31 = arith.constant 0 : index
    %c0_32 = arith.constant 0 : index
    %48 = vector.load %arg4[%c2_30, %c0_31, %c0_32] : memref<4x32x256xbf16, #tpu.memory_space<vmem>>, vector<1x32x256xbf16>
    %49 = vector.shape_cast %48 : vector<1x32x256xbf16> to vector<32x256xbf16>
    %50 = vector.shape_cast %47 : vector<32x256xbf16> to vector<1x32x256xbf16>
    tpu.vector_store %arg4[%c2_30, %c0_31, %c0_32], %50 {strides = array<i32>} : memref<4x32x256xbf16, #tpu.memory_space<vmem>>, vector<1x32x256xbf16>,
    %cst_33 = arith.constant 0.000000e+00 : f32
    %51 = vector.broadcast %cst_33 : f32 to vector<32x256xf32>
    %52 = arith.select %43, %51, %41 : vector<32x256xi1>, vector<32x256xf32>
    %c3 = arith.constant 3 : index
    %c0_34 = arith.constant 0 : index
    %c0_35 = arith.constant 0 : index
    %53 = vector.load %arg1[%c3, %c0_34, %c0_35] : memref<4x144x256xbf16, #tpu.memory_space<vmem>>, vector<1x144x256xbf16>
    %54 = vector.shape_cast %53 : vector<1x144x256xbf16> to vector<144x256xbf16>
    %cst_36 = arith.constant dense<0.000000e+00> : vector<32x256xf32>
    %55 = tpu.matmul %0, %54, %cst_36 {dimension_numbers = #tpu.dot_dimension_numbers<[1], [0], [0], [1], [0, 0, 1, 1], [], []>} : vector<32x144xbf16>, vector<144x256xbf16>, vector<32x256xf32> -> vector<32x256xf32>
    %56 = arith.addf %55, %3 : vector<32x256xf32>
    %57 = arith.addf %52, %56 : vector<32x256xf32>
    %cst_37 = arith.constant 1.000000e+00 : f32
    %58 = vector.broadcast %cst_37 : f32 to vector<32x256xf32>
    %59 = arith.cmpf oge, %57, %58 : vector<32x256xf32>
    %cst_38 = arith.constant 1.000000e+00 : f32
    %cst_39 = arith.constant 0.000000e+00 : f32
    %60 = vector.broadcast %cst_38 : f32 to vector<32x256xf32>
    %61 = vector.broadcast %cst_39 : f32 to vector<32x256xf32>
    %62 = arith.select %59, %60, %61 : vector<32x256xi1>, vector<32x256xf32>
    %63 = arith.truncf %62 : vector<32x256xf32> to vector<32x256xbf16>
    %c3_40 = arith.constant 3 : index
    %c0_41 = arith.constant 0 : index
    %c0_42 = arith.constant 0 : index
    %64 = vector.load %arg4[%c3_40, %c0_41, %c0_42] : memref<4x32x256xbf16, #tpu.memory_space<vmem>>, vector<1x32x256xbf16>
    %65 = vector.shape_cast %64 : vector<1x32x256xbf16> to vector<32x256xbf16>
    %66 = vector.shape_cast %63 : vector<32x256xbf16> to vector<1x32x256xbf16>
    tpu.vector_store %arg4[%c3_40, %c0_41, %c0_42], %66 {strides = array<i32>} : memref<4x32x256xbf16, #tpu.memory_space<vmem>>, vector<1x32x256xbf16>,
    return
  }
  func.func @transform_0(%arg0: i32) -> (i32, i32, i32) {
    %c0_i32 = arith.constant 0 : i32
    %c0_i32_0 = arith.constant 0 : i32
    %c0_i32_1 = arith.constant 0 : i32
    return %c0_i32, %c0_i32_0, %arg0 : i32, i32, i32
  }
  func.func @transform_1(%arg0: i32) -> (i32, i32) {
    %c0_i32 = arith.constant 0 : i32
    %c0_i32_0 = arith.constant 0 : i32
    %c0_i32_1 = arith.constant 0 : i32
    return %c0_i32, %c0_i32_0 : i32, i32
  }
  func.func @transform_2(%arg0: i32) -> (i32, i32) {
    %c0_i32 = arith.constant 0 : i32
    %c0_i32_0 = arith.constant 0 : i32
    %c0_i32_1 = arith.constant 0 : i32
    return %c0_i32, %c0_i32_0 : i32, i32
  }
  func.func @transform_3(%arg0: i32) -> (i32, i32, i32) {
    %c0_i32 = arith.constant 0 : i32
    %c0_i32_0 = arith.constant 0 : i32
    %c0_i32_1 = arith.constant 0 : i32
    return %c0_i32, %c0_i32_0, %arg0 : i32, i32, i32
  }
}

module attributes {stable_mosaic.version = 11 : i64} {
  func.func @_stream_matmul_if_kernel(%arg0: i32, %arg1: memref<4x288x128xbf16, #tpu.memory_space<vmem>>, %arg2: memref<32x288xbf16, #tpu.memory_space<vmem>>, %arg3: memref<32x1xf32, #tpu.memory_space<vmem>>, %arg4: memref<4x32x128xbf16, #tpu.memory_space<vmem>>) attributes {dimension_semantics = [#tpu.dimension_semantics<parallel>], iteration_bounds = array<i64: 1>, scalar_prefetch = 0 : i64, scratch_operands = 0 : i64, tpu.core_type = #tpu.core_type<tc>, window_params = [{transform_indices = @transform_0, window_bounds = array<i64: 4, 288, 128>}, {pipeline_mode = #tpu.pipeline_mode<synchronous>, transform_indices = @transform_1, window_bounds = array<i64: 32, 288>}, {pipeline_mode = #tpu.pipeline_mode<synchronous>, transform_indices = @transform_2, window_bounds = array<i64: 32, 1>}, {transform_indices = @transform_3, window_bounds = array<i64: 4, 32, 128>}]} {
    %c0 = arith.constant 0 : index
    %c0_0 = arith.constant 0 : index
    %0 = vector.load %arg2[%c0, %c0_0] : memref<32x288xbf16, #tpu.memory_space<vmem>>, vector<32x288xbf16>
    %c0_1 = arith.constant 0 : index
    %c0_2 = arith.constant 0 : index
    %1 = vector.load %arg3[%c0_1, %c0_2] : memref<32x1xf32, #tpu.memory_space<vmem>>, vector<32x1xf32>
    %2 = vector.shape_cast %1 : vector<32x1xf32> to vector<32x1xf32>
    %3 = vector.broadcast %2 : vector<32x1xf32> to vector<32x128xf32>
    %cst = arith.constant 0.000000e+00 : f32
    %4 = vector.broadcast %cst : f32 to vector<32x128xf32>
    %c0_3 = arith.constant 0 : index
    %c0_4 = arith.constant 0 : index
    %c0_5 = arith.constant 0 : index
    %5 = vector.load %arg1[%c0_3, %c0_4, %c0_5] : memref<4x288x128xbf16, #tpu.memory_space<vmem>>, vector<1x288x128xbf16>
    %6 = vector.shape_cast %5 : vector<1x288x128xbf16> to vector<288x128xbf16>
    %cst_6 = arith.constant dense<0.000000e+00> : vector<32x128xf32>
    %7 = tpu.matmul %0, %6, %cst_6 {dimension_numbers = #tpu.dot_dimension_numbers<[1], [0], [0], [1], [0, 0, 1, 1], [], []>} : vector<32x288xbf16>, vector<288x128xbf16>, vector<32x128xf32> -> vector<32x128xf32>
    %8 = arith.addf %7, %3 : vector<32x128xf32>
    %9 = arith.addf %4, %8 : vector<32x128xf32>
    %cst_7 = arith.constant 1.000000e+00 : f32
    %10 = vector.broadcast %cst_7 : f32 to vector<32x128xf32>
    %11 = arith.cmpf oge, %9, %10 : vector<32x128xf32>
    %cst_8 = arith.constant 1.000000e+00 : f32
    %cst_9 = arith.constant 0.000000e+00 : f32
    %12 = vector.broadcast %cst_8 : f32 to vector<32x128xf32>
    %13 = vector.broadcast %cst_9 : f32 to vector<32x128xf32>
    %14 = arith.select %11, %12, %13 : vector<32x128xi1>, vector<32x128xf32>
    %15 = arith.truncf %14 : vector<32x128xf32> to vector<32x128xbf16>
    %c0_10 = arith.constant 0 : index
    %c0_11 = arith.constant 0 : index
    %c0_12 = arith.constant 0 : index
    %16 = vector.load %arg4[%c0_10, %c0_11, %c0_12] : memref<4x32x128xbf16, #tpu.memory_space<vmem>>, vector<1x32x128xbf16>
    %17 = vector.shape_cast %16 : vector<1x32x128xbf16> to vector<32x128xbf16>
    %18 = vector.shape_cast %15 : vector<32x128xbf16> to vector<1x32x128xbf16>
    tpu.vector_store %arg4[%c0_10, %c0_11, %c0_12], %18 {strides = array<i32>} : memref<4x32x128xbf16, #tpu.memory_space<vmem>>, vector<1x32x128xbf16>,
    %cst_13 = arith.constant 0.000000e+00 : f32
    %19 = vector.broadcast %cst_13 : f32 to vector<32x128xf32>
    %20 = arith.select %11, %19, %9 : vector<32x128xi1>, vector<32x128xf32>
    %c1 = arith.constant 1 : index
    %c0_14 = arith.constant 0 : index
    %c0_15 = arith.constant 0 : index
    %21 = vector.load %arg1[%c1, %c0_14, %c0_15] : memref<4x288x128xbf16, #tpu.memory_space<vmem>>, vector<1x288x128xbf16>
    %22 = vector.shape_cast %21 : vector<1x288x128xbf16> to vector<288x128xbf16>
    %cst_16 = arith.constant dense<0.000000e+00> : vector<32x128xf32>
    %23 = tpu.matmul %0, %22, %cst_16 {dimension_numbers = #tpu.dot_dimension_numbers<[1], [0], [0], [1], [0, 0, 1, 1], [], []>} : vector<32x288xbf16>, vector<288x128xbf16>, vector<32x128xf32> -> vector<32x128xf32>
    %24 = arith.addf %23, %3 : vector<32x128xf32>
    %25 = arith.addf %20, %24 : vector<32x128xf32>
    %cst_17 = arith.constant 1.000000e+00 : f32
    %26 = vector.broadcast %cst_17 : f32 to vector<32x128xf32>
    %27 = arith.cmpf oge, %25, %26 : vector<32x128xf32>
    %cst_18 = arith.constant 1.000000e+00 : f32
    %cst_19 = arith.constant 0.000000e+00 : f32
    %28 = vector.broadcast %cst_18 : f32 to vector<32x128xf32>
    %29 = vector.broadcast %cst_19 : f32 to vector<32x128xf32>
    %30 = arith.select %27, %28, %29 : vector<32x128xi1>, vector<32x128xf32>
    %31 = arith.truncf %30 : vector<32x128xf32> to vector<32x128xbf16>
    %c1_20 = arith.constant 1 : index
    %c0_21 = arith.constant 0 : index
    %c0_22 = arith.constant 0 : index
    %32 = vector.load %arg4[%c1_20, %c0_21, %c0_22] : memref<4x32x128xbf16, #tpu.memory_space<vmem>>, vector<1x32x128xbf16>
    %33 = vector.shape_cast %32 : vector<1x32x128xbf16> to vector<32x128xbf16>
    %34 = vector.shape_cast %31 : vector<32x128xbf16> to vector<1x32x128xbf16>
    tpu.vector_store %arg4[%c1_20, %c0_21, %c0_22], %34 {strides = array<i32>} : memref<4x32x128xbf16, #tpu.memory_space<vmem>>, vector<1x32x128xbf16>,
    %cst_23 = arith.constant 0.000000e+00 : f32
    %35 = vector.broadcast %cst_23 : f32 to vector<32x128xf32>
    %36 = arith.select %27, %35, %25 : vector<32x128xi1>, vector<32x128xf32>
    %c2 = arith.constant 2 : index
    %c0_24 = arith.constant 0 : index
    %c0_25 = arith.constant 0 : index
    %37 = vector.load %arg1[%c2, %c0_24, %c0_25] : memref<4x288x128xbf16, #tpu.memory_space<vmem>>, vector<1x288x128xbf16>
    %38 = vector.shape_cast %37 : vector<1x288x128xbf16> to vector<288x128xbf16>
    %cst_26 = arith.constant dense<0.000000e+00> : vector<32x128xf32>
    %39 = tpu.matmul %0, %38, %cst_26 {dimension_numbers = #tpu.dot_dimension_numbers<[1], [0], [0], [1], [0, 0, 1, 1], [], []>} : vector<32x288xbf16>, vector<288x128xbf16>, vector<32x128xf32> -> vector<32x128xf32>
    %40 = arith.addf %39, %3 : vector<32x128xf32>
    %41 = arith.addf %36, %40 : vector<32x128xf32>
    %cst_27 = arith.constant 1.000000e+00 : f32
    %42 = vector.broadcast %cst_27 : f32 to vector<32x128xf32>
    %43 = arith.cmpf oge, %41, %42 : vector<32x128xf32>
    %cst_28 = arith.constant 1.000000e+00 : f32
    %cst_29 = arith.constant 0.000000e+00 : f32
    %44 = vector.broadcast %cst_28 : f32 to vector<32x128xf32>
    %45 = vector.broadcast %cst_29 : f32 to vector<32x128xf32>
    %46 = arith.select %43, %44, %45 : vector<32x128xi1>, vector<32x128xf32>
    %47 = arith.truncf %46 : vector<32x128xf32> to vector<32x128xbf16>
    %c2_30 = arith.constant 2 : index
    %c0_31 = arith.constant 0 : index
    %c0_32 = arith.constant 0 : index
    %48 = vector.load %arg4[%c2_30, %c0_31, %c0_32] : memref<4x32x128xbf16, #tpu.memory_space<vmem>>, vector<1x32x128xbf16>
    %49 = vector.shape_cast %48 : vector<1x32x128xbf16> to vector<32x128xbf16>
    %50 = vector.shape_cast %47 : vector<32x128xbf16> to vector<1x32x128xbf16>
    tpu.vector_store %arg4[%c2_30, %c0_31, %c0_32], %50 {strides = array<i32>} : memref<4x32x128xbf16, #tpu.memory_space<vmem>>, vector<1x32x128xbf16>,
    %cst_33 = arith.constant 0.000000e+00 : f32
    %51 = vector.broadcast %cst_33 : f32 to vector<32x128xf32>
    %52 = arith.select %43, %51, %41 : vector<32x128xi1>, vector<32x128xf32>
    %c3 = arith.constant 3 : index
    %c0_34 = arith.constant 0 : index
    %c0_35 = arith.constant 0 : index
    %53 = vector.load %arg1[%c3, %c0_34, %c0_35] : memref<4x288x128xbf16, #tpu.memory_space<vmem>>, vector<1x288x128xbf16>
    %54 = vector.shape_cast %53 : vector<1x288x128xbf16> to vector<288x128xbf16>
    %cst_36 = arith.constant dense<0.000000e+00> : vector<32x128xf32>
    %55 = tpu.matmul %0, %54, %cst_36 {dimension_numbers = #tpu.dot_dimension_numbers<[1], [0], [0], [1], [0, 0, 1, 1], [], []>} : vector<32x288xbf16>, vector<288x128xbf16>, vector<32x128xf32> -> vector<32x128xf32>
    %56 = arith.addf %55, %3 : vector<32x128xf32>
    %57 = arith.addf %52, %56 : vector<32x128xf32>
    %cst_37 = arith.constant 1.000000e+00 : f32
    %58 = vector.broadcast %cst_37 : f32 to vector<32x128xf32>
    %59 = arith.cmpf oge, %57, %58 : vector<32x128xf32>
    %cst_38 = arith.constant 1.000000e+00 : f32
    %cst_39 = arith.constant 0.000000e+00 : f32
    %60 = vector.broadcast %cst_38 : f32 to vector<32x128xf32>
    %61 = vector.broadcast %cst_39 : f32 to vector<32x128xf32>
    %62 = arith.select %59, %60, %61 : vector<32x128xi1>, vector<32x128xf32>
    %63 = arith.truncf %62 : vector<32x128xf32> to vector<32x128xbf16>
    %c3_40 = arith.constant 3 : index
    %c0_41 = arith.constant 0 : index
    %c0_42 = arith.constant 0 : index
    %64 = vector.load %arg4[%c3_40, %c0_41, %c0_42] : memref<4x32x128xbf16, #tpu.memory_space<vmem>>, vector<1x32x128xbf16>
    %65 = vector.shape_cast %64 : vector<1x32x128xbf16> to vector<32x128xbf16>
    %66 = vector.shape_cast %63 : vector<32x128xbf16> to vector<1x32x128xbf16>
    tpu.vector_store %arg4[%c3_40, %c0_41, %c0_42], %66 {strides = array<i32>} : memref<4x32x128xbf16, #tpu.memory_space<vmem>>, vector<1x32x128xbf16>,
    return
  }
  func.func @transform_0(%arg0: i32) -> (i32, i32, i32) {
    %c0_i32 = arith.constant 0 : i32
    %c0_i32_0 = arith.constant 0 : i32
    %c0_i32_1 = arith.constant 0 : i32
    return %c0_i32, %c0_i32_0, %arg0 : i32, i32, i32
  }
  func.func @transform_1(%arg0: i32) -> (i32, i32) {
    %c0_i32 = arith.constant 0 : i32
    %c0_i32_0 = arith.constant 0 : i32
    %c0_i32_1 = arith.constant 0 : i32
    return %c0_i32, %c0_i32_0 : i32, i32
  }
  func.func @transform_2(%arg0: i32) -> (i32, i32) {
    %c0_i32 = arith.constant 0 : i32
    %c0_i32_0 = arith.constant 0 : i32
    %c0_i32_1 = arith.constant 0 : i32
    return %c0_i32, %c0_i32_0 : i32, i32
  }
  func.func @transform_3(%arg0: i32) -> (i32, i32, i32) {
    %c0_i32 = arith.constant 0 : i32
    %c0_i32_0 = arith.constant 0 : i32
    %c0_i32_1 = arith.constant 0 : i32
    return %c0_i32, %c0_i32_0, %arg0 : i32, i32, i32
  }
}

module attributes {stable_mosaic.version = 11 : i64} {
  func.func @_stream_matmul_if_kernel(%arg0: i32, %arg1: memref<4x288x32xbf16, #tpu.memory_space<vmem>>, %arg2: memref<64x288xbf16, #tpu.memory_space<vmem>>, %arg3: memref<64x1xf32, #tpu.memory_space<vmem>>, %arg4: memref<4x64x32xbf16, #tpu.memory_space<vmem>>) attributes {dimension_semantics = [#tpu.dimension_semantics<parallel>], iteration_bounds = array<i64: 1>, scalar_prefetch = 0 : i64, scratch_operands = 0 : i64, tpu.core_type = #tpu.core_type<tc>, window_params = [{transform_indices = @transform_0, window_bounds = array<i64: 4, 288, 32>}, {pipeline_mode = #tpu.pipeline_mode<synchronous>, transform_indices = @transform_1, window_bounds = array<i64: 64, 288>}, {pipeline_mode = #tpu.pipeline_mode<synchronous>, transform_indices = @transform_2, window_bounds = array<i64: 64, 1>}, {transform_indices = @transform_3, window_bounds = array<i64: 4, 64, 32>}]} {
    %c0 = arith.constant 0 : index
    %c0_0 = arith.constant 0 : index
    %0 = vector.load %arg2[%c0, %c0_0] : memref<64x288xbf16, #tpu.memory_space<vmem>>, vector<64x288xbf16>
    %c0_1 = arith.constant 0 : index
    %c0_2 = arith.constant 0 : index
    %1 = vector.load %arg3[%c0_1, %c0_2] : memref<64x1xf32, #tpu.memory_space<vmem>>, vector<64x1xf32>
    %2 = vector.shape_cast %1 : vector<64x1xf32> to vector<64x1xf32>
    %3 = vector.broadcast %2 : vector<64x1xf32> to vector<64x32xf32>
    %cst = arith.constant 0.000000e+00 : f32
    %4 = vector.broadcast %cst : f32 to vector<64x32xf32>
    %c0_3 = arith.constant 0 : index
    %c0_4 = arith.constant 0 : index
    %c0_5 = arith.constant 0 : index
    %5 = vector.load %arg1[%c0_3, %c0_4, %c0_5] : memref<4x288x32xbf16, #tpu.memory_space<vmem>>, vector<1x288x32xbf16>
    %6 = vector.shape_cast %5 : vector<1x288x32xbf16> to vector<288x32xbf16>
    %cst_6 = arith.constant dense<0.000000e+00> : vector<64x32xf32>
    %7 = tpu.matmul %0, %6, %cst_6 {dimension_numbers = #tpu.dot_dimension_numbers<[1], [0], [0], [1], [0, 0, 1, 1], [], []>} : vector<64x288xbf16>, vector<288x32xbf16>, vector<64x32xf32> -> vector<64x32xf32>
    %8 = arith.addf %7, %3 : vector<64x32xf32>
    %9 = arith.addf %4, %8 : vector<64x32xf32>
    %cst_7 = arith.constant 1.000000e+00 : f32
    %10 = vector.broadcast %cst_7 : f32 to vector<64x32xf32>
    %11 = arith.cmpf oge, %9, %10 : vector<64x32xf32>
    %cst_8 = arith.constant 1.000000e+00 : f32
    %cst_9 = arith.constant 0.000000e+00 : f32
    %12 = vector.broadcast %cst_8 : f32 to vector<64x32xf32>
    %13 = vector.broadcast %cst_9 : f32 to vector<64x32xf32>
    %14 = arith.select %11, %12, %13 : vector<64x32xi1>, vector<64x32xf32>
    %15 = arith.truncf %14 : vector<64x32xf32> to vector<64x32xbf16>
    %c0_10 = arith.constant 0 : index
    %c0_11 = arith.constant 0 : index
    %c0_12 = arith.constant 0 : index
    %16 = vector.load %arg4[%c0_10, %c0_11, %c0_12] : memref<4x64x32xbf16, #tpu.memory_space<vmem>>, vector<1x64x32xbf16>
    %17 = vector.shape_cast %16 : vector<1x64x32xbf16> to vector<64x32xbf16>
    %18 = vector.shape_cast %15 : vector<64x32xbf16> to vector<1x64x32xbf16>
    tpu.vector_store %arg4[%c0_10, %c0_11, %c0_12], %18 {strides = array<i32>} : memref<4x64x32xbf16, #tpu.memory_space<vmem>>, vector<1x64x32xbf16>,
    %cst_13 = arith.constant 0.000000e+00 : f32
    %19 = vector.broadcast %cst_13 : f32 to vector<64x32xf32>
    %20 = arith.select %11, %19, %9 : vector<64x32xi1>, vector<64x32xf32>
    %c1 = arith.constant 1 : index
    %c0_14 = arith.constant 0 : index
    %c0_15 = arith.constant 0 : index
    %21 = vector.load %arg1[%c1, %c0_14, %c0_15] : memref<4x288x32xbf16, #tpu.memory_space<vmem>>, vector<1x288x32xbf16>
    %22 = vector.shape_cast %21 : vector<1x288x32xbf16> to vector<288x32xbf16>
    %cst_16 = arith.constant dense<0.000000e+00> : vector<64x32xf32>
    %23 = tpu.matmul %0, %22, %cst_16 {dimension_numbers = #tpu.dot_dimension_numbers<[1], [0], [0], [1], [0, 0, 1, 1], [], []>} : vector<64x288xbf16>, vector<288x32xbf16>, vector<64x32xf32> -> vector<64x32xf32>
    %24 = arith.addf %23, %3 : vector<64x32xf32>
    %25 = arith.addf %20, %24 : vector<64x32xf32>
    %cst_17 = arith.constant 1.000000e+00 : f32
    %26 = vector.broadcast %cst_17 : f32 to vector<64x32xf32>
    %27 = arith.cmpf oge, %25, %26 : vector<64x32xf32>
    %cst_18 = arith.constant 1.000000e+00 : f32
    %cst_19 = arith.constant 0.000000e+00 : f32
    %28 = vector.broadcast %cst_18 : f32 to vector<64x32xf32>
    %29 = vector.broadcast %cst_19 : f32 to vector<64x32xf32>
    %30 = arith.select %27, %28, %29 : vector<64x32xi1>, vector<64x32xf32>
    %31 = arith.truncf %30 : vector<64x32xf32> to vector<64x32xbf16>
    %c1_20 = arith.constant 1 : index
    %c0_21 = arith.constant 0 : index
    %c0_22 = arith.constant 0 : index
    %32 = vector.load %arg4[%c1_20, %c0_21, %c0_22] : memref<4x64x32xbf16, #tpu.memory_space<vmem>>, vector<1x64x32xbf16>
    %33 = vector.shape_cast %32 : vector<1x64x32xbf16> to vector<64x32xbf16>
    %34 = vector.shape_cast %31 : vector<64x32xbf16> to vector<1x64x32xbf16>
    tpu.vector_store %arg4[%c1_20, %c0_21, %c0_22], %34 {strides = array<i32>} : memref<4x64x32xbf16, #tpu.memory_space<vmem>>, vector<1x64x32xbf16>,
    %cst_23 = arith.constant 0.000000e+00 : f32
    %35 = vector.broadcast %cst_23 : f32 to vector<64x32xf32>
    %36 = arith.select %27, %35, %25 : vector<64x32xi1>, vector<64x32xf32>
    %c2 = arith.constant 2 : index
    %c0_24 = arith.constant 0 : index
    %c0_25 = arith.constant 0 : index
    %37 = vector.load %arg1[%c2, %c0_24, %c0_25] : memref<4x288x32xbf16, #tpu.memory_space<vmem>>, vector<1x288x32xbf16>
    %38 = vector.shape_cast %37 : vector<1x288x32xbf16> to vector<288x32xbf16>
    %cst_26 = arith.constant dense<0.000000e+00> : vector<64x32xf32>
    %39 = tpu.matmul %0, %38, %cst_26 {dimension_numbers = #tpu.dot_dimension_numbers<[1], [0], [0], [1], [0, 0, 1, 1], [], []>} : vector<64x288xbf16>, vector<288x32xbf16>, vector<64x32xf32> -> vector<64x32xf32>
    %40 = arith.addf %39, %3 : vector<64x32xf32>
    %41 = arith.addf %36, %40 : vector<64x32xf32>
    %cst_27 = arith.constant 1.000000e+00 : f32
    %42 = vector.broadcast %cst_27 : f32 to vector<64x32xf32>
    %43 = arith.cmpf oge, %41, %42 : vector<64x32xf32>
    %cst_28 = arith.constant 1.000000e+00 : f32
    %cst_29 = arith.constant 0.000000e+00 : f32
    %44 = vector.broadcast %cst_28 : f32 to vector<64x32xf32>
    %45 = vector.broadcast %cst_29 : f32 to vector<64x32xf32>
    %46 = arith.select %43, %44, %45 : vector<64x32xi1>, vector<64x32xf32>
    %47 = arith.truncf %46 : vector<64x32xf32> to vector<64x32xbf16>
    %c2_30 = arith.constant 2 : index
    %c0_31 = arith.constant 0 : index
    %c0_32 = arith.constant 0 : index
    %48 = vector.load %arg4[%c2_30, %c0_31, %c0_32] : memref<4x64x32xbf16, #tpu.memory_space<vmem>>, vector<1x64x32xbf16>
    %49 = vector.shape_cast %48 : vector<1x64x32xbf16> to vector<64x32xbf16>
    %50 = vector.shape_cast %47 : vector<64x32xbf16> to vector<1x64x32xbf16>
    tpu.vector_store %arg4[%c2_30, %c0_31, %c0_32], %50 {strides = array<i32>} : memref<4x64x32xbf16, #tpu.memory_space<vmem>>, vector<1x64x32xbf16>,
    %cst_33 = arith.constant 0.000000e+00 : f32
    %51 = vector.broadcast %cst_33 : f32 to vector<64x32xf32>
    %52 = arith.select %43, %51, %41 : vector<64x32xi1>, vector<64x32xf32>
    %c3 = arith.constant 3 : index
    %c0_34 = arith.constant 0 : index
    %c0_35 = arith.constant 0 : index
    %53 = vector.load %arg1[%c3, %c0_34, %c0_35] : memref<4x288x32xbf16, #tpu.memory_space<vmem>>, vector<1x288x32xbf16>
    %54 = vector.shape_cast %53 : vector<1x288x32xbf16> to vector<288x32xbf16>
    %cst_36 = arith.constant dense<0.000000e+00> : vector<64x32xf32>
    %55 = tpu.matmul %0, %54, %cst_36 {dimension_numbers = #tpu.dot_dimension_numbers<[1], [0], [0], [1], [0, 0, 1, 1], [], []>} : vector<64x288xbf16>, vector<288x32xbf16>, vector<64x32xf32> -> vector<64x32xf32>
    %56 = arith.addf %55, %3 : vector<64x32xf32>
    %57 = arith.addf %52, %56 : vector<64x32xf32>
    %cst_37 = arith.constant 1.000000e+00 : f32
    %58 = vector.broadcast %cst_37 : f32 to vector<64x32xf32>
    %59 = arith.cmpf oge, %57, %58 : vector<64x32xf32>
    %cst_38 = arith.constant 1.000000e+00 : f32
    %cst_39 = arith.constant 0.000000e+00 : f32
    %60 = vector.broadcast %cst_38 : f32 to vector<64x32xf32>
    %61 = vector.broadcast %cst_39 : f32 to vector<64x32xf32>
    %62 = arith.select %59, %60, %61 : vector<64x32xi1>, vector<64x32xf32>
    %63 = arith.truncf %62 : vector<64x32xf32> to vector<64x32xbf16>
    %c3_40 = arith.constant 3 : index
    %c0_41 = arith.constant 0 : index
    %c0_42 = arith.constant 0 : index
    %64 = vector.load %arg4[%c3_40, %c0_41, %c0_42] : memref<4x64x32xbf16, #tpu.memory_space<vmem>>, vector<1x64x32xbf16>
    %65 = vector.shape_cast %64 : vector<1x64x32xbf16> to vector<64x32xbf16>
    %66 = vector.shape_cast %63 : vector<64x32xbf16> to vector<1x64x32xbf16>
    tpu.vector_store %arg4[%c3_40, %c0_41, %c0_42], %66 {strides = array<i32>} : memref<4x64x32xbf16, #tpu.memory_space<vmem>>, vector<1x64x32xbf16>,
    return
  }
  func.func @transform_0(%arg0: i32) -> (i32, i32, i32) {
    %c0_i32 = arith.constant 0 : i32
    %c0_i32_0 = arith.constant 0 : i32
    %c0_i32_1 = arith.constant 0 : i32
    return %c0_i32, %c0_i32_0, %arg0 : i32, i32, i32
  }
  func.func @transform_1(%arg0: i32) -> (i32, i32) {
    %c0_i32 = arith.constant 0 : i32
    %c0_i32_0 = arith.constant 0 : i32
    %c0_i32_1 = arith.constant 0 : i32
    return %c0_i32, %c0_i32_0 : i32, i32
  }
  func.func @transform_2(%arg0: i32) -> (i32, i32) {
    %c0_i32 = arith.constant 0 : i32
    %c0_i32_0 = arith.constant 0 : i32
    %c0_i32_1 = arith.constant 0 : i32
    return %c0_i32, %c0_i32_0 : i32, i32
  }
  func.func @transform_3(%arg0: i32) -> (i32, i32, i32) {
    %c0_i32 = arith.constant 0 : i32
    %c0_i32_0 = arith.constant 0 : i32
    %c0_i32_1 = arith.constant 0 : i32
    return %c0_i32, %c0_i32_0, %arg0 : i32, i32, i32
  }
}

module attributes {stable_mosaic.version = 11 : i64} {
  func.func @_stream_matmul_if_kernel(%arg0: i32, %arg1: memref<4x576x8xbf16, #tpu.memory_space<vmem>>, %arg2: memref<64x576xbf16, #tpu.memory_space<vmem>>, %arg3: memref<64x1xf32, #tpu.memory_space<vmem>>, %arg4: memref<4x64x8xbf16, #tpu.memory_space<vmem>>) attributes {dimension_semantics = [#tpu.dimension_semantics<parallel>], iteration_bounds = array<i64: 1>, scalar_prefetch = 0 : i64, scratch_operands = 0 : i64, tpu.core_type = #tpu.core_type<tc>, window_params = [{transform_indices = @transform_0, window_bounds = array<i64: 4, 576, 8>}, {pipeline_mode = #tpu.pipeline_mode<synchronous>, transform_indices = @transform_1, window_bounds = array<i64: 64, 576>}, {pipeline_mode = #tpu.pipeline_mode<synchronous>, transform_indices = @transform_2, window_bounds = array<i64: 64, 1>}, {transform_indices = @transform_3, window_bounds = array<i64: 4, 64, 8>}]} {
    %c0 = arith.constant 0 : index
    %c0_0 = arith.constant 0 : index
    %0 = vector.load %arg2[%c0, %c0_0] : memref<64x576xbf16, #tpu.memory_space<vmem>>, vector<64x576xbf16>
    %c0_1 = arith.constant 0 : index
    %c0_2 = arith.constant 0 : index
    %1 = vector.load %arg3[%c0_1, %c0_2] : memref<64x1xf32, #tpu.memory_space<vmem>>, vector<64x1xf32>
    %2 = vector.shape_cast %1 : vector<64x1xf32> to vector<64x1xf32>
    %3 = vector.broadcast %2 : vector<64x1xf32> to vector<64x8xf32>
    %cst = arith.constant 0.000000e+00 : f32
    %4 = vector.broadcast %cst : f32 to vector<64x8xf32>
    %c0_3 = arith.constant 0 : index
    %c0_4 = arith.constant 0 : index
    %c0_5 = arith.constant 0 : index
    %5 = vector.load %arg1[%c0_3, %c0_4, %c0_5] : memref<4x576x8xbf16, #tpu.memory_space<vmem>>, vector<1x576x8xbf16>
    %6 = vector.shape_cast %5 : vector<1x576x8xbf16> to vector<576x8xbf16>
    %cst_6 = arith.constant dense<0.000000e+00> : vector<64x8xf32>
    %7 = tpu.matmul %0, %6, %cst_6 {dimension_numbers = #tpu.dot_dimension_numbers<[1], [0], [0], [1], [0, 0, 1, 1], [], []>} : vector<64x576xbf16>, vector<576x8xbf16>, vector<64x8xf32> -> vector<64x8xf32>
    %8 = arith.addf %7, %3 : vector<64x8xf32>
    %9 = arith.addf %4, %8 : vector<64x8xf32>
    %cst_7 = arith.constant 1.000000e+00 : f32
    %10 = vector.broadcast %cst_7 : f32 to vector<64x8xf32>
    %11 = arith.cmpf oge, %9, %10 : vector<64x8xf32>
    %cst_8 = arith.constant 1.000000e+00 : f32
    %cst_9 = arith.constant 0.000000e+00 : f32
    %12 = vector.broadcast %cst_8 : f32 to vector<64x8xf32>
    %13 = vector.broadcast %cst_9 : f32 to vector<64x8xf32>
    %14 = arith.select %11, %12, %13 : vector<64x8xi1>, vector<64x8xf32>
    %15 = arith.truncf %14 : vector<64x8xf32> to vector<64x8xbf16>
    %c0_10 = arith.constant 0 : index
    %c0_11 = arith.constant 0 : index
    %c0_12 = arith.constant 0 : index
    %16 = vector.load %arg4[%c0_10, %c0_11, %c0_12] : memref<4x64x8xbf16, #tpu.memory_space<vmem>>, vector<1x64x8xbf16>
    %17 = vector.shape_cast %16 : vector<1x64x8xbf16> to vector<64x8xbf16>
    %18 = vector.shape_cast %15 : vector<64x8xbf16> to vector<1x64x8xbf16>
    tpu.vector_store %arg4[%c0_10, %c0_11, %c0_12], %18 {strides = array<i32>} : memref<4x64x8xbf16, #tpu.memory_space<vmem>>, vector<1x64x8xbf16>,
    %cst_13 = arith.constant 0.000000e+00 : f32
    %19 = vector.broadcast %cst_13 : f32 to vector<64x8xf32>
    %20 = arith.select %11, %19, %9 : vector<64x8xi1>, vector<64x8xf32>
    %c1 = arith.constant 1 : index
    %c0_14 = arith.constant 0 : index
    %c0_15 = arith.constant 0 : index
    %21 = vector.load %arg1[%c1, %c0_14, %c0_15] : memref<4x576x8xbf16, #tpu.memory_space<vmem>>, vector<1x576x8xbf16>
    %22 = vector.shape_cast %21 : vector<1x576x8xbf16> to vector<576x8xbf16>
    %cst_16 = arith.constant dense<0.000000e+00> : vector<64x8xf32>
    %23 = tpu.matmul %0, %22, %cst_16 {dimension_numbers = #tpu.dot_dimension_numbers<[1], [0], [0], [1], [0, 0, 1, 1], [], []>} : vector<64x576xbf16>, vector<576x8xbf16>, vector<64x8xf32> -> vector<64x8xf32>
    %24 = arith.addf %23, %3 : vector<64x8xf32>
    %25 = arith.addf %20, %24 : vector<64x8xf32>
    %cst_17 = arith.constant 1.000000e+00 : f32
    %26 = vector.broadcast %cst_17 : f32 to vector<64x8xf32>
    %27 = arith.cmpf oge, %25, %26 : vector<64x8xf32>
    %cst_18 = arith.constant 1.000000e+00 : f32
    %cst_19 = arith.constant 0.000000e+00 : f32
    %28 = vector.broadcast %cst_18 : f32 to vector<64x8xf32>
    %29 = vector.broadcast %cst_19 : f32 to vector<64x8xf32>
    %30 = arith.select %27, %28, %29 : vector<64x8xi1>, vector<64x8xf32>
    %31 = arith.truncf %30 : vector<64x8xf32> to vector<64x8xbf16>
    %c1_20 = arith.constant 1 : index
    %c0_21 = arith.constant 0 : index
    %c0_22 = arith.constant 0 : index
    %32 = vector.load %arg4[%c1_20, %c0_21, %c0_22] : memref<4x64x8xbf16, #tpu.memory_space<vmem>>, vector<1x64x8xbf16>
    %33 = vector.shape_cast %32 : vector<1x64x8xbf16> to vector<64x8xbf16>
    %34 = vector.shape_cast %31 : vector<64x8xbf16> to vector<1x64x8xbf16>
    tpu.vector_store %arg4[%c1_20, %c0_21, %c0_22], %34 {strides = array<i32>} : memref<4x64x8xbf16, #tpu.memory_space<vmem>>, vector<1x64x8xbf16>,
    %cst_23 = arith.constant 0.000000e+00 : f32
    %35 = vector.broadcast %cst_23 : f32 to vector<64x8xf32>
    %36 = arith.select %27, %35, %25 : vector<64x8xi1>, vector<64x8xf32>
    %c2 = arith.constant 2 : index
    %c0_24 = arith.constant 0 : index
    %c0_25 = arith.constant 0 : index
    %37 = vector.load %arg1[%c2, %c0_24, %c0_25] : memref<4x576x8xbf16, #tpu.memory_space<vmem>>, vector<1x576x8xbf16>
    %38 = vector.shape_cast %37 : vector<1x576x8xbf16> to vector<576x8xbf16>
    %cst_26 = arith.constant dense<0.000000e+00> : vector<64x8xf32>
    %39 = tpu.matmul %0, %38, %cst_26 {dimension_numbers = #tpu.dot_dimension_numbers<[1], [0], [0], [1], [0, 0, 1, 1], [], []>} : vector<64x576xbf16>, vector<576x8xbf16>, vector<64x8xf32> -> vector<64x8xf32>
    %40 = arith.addf %39, %3 : vector<64x8xf32>
    %41 = arith.addf %36, %40 : vector<64x8xf32>
    %cst_27 = arith.constant 1.000000e+00 : f32
    %42 = vector.broadcast %cst_27 : f32 to vector<64x8xf32>
    %43 = arith.cmpf oge, %41, %42 : vector<64x8xf32>
    %cst_28 = arith.constant 1.000000e+00 : f32
    %cst_29 = arith.constant 0.000000e+00 : f32
    %44 = vector.broadcast %cst_28 : f32 to vector<64x8xf32>
    %45 = vector.broadcast %cst_29 : f32 to vector<64x8xf32>
    %46 = arith.select %43, %44, %45 : vector<64x8xi1>, vector<64x8xf32>
    %47 = arith.truncf %46 : vector<64x8xf32> to vector<64x8xbf16>
    %c2_30 = arith.constant 2 : index
    %c0_31 = arith.constant 0 : index
    %c0_32 = arith.constant 0 : index
    %48 = vector.load %arg4[%c2_30, %c0_31, %c0_32] : memref<4x64x8xbf16, #tpu.memory_space<vmem>>, vector<1x64x8xbf16>
    %49 = vector.shape_cast %48 : vector<1x64x8xbf16> to vector<64x8xbf16>
    %50 = vector.shape_cast %47 : vector<64x8xbf16> to vector<1x64x8xbf16>
    tpu.vector_store %arg4[%c2_30, %c0_31, %c0_32], %50 {strides = array<i32>} : memref<4x64x8xbf16, #tpu.memory_space<vmem>>, vector<1x64x8xbf16>,
    %cst_33 = arith.constant 0.000000e+00 : f32
    %51 = vector.broadcast %cst_33 : f32 to vector<64x8xf32>
    %52 = arith.select %43, %51, %41 : vector<64x8xi1>, vector<64x8xf32>
    %c3 = arith.constant 3 : index
    %c0_34 = arith.constant 0 : index
    %c0_35 = arith.constant 0 : index
    %53 = vector.load %arg1[%c3, %c0_34, %c0_35] : memref<4x576x8xbf16, #tpu.memory_space<vmem>>, vector<1x576x8xbf16>
    %54 = vector.shape_cast %53 : vector<1x576x8xbf16> to vector<576x8xbf16>
    %cst_36 = arith.constant dense<0.000000e+00> : vector<64x8xf32>
    %55 = tpu.matmul %0, %54, %cst_36 {dimension_numbers = #tpu.dot_dimension_numbers<[1], [0], [0], [1], [0, 0, 1, 1], [], []>} : vector<64x576xbf16>, vector<576x8xbf16>, vector<64x8xf32> -> vector<64x8xf32>
    %56 = arith.addf %55, %3 : vector<64x8xf32>
    %57 = arith.addf %52, %56 : vector<64x8xf32>
    %cst_37 = arith.constant 1.000000e+00 : f32
    %58 = vector.broadcast %cst_37 : f32 to vector<64x8xf32>
    %59 = arith.cmpf oge, %57, %58 : vector<64x8xf32>
    %cst_38 = arith.constant 1.000000e+00 : f32
    %cst_39 = arith.constant 0.000000e+00 : f32
    %60 = vector.broadcast %cst_38 : f32 to vector<64x8xf32>
    %61 = vector.broadcast %cst_39 : f32 to vector<64x8xf32>
    %62 = arith.select %59, %60, %61 : vector<64x8xi1>, vector<64x8xf32>
    %63 = arith.truncf %62 : vector<64x8xf32> to vector<64x8xbf16>
    %c3_40 = arith.constant 3 : index
    %c0_41 = arith.constant 0 : index
    %c0_42 = arith.constant 0 : index
    %64 = vector.load %arg4[%c3_40, %c0_41, %c0_42] : memref<4x64x8xbf16, #tpu.memory_space<vmem>>, vector<1x64x8xbf16>
    %65 = vector.shape_cast %64 : vector<1x64x8xbf16> to vector<64x8xbf16>
    %66 = vector.shape_cast %63 : vector<64x8xbf16> to vector<1x64x8xbf16>
    tpu.vector_store %arg4[%c3_40, %c0_41, %c0_42], %66 {strides = array<i32>} : memref<4x64x8xbf16, #tpu.memory_space<vmem>>, vector<1x64x8xbf16>,
    return
  }
  func.func @transform_0(%arg0: i32) -> (i32, i32, i32) {
    %c0_i32 = arith.constant 0 : i32
    %c0_i32_0 = arith.constant 0 : i32
    %c0_i32_1 = arith.constant 0 : i32
    return %c0_i32, %c0_i32_0, %arg0 : i32, i32, i32
  }
  func.func @transform_1(%arg0: i32) -> (i32, i32) {
    %c0_i32 = arith.constant 0 : i32
    %c0_i32_0 = arith.constant 0 : i32
    %c0_i32_1 = arith.constant 0 : i32
    return %c0_i32, %c0_i32_0 : i32, i32
  }
  func.func @transform_2(%arg0: i32) -> (i32, i32) {
    %c0_i32 = arith.constant 0 : i32
    %c0_i32_0 = arith.constant 0 : i32
    %c0_i32_1 = arith.constant 0 : i32
    return %c0_i32, %c0_i32_0 : i32, i32
  }
  func.func @transform_3(%arg0: i32) -> (i32, i32, i32) {
    %c0_i32 = arith.constant 0 : i32
    %c0_i32_0 = arith.constant 0 : i32
    %c0_i32_1 = arith.constant 0 : i32
    return %c0_i32, %c0_i32_0, %arg0 : i32, i32, i32
  }
}

module attributes {stable_mosaic.version = 11 : i64} {
  func.func @_stream_matmul_if_kernel(%arg0: i32, %arg1: memref<4x576x2xbf16, #tpu.memory_space<vmem>>, %arg2: memref<64x576xbf16, #tpu.memory_space<vmem>>, %arg3: memref<64x1xf32, #tpu.memory_space<vmem>>, %arg4: memref<4x64x2xbf16, #tpu.memory_space<vmem>>) attributes {dimension_semantics = [#tpu.dimension_semantics<parallel>], iteration_bounds = array<i64: 1>, scalar_prefetch = 0 : i64, scratch_operands = 0 : i64, tpu.core_type = #tpu.core_type<tc>, window_params = [{transform_indices = @transform_0, window_bounds = array<i64: 4, 576, 2>}, {pipeline_mode = #tpu.pipeline_mode<synchronous>, transform_indices = @transform_1, window_bounds = array<i64: 64, 576>}, {pipeline_mode = #tpu.pipeline_mode<synchronous>, transform_indices = @transform_2, window_bounds = array<i64: 64, 1>}, {transform_indices = @transform_3, window_bounds = array<i64: 4, 64, 2>}]} {
    %c0 = arith.constant 0 : index
    %c0_0 = arith.constant 0 : index
    %0 = vector.load %arg2[%c0, %c0_0] : memref<64x576xbf16, #tpu.memory_space<vmem>>, vector<64x576xbf16>
    %c0_1 = arith.constant 0 : index
    %c0_2 = arith.constant 0 : index
    %1 = vector.load %arg3[%c0_1, %c0_2] : memref<64x1xf32, #tpu.memory_space<vmem>>, vector<64x1xf32>
    %2 = vector.shape_cast %1 : vector<64x1xf32> to vector<64x1xf32>
    %3 = vector.broadcast %2 : vector<64x1xf32> to vector<64x2xf32>
    %cst = arith.constant 0.000000e+00 : f32
    %4 = vector.broadcast %cst : f32 to vector<64x2xf32>
    %c0_3 = arith.constant 0 : index
    %c0_4 = arith.constant 0 : index
    %c0_5 = arith.constant 0 : index
    %5 = vector.load %arg1[%c0_3, %c0_4, %c0_5] : memref<4x576x2xbf16, #tpu.memory_space<vmem>>, vector<1x576x2xbf16>
    %6 = vector.shape_cast %5 : vector<1x576x2xbf16> to vector<576x2xbf16>
    %cst_6 = arith.constant dense<0.000000e+00> : vector<64x2xf32>
    %7 = tpu.matmul %0, %6, %cst_6 {dimension_numbers = #tpu.dot_dimension_numbers<[1], [0], [0], [1], [0, 0, 1, 1], [], []>} : vector<64x576xbf16>, vector<576x2xbf16>, vector<64x2xf32> -> vector<64x2xf32>
    %8 = arith.addf %7, %3 : vector<64x2xf32>
    %9 = arith.addf %4, %8 : vector<64x2xf32>
    %cst_7 = arith.constant 1.000000e+00 : f32
    %10 = vector.broadcast %cst_7 : f32 to vector<64x2xf32>
    %11 = arith.cmpf oge, %9, %10 : vector<64x2xf32>
    %cst_8 = arith.constant 1.000000e+00 : f32
    %cst_9 = arith.constant 0.000000e+00 : f32
    %12 = vector.broadcast %cst_8 : f32 to vector<64x2xf32>
    %13 = vector.broadcast %cst_9 : f32 to vector<64x2xf32>
    %14 = arith.select %11, %12, %13 : vector<64x2xi1>, vector<64x2xf32>
    %15 = arith.truncf %14 : vector<64x2xf32> to vector<64x2xbf16>
    %c0_10 = arith.constant 0 : index
    %c0_11 = arith.constant 0 : index
    %c0_12 = arith.constant 0 : index
    %16 = vector.load %arg4[%c0_10, %c0_11, %c0_12] : memref<4x64x2xbf16, #tpu.memory_space<vmem>>, vector<1x64x2xbf16>
    %17 = vector.shape_cast %16 : vector<1x64x2xbf16> to vector<64x2xbf16>
    %18 = vector.shape_cast %15 : vector<64x2xbf16> to vector<1x64x2xbf16>
    tpu.vector_store %arg4[%c0_10, %c0_11, %c0_12], %18 {strides = array<i32>} : memref<4x64x2xbf16, #tpu.memory_space<vmem>>, vector<1x64x2xbf16>,
    %cst_13 = arith.constant 0.000000e+00 : f32
    %19 = vector.broadcast %cst_13 : f32 to vector<64x2xf32>
    %20 = arith.select %11, %19, %9 : vector<64x2xi1>, vector<64x2xf32>
    %c1 = arith.constant 1 : index
    %c0_14 = arith.constant 0 : index
    %c0_15 = arith.constant 0 : index
    %21 = vector.load %arg1[%c1, %c0_14, %c0_15] : memref<4x576x2xbf16, #tpu.memory_space<vmem>>, vector<1x576x2xbf16>
    %22 = vector.shape_cast %21 : vector<1x576x2xbf16> to vector<576x2xbf16>
    %cst_16 = arith.constant dense<0.000000e+00> : vector<64x2xf32>
    %23 = tpu.matmul %0, %22, %cst_16 {dimension_numbers = #tpu.dot_dimension_numbers<[1], [0], [0], [1], [0, 0, 1, 1], [], []>} : vector<64x576xbf16>, vector<576x2xbf16>, vector<64x2xf32> -> vector<64x2xf32>
    %24 = arith.addf %23, %3 : vector<64x2xf32>
    %25 = arith.addf %20, %24 : vector<64x2xf32>
    %cst_17 = arith.constant 1.000000e+00 : f32
    %26 = vector.broadcast %cst_17 : f32 to vector<64x2xf32>
    %27 = arith.cmpf oge, %25, %26 : vector<64x2xf32>
    %cst_18 = arith.constant 1.000000e+00 : f32
    %cst_19 = arith.constant 0.000000e+00 : f32
    %28 = vector.broadcast %cst_18 : f32 to vector<64x2xf32>
    %29 = vector.broadcast %cst_19 : f32 to vector<64x2xf32>
    %30 = arith.select %27, %28, %29 : vector<64x2xi1>, vector<64x2xf32>
    %31 = arith.truncf %30 : vector<64x2xf32> to vector<64x2xbf16>
    %c1_20 = arith.constant 1 : index
    %c0_21 = arith.constant 0 : index
    %c0_22 = arith.constant 0 : index
    %32 = vector.load %arg4[%c1_20, %c0_21, %c0_22] : memref<4x64x2xbf16, #tpu.memory_space<vmem>>, vector<1x64x2xbf16>
    %33 = vector.shape_cast %32 : vector<1x64x2xbf16> to vector<64x2xbf16>
    %34 = vector.shape_cast %31 : vector<64x2xbf16> to vector<1x64x2xbf16>
    tpu.vector_store %arg4[%c1_20, %c0_21, %c0_22], %34 {strides = array<i32>} : memref<4x64x2xbf16, #tpu.memory_space<vmem>>, vector<1x64x2xbf16>,
    %cst_23 = arith.constant 0.000000e+00 : f32
    %35 = vector.broadcast %cst_23 : f32 to vector<64x2xf32>
    %36 = arith.select %27, %35, %25 : vector<64x2xi1>, vector<64x2xf32>
    %c2 = arith.constant 2 : index
    %c0_24 = arith.constant 0 : index
    %c0_25 = arith.constant 0 : index
    %37 = vector.load %arg1[%c2, %c0_24, %c0_25] : memref<4x576x2xbf16, #tpu.memory_space<vmem>>, vector<1x576x2xbf16>
    %38 = vector.shape_cast %37 : vector<1x576x2xbf16> to vector<576x2xbf16>
    %cst_26 = arith.constant dense<0.000000e+00> : vector<64x2xf32>
    %39 = tpu.matmul %0, %38, %cst_26 {dimension_numbers = #tpu.dot_dimension_numbers<[1], [0], [0], [1], [0, 0, 1, 1], [], []>} : vector<64x576xbf16>, vector<576x2xbf16>, vector<64x2xf32> -> vector<64x2xf32>
    %40 = arith.addf %39, %3 : vector<64x2xf32>
    %41 = arith.addf %36, %40 : vector<64x2xf32>
    %cst_27 = arith.constant 1.000000e+00 : f32
    %42 = vector.broadcast %cst_27 : f32 to vector<64x2xf32>
    %43 = arith.cmpf oge, %41, %42 : vector<64x2xf32>
    %cst_28 = arith.constant 1.000000e+00 : f32
    %cst_29 = arith.constant 0.000000e+00 : f32
    %44 = vector.broadcast %cst_28 : f32 to vector<64x2xf32>
    %45 = vector.broadcast %cst_29 : f32 to vector<64x2xf32>
    %46 = arith.select %43, %44, %45 : vector<64x2xi1>, vector<64x2xf32>
    %47 = arith.truncf %46 : vector<64x2xf32> to vector<64x2xbf16>
    %c2_30 = arith.constant 2 : index
    %c0_31 = arith.constant 0 : index
    %c0_32 = arith.constant 0 : index
    %48 = vector.load %arg4[%c2_30, %c0_31, %c0_32] : memref<4x64x2xbf16, #tpu.memory_space<vmem>>, vector<1x64x2xbf16>
    %49 = vector.shape_cast %48 : vector<1x64x2xbf16> to vector<64x2xbf16>
    %50 = vector.shape_cast %47 : vector<64x2xbf16> to vector<1x64x2xbf16>
    tpu.vector_store %arg4[%c2_30, %c0_31, %c0_32], %50 {strides = array<i32>} : memref<4x64x2xbf16, #tpu.memory_space<vmem>>, vector<1x64x2xbf16>,
    %cst_33 = arith.constant 0.000000e+00 : f32
    %51 = vector.broadcast %cst_33 : f32 to vector<64x2xf32>
    %52 = arith.select %43, %51, %41 : vector<64x2xi1>, vector<64x2xf32>
    %c3 = arith.constant 3 : index
    %c0_34 = arith.constant 0 : index
    %c0_35 = arith.constant 0 : index
    %53 = vector.load %arg1[%c3, %c0_34, %c0_35] : memref<4x576x2xbf16, #tpu.memory_space<vmem>>, vector<1x576x2xbf16>
    %54 = vector.shape_cast %53 : vector<1x576x2xbf16> to vector<576x2xbf16>
    %cst_36 = arith.constant dense<0.000000e+00> : vector<64x2xf32>
    %55 = tpu.matmul %0, %54, %cst_36 {dimension_numbers = #tpu.dot_dimension_numbers<[1], [0], [0], [1], [0, 0, 1, 1], [], []>} : vector<64x576xbf16>, vector<576x2xbf16>, vector<64x2xf32> -> vector<64x2xf32>
    %56 = arith.addf %55, %3 : vector<64x2xf32>
    %57 = arith.addf %52, %56 : vector<64x2xf32>
    %cst_37 = arith.constant 1.000000e+00 : f32
    %58 = vector.broadcast %cst_37 : f32 to vector<64x2xf32>
    %59 = arith.cmpf oge, %57, %58 : vector<64x2xf32>
    %cst_38 = arith.constant 1.000000e+00 : f32
    %cst_39 = arith.constant 0.000000e+00 : f32
    %60 = vector.broadcast %cst_38 : f32 to vector<64x2xf32>
    %61 = vector.broadcast %cst_39 : f32 to vector<64x2xf32>
    %62 = arith.select %59, %60, %61 : vector<64x2xi1>, vector<64x2xf32>
    %63 = arith.truncf %62 : vector<64x2xf32> to vector<64x2xbf16>
    %c3_40 = arith.constant 3 : index
    %c0_41 = arith.constant 0 : index
    %c0_42 = arith.constant 0 : index
    %64 = vector.load %arg4[%c3_40, %c0_41, %c0_42] : memref<4x64x2xbf16, #tpu.memory_space<vmem>>, vector<1x64x2xbf16>
    %65 = vector.shape_cast %64 : vector<1x64x2xbf16> to vector<64x2xbf16>
    %66 = vector.shape_cast %63 : vector<64x2xbf16> to vector<1x64x2xbf16>
    tpu.vector_store %arg4[%c3_40, %c0_41, %c0_42], %66 {strides = array<i32>} : memref<4x64x2xbf16, #tpu.memory_space<vmem>>, vector<1x64x2xbf16>,
    return
  }
  func.func @transform_0(%arg0: i32) -> (i32, i32, i32) {
    %c0_i32 = arith.constant 0 : i32
    %c0_i32_0 = arith.constant 0 : i32
    %c0_i32_1 = arith.constant 0 : i32
    return %c0_i32, %c0_i32_0, %arg0 : i32, i32, i32
  }
  func.func @transform_1(%arg0: i32) -> (i32, i32) {
    %c0_i32 = arith.constant 0 : i32
    %c0_i32_0 = arith.constant 0 : i32
    %c0_i32_1 = arith.constant 0 : i32
    return %c0_i32, %c0_i32_0 : i32, i32
  }
  func.func @transform_2(%arg0: i32) -> (i32, i32) {
    %c0_i32 = arith.constant 0 : i32
    %c0_i32_0 = arith.constant 0 : i32
    %c0_i32_1 = arith.constant 0 : i32
    return %c0_i32, %c0_i32_0 : i32, i32
  }
  func.func @transform_3(%arg0: i32) -> (i32, i32, i32) {
    %c0_i32 = arith.constant 0 : i32
    %c0_i32_0 = arith.constant 0 : i32
    %c0_i32_1 = arith.constant 0 : i32
    return %c0_i32, %c0_i32_0, %arg0 : i32, i32, i32
  }
}

module attributes {stable_mosaic.version = 11 : i64} {
  func.func @_final_linear_if_mean_kernel(%arg0: i32, %arg1: memref<4x64x2xbf16, #tpu.memory_space<vmem>>, %arg2: memref<10x64xbf16, #tpu.memory_space<vmem>>, %arg3: memref<10x1xf32, #tpu.memory_space<vmem>>, %arg4: memref<10x2xf32, #tpu.memory_space<vmem>>) attributes {dimension_semantics = [#tpu.dimension_semantics<arbitrary>], iteration_bounds = array<i64: 1>, scalar_prefetch = 0 : i64, scratch_operands = 0 : i64, tpu.core_type = #tpu.core_type<tc>, window_params = [{pipeline_mode = #tpu.pipeline_mode<synchronous>, transform_indices = @transform_0, window_bounds = array<i64: 4, 64, 2>}, {pipeline_mode = #tpu.pipeline_mode<synchronous>, transform_indices = @transform_1, window_bounds = array<i64: 10, 64>}, {pipeline_mode = #tpu.pipeline_mode<synchronous>, transform_indices = @transform_2, window_bounds = array<i64: 10, 1>}, {pipeline_mode = #tpu.pipeline_mode<synchronous>, transform_indices = @transform_3, window_bounds = array<i64: 10, 2>}]} {
    %c0 = arith.constant 0 : index
    %c0_0 = arith.constant 0 : index
    %0 = vector.load %arg2[%c0, %c0_0] : memref<10x64xbf16, #tpu.memory_space<vmem>>, vector<10x64xbf16>
    %c0_1 = arith.constant 0 : index
    %c0_2 = arith.constant 0 : index
    %1 = vector.load %arg3[%c0_1, %c0_2] : memref<10x1xf32, #tpu.memory_space<vmem>>, vector<10x1xf32>
    %2 = vector.shape_cast %1 : vector<10x1xf32> to vector<10x1xf32>
    %3 = vector.broadcast %2 : vector<10x1xf32> to vector<10x2xf32>
    %cst = arith.constant 0.000000e+00 : f32
    %4 = vector.broadcast %cst : f32 to vector<10x2xf32>
    %cst_3 = arith.constant 0.000000e+00 : f32
    %5 = vector.broadcast %cst_3 : f32 to vector<10x2xf32>
    %c0_4 = arith.constant 0 : index
    %c0_5 = arith.constant 0 : index
    %c0_6 = arith.constant 0 : index
    %6 = vector.load %arg1[%c0_4, %c0_5, %c0_6] : memref<4x64x2xbf16, #tpu.memory_space<vmem>>, vector<1x64x2xbf16>
    %7 = vector.shape_cast %6 : vector<1x64x2xbf16> to vector<64x2xbf16>
    %cst_7 = arith.constant dense<0.000000e+00> : vector<10x2xf32>
    %8 = tpu.matmul %0, %7, %cst_7 {dimension_numbers = #tpu.dot_dimension_numbers<[1], [0], [0], [1], [0, 0, 1, 1], [], []>} : vector<10x64xbf16>, vector<64x2xbf16>, vector<10x2xf32> -> vector<10x2xf32>
    %9 = arith.addf %8, %3 : vector<10x2xf32>
    %10 = arith.addf %4, %9 : vector<10x2xf32>
    %cst_8 = arith.constant 1.000000e+00 : f32
    %11 = vector.broadcast %cst_8 : f32 to vector<10x2xf32>
    %12 = arith.cmpf oge, %10, %11 : vector<10x2xf32>
    %13 = arith.extui %12 : vector<10x2xi1> to vector<10x2xi32>
    %14 = arith.sitofp %13 : vector<10x2xi32> to vector<10x2xf32>
    %15 = arith.addf %5, %14 : vector<10x2xf32>
    %cst_9 = arith.constant 0.000000e+00 : f32
    %16 = vector.broadcast %cst_9 : f32 to vector<10x2xf32>
    %17 = arith.select %12, %16, %10 : vector<10x2xi1>, vector<10x2xf32>
    %c1 = arith.constant 1 : index
    %c0_10 = arith.constant 0 : index
    %c0_11 = arith.constant 0 : index
    %18 = vector.load %arg1[%c1, %c0_10, %c0_11] : memref<4x64x2xbf16, #tpu.memory_space<vmem>>, vector<1x64x2xbf16>
    %19 = vector.shape_cast %18 : vector<1x64x2xbf16> to vector<64x2xbf16>
    %cst_12 = arith.constant dense<0.000000e+00> : vector<10x2xf32>
    %20 = tpu.matmul %0, %19, %cst_12 {dimension_numbers = #tpu.dot_dimension_numbers<[1], [0], [0], [1], [0, 0, 1, 1], [], []>} : vector<10x64xbf16>, vector<64x2xbf16>, vector<10x2xf32> -> vector<10x2xf32>
    %21 = arith.addf %20, %3 : vector<10x2xf32>
    %22 = arith.addf %17, %21 : vector<10x2xf32>
    %cst_13 = arith.constant 1.000000e+00 : f32
    %23 = vector.broadcast %cst_13 : f32 to vector<10x2xf32>
    %24 = arith.cmpf oge, %22, %23 : vector<10x2xf32>
    %25 = arith.extui %24 : vector<10x2xi1> to vector<10x2xi32>
    %26 = arith.sitofp %25 : vector<10x2xi32> to vector<10x2xf32>
    %27 = arith.addf %15, %26 : vector<10x2xf32>
    %cst_14 = arith.constant 0.000000e+00 : f32
    %28 = vector.broadcast %cst_14 : f32 to vector<10x2xf32>
    %29 = arith.select %24, %28, %22 : vector<10x2xi1>, vector<10x2xf32>
    %c2 = arith.constant 2 : index
    %c0_15 = arith.constant 0 : index
    %c0_16 = arith.constant 0 : index
    %30 = vector.load %arg1[%c2, %c0_15, %c0_16] : memref<4x64x2xbf16, #tpu.memory_space<vmem>>, vector<1x64x2xbf16>
    %31 = vector.shape_cast %30 : vector<1x64x2xbf16> to vector<64x2xbf16>
    %cst_17 = arith.constant dense<0.000000e+00> : vector<10x2xf32>
    %32 = tpu.matmul %0, %31, %cst_17 {dimension_numbers = #tpu.dot_dimension_numbers<[1], [0], [0], [1], [0, 0, 1, 1], [], []>} : vector<10x64xbf16>, vector<64x2xbf16>, vector<10x2xf32> -> vector<10x2xf32>
    %33 = arith.addf %32, %3 : vector<10x2xf32>
    %34 = arith.addf %29, %33 : vector<10x2xf32>
    %cst_18 = arith.constant 1.000000e+00 : f32
    %35 = vector.broadcast %cst_18 : f32 to vector<10x2xf32>
    %36 = arith.cmpf oge, %34, %35 : vector<10x2xf32>
    %37 = arith.extui %36 : vector<10x2xi1> to vector<10x2xi32>
    %38 = arith.sitofp %37 : vector<10x2xi32> to vector<10x2xf32>
    %39 = arith.addf %27, %38 : vector<10x2xf32>
    %cst_19 = arith.constant 0.000000e+00 : f32
    %40 = vector.broadcast %cst_19 : f32 to vector<10x2xf32>
    %41 = arith.select %36, %40, %34 : vector<10x2xi1>, vector<10x2xf32>
    %c3 = arith.constant 3 : index
    %c0_20 = arith.constant 0 : index
    %c0_21 = arith.constant 0 : index
    %42 = vector.load %arg1[%c3, %c0_20, %c0_21] : memref<4x64x2xbf16, #tpu.memory_space<vmem>>, vector<1x64x2xbf16>
    %43 = vector.shape_cast %42 : vector<1x64x2xbf16> to vector<64x2xbf16>
    %cst_22 = arith.constant dense<0.000000e+00> : vector<10x2xf32>
    %44 = tpu.matmul %0, %43, %cst_22 {dimension_numbers = #tpu.dot_dimension_numbers<[1], [0], [0], [1], [0, 0, 1, 1], [], []>} : vector<10x64xbf16>, vector<64x2xbf16>, vector<10x2xf32> -> vector<10x2xf32>
    %45 = arith.addf %44, %3 : vector<10x2xf32>
    %46 = arith.addf %41, %45 : vector<10x2xf32>
    %cst_23 = arith.constant 1.000000e+00 : f32
    %47 = vector.broadcast %cst_23 : f32 to vector<10x2xf32>
    %48 = arith.cmpf oge, %46, %47 : vector<10x2xf32>
    %49 = arith.extui %48 : vector<10x2xi1> to vector<10x2xi32>
    %50 = arith.sitofp %49 : vector<10x2xi32> to vector<10x2xf32>
    %51 = arith.addf %39, %50 : vector<10x2xf32>
    %cst_24 = arith.constant 2.500000e-01 : f32
    %52 = vector.broadcast %cst_24 : f32 to vector<10x2xf32>
    %53 = arith.mulf %51, %52 : vector<10x2xf32>
    %c0_25 = arith.constant 0 : index
    %c0_26 = arith.constant 0 : index
    %54 = vector.load %arg4[%c0_25, %c0_26] : memref<10x2xf32, #tpu.memory_space<vmem>>, vector<10x2xf32>
    tpu.vector_store %arg4[%c0_25, %c0_26], %53 {strides = array<i32>} : memref<10x2xf32, #tpu.memory_space<vmem>>, vector<10x2xf32>,
    return
  }
  func.func @transform_0(%arg0: i32) -> (i32, i32, i32) {
    %c0_i32 = arith.constant 0 : i32
    %c0_i32_0 = arith.constant 0 : i32
    %c0_i32_1 = arith.constant 0 : i32
    %c0_i32_2 = arith.constant 0 : i32
    return %c0_i32, %c0_i32_0, %c0_i32_1 : i32, i32, i32
  }
  func.func @transform_1(%arg0: i32) -> (i32, i32) {
    %c0_i32 = arith.constant 0 : i32
    %c0_i32_0 = arith.constant 0 : i32
    %c0_i32_1 = arith.constant 0 : i32
    return %c0_i32, %c0_i32_0 : i32, i32
  }
  func.func @transform_2(%arg0: i32) -> (i32, i32) {
    %c0_i32 = arith.constant 0 : i32
    %c0_i32_0 = arith.constant 0 : i32
    %c0_i32_1 = arith.constant 0 : i32
    return %c0_i32, %c0_i32_0 : i32, i32
  }
  func.func @transform_3(%arg0: i32) -> (i32, i32) {
    %c0_i32 = arith.constant 0 : i32
    %c0_i32_0 = arith.constant 0 : i32
    %c0_i32_1 = arith.constant 0 : i32
    return %c0_i32, %c0_i32_0 : i32, i32
  }
}

</mosaic_0001>

<bundles_post_ra>
// kernel: dvs_event_net_forward.7
= control target key start
LH: loop header
LB: loop body
LE: loop exit
PB: predicated region body
PF: predicated region fallthrough
CT: control target
= control target key end

     0   :  { %s1387_s12 = smov 0   ;;  %s1389_s13 = smov 0   ;;  %s1689_s0 = inlined_call_operand.vmem [shape: bf16[4,18,2048], index: 0, kind: input, shape index: {}]   ;;  %s1690_s1 = inlined_call_operand.vmem [shape: bf16[16,18], index: 1, kind: input, shape index: {}]   ;;  %s1691_s2 = inlined_call_operand.vmem [shape: f32[16,1], index: 2, kind: input, shape index: {}]   ;;  %s1692_s3 = inlined_call_operand.vmem [shape: bf16[4,16,2048], index: 3, kind: output, shape index: {}]  }
   0x1   :  { %s1391_s14 = smov 0  }
   0x2 LB: > { %s1145_s15 = sadd.s32 4294967295, %s1363_s14   ;;  %s1404_s16 = sadd.s32 1, %s1363_s14   ;;  %s1363_s14 = sphi %s1391_s14, %s1696_s14   ;;  %s1359_s13 = sphi %s1389_s13, %s1695_s13   ;;  %s1355_s12 = sphi %s1387_s12, %s1694_s12  }
   0x3   : > { %s17_s17 = ssub.s32 %s1363_s14, %s1404_s16  ;;  %s20_s18 = sadd.s32 1, %s1359_s13 }
   0x4   : > { %p18_p0 = scmp.eq.s32.totalorder %s17_s17, 0  ;;  %p27_p1 = scmp.ne.s32.totalorder %s1359_s13, %s1355_s12 }
   0x5   : > { %p28_p2 = scmp.eq.s32.totalorder %s1363_s14, 0  ;;  %p99_p3 = scmp.eq.s32.totalorder %s1145_s15, 3 }
   0x6   : > { %s1415_s19 = scalar_select %p18_p0, %s1359_s13, %s20_s18  }
   0x7   : > { %p29_p4 = por %p28_p2, %p27_p1  ;;  %p1417_p5 = por %p99_p3, %p27_p1 }
   0x8   : > { %p1148_p6 = scmp.ge.s32.totalorder %s1363_s14, 4 }
   0xa   : > { %127 = sbr.rel (%p1148_p6) target bundleno = 33 (0x21), region = 24 }
  0x11   : > { %130 = sbr.rel (!%p29_p4) target bundleno = 33 (0x21), region = 28  ;;  %s132_s21 = sand.u32 (%p29_p4), 1, %s1359_s13  }
  0x12   : > { %s1253_s22 = sshll.u32 (%p29_p4), %s1363_s14, 4  ;;  %s1271_s23 = smul.u32 (%p29_p4), 192, %s132_s21 }
  0x13   : > { %s1427_s26 = scalar_lea.vmem (%p29_p4), %s1689_s0, %s1253_s22 }
  0x14   : > { %v150_v0 = vld [vmem:[%s1427_s26] sm:$0xff] (%p29_p4)  ;;  %v152_v1 = vld [vmem:[%s1427_s26 + $0x8] sm:$0xff] (%p29_p4)  ;;  %s1435_s27 = scalar_lea.vmem (%p29_p4), [#allocation2], %s1271_s23 }
  0x15   : > { %v154_v2 = vld [vmem:[%s1427_s26 + $0x40] sm:$0xff] (%p29_p4)  ;;  %v156_v3 = vld [vmem:[%s1427_s26 + $0x48] sm:$0xff] (%p29_p4)  ;;  %151 = vst [vmem:[%s1435_s27] sm:$0xff] (%p29_p4), %v150_v0  ;;  %153 = vst [vmem:[%s1435_s27 + $0x8] sm:$0xff] (%p29_p4), %v152_v1 }
  0x16   : > { %v158_v4 = vld [vmem:[%s1427_s26 + $0x80] sm:$0xff] (%p29_p4)  ;;  %v160_v5 = vld [vmem:[%s1427_s26 + $0x88] sm:$0xff] (%p29_p4)  ;;  %155 = vst [vmem:[%s1435_s27 + $0x10] sm:$0xff] (%p29_p4), %v154_v2  ;;  %157 = vst [vmem:[%s1435_s27 + $0x18] sm:$0xff] (%p29_p4), %v156_v3 }
  0x17   : > { %159 = vst [vmem:[%s1435_s27 + $0x20] sm:$0xff] (%p29_p4), %v158_v4  ;;  %161 = vst [vmem:[%s1435_s27 + $0x28] sm:$0xff] (%p29_p4), %v160_v5  ;;  %v162_v6 = vld [vmem:[%s1427_s26 + $0xc0] sm:$0xff] (%p29_p4)  ;;  %v164_v7 = vld [vmem:[%s1427_s26 + $0xc8] sm:$0xff] (%p29_p4) }
  0x18   : > { %v166_v8 = vld [vmem:[%s1427_s26 + $0x100] sm:$0xff]  ;;  %163 = vst [vmem:[%s1435_s27 + $0x30] sm:$0xff] %v162_v6  ;;  %165 = vst [vmem:[%s1435_s27 + $0x38] sm:$0xff] %v164_v7  ;;  %v168_v9 = vld [vmem:[%s1427_s26 + $0x108] sm:$0xff] }
  0x19   : > { %167 = vst [vmem:[%s1435_s27 + $0x40] sm:$0xff] %v166_v8  ;;  %v170_v10 = vld [vmem:[%s1427_s26 + $0x140] sm:$0xff]  ;;  %v172_v11 = vld [vmem:[%s1427_s26 + $0x148] sm:$0xff]  ;;  %169 = vst [vmem:[%s1435_s27 + $0x48] sm:$0xff] %v168_v9 }
  0x1a   : > { %171 = vst [vmem:[%s1435_s27 + $0x50] sm:$0xff] %v170_v10  ;;  %173 = vst [vmem:[%s1435_s27 + $0x58] sm:$0xff] %v172_v11  ;;  %v174_v12 = vld [vmem:[%s1427_s26 + $0x180] sm:$0xff]  ;;  %v176_v13 = vld [vmem:[%s1427_s26 + $0x188] sm:$0xff] }
  0x1b   : > { %v178_v14 = vld [vmem:[%s1427_s26 + $0x1c0] sm:$0xff]  ;;  %175 = vst [vmem:[%s1435_s27 + $0x60] sm:$0xff] %v174_v12  ;;  %177 = vst [vmem:[%s1435_s27 + $0x68] sm:$0xff] %v176_v13  ;;  %v180_v15 = vld [vmem:[%s1427_s26 + $0x1c8] sm:$0xff] }
  0x1c   : > { %179 = vst [vmem:[%s1435_s27 + $0x70] sm:$0xff] %v178_v14  ;;  %v182_v16 = vld [vmem:[%s1427_s26 + $0x200] sm:$0xff]  ;;  %v184_v17 = vld [vmem:[%s1427_s26 + $0x208] sm:$0xff]  ;;  %181 = vst [vmem:[%s1435_s27 + $0x78] sm:$0xff] %v180_v15 }
  0x1d   : > { %183 = vst [vmem:[%s1435_s27 + $0x80] sm:$0xff] %v182_v16  ;;  %185 = vst [vmem:[%s1435_s27 + $0x88] sm:$0xff] %v184_v17  ;;  %v186_v18 = vld [vmem:[%s1427_s26 + $0x240] sm:$0xff]  ;;  %v188_v19 = vld [vmem:[%s1427_s26 + $0x248] sm:$0xff] }
  0x1e   : > { %v190_v20 = vld [vmem:[%s1427_s26 + $0x280] sm:$0xff]  ;;  %187 = vst [vmem:[%s1435_s27 + $0x90] sm:$0xff] %v186_v18  ;;  %189 = vst [vmem:[%s1435_s27 + $0x98] sm:$0xff] %v188_v19  ;;  %v192_v21 = vld [vmem:[%s1427_s26 + $0x288] sm:$0xff] }
  0x1f   : > { %191 = vst [vmem:[%s1435_s27 + $0xa0] sm:$0xff] %v190_v20  ;;  %v194_v22 = vld [vmem:[%s1427_s26 + $0x2c0] sm:$0xff]  ;;  %v196_v23 = vld [vmem:[%s1427_s26 + $0x2c8] sm:$0xff]  ;;  %193 = vst [vmem:[%s1435_s27 + $0xa8] sm:$0xff] %v192_v21 }
  0x20   : > { %195 = vst [vmem:[%s1435_s27 + $0xb0] sm:$0xff] %v194_v22  ;;  %197 = vst [vmem:[%s1435_s27 + $0xb8] sm:$0xff] %v196_v23 }
  0x21 PF: > { %p1151_p7 = scmp.ge.s32.totalorder %s1363_s14, 1  ;;  %p202_p8 = scmp.lt.s32.totalorder %s1363_s14, 5 }
  0x23   : > { %p203_p9 = pnand %p1151_p7, %p202_p8 }
  0x24   : > { %s209_s28 = sand.u32 (!%p203_p9), 1, %s1355_s12   ;;  %v1365_v24 = vmov (!%p203_p9), 0   ;;  %v236_v25 = vld [vmem:[%s1691_s2] sm:$0xff] (!%p203_p9)  ;;  %v237_v26 = vld [vmem:[%s1691_s2 + $0x8] sm:$0xff] (!%p203_p9)  ;;  %vm293_vm0 = vcmask (!%p203_p9), 1040384   ;;  %vm289_vm1 = vcmask (!%p203_p9), 146432  }
  0x25   : > { %206 = sbr.rel (%p203_p9) target bundleno = 318 (0x13e), region = 51  ;;  %338 = vmatprep.mubr.bf16.mxu0 (!%p203_p9), %v1365_v24  ;;  %381 = vmatprep.mubr.bf16.mxu1 (!%p203_p9), %v1365_v24  ;;  %v1512_v43 = vld [vmem:[%s1690_s1] sm:$0xff] (!%p203_p9)   ;;  %s1152_s10 = sshll.u32 (!%p203_p9), %s209_s28, 7 }
  0x26   : > { %s1272_s29 = smul.u32 (!%p203_p9), 192, %s209_s28  ;;  %1299 = vset.pattern.permute.xlu0 (!%p203_p9), %v1365_v24  ;;  %s1581_s11 = scalar_lea.vmem (!%p203_p9), [#allocation3], %s1152_s10 }
  0x27   : > { %240 = vperm.xlu0 (!%p203_p9), %1299, %v236_v25  }
  0x28   : > { %s1493_s7 = scalar_lea.vmem (!%p203_p9), [#allocation2], %s1272_s29 }
  0x29   : > { %v1300_v27 = vld [vmem:[%s1493_s7 + $0x4] ss:$16 sps:$4 sm:$0xff] (!%p203_p9)   ;;  %v1302_v28 = vld [vmem:[%s1493_s7 + $0xc] ss:$16 sps:$4 sm:$0xff] (!%p203_p9)   ;;  %v1304_v29 = vld [vmem:[%s1493_s7] ss:$16 sps:$4 sm:$0xff] (!%p203_p9)  }
  0x2a   : > { %306 = vmatprep.subr.bf16.mxu0 (!%p203_p9), %v1300_v27  ;;  %v1305_v30 = vld [vmem:[%s1493_s7 + $0x8] ss:$16 sps:$4 sm:$0xff] (!%p203_p9)   ;;  %v252_v31 = vld [vmem:[%s1493_s7 + $0x20] sm:$0x11] (!%p203_p9)  ;;  %349 = vmatprep.subr.bf16.mxu1 (!%p203_p9), %v1302_v28  ;;  %v1316_v39 = vld [vmem:[%s1493_s7 + $0x3c] ss:$16 sps:$4 sm:$0xff] (!%p203_p9)  }
  0x2b   : > { %v1159_v32 = vcombine.high (!%p203_p9), %v252_v31, %v252_v31  ;;  %v253_v33 = vld [vmem:[%s1493_s7 + $0x28] sm:$0x11] (!%p203_p9)  ;;  %v1158_v34 = vcombine.low (!%p203_p9), %v252_v31, %v252_v31  ;;  %245 = vperm.xlu0 (!%p203_p9), %1299, %v237_v26   ;;  %307 = vmatpush1.bf16.msra.mxu0 (!%p203_p9), %v1304_v29  ;;  %v1313_v38 = vld [vmem:[%s1493_s7 + $0x34] ss:$16 sps:$4 sm:$0xff] (!%p203_p9)   ;;  %v1175_v42 = vld [vmem:[%s1493_s7 + $0x58] sm:$0x11] (!%p203_p9) }
  0x2c   : > { %350 = vmatpush1.bf16.msra.mxu1 %v1305_v30  ;;  %v1161_v35 = vcombine.high %v253_v33, %v253_v33  ;;  %v1160_v36 = vcombine.low %v253_v33, %v253_v33  ;;  %v1174_v41 = vld [vmem:[%s1493_s7 + $0x50] sm:$0x11]  ;;  %v1314_v45 = vld [vmem:[%s1493_s7 + $0x38] ss:$16 sps:$4 sm:$0xff]   ;;  %v1183_v47 = vcombine.high %v1175_v42, %v1175_v42  ;;  %v1182_v49 = vcombine.low %v1175_v42, %v1175_v42  ;;  %v1326_v53 = vld [vmem:[%s1493_s7 + $0x6c] ss:$16 sps:$4 sm:$0xff]  }
  0x2d   : > { %1162 = vmatprep.subr.msk.bf16.mxu0 %vm293_vm0, %v1159_v32  ;;  %v295_v37 = vsel %vm293_vm0, %v1158_v34, 0  ;;  %v1311_v44 = vld [vmem:[%s1493_s7 + $0x30] ss:$16 sps:$4 sm:$0xff]   ;;  %v1181_v46 = vcombine.high %v1174_v41, %v1174_v41  ;;  %v1180_v48 = vcombine.low %v1174_v41, %v1174_v41  ;;  %v1323_v50 = vld [vmem:[%s1493_s7 + $0x64] ss:$16 sps:$4 sm:$0xff]   ;;  %v1366_v28 = vmov 0.0  }
  0x2e   : > { %1164 = vmatprep.subr.msk.bf16.mxu1 %vm293_vm0, %v1161_v35  ;;  %v301_v40 = vsel %vm293_vm0, %v1160_v36, 0  ;;  %v496_v52 = vsel %vm293_vm0, %v1182_v49, 0  ;;  %v1200_v54 = vld [vmem:[%s1493_s7 + $0x80] sm:$0x11]  ;;  %v1201_v55 = vld [vmem:[%s1493_s7 + $0x88] sm:$0x11] }
  0x2f   : > { %309 = vmatpush1.bf16.msra.mxu0 %v295_v37  ;;  %v490_v51 = vsel %vm293_vm0, %v1180_v48, 0  ;;  %v1321_v56 = vld [vmem:[%s1493_s7 + $0x60] ss:$16 sps:$4 sm:$0xff]   ;;  %v1324_v57 = vld [vmem:[%s1493_s7 + $0x68] ss:$16 sps:$4 sm:$0xff]   ;;  %v1207_v58 = vcombine.high %v1200_v54, %v1200_v54  ;;  %v1209_v59 = vcombine.high %v1201_v55, %v1201_v55  ;;  %v1206_v60 = vcombine.low %v1200_v54, %v1200_v54  ;;  %s1270_s12 = sshll.u32 (%p1417_p5), %s1145_s15, 4 }
  0x30   : > { %352 = vmatpush1.bf16.msra.mxu1 %v301_v40  ;;  %501 = vmatprep.subr.bf16.mxu0 %v1313_v38  ;;  %v1208_v61 = vcombine.low %v1201_v55, %v1201_v55  ;;  %v1333_v62 = vld [vmem:[%s1493_s7 + $0x94] ss:$16 sps:$4 sm:$0xff]   ;;  %v1336_v1 = vld [vmem:[%s1493_s7 + $0x9c] ss:$16 sps:$4 sm:$0xff]   ;;  %v1331_v4 = vld [vmem:[%s1493_s7 + $0x90] ss:$16 sps:$4 sm:$0xff]   ;;  %s1041_s20 = scalar_lea.vmem (%p1417_p5), %s1692_s3, %s1270_s12 }
  0x31   : > { %544 = vmatprep.subr.bf16.mxu1 %v1316_v39  ;;  %v686_v63 = vsel %vm293_vm0, %v1206_v60, 0  ;;  %v1226_v2 = vld [vmem:[%s1493_s7 + $0xb0] sm:$0x11]  ;;  %v1227_v3 = vld [vmem:[%s1493_s7 + $0xb8] sm:$0x11] }
  0x32   : > { %1163 = vmatmul.mubr.msk.bf16.vlgmr.msra.gmra.mrb[0].mxu0 %vm289_vm1, %v1512_v43  ;;  %v692_v0 = vsel %vm293_vm0, %v1208_v61, 0  ;;  %v1334_v5 = vld [vmem:[%s1493_s7 + $0x98] ss:$16 sps:$4 sm:$0xff]   ;;  %v1233_v6 = vcombine.high %v1226_v2, %v1226_v2  ;;  %v1235_v7 = vcombine.high %v1227_v3, %v1227_v3  ;;  %v1232_v8 = vcombine.low %v1226_v2, %v1226_v2 }
  0x33   : > { %1165 = vmatmul.mubr.msk.bf16.vlgmr.msra.gmra.mrb[0].mxu1 %vm289_vm1, %v1512_v43  ;;  %502 = vmatpush1.bf16.msra.mxu0 %v1311_v44  ;;  %v1234_v9 = vcombine.low %v1227_v3, %v1227_v3 }
  0x34   : > { %545 = vmatpush1.bf16.msra.mxu1 %v1314_v45  ;;  %1184 = vmatprep.subr.msk.bf16.mxu0 %vm293_vm0, %v1181_v46  ;;  %v882_v10 = vsel %vm293_vm0, %v1232_v8, 0 }
  0x35   : > { %1186 = vmatprep.subr.msk.bf16.mxu1 %vm293_vm0, %v1183_v47  ;;  %533 = vmatprep.mubr.bf16.mxu0 %v1365_v24  ;;  %v888_v11 = vsel %vm293_vm0, %v1234_v9, 0 }
  0x36   : > { %576 = vmatprep.mubr.bf16.mxu1 %v1365_v24 }
  0x37   : > { %504 = vmatpush1.bf16.msra.mxu0 %v490_v51 }
  0x38   : > { %547 = vmatpush1.bf16.msra.mxu1 %v496_v52  ;;  %697 = vmatprep.subr.bf16.mxu0 %v1323_v50 }
  0x39   : > { %740 = vmatprep.subr.bf16.mxu1 %v1326_v53 }
  0x3a   : > { %1185 = vmatmul.mubr.msk.bf16.vlgmr.msra.gmra.mrb[4].mxu0 %vm289_vm1, %v1512_v43 }
  0x3b   : > { %1187 = vmatmul.mubr.msk.bf16.vlgmr.msra.gmra.mrb[4].mxu1 %vm289_vm1, %v1512_v43  ;;  %698 = vmatpush1.bf16.msra.mxu0 %v1321_v56 }
  0x3c   : > { %741 = vmatpush1.bf16.msra.mxu1 %v1324_v57  ;;  %1210 = vmatprep.subr.msk.bf16.mxu0 %vm293_vm0, %v1207_v58 }
  0x3d   : > { %1212 = vmatprep.subr.msk.bf16.mxu1 %vm293_vm0, %v1209_v59  ;;  %729 = vmatprep.mubr.bf16.mxu0 %v1365_v24 }
  0x3e   : > { %772 = vmatprep.mubr.bf16.mxu1 %v1365_v24 }
  0x3f   : > { %700 = vmatpush1.bf16.msra.mxu0 %v686_v63 }
  0x40   : > { %743 = vmatpush1.bf16.msra.mxu1 %v692_v0  ;;  %893 = vmatprep.subr.bf16.mxu0 %v1333_v62 }
  0x41   : > { %936 = vmatprep.subr.bf16.mxu1 %v1336_v1 }
  0x42   : > { %1211 = vmatmul.mubr.msk.bf16.vlgmr.msra.gmra.mrb[8].mxu0 %vm289_vm1, %v1512_v43 }
  0x43   : > { %1213 = vmatmul.mubr.msk.bf16.vlgmr.msra.gmra.mrb[8].mxu1 %vm289_vm1, %v1512_v43  ;;  %894 = vmatpush1.bf16.msra.mxu0 %v1331_v4 }
  0x44   : > { %937 = vmatpush1.bf16.msra.mxu1 %v1334_v5  ;;  %1236 = vmatprep.subr.msk.bf16.mxu0 %vm293_vm0, %v1233_v6 }
  0x45   : > { %1238 = vmatprep.subr.msk.bf16.mxu1 %vm293_vm0, %v1235_v7  ;;  %925 = vmatprep.mubr.bf16.mxu0 %v1365_v24 }
  0x46   : > { %968 = vmatprep.mubr.bf16.mxu1 %v1365_v24 }
  0x47   : > { %896 = vmatpush1.bf16.msra.mxu0 %v882_v10 }
  0x48   : > { %939 = vmatpush1.bf16.msra.mxu1 %v888_v11 }
  0x4a   : > { %1237 = vmatmul.mubr.msk.bf16.vlgmr.msra.gmra.mrb[12].mxu0 %vm289_vm1, %v1512_v43 }
  0x4b   : > { %1239 = vmatmul.mubr.msk.bf16.vlgmr.msra.gmra.mrb[12].mxu1 %vm289_vm1, %v1512_v43 }
  0xa6   : > { %v1562_v12 = vpop.permute.xlu0 %240 }
  0xaa   : > { %v1564_v13 = vpop.permute.xlu0 %245 }
 0x105   : > { %v340_v14 = vpop.f32.mrb[0].mxu0 }
 0x106   : > { %v383_v15 = vpop.f32.mrb[0].mxu1  ;;  %v341_v16 = vadd.f32 %v340_v14, %v1562_v12  ;;  %v342_v18 = vpop.f32.mrb[1].mxu0 }
 0x107   : > { %v384_v17 = vadd.f32 %v383_v15, %v1562_v12  ;;  %v385_v19 = vpop.f32.mrb[1].mxu1  ;;  %v343_v20 = vadd.f32 %v342_v18, %v1562_v12  ;;  %v344_v22 = vpop.f32.mrb[2].mxu0 }
 0x108   : > { %v386_v21 = vadd.f32 %v385_v19, %v1562_v12  ;;  %v387_v23 = vpop.f32.mrb[2].mxu1  ;;  %vm400_vm2 = vcmp.ge.f32.partialorder %v341_v16, 1.0  ;;  %v345_v24 = vadd.f32 %v344_v22, %v1564_v13  ;;  %v346_v26 = vpop.f32.mrb[3].mxu0 }
 0x109   : > { %vm402_vm3 = vcmp.ge.f32.partialorder %v384_v17, 1.0  ;;  %v388_v25 = vadd.f32 %v387_v23, %v1564_v13  ;;  %v389_v27 = vpop.f32.mrb[3].mxu1  ;;  %v408_v29 = vsel %vm400_vm2, 1.0, %v1366_v28  ;;  %v444_v31 = vsel %vm400_vm2, 0.0, %v341_v16 }
 0x10a   : > { %v410_v30 = vsel %vm402_vm3, 1.0, %v1366_v28  ;;  %vm401_vm4 = vcmp.ge.f32.partialorder %v343_v20, 1.0  ;;  %vm403_vm5 = vcmp.ge.f32.partialorder %v386_v21, 1.0  ;;  %vm404_vm6 = vcmp.ge.f32.partialorder %v345_v24, 1.0 }
 0x10b   : > { %v446_v32 = vsel %vm402_vm3, 0.0, %v384_v17  ;;  %v409_v33 = vsel %vm401_vm4, 1.0, %v1366_v28  ;;  %v411_v34 = vsel %vm403_vm5, 1.0, %v1366_v28  ;;  %vm406_vm7 = vcmp.ge.f32.partialorder %v388_v25, 1.0 }
 0x10c   : > { %v1254_v35 = vpack.c.bf16 %v409_v33, %v408_v29  ;;  %v445_v36 = vsel %vm401_vm4, 0.0, %v343_v20  ;;  %v1255_v37 = vpack.c.bf16 %v411_v34, %v410_v30  ;;  %v447_v38 = vsel %vm403_vm5, 0.0, %v386_v21 }
 0x10d   : > { %v412_v39 = vsel %vm404_vm6, 1.0, %v1366_v28  ;;  %v448_v40 = vsel %vm404_vm6, 0.0, %v345_v24  ;;  %v347_v41 = vadd.f32 %v346_v26, %v1564_v13  ;;  %v390_v42 = vadd.f32 %v389_v27, %v1564_v13  ;;  %v535_v43 = vpop.f32.mrb[4].mxu0 }
 0x10e   : > { %v578_v44 = vpop.f32.mrb[4].mxu1  ;;  %440 = vst [vmem:[%s1581_s11] sm:$0xff] %v1254_v35  ;;  %441 = vst [vmem:[%s1581_s11 + $0x8] sm:$0xff] %v1255_v37  ;;  %v414_v45 = vsel %vm406_vm7, 1.0, %v1366_v28  ;;  %v450_v46 = vsel %vm406_vm7, 0.0, %v388_v25  ;;  %v536_v47 = vadd.f32 %v535_v43, %v1562_v12  ;;  %v537_v49 = vpop.f32.mrb[5].mxu0 }
 0x10f   : > { %v579_v48 = vadd.f32 %v578_v44, %v1562_v12  ;;  %v580_v50 = vpop.f32.mrb[5].mxu1  ;;  %vm405_vm8 = vcmp.ge.f32.partialorder %v347_v41, 1.0  ;;  %vm407_vm9 = vcmp.ge.f32.partialorder %v390_v42, 1.0  ;;  %v538_v51 = vadd.f32 %v537_v49, %v1562_v12  ;;  %v539_v53 = vpop.f32.mrb[6].mxu0 }
 0x110   : > { %v581_v52 = vadd.f32 %v580_v50, %v1562_v12  ;;  %v582_v54 = vpop.f32.mrb[6].mxu1  ;;  %v413_v55 = vsel %vm405_vm8, 1.0, %v1366_v28  ;;  %v449_v56 = vsel %vm405_vm8, 0.0, %v347_v41  ;;  %v415_v57 = vsel %vm407_vm9, 1.0, %v1366_v28  ;;  %v541_v59 = vpop.f32.mrb[7].mxu0 }
 0x111   : > { %v451_v58 = vsel %vm407_vm9, 0.0, %v390_v42  ;;  %v584_v60 = vpop.f32.mrb[7].mxu1  ;;  %v1256_v61 = vpack.c.bf16 %v413_v55, %v412_v39  ;;  %v1257_v62 = vpack.c.bf16 %v415_v57, %v414_v45  ;;  %v587_v63 = vadd.f32 %v536_v47, %v444_v31 }
 0x112   : > { %v589_v0 = vadd.f32 %v579_v48, %v446_v32  ;;  %v588_v1 = vadd.f32 %v538_v51, %v445_v36  ;;  %v590_v2 = vadd.f32 %v581_v52, %v447_v38  ;;  %v540_v3 = vadd.f32 %v539_v53, %v1564_v13 }
 0x113   : > { %v583_v4 = vadd.f32 %v582_v54, %v1564_v13  ;;  %442 = vst [vmem:[%s1581_s11 + $0x10] sm:$0xff] %v1256_v61  ;;  %443 = vst [vmem:[%s1581_s11 + $0x18] sm:$0xff] %v1257_v62  ;;  %v542_v5 = vadd.f32 %v541_v59, %v1564_v13  ;;  %v585_v6 = vadd.f32 %v584_v60, %v1564_v13  ;;  %vm595_vm10 = vcmp.ge.f32.partialorder %v587_v63, 1.0 }
 0x114   : > { %vm597_vm11 = vcmp.ge.f32.partialorder %v589_v0, 1.0  ;;  %v591_v7 = vadd.f32 %v540_v3, %v448_v40  ;;  %v603_v9 = vsel %vm595_vm10, 1.0, %v1366_v28  ;;  %v640_v10 = vsel %vm595_vm10, 0.0, %v587_v63 }
 0x115   : > { %v593_v8 = vadd.f32 %v583_v4, %v450_v46  ;;  %v592_v11 = vadd.f32 %v542_v5, %v449_v56  ;;  %v594_v14 = vadd.f32 %v585_v6, %v451_v58  ;;  %v731_v15 = vpop.f32.mrb[8].mxu0  ;;  %v605_v16 = vsel %vm597_vm11, 1.0, %v1366_v28 }
 0x116   : > { %v642_v17 = vsel %vm597_vm11, 0.0, %v589_v0  ;;  %v774_v18 = vpop.f32.mrb[8].mxu1  ;;  %v732_v19 = vadd.f32 %v731_v15, %v1562_v12  ;;  %vm596_vm12 = vcmp.ge.f32.partialorder %v588_v1, 1.0  ;;  %v733_v21 = vpop.f32.mrb[9].mxu0  ;;  %vm598_vm13 = vcmp.ge.f32.partialorder %v590_v2, 1.0 }
 0x117   : > { %v775_v20 = vadd.f32 %v774_v18, %v1562_v12  ;;  %v776_v22 = vpop.f32.mrb[9].mxu1  ;;  %v604_v23 = vsel %vm596_vm12, 1.0, %v1366_v28  ;;  %v641_v24 = vsel %vm596_vm12, 0.0, %v588_v1  ;;  %v734_v25 = vadd.f32 %v733_v21, %v1562_v12  ;;  %v735_v27 = vpop.f32.mrb[10].mxu0 }
 0x118   : > { %v606_v26 = vsel %vm598_vm13, 1.0, %v1366_v28  ;;  %v778_v29 = vpop.f32.mrb[10].mxu1  ;;  %v783_v30 = vadd.f32 %v732_v19, %v640_v10  ;;  %v1258_v32 = vpack.c.bf16 %v604_v23, %v603_v9  ;;  %v737_v34 = vpop.f32.mrb[11].mxu0  ;;  %v643_v37 = vsel %vm598_vm13, 0.0, %v590_v2 }
 0x119   : > { %v785_v31 = vadd.f32 %v775_v20, %v642_v17  ;;  %v1259_v33 = vpack.c.bf16 %v606_v26, %v605_v16  ;;  %v780_v35 = vpop.f32.mrb[11].mxu1  ;;  %v784_v36 = vadd.f32 %v734_v25, %v641_v24  ;;  %v777_v38 = vadd.f32 %v776_v22, %v1562_v12 }
 0x11a   : > { %vm599_vm14 = vcmp.ge.f32.partialorder %v591_v7, 1.0  ;;  %1192 = vst [vmem:[%s1581_s11 + $0x20] sm:$0xff] %v1258_v32  ;;  %v736_v41 = vadd.f32 %v735_v27, %v1564_v13  ;;  %vm601_vm15 = vcmp.ge.f32.partialorder %v593_v8, 1.0  ;;  %v779_v45 = vadd.f32 %v778_v29, %v1564_v13 }
 0x11b   : > { %1193 = vst [vmem:[%s1581_s11 + $0x28] sm:$0xff] %v1259_v33  ;;  %v607_v39 = vsel %vm599_vm14, 1.0, %v1366_v28  ;;  %v644_v40 = vsel %vm599_vm14, 0.0, %v591_v7  ;;  %v786_v42 = vadd.f32 %v777_v38, %v643_v37  ;;  %v609_v43 = vsel %vm601_vm15, 1.0, %v1366_v28 }
 0x11c   : > { %v646_v44 = vsel %vm601_vm15, 0.0, %v593_v8  ;;  %v787_v46 = vadd.f32 %v736_v41, %v644_v40  ;;  %vm600_vm0 = vcmp.ge.f32.partialorder %v592_v11, 1.0  ;;  %v738_v47 = vadd.f32 %v737_v34, %v1564_v13 }
 0x11d   : > { %vm602_vm1 = vcmp.ge.f32.partialorder %v594_v14, 1.0  ;;  %v789_v48 = vadd.f32 %v779_v45, %v646_v44  ;;  %v608_v49 = vsel %vm600_vm0, 1.0, %v1366_v28  ;;  %v645_v50 = vsel %vm600_vm0, 0.0, %v592_v11  ;;  %v927_v52 = vpop.f32.mrb[12].mxu0 }
 0x11e   : > { %v610_v51 = vsel %vm602_vm1, 1.0, %v1366_v28  ;;  %v970_v53 = vpop.f32.mrb[12].mxu1  ;;  %v1260_v54 = vpack.c.bf16 %v608_v49, %v607_v39  ;;  %v1615_v55 = vadd.f32 %v738_v47, %v645_v50  ;;  %v647_v57 = vsel %vm602_vm1, 0.0, %v594_v14  ;;  %v929_v58 = vpop.f32.mrb[13].mxu0 }
 0x11f   : > { %v1261_v56 = vpack.c.bf16 %v610_v51, %v609_v43  ;;  %v972_v59 = vpop.f32.mrb[13].mxu1  ;;  %v781_v60 = vadd.f32 %v780_v35, %v1564_v13  ;;  %vm791_vm2 = vcmp.ge.f32.partialorder %v783_v30, 1.0  ;;  %v928_v61 = vadd.f32 %v927_v52, %v1562_v12  ;;  %v931_v62 = vpop.f32.mrb[14].mxu0  ;;  %v1056_v52 = vld [vmem:[%s1581_s11 + $0x8] sm:$0xff] (%p1417_p5) }
 0x120   : > { %vm793_vm3 = vcmp.ge.f32.partialorder %v785_v31, 1.0  ;;  %v974_v63 = vpop.f32.mrb[14].mxu1  ;;  %1194 = vst [vmem:[%s1581_s11 + $0x30] sm:$0xff] %v1260_v54  ;;  %v799_v0 = vsel %vm791_vm2, 1.0, %v1366_v28  ;;  %v836_v1 = vsel %vm791_vm2, 0.0, %v783_v30  ;;  %v933_v4 = vpop.f32.mrb[15].mxu0  ;;  %v971_v8 = vadd.f32 %v970_v53, %v1562_v12 }
 0x121   : > { %1195 = vst [vmem:[%s1581_s11 + $0x38] sm:$0xff] %v1261_v56  ;;  %v801_v2 = vsel %vm793_vm3, 1.0, %v1366_v28  ;;  %v838_v3 = vsel %vm793_vm3, 0.0, %v785_v31  ;;  %v976_v5 = vpop.f32.mrb[15].mxu1  ;;  %v790_v6 = vadd.f32 %v781_v60, %v647_v57  ;;  %v979_v7 = vadd.f32 %v928_v61, %v836_v1  ;;  %v1060_v53 = vld [vmem:[%s1581_s11 + $0x18] sm:$0xff] (%p1417_p5)  ;;  %v1062_v54 = vld [vmem:[%s1581_s11 + $0x20] sm:$0xff] (%p1417_p5) }
 0x122   : > { %vm792_vm4 = vcmp.ge.f32.partialorder %v784_v36, 1.0  ;;  %v930_v11 = vadd.f32 %v929_v58, %v1562_v12  ;;  %vm794_vm5 = vcmp.ge.f32.partialorder %v786_v42, 1.0  ;;  %v981_v14 = vadd.f32 %v971_v8, %v838_v3  ;;  %1057 = vst [vmem:[%s1041_s20 + $0x8] sm:$0xff] (%p1417_p5), %v1056_v52  ;;  %1061 = vst [vmem:[%s1041_s20 + $0x48] sm:$0xff] (%p1417_p5), %v1060_v53 }
 0x123   : > { %v800_v9 = vsel %vm792_vm4, 1.0, %v1366_v28  ;;  %v837_v10 = vsel %vm792_vm4, 0.0, %v784_v36  ;;  %vm987_vm6 = vcmp.ge.f32.partialorder %v979_v7, 1.0  ;;  %v802_v16 = vsel %vm794_vm5, 1.0, %v1366_v28  ;;  %1063 = vst [vmem:[%s1041_s20 + $0x80] sm:$0xff] (%p1417_p5), %v1062_v54 }
 0x124   : > { %v1262_v15 = vpack.c.bf16 %v800_v9, %v799_v0  ;;  %v995_v17 = vsel %vm987_vm6, 1.0, %v1366_v28  ;;  %v980_v18 = vadd.f32 %v930_v11, %v837_v10  ;;  %v1263_v19 = vpack.c.bf16 %v802_v16, %v801_v2 }
 0x125   : > { %vm989_vm7 = vcmp.ge.f32.partialorder %v981_v14, 1.0  ;;  %v973_v20 = vadd.f32 %v972_v59, %v1562_v12  ;;  %vm795_vm8 = vcmp.ge.f32.partialorder %v787_v46, 1.0  ;;  %v932_v21 = vadd.f32 %v931_v62, %v1564_v13 }
 0x126   : > { %1218 = vst [vmem:[%s1581_s11 + $0x40] sm:$0xff] %v1262_v15  ;;  %v997_v22 = vsel %vm989_vm7, 1.0, %v1366_v28  ;;  %vm988_vm9 = vcmp.ge.f32.partialorder %v980_v18, 1.0  ;;  %1219 = vst [vmem:[%s1581_s11 + $0x48] sm:$0xff] %v1263_v19  ;;  %v839_v23 = vsel %vm794_vm5, 0.0, %v786_v42  ;;  %v840_v24 = vsel %vm795_vm8, 0.0, %v787_v46 }
 0x127   : > { %v996_v25 = vsel %vm988_vm9, 1.0, %v1366_v28  ;;  %v982_v26 = vadd.f32 %v973_v20, %v839_v23  ;;  %v983_v27 = vadd.f32 %v932_v21, %v840_v24  ;;  %vm797_vm10 = vcmp.ge.f32.partialorder %v789_v48, 1.0  ;;  %v1066_v56 = vld [vmem:[%s1581_s11 + $0x30] sm:$0xff] (%p1417_p5) }
 0x128   : > { %v1266_v29 = vpack.c.bf16 %v996_v25, %v995_v17  ;;  %v803_v30 = vsel %vm795_vm8, 1.0, %v1366_v28  ;;  %v805_v12 = vsel %vm797_vm10, 1.0, %v1366_v28  ;;  %v975_v31 = vadd.f32 %v974_v63, %v1564_v13  ;;  %v1068_v57 = vld [vmem:[%s1581_s11 + $0x38] sm:$0xff] (%p1417_p5)  ;;  %1067 = vst [vmem:[%s1041_s20 + $0xc0] sm:$0xff] (%p1417_p5), %v1066_v56 }
 0x129   : > { %vm990_vm11 = vcmp.ge.f32.partialorder %v982_v26, 1.0  ;;  %v842_v32 = vsel %vm797_vm10, 0.0, %v789_v48  ;;  %vm796_vm12 = vcmp.ge.f32.partialorder %v1615_v55, 1.0  ;;  %v934_v33 = vadd.f32 %v933_v4, %v1564_v13  ;;  %1069 = vst [vmem:[%s1041_s20 + $0xc8] sm:$0xff] (%p1417_p5), %v1068_v57 }
 0x12a   : > { %1244 = vst [vmem:[%s1581_s11 + $0x60] sm:$0xff] %v1266_v29  ;;  %v998_v34 = vsel %vm990_vm11, 1.0, %v1366_v28  ;;  %vm991_vm13 = vcmp.ge.f32.partialorder %v983_v27, 1.0  ;;  %v985_v35 = vadd.f32 %v975_v31, %v842_v32  ;;  %v804_v36 = vsel %vm796_vm12, 1.0, %v1366_v28 }
 0x12b   : > { %v1267_v37 = vpack.c.bf16 %v998_v34, %v997_v22  ;;  %v1264_v38 = vpack.c.bf16 %v804_v36, %v803_v30  ;;  %v841_v39 = vsel %vm796_vm12, 0.0, %v1615_v55  ;;  %vm798_vm14 = vcmp.ge.f32.partialorder %v790_v6, 1.0  ;;  %v1064_v55 = vld [vmem:[%s1581_s11 + $0x28] sm:$0xff] (%p1417_p5) }
 0x12c   : > { %v984_v40 = vadd.f32 %v934_v33, %v841_v39  ;;  %v806_v41 = vsel %vm798_vm14, 1.0, %v1366_v28  ;;  %v999_v42 = vsel %vm991_vm13, 1.0, %v1366_v28  ;;  %vm993_vm15 = vcmp.ge.f32.partialorder %v985_v35, 1.0  ;;  %1065 = vst [vmem:[%s1041_s20 + $0x88] sm:$0xff] (%p1417_p5), %v1064_v55 }
 0x12d   : > { %1245 = vst [vmem:[%s1581_s11 + $0x68] sm:$0xff] %v1267_v37  ;;  %1220 = vst [vmem:[%s1581_s11 + $0x50] sm:$0xff] %v1264_v38  ;;  %v1265_v43 = vpack.c.bf16 %v806_v41, %v805_v12  ;;  %v977_v44 = vadd.f32 %v976_v5, %v1564_v13  ;;  %v843_v45 = vsel %vm798_vm14, 0.0, %v790_v6  ;;  %v1001_v48 = vsel %vm993_vm15, 1.0, %v1366_v28  ;;  %v1054_v13 = vld [vmem:[%s1581_s11] sm:$0xff] (%p1417_p5)  ;;  %v1072_v59 = vld [vmem:[%s1581_s11 + $0x48] sm:$0xff] (%p1417_p5) }
 0x12e   : > { %vm992_vm0 = vcmp.ge.f32.partialorder %v984_v40, 1.0  ;;  %1055 = vst [vmem:[%s1041_s20] sm:$0xff] (%p1417_p5), %v1054_v13  ;;  %v1070_v58 = vld [vmem:[%s1581_s11 + $0x40] sm:$0xff] (%p1417_p5)  ;;  %1073 = vst [vmem:[%s1041_s20 + $0x108] sm:$0xff] (%p1417_p5), %v1072_v59 }
 0x12f   : > { %v1000_v46 = vsel %vm992_vm0, 1.0, %v1366_v28  ;;  %1221 = vst [vmem:[%s1581_s11 + $0x58] sm:$0xff] %v1265_v43  ;;  %v986_v47 = vadd.f32 %v977_v44, %v843_v45  ;;  %1038 = sbr.rel (!%p1417_p5) target bundleno = 318 (0x13e), region = 59  ;;  %1071 = vst [vmem:[%s1041_s20 + $0x100] sm:$0xff] (%p1417_p5), %v1070_v58 }
 0x130   : > { %v1268_v49 = vpack.c.bf16 %v1000_v46, %v999_v42 }
 0x131   : > { %vm994_vm1 = vcmp.ge.f32.partialorder %v986_v47, 1.0  ;;  %v1078_v62 = vld [vmem:[%s1581_s11 + $0x60] sm:$0xff] (%p1417_p5) }
 0x132   : > { %1246 = vst [vmem:[%s1581_s11 + $0x70] sm:$0xff] %v1268_v49  ;;  %v1002_v50 = vsel %vm994_vm1, 1.0, %v1366_v28  ;;  %v1058_v28 = vld [vmem:[%s1581_s11 + $0x10] sm:$0xff] (%p1417_p5)  ;;  %1079 = vst [vmem:[%s1041_s20 + $0x180] sm:$0xff] (%p1417_p5), %v1078_v62 }
 0x133   : > { %v1269_v51 = vpack.c.bf16 %v1002_v50, %v1001_v48  ;;  %1059 = vst [vmem:[%s1041_s20 + $0x40] sm:$0xff] (%p1417_p5), %v1058_v28 }
 0x134   : > { %v1074_v60 = vld [vmem:[%s1581_s11 + $0x50] sm:$0xff] (%p1417_p5)  ;;  %v1080_v63 = vld [vmem:[%s1581_s11 + $0x68] sm:$0xff] (%p1417_p5) }
 0x135   : > { %1247 = vst [vmem:[%s1581_s11 + $0x78] sm:$0xff] %v1269_v51  ;;  %1075 = vst [vmem:[%s1041_s20 + $0x140] sm:$0xff] (%p1417_p5), %v1074_v60 }
 0x136   : > { %v1076_v61 = vld [vmem:[%s1581_s11 + $0x58] sm:$0xff]  ;;  %1081 = vst [vmem:[%s1041_s20 + $0x188] sm:$0xff] %v1080_v63 }
 0x137   : > { %1077 = vst [vmem:[%s1041_s20 + $0x148] sm:$0xff] %v1076_v61 }
 0x139   : > { %v1082_v0 = vld [vmem:[%s1581_s11 + $0x70] sm:$0xff] }
 0x13a   : > { %1083 = vst [vmem:[%s1041_s20 + $0x1c0] sm:$0xff] %v1082_v0 }
 0x13c   : > { %v1084_v1 = vld [vmem:[%s1581_s11 + $0x78] sm:$0xff] }
 0x13d   : > { %1085 = vst [vmem:[%s1041_s20 + $0x1c8] sm:$0xff] %v1084_v1 }
 0x13e PF: > { %p10_p10 = scmp.ge.s32.totalorder %s1404_s16, 6   ;;  %s1694_s12 = smov %s1359_s13 }
 0x13f   : > { %s1695_s13 = smov %s1415_s19  ;;  %s1696_s14 = smov %s1404_s16 }
 0x140   :  { %12 = sbr.rel (!%p10_p10) target bundleno = 2 (0x2), region = 119 }

// kernel: dvs_event_net_forward.8
= control target key start
LH: loop header
LB: loop body
LE: loop exit
PB: predicated region body
PF: predicated region fallthrough
CT: control target
= control target key end

     0   :  { %s1967_s12 = smov 0   ;;  %s1969_s13 = smov 0   ;;  %s2473_s0 = inlined_call_operand.vmem [shape: bf16[4,144,512], index: 0, kind: input, shape index: {}]   ;;  %s2474_s1 = inlined_call_operand.vmem [shape: bf16[32,144], index: 1, kind: input, shape index: {}]   ;;  %s2475_s2 = inlined_call_operand.vmem [shape: f32[32,1], index: 2, kind: input, shape index: {}]   ;;  %s2476_s3 = inlined_call_operand.vmem [shape: bf16[4,32,512], index: 3, kind: output, shape index: {}]  }
   0x1   :  { %s1971_s14 = smov 0  }
   0x2 LB: > { %s1580_s15 = sadd.s32 4294967295, %s1943_s14   ;;  %s1984_s16 = sadd.s32 1, %s1943_s14   ;;  %s1943_s14 = sphi %s1971_s14, %s2480_s14   ;;  %s1939_s13 = sphi %s1969_s13, %s2479_s13   ;;  %s1935_s12 = sphi %s1967_s12, %s2478_s12  }
   0x3   : > { %s17_s17 = ssub.s32 %s1943_s14, %s1984_s16  ;;  %s20_s18 = sadd.s32 1, %s1939_s13 }
   0x4   : > { %p18_p0 = scmp.eq.s32.totalorder %s17_s17, 0  ;;  %p27_p1 = scmp.ne.s32.totalorder %s1939_s13, %s1935_s12 }
   0x5   : > { %p28_p2 = scmp.eq.s32.totalorder %s1943_s14, 0  ;;  %p99_p3 = scmp.eq.s32.totalorder %s1580_s15, 1 }
   0x6   : > { %s1995_s19 = scalar_select %p18_p0, %s1939_s13, %s20_s18  }
   0x7   : > { %p29_p4 = por %p28_p2, %p27_p1  ;;  %p1997_p5 = por %p99_p3, %p27_p1 }
   0x8   : > { %p1583_p6 = scmp.ge.s32.totalorder %s1943_s14, 2 }
   0xa   : > { %127 = sbr.rel (%p1583_p6) target bundleno = 57 (0x39), region = 24 }
  0x11   : > { %130 = sbr.rel (!%p29_p4) target bundleno = 57 (0x39), region = 28  ;;  %s132_s21 = sand.u32 (%p29_p4), 1, %s1939_s13  }
  0x12   : > { %s1759_s22 = sshll.u32 (%p29_p4), %s1943_s14, 3  ;;  %s1777_s23 = smul.u32 (%p29_p4), 576, %s132_s21 }
  0x13   : > { %s2007_s26 = scalar_lea.vmem (%p29_p4), %s2473_s0, %s1759_s22 }
  0x14   : > { %v307_v0 = vld [vmem:[%s2007_s26] sm:$0xff] (%p29_p4)  ;;  %v309_v1 = vld [vmem:[%s2007_s26 + $0x10] sm:$0xff] (%p29_p4)  ;;  %s2015_s27 = scalar_lea.vmem (%p29_p4), [#allocation2], %s1777_s23 }
  0x15   : > { %v311_v2 = vld [vmem:[%s2007_s26 + $0x20] sm:$0xff] (%p29_p4)  ;;  %v313_v3 = vld [vmem:[%s2007_s26 + $0x30] sm:$0xff] (%p29_p4)  ;;  %308 = vst [vmem:[%s2015_s27] sm:$0xff] (%p29_p4), %v307_v0  ;;  %310 = vst [vmem:[%s2015_s27 + $0x8] sm:$0xff] (%p29_p4), %v309_v1 }
  0x16   : > { %v315_v4 = vld [vmem:[%s2007_s26 + $0x40] sm:$0xff] (%p29_p4)  ;;  %v317_v5 = vld [vmem:[%s2007_s26 + $0x50] sm:$0xff] (%p29_p4)  ;;  %312 = vst [vmem:[%s2015_s27 + $0x10] sm:$0xff] (%p29_p4), %v311_v2  ;;  %314 = vst [vmem:[%s2015_s27 + $0x18] sm:$0xff] (%p29_p4), %v313_v3 }
  0x17   : > { %316 = vst [vmem:[%s2015_s27 + $0x20] sm:$0xff] (%p29_p4), %v315_v4  ;;  %318 = vst [vmem:[%s2015_s27 + $0x28] sm:$0xff] (%p29_p4), %v317_v5  ;;  %v319_v6 = vld [vmem:[%s2007_s26 + $0x60] sm:$0xff] (%p29_p4)  ;;  %v321_v7 = vld [vmem:[%s2007_s26 + $0x70] sm:$0xff] (%p29_p4) }
  0x18   : > { %v323_v8 = vld [vmem:[%s2007_s26 + $0x80] sm:$0xff]  ;;  %320 = vst [vmem:[%s2015_s27 + $0x30] sm:$0xff] %v319_v6  ;;  %322 = vst [vmem:[%s2015_s27 + $0x38] sm:$0xff] %v321_v7  ;;  %v325_v9 = vld [vmem:[%s2007_s26 + $0x90] sm:$0xff] }
  0x19   : > { %324 = vst [vmem:[%s2015_s27 + $0x40] sm:$0xff] %v323_v8  ;;  %v327_v10 = vld [vmem:[%s2007_s26 + $0xa0] sm:$0xff]  ;;  %v329_v11 = vld [vmem:[%s2007_s26 + $0xb0] sm:$0xff]  ;;  %326 = vst [vmem:[%s2015_s27 + $0x48] sm:$0xff] %v325_v9 }
  0x1a   : > { %328 = vst [vmem:[%s2015_s27 + $0x50] sm:$0xff] %v327_v10  ;;  %330 = vst [vmem:[%s2015_s27 + $0x58] sm:$0xff] %v329_v11  ;;  %v331_v12 = vld [vmem:[%s2007_s26 + $0xc0] sm:$0xff]  ;;  %v333_v13 = vld [vmem:[%s2007_s26 + $0xd0] sm:$0xff] }
  0x1b   : > { %v335_v14 = vld [vmem:[%s2007_s26 + $0xe0] sm:$0xff]  ;;  %332 = vst [vmem:[%s2015_s27 + $0x60] sm:$0xff] %v331_v12  ;;  %334 = vst [vmem:[%s2015_s27 + $0x68] sm:$0xff] %v333_v13  ;;  %v337_v15 = vld [vmem:[%s2007_s26 + $0xf0] sm:$0xff] }
  0x1c   : > { %336 = vst [vmem:[%s2015_s27 + $0x70] sm:$0xff] %v335_v14  ;;  %v339_v16 = vld [vmem:[%s2007_s26 + $0x100] sm:$0xff]  ;;  %v341_v17 = vld [vmem:[%s2007_s26 + $0x110] sm:$0xff]  ;;  %338 = vst [vmem:[%s2015_s27 + $0x78] sm:$0xff] %v337_v15 }
  0x1d   : > { %340 = vst [vmem:[%s2015_s27 + $0x80] sm:$0xff] %v339_v16  ;;  %342 = vst [vmem:[%s2015_s27 + $0x88] sm:$0xff] %v341_v17  ;;  %v343_v18 = vld [vmem:[%s2007_s26 + $0x120] sm:$0xff]  ;;  %v345_v19 = vld [vmem:[%s2007_s26 + $0x130] sm:$0xff] }
  0x1e   : > { %v347_v20 = vld [vmem:[%s2007_s26 + $0x140] sm:$0xff]  ;;  %344 = vst [vmem:[%s2015_s27 + $0x90] sm:$0xff] %v343_v18  ;;  %346 = vst [vmem:[%s2015_s27 + $0x98] sm:$0xff] %v345_v19  ;;  %v349_v21 = vld [vmem:[%s2007_s26 + $0x150] sm:$0xff] }
  0x1f   : > { %348 = vst [vmem:[%s2015_s27 + $0xa0] sm:$0xff] %v347_v20  ;;  %v351_v22 = vld [vmem:[%s2007_s26 + $0x160] sm:$0xff]  ;;  %v353_v23 = vld [vmem:[%s2007_s26 + $0x170] sm:$0xff]  ;;  %350 = vst [vmem:[%s2015_s27 + $0xa8] sm:$0xff] %v349_v21 }
  0x20   : > { %352 = vst [vmem:[%s2015_s27 + $0xb0] sm:$0xff] %v351_v22  ;;  %354 = vst [vmem:[%s2015_s27 + $0xb8] sm:$0xff] %v353_v23  ;;  %v355_v24 = vld [vmem:[%s2007_s26 + $0x180] sm:$0xff]  ;;  %v357_v25 = vld [vmem:[%s2007_s26 + $0x190] sm:$0xff] }
  0x21   : > { %v359_v26 = vld [vmem:[%s2007_s26 + $0x1a0] sm:$0xff]  ;;  %356 = vst [vmem:[%s2015_s27 + $0xc0] sm:$0xff] %v355_v24  ;;  %358 = vst [vmem:[%s2015_s27 + $0xc8] sm:$0xff] %v357_v25  ;;  %v361_v27 = vld [vmem:[%s2007_s26 + $0x1b0] sm:$0xff] }
  0x22   : > { %360 = vst [vmem:[%s2015_s27 + $0xd0] sm:$0xff] %v359_v26  ;;  %v363_v28 = vld [vmem:[%s2007_s26 + $0x1c0] sm:$0xff]  ;;  %v365_v29 = vld [vmem:[%s2007_s26 + $0x1d0] sm:$0xff]  ;;  %362 = vst [vmem:[%s2015_s27 + $0xd8] sm:$0xff] %v361_v27 }
  0x23   : > { %364 = vst [vmem:[%s2015_s27 + $0xe0] sm:$0xff] %v363_v28  ;;  %366 = vst [vmem:[%s2015_s27 + $0xe8] sm:$0xff] %v365_v29  ;;  %v367_v30 = vld [vmem:[%s2007_s26 + $0x1e0] sm:$0xff]  ;;  %v369_v31 = vld [vmem:[%s2007_s26 + $0x1f0] sm:$0xff] }
  0x24   : > { %v371_v32 = vld [vmem:[%s2007_s26 + $0x200] sm:$0xff]  ;;  %368 = vst [vmem:[%s2015_s27 + $0xf0] sm:$0xff] %v367_v30  ;;  %370 = vst [vmem:[%s2015_s27 + $0xf8] sm:$0xff] %v369_v31  ;;  %v373_v33 = vld [vmem:[%s2007_s26 + $0x210] sm:$0xff] }
  0x25   : > { %372 = vst [vmem:[%s2015_s27 + $0x100] sm:$0xff] %v371_v32  ;;  %v375_v34 = vld [vmem:[%s2007_s26 + $0x220] sm:$0xff]  ;;  %v377_v35 = vld [vmem:[%s2007_s26 + $0x230] sm:$0xff]  ;;  %374 = vst [vmem:[%s2015_s27 + $0x108] sm:$0xff] %v373_v33 }
  0x26   : > { %376 = vst [vmem:[%s2015_s27 + $0x110] sm:$0xff] %v375_v34  ;;  %378 = vst [vmem:[%s2015_s27 + $0x118] sm:$0xff] %v377_v35  ;;  %v379_v36 = vld [vmem:[%s2007_s26 + $0x240] sm:$0xff]  ;;  %v381_v37 = vld [vmem:[%s2007_s26 + $0x250] sm:$0xff] }
  0x27   : > { %v383_v38 = vld [vmem:[%s2007_s26 + $0x260] sm:$0xff]  ;;  %380 = vst [vmem:[%s2015_s27 + $0x120] sm:$0xff] %v379_v36  ;;  %382 = vst [vmem:[%s2015_s27 + $0x128] sm:$0xff] %v381_v37  ;;  %v385_v39 = vld [vmem:[%s2007_s26 + $0x270] sm:$0xff] }
  0x28   : > { %384 = vst [vmem:[%s2015_s27 + $0x130] sm:$0xff] %v383_v38  ;;  %v387_v40 = vld [vmem:[%s2007_s26 + $0x280] sm:$0xff]  ;;  %v389_v41 = vld [vmem:[%s2007_s26 + $0x290] sm:$0xff]  ;;  %386 = vst [vmem:[%s2015_s27 + $0x138] sm:$0xff] %v385_v39 }
  0x29   : > { %388 = vst [vmem:[%s2015_s27 + $0x140] sm:$0xff] %v387_v40  ;;  %390 = vst [vmem:[%s2015_s27 + $0x148] sm:$0xff] %v389_v41  ;;  %v391_v42 = vld [vmem:[%s2007_s26 + $0x2a0] sm:$0xff]  ;;  %v393_v43 = vld [vmem:[%s2007_s26 + $0x2b0] sm:$0xff] }
  0x2a   : > { %v395_v44 = vld [vmem:[%s2007_s26 + $0x2c0] sm:$0xff]  ;;  %392 = vst [vmem:[%s2015_s27 + $0x150] sm:$0xff] %v391_v42  ;;  %394 = vst [vmem:[%s2015_s27 + $0x158] sm:$0xff] %v393_v43  ;;  %v397_v45 = vld [vmem:[%s2007_s26 + $0x2d0] sm:$0xff] }
  0x2b   : > { %396 = vst [vmem:[%s2015_s27 + $0x160] sm:$0xff] %v395_v44  ;;  %v399_v46 = vld [vmem:[%s2007_s26 + $0x2e0] sm:$0xff]  ;;  %v401_v47 = vld [vmem:[%s2007_s26 + $0x2f0] sm:$0xff]  ;;  %398 = vst [vmem:[%s2015_s27 + $0x168] sm:$0xff] %v397_v45 }
  0x2c   : > { %400 = vst [vmem:[%s2015_s27 + $0x170] sm:$0xff] %v399_v46  ;;  %402 = vst [vmem:[%s2015_s27 + $0x178] sm:$0xff] %v401_v47  ;;  %v403_v48 = vld [vmem:[%s2007_s26 + $0x300] sm:$0xff]  ;;  %v405_v49 = vld [vmem:[%s2007_s26 + $0x310] sm:$0xff] }
  0x2d   : > { %v407_v50 = vld [vmem:[%s2007_s26 + $0x320] sm:$0xff]  ;;  %404 = vst [vmem:[%s2015_s27 + $0x180] sm:$0xff] %v403_v48  ;;  %406 = vst [vmem:[%s2015_s27 + $0x188] sm:$0xff] %v405_v49  ;;  %v409_v51 = vld [vmem:[%s2007_s26 + $0x330] sm:$0xff] }
  0x2e   : > { %408 = vst [vmem:[%s2015_s27 + $0x190] sm:$0xff] %v407_v50  ;;  %v411_v52 = vld [vmem:[%s2007_s26 + $0x340] sm:$0xff]  ;;  %v413_v53 = vld [vmem:[%s2007_s26 + $0x350] sm:$0xff]  ;;  %410 = vst [vmem:[%s2015_s27 + $0x198] sm:$0xff] %v409_v51 }
  0x2f   : > { %412 = vst [vmem:[%s2015_s27 + $0x1a0] sm:$0xff] %v411_v52  ;;  %414 = vst [vmem:[%s2015_s27 + $0x1a8] sm:$0xff] %v413_v53  ;;  %v415_v54 = vld [vmem:[%s2007_s26 + $0x360] sm:$0xff]  ;;  %v417_v55 = vld [vmem:[%s2007_s26 + $0x370] sm:$0xff] }
  0x30   : > { %v419_v56 = vld [vmem:[%s2007_s26 + $0x380] sm:$0xff]  ;;  %416 = vst [vmem:[%s2015_s27 + $0x1b0] sm:$0xff] %v415_v54  ;;  %418 = vst [vmem:[%s2015_s27 + $0x1b8] sm:$0xff] %v417_v55  ;;  %v421_v57 = vld [vmem:[%s2007_s26 + $0x390] sm:$0xff] }
  0x31   : > { %420 = vst [vmem:[%s2015_s27 + $0x1c0] sm:$0xff] %v419_v56  ;;  %v423_v58 = vld [vmem:[%s2007_s26 + $0x3a0] sm:$0xff]  ;;  %v425_v59 = vld [vmem:[%s2007_s26 + $0x3b0] sm:$0xff]  ;;  %422 = vst [vmem:[%s2015_s27 + $0x1c8] sm:$0xff] %v421_v57 }
  0x32   : > { %424 = vst [vmem:[%s2015_s27 + $0x1d0] sm:$0xff] %v423_v58  ;;  %426 = vst [vmem:[%s2015_s27 + $0x1d8] sm:$0xff] %v425_v59  ;;  %v427_v60 = vld [vmem:[%s2007_s26 + $0x3c0] sm:$0xff]  ;;  %v429_v61 = vld [vmem:[%s2007_s26 + $0x3d0] sm:$0xff] }
  0x33   : > { %v431_v62 = vld [vmem:[%s2007_s26 + $0x3e0] sm:$0xff]  ;;  %428 = vst [vmem:[%s2015_s27 + $0x1e0] sm:$0xff] %v427_v60  ;;  %430 = vst [vmem:[%s2015_s27 + $0x1e8] sm:$0xff] %v429_v61  ;;  %v433_v63 = vld [vmem:[%s2007_s26 + $0x3f0] sm:$0xff] }
  0x34   : > { %432 = vst [vmem:[%s2015_s27 + $0x1f0] sm:$0xff] %v431_v62  ;;  %v435_v0 = vld [vmem:[%s2007_s26 + $0x400] sm:$0xff]  ;;  %v437_v1 = vld [vmem:[%s2007_s26 + $0x410] sm:$0xff]  ;;  %434 = vst [vmem:[%s2015_s27 + $0x1f8] sm:$0xff] %v433_v63 }
  0x35   : > { %436 = vst [vmem:[%s2015_s27 + $0x200] sm:$0xff] %v435_v0  ;;  %438 = vst [vmem:[%s2015_s27 + $0x208] sm:$0xff] %v437_v1  ;;  %v439_v2 = vld [vmem:[%s2007_s26 + $0x420] sm:$0xff]  ;;  %v441_v3 = vld [vmem:[%s2007_s26 + $0x430] sm:$0xff] }
  0x36   : > { %v443_v4 = vld [vmem:[%s2007_s26 + $0x440] sm:$0xff]  ;;  %440 = vst [vmem:[%s2015_s27 + $0x210] sm:$0xff] %v439_v2  ;;  %442 = vst [vmem:[%s2015_s27 + $0x218] sm:$0xff] %v441_v3  ;;  %v445_v5 = vld [vmem:[%s2007_s26 + $0x450] sm:$0xff] }
  0x37   : > { %444 = vst [vmem:[%s2015_s27 + $0x220] sm:$0xff] %v443_v4  ;;  %v447_v6 = vld [vmem:[%s2007_s26 + $0x460] sm:$0xff]  ;;  %v449_v7 = vld [vmem:[%s2007_s26 + $0x470] sm:$0xff]  ;;  %446 = vst [vmem:[%s2015_s27 + $0x228] sm:$0xff] %v445_v5 }
  0x38   : > { %448 = vst [vmem:[%s2015_s27 + $0x230] sm:$0xff] %v447_v6  ;;  %450 = vst [vmem:[%s2015_s27 + $0x238] sm:$0xff] %v449_v7 }
  0x39 PF: > { %p1586_p7 = scmp.ge.s32.totalorder %s1943_s14, 1  ;;  %p455_p8 = scmp.lt.s32.totalorder %s1943_s14, 3 }
  0x3b   : > { %p456_p9 = pnand %p1586_p7, %p455_p8 }
  0x3c   : > { %s462_s28 = sand.u32 (!%p456_p9), 1, %s1935_s12   ;;  %v2161_v8 = vld [vmem:[%s2474_s1 + $0x4] ss:$8 sps:$4 sm:$0xff] (!%p456_p9)   ;;  %vm641_vm0 = vcmask (!%p456_p9), 130048   ;;  %v1945_v10 = vmov (!%p456_p9), 0   ;;  %v493_v11 = vld [vmem:[%s2475_s2 + $0x10] sm:$0xff] (!%p456_p9) }
  0x3d   : > { %459 = sbr.rel (%p456_p9) target bundleno = 385 (0x181), region = 66  ;;  %1610 = vmatprep.mubr.msk.bf16.mxu0 (!%p456_p9), %vm641_vm0, %v2161_v8  ;;  %1652 = vmatprep.mubr.msk.bf16.mxu1 (!%p456_p9), %vm641_vm0, %v2161_v8  ;;  %v491_v9 = vld [vmem:[%s2475_s2] sm:$0xff] (!%p456_p9)  ;;  %v492_v13 = vld [vmem:[%s2475_s2 + $0x8] sm:$0xff] (!%p456_p9)  ;;  %v494_v15 = vld [vmem:[%s2475_s2 + $0x18] sm:$0xff] (!%p456_p9)  ;;  %s1587_s27 = sshll.u32 (!%p456_p9), %s462_s28, 7 }
  0x3e   : > { %s1778_s4 = smul.u32 (!%p456_p9), 576, %s462_s28  ;;  %1805 = vset.pattern.permute.xlu0 (!%p456_p9), %v1945_v10  ;;  %1806 = vset.pattern.permute.xlu1 (!%p456_p9), %v1945_v10  ;;  %v2224_v52 = vld [vmem:[%s2474_s1] ss:$8 sps:$4 sm:$0xff] (!%p456_p9)   ;;  %v2233_v57 = vld [vmem:[%s2474_s1 + $0x14] ss:$8 sps:$4 sm:$0xff] (!%p456_p9)   ;;  %s2317_s12 = scalar_lea.vmem (!%p456_p9), [#allocation3], %s1587_s27 }
  0x3f   : > { %497 = vperm.xlu0 (!%p456_p9), %1805, %v491_v9   ;;  %507 = vperm.xlu1 (!%p456_p9), %1806, %v493_v11   ;;  %v2246_v62 = vld [vmem:[%s2474_s1 + $0x10] ss:$8 sps:$4 sm:$0xff] (!%p456_p9)  }
  0x40   : > { %s2175_s9 = scalar_lea.vmem (!%p456_p9), [#allocation2], %s1778_s4 }
  0x41   : > { %v1807_v12 = vld [vmem:[%s2175_s9 + $0x4] ss:$8 sps:$4 sm:$0xff] (!%p456_p9)   ;;  %v1809_v14 = vld [vmem:[%s2175_s9 + $0x94] ss:$8 sps:$4 sm:$0xff] (!%p456_p9)   ;;  %v1811_v16 = vld [vmem:[%s2175_s9] ss:$8 sps:$4 sm:$0xff] (!%p456_p9)  }
  0x42   : > { %648 = vmatprep.subr.bf16.mxu0 (!%p456_p9), %v1807_v12  ;;  %v1812_v17 = vld [vmem:[%s2175_s9 + $0x90] ss:$8 sps:$4 sm:$0xff] (!%p456_p9)   ;;  %870 = vmatprep.subr.bf16.mxu1 (!%p456_p9), %v1809_v14  ;;  %v1813_v18 = vld [vmem:[%s2175_s9 + $0x14] ss:$8 sps:$4 sm:$0xff] (!%p456_p9)   ;;  %v1815_v19 = vld [vmem:[%s2175_s9 + $0xa4] ss:$8 sps:$4 sm:$0xff] (!%p456_p9)  }
  0x43   : > { %649 = vmatpush1.bf16.msra.mxu0 (!%p456_p9), %v1811_v16  ;;  %871 = vmatpush1.bf16.msra.mxu1 (!%p456_p9), %v1812_v17  ;;  %v1817_v20 = vld [vmem:[%s2175_s9 + $0x10] ss:$8 sps:$4 sm:$0xff] (!%p456_p9)   ;;  %v1818_v21 = vld [vmem:[%s2175_s9 + $0xa0] ss:$8 sps:$4 sm:$0xff] (!%p456_p9)   ;;  %v1819_v22 = vld [vmem:[%s2175_s9 + $0x24] ss:$8 sps:$4 sm:$0xff] (!%p456_p9)  }
  0x44   : > { %650 = vmatprep.subr.bf16.mxu0 %v1813_v18  ;;  %502 = vperm.xlu0 %1805, %v492_v13   ;;  %v1821_v23 = vld [vmem:[%s2175_s9 + $0xb4] ss:$8 sps:$4 sm:$0xff]   ;;  %v1823_v24 = vld [vmem:[%s2175_s9 + $0x20] ss:$8 sps:$4 sm:$0xff]   ;;  %v1824_v25 = vld [vmem:[%s2175_s9 + $0xb0] ss:$8 sps:$4 sm:$0xff]  }
  0x45   : > { %872 = vmatprep.subr.bf16.mxu1 %v1815_v19  ;;  %512 = vperm.xlu1 %1806, %v494_v15   ;;  %v1825_v26 = vld [vmem:[%s2175_s9 + $0x34] ss:$8 sps:$4 sm:$0xff]   ;;  %v1827_v27 = vld [vmem:[%s2175_s9 + $0xc4] ss:$8 sps:$4 sm:$0xff]   ;;  %v1829_v28 = vld [vmem:[%s2175_s9 + $0x30] ss:$8 sps:$4 sm:$0xff]  }
  0x46   : > { %v1830_v29 = vld [vmem:[%s2175_s9 + $0xc0] ss:$8 sps:$4 sm:$0xff]   ;;  %v1831_v30 = vld [vmem:[%s2175_s9 + $0x44] ss:$8 sps:$4 sm:$0xff]   ;;  %v1833_v31 = vld [vmem:[%s2175_s9 + $0xd4] ss:$8 sps:$4 sm:$0xff]  }
  0x47   : > { %651 = vmatpush1.bf16.msra.mxu0 %v1817_v20  ;;  %873 = vmatpush1.bf16.msra.mxu1 %v1818_v21  ;;  %v1835_v32 = vld [vmem:[%s2175_s9 + $0x40] ss:$8 sps:$4 sm:$0xff]   ;;  %v1836_v33 = vld [vmem:[%s2175_s9 + $0xd0] ss:$8 sps:$4 sm:$0xff]   ;;  %v1837_v34 = vld [vmem:[%s2175_s9 + $0x54] ss:$8 sps:$4 sm:$0xff]  }
  0x48   : > { %652 = vmatprep.subr.bf16.mxu0 %v1819_v22  ;;  %874 = vmatprep.subr.bf16.mxu1 %v1821_v23  ;;  %v1839_v35 = vld [vmem:[%s2175_s9 + $0xe4] ss:$8 sps:$4 sm:$0xff]   ;;  %v1841_v36 = vld [vmem:[%s2175_s9 + $0x50] ss:$8 sps:$4 sm:$0xff]   ;;  %v1842_v37 = vld [vmem:[%s2175_s9 + $0xe0] ss:$8 sps:$4 sm:$0xff]  }
  0x49   : > { %v1843_v38 = vld [vmem:[%s2175_s9 + $0x64] ss:$8 sps:$4 sm:$0xff]   ;;  %v1845_v39 = vld [vmem:[%s2175_s9 + $0xf4] ss:$8 sps:$4 sm:$0xff]   ;;  %v1847_v40 = vld [vmem:[%s2175_s9 + $0x60] ss:$8 sps:$4 sm:$0xff]  }
  0x4a   : > { %v1848_v41 = vld [vmem:[%s2175_s9 + $0xf0] ss:$8 sps:$4 sm:$0xff]   ;;  %v1849_v42 = vld [vmem:[%s2175_s9 + $0x74] ss:$8 sps:$4 sm:$0xff]   ;;  %v1851_v43 = vld [vmem:[%s2175_s9 + $0x104] ss:$8 sps:$4 sm:$0xff]  }
  0x4b   : > { %653 = vmatpush1.bf16.msra.mxu0 %v1823_v24  ;;  %875 = vmatpush1.bf16.msra.mxu1 %v1824_v25  ;;  %v1853_v44 = vld [vmem:[%s2175_s9 + $0x70] ss:$8 sps:$4 sm:$0xff]   ;;  %v1854_v45 = vld [vmem:[%s2175_s9 + $0x100] ss:$8 sps:$4 sm:$0xff]   ;;  %v1855_v46 = vld [vmem:[%s2175_s9 + $0x84] ss:$8 sps:$4 sm:$0xff]  }
  0x4c   : > { %654 = vmatprep.subr.bf16.mxu0 %v1825_v26  ;;  %876 = vmatprep.subr.bf16.mxu1 %v1827_v27  ;;  %v1857_v47 = vld [vmem:[%s2175_s9 + $0x114] ss:$8 sps:$4 sm:$0xff]   ;;  %v1859_v48 = vld [vmem:[%s2175_s9 + $0x80] ss:$8 sps:$4 sm:$0xff]   ;;  %v1860_v49 = vld [vmem:[%s2175_s9 + $0x110] ss:$8 sps:$4 sm:$0xff]  }
  0x4d   : > { %v1866_v50 = vld [vmem:[%s2175_s9 + $0x124] ss:$8 sps:$4 sm:$0xff]   ;;  %v1869_v51 = vld [vmem:[%s2175_s9 + $0x1b4] ss:$8 sps:$4 sm:$0xff]   ;;  %v1864_v53 = vld [vmem:[%s2175_s9 + $0x120] ss:$8 sps:$4 sm:$0xff]  }
  0x4e   : > { %v1867_v54 = vld [vmem:[%s2175_s9 + $0x1b0] ss:$8 sps:$4 sm:$0xff]   ;;  %v1872_v55 = vld [vmem:[%s2175_s9 + $0x134] ss:$8 sps:$4 sm:$0xff]   ;;  %v1875_v56 = vld [vmem:[%s2175_s9 + $0x1c4] ss:$8 sps:$4 sm:$0xff]  }
  0x4f   : > { %655 = vmatpush1.bf16.msra.mxu0 %v1829_v28  ;;  %877 = vmatpush1.bf16.msra.mxu1 %v1830_v29  ;;  %v1870_v58 = vld [vmem:[%s2175_s9 + $0x130] ss:$8 sps:$4 sm:$0xff]   ;;  %v1873_v59 = vld [vmem:[%s2175_s9 + $0x1c0] ss:$8 sps:$4 sm:$0xff]   ;;  %v1878_v60 = vld [vmem:[%s2175_s9 + $0x144] ss:$8 sps:$4 sm:$0xff]  }
  0x50   : > { %656 = vmatprep.subr.bf16.mxu0 %v1831_v30  ;;  %878 = vmatprep.subr.bf16.mxu1 %v1833_v31  ;;  %v1881_v61 = vld [vmem:[%s2175_s9 + $0x1d4] ss:$8 sps:$4 sm:$0xff]   ;;  %v1876_v63 = vld [vmem:[%s2175_s9 + $0x140] ss:$8 sps:$4 sm:$0xff]   ;;  %v1879_v0 = vld [vmem:[%s2175_s9 + $0x1d0] ss:$8 sps:$4 sm:$0xff]  }
  0x51   : > { %v1884_v1 = vld [vmem:[%s2175_s9 + $0x154] ss:$8 sps:$4 sm:$0xff]   ;;  %v1887_v2 = vld [vmem:[%s2175_s9 + $0x1e4] ss:$8 sps:$4 sm:$0xff]   ;;  %v1882_v3 = vld [vmem:[%s2175_s9 + $0x150] ss:$8 sps:$4 sm:$0xff]  }
  0x52   : > { %v1885_v4 = vld [vmem:[%s2175_s9 + $0x1e0] ss:$8 sps:$4 sm:$0xff]   ;;  %v1890_v5 = vld [vmem:[%s2175_s9 + $0x164] ss:$8 sps:$4 sm:$0xff]   ;;  %v1893_v6 = vld [vmem:[%s2175_s9 + $0x1f4] ss:$8 sps:$4 sm:$0xff]  }
  0x53   : > { %657 = vmatpush1.bf16.msra.mxu0 %v1835_v32  ;;  %879 = vmatpush1.bf16.msra.mxu1 %v1836_v33  ;;  %v1888_v7 = vld [vmem:[%s2175_s9 + $0x160] ss:$8 sps:$4 sm:$0xff]   ;;  %v1891_v9 = vld [vmem:[%s2175_s9 + $0x1f0] ss:$8 sps:$4 sm:$0xff]   ;;  %v1896_v10 = vld [vmem:[%s2175_s9 + $0x174] ss:$8 sps:$4 sm:$0xff]  }
  0x54   : > { %658 = vmatprep.subr.bf16.mxu0 %v1837_v34  ;;  %880 = vmatprep.subr.bf16.mxu1 %v1839_v35  ;;  %v1899_v11 = vld [vmem:[%s2175_s9 + $0x204] ss:$8 sps:$4 sm:$0xff]   ;;  %v1894_v12 = vld [vmem:[%s2175_s9 + $0x170] ss:$8 sps:$4 sm:$0xff]   ;;  %v1897_v13 = vld [vmem:[%s2175_s9 + $0x200] ss:$8 sps:$4 sm:$0xff]  }
  0x55   : > { %v1908_v14 = vld [vmem:[%s2175_s9 + $0x214] ss:$8 sps:$4 sm:$0xff]   ;;  %v1903_v15 = vld [vmem:[%s2175_s9 + $0x180] ss:$8 sps:$4 sm:$0xff]   ;;  %v1906_v16 = vld [vmem:[%s2175_s9 + $0x210] ss:$8 sps:$4 sm:$0xff]  }
  0x56   : > { %v1911_v17 = vld [vmem:[%s2175_s9 + $0x194] ss:$8 sps:$4 sm:$0xff]   ;;  %v1914_v18 = vld [vmem:[%s2175_s9 + $0x224] ss:$8 sps:$4 sm:$0xff]   ;;  %v1909_v19 = vld [vmem:[%s2175_s9 + $0x190] ss:$8 sps:$4 sm:$0xff]  }
  0x57   : > { %659 = vmatpush1.bf16.msra.mxu0 %v1841_v36  ;;  %881 = vmatpush1.bf16.msra.mxu1 %v1842_v37  ;;  %v1912_v20 = vld [vmem:[%s2175_s9 + $0x220] ss:$8 sps:$4 sm:$0xff]   ;;  %v1917_v21 = vld [vmem:[%s2175_s9 + $0x1a4] ss:$8 sps:$4 sm:$0xff]   ;;  %v1920_v22 = vld [vmem:[%s2175_s9 + $0x234] ss:$8 sps:$4 sm:$0xff]  }
  0x58   : > { %660 = vmatprep.subr.bf16.mxu0 %v1843_v38  ;;  %882 = vmatprep.subr.bf16.mxu1 %v1845_v39  ;;  %v1915_v23 = vld [vmem:[%s2175_s9 + $0x1a0] ss:$8 sps:$4 sm:$0xff]   ;;  %v1918_v24 = vld [vmem:[%s2175_s9 + $0x230] ss:$8 sps:$4 sm:$0xff]   ;;  %s1776_s28 = sshll.u32 (%p1997_p5), %s1580_s15, 3 }
  0x59   : > { %s1431_s20 = scalar_lea.vmem (%p1997_p5), %s2476_s3, %s1776_s28 }
  0x5b   : > { %661 = vmatpush1.bf16.msra.mxu0 %v1847_v40  ;;  %883 = vmatpush1.bf16.msra.mxu1 %v1848_v41 }
  0x5c   : > { %662 = vmatprep.subr.bf16.mxu0 %v1849_v42  ;;  %884 = vmatprep.subr.bf16.mxu1 %v1851_v43  ;;  %v1946_v42 = vmov 0.0  }
  0x5f   : > { %663 = vmatpush1.bf16.msra.mxu0 %v1853_v44  ;;  %885 = vmatpush1.bf16.msra.mxu1 %v1854_v45 }
  0x60   : > { %664 = vmatprep.subr.bf16.mxu0 %v1855_v46  ;;  %886 = vmatprep.subr.bf16.mxu1 %v1857_v47 }
  0x63   : > { %665 = vmatpush1.bf16.msra.mxu0 %v1859_v48  ;;  %887 = vmatpush1.bf16.msra.mxu1 %v1860_v49 }
  0x64   : > { %1093 = vmatprep.subr.bf16.mxu0 %v1866_v50  ;;  %1316 = vmatprep.subr.bf16.mxu1 %v1869_v51 }
  0x66   : > { %681 = vmatmul.mubr.bf16.vlgmr.msra.gmra.mrb[0].mxu0 %v2224_v52  ;;  %903 = vmatmul.mubr.bf16.vlgmr.msra.gmra.mrb[0].mxu1 %v2224_v52 }
  0x67   : > { %1094 = vmatpush1.bf16.msra.mxu0 %v1864_v53  ;;  %1317 = vmatpush1.bf16.msra.mxu1 %v1867_v54 }
  0x68   : > { %1095 = vmatprep.subr.bf16.mxu0 %v1872_v55  ;;  %1318 = vmatprep.subr.bf16.mxu1 %v1875_v56 }
  0x69   : > { %1611 = vmatprep.mubr.msk.bf16.mxu0 %vm641_vm0, %v2233_v57  ;;  %1653 = vmatprep.mubr.msk.bf16.mxu1 %vm641_vm0, %v2233_v57 }
  0x6b   : > { %1096 = vmatpush1.bf16.msra.mxu0 %v1870_v58  ;;  %1319 = vmatpush1.bf16.msra.mxu1 %v1873_v59 }
  0x6c   : > { %1097 = vmatprep.subr.bf16.mxu0 %v1878_v60  ;;  %1320 = vmatprep.subr.bf16.mxu1 %v1881_v61 }
  0x6e   : > { %691 = vmatmul.mubr.bf16.gmra.mrb[4].mxu0 %v2246_v62  ;;  %913 = vmatmul.mubr.bf16.gmra.mrb[4].mxu1 %v2246_v62 }
  0x6f   : > { %1098 = vmatpush1.bf16.msra.mxu0 %v1876_v63  ;;  %1321 = vmatpush1.bf16.msra.mxu1 %v1879_v0 }
  0x70   : > { %1099 = vmatprep.subr.bf16.mxu0 %v1884_v1  ;;  %1322 = vmatprep.subr.bf16.mxu1 %v1887_v2 }
  0x71   : > { %1698 = vmatprep.mubr.msk.bf16.mxu0 %vm641_vm0, %v2161_v8  ;;  %1744 = vmatprep.mubr.msk.bf16.mxu1 %vm641_vm0, %v2161_v8  ;;  %v1905_v8 = vld [vmem:[%s2175_s9 + $0x184] ss:$8 sps:$4 sm:$0xff]  }
  0x73   : > { %1100 = vmatpush1.bf16.msra.mxu0 %v1882_v3  ;;  %1323 = vmatpush1.bf16.msra.mxu1 %v1885_v4 }
  0x74   : > { %1101 = vmatprep.subr.bf16.mxu0 %v1890_v5  ;;  %1324 = vmatprep.subr.bf16.mxu1 %v1893_v6 }
  0x77   : > { %1102 = vmatpush1.bf16.msra.mxu0 %v1888_v7  ;;  %1325 = vmatpush1.bf16.msra.mxu1 %v1891_v9 }
  0x78   : > { %1103 = vmatprep.subr.bf16.mxu0 %v1896_v10  ;;  %1326 = vmatprep.subr.bf16.mxu1 %v1899_v11 }
  0x7b   : > { %1104 = vmatpush1.bf16.msra.mxu0 %v1894_v12  ;;  %1327 = vmatpush1.bf16.msra.mxu1 %v1897_v13 }
  0x7c   : > { %1105 = vmatprep.subr.bf16.mxu0 %v1905_v8  ;;  %1328 = vmatprep.subr.bf16.mxu1 %v1908_v14 }
  0x7f   : > { %1106 = vmatpush1.bf16.msra.mxu0 %v1903_v15  ;;  %1329 = vmatpush1.bf16.msra.mxu1 %v1906_v16 }
  0x80   : > { %1107 = vmatprep.subr.bf16.mxu0 %v1911_v17  ;;  %1330 = vmatprep.subr.bf16.mxu1 %v1914_v18 }
  0x83   : > { %1108 = vmatpush1.bf16.msra.mxu0 %v1909_v19  ;;  %1331 = vmatpush1.bf16.msra.mxu1 %v1912_v20 }
  0x84   : > { %1109 = vmatprep.subr.bf16.mxu0 %v1917_v21  ;;  %1332 = vmatprep.subr.bf16.mxu1 %v1920_v22 }
  0x87   : > { %1110 = vmatpush1.bf16.msra.mxu0 %v1915_v23  ;;  %1333 = vmatpush1.bf16.msra.mxu1 %v1918_v24 }
  0x8a   : > { %1126 = vmatmul.mubr.bf16.vlgmr.msra.gmra.mrb[8].mxu0 %v2224_v52  ;;  %1349 = vmatmul.mubr.bf16.vlgmr.msra.gmra.mrb[8].mxu1 %v2224_v52 }
  0x8b   : > { %1699 = vmatprep.mubr.msk.bf16.mxu0 %vm641_vm0, %v2233_v57  ;;  %1745 = vmatprep.mubr.msk.bf16.mxu1 %vm641_vm0, %v2233_v57 }
  0x92   : > { %1136 = vmatmul.mubr.bf16.gmra.mrb[12].mxu0 %v2246_v62  ;;  %1359 = vmatmul.mubr.bf16.gmra.mrb[12].mxu1 %v2246_v62 }
  0xbe   : > { %v2290_v25 = vpop.permute.xlu0 %497  ;;  %v2294_v27 = vpop.permute.xlu1 %507 }
  0xc3   : > { %v2292_v26 = vpop.permute.xlu0 %502 }
  0xc4   : > { %v2315_v56 = vpop.permute.xlu1 %512 }
 0x139   : > { %v682_v28 = vpop.f32.mrb[0].mxu0  ;;  %v904_v29 = vpop.f32.mrb[0].mxu1 }
 0x13a   : > { %v683_v30 = vadd.f32 %v682_v28, %v2290_v25  ;;  %v684_v31 = vpop.f32.mrb[1].mxu0  ;;  %v905_v32 = vadd.f32 %v904_v29, %v2290_v25  ;;  %v906_v33 = vpop.f32.mrb[1].mxu1 }
 0x13b   : > { %v685_v34 = vadd.f32 %v684_v31, %v2290_v25  ;;  %v686_v35 = vpop.f32.mrb[2].mxu0  ;;  %v908_v36 = vpop.f32.mrb[2].mxu1  ;;  %v907_v39 = vadd.f32 %v906_v33, %v2290_v25 }
 0x13c   : > { %vm709_vm1 = vcmp.ge.f32.partialorder %v683_v30, 1.0  ;;  %v687_v37 = vadd.f32 %v686_v35, %v2292_v26  ;;  %v688_v38 = vpop.f32.mrb[3].mxu0  ;;  %v909_v40 = vadd.f32 %v908_v36, %v2292_v26  ;;  %v910_v41 = vpop.f32.mrb[3].mxu1 }
 0x13d   : > { %v717_v43 = vsel %vm709_vm1, 1.0, %v1946_v42  ;;  %v753_v44 = vsel %vm709_vm1, 0.0, %v683_v30  ;;  %vm710_vm2 = vcmp.ge.f32.partialorder %v685_v34, 1.0  ;;  %v689_v45 = vadd.f32 %v688_v38, %v2292_v26 }
 0x13e   : > { %v718_v46 = vsel %vm710_vm2, 1.0, %v1946_v42  ;;  %v754_v47 = vsel %vm710_vm2, 0.0, %v685_v34  ;;  %vm711_vm3 = vcmp.ge.f32.partialorder %v687_v37, 1.0  ;;  %v2307_v48 = vadd.f32 %v905_v32, %v753_v44 }
 0x13f   : > { %v1760_v49 = vpack.c.bf16 %v718_v46, %v717_v43  ;;  %v719_v50 = vsel %vm711_vm3, 1.0, %v1946_v42  ;;  %v755_v51 = vsel %vm711_vm3, 0.0, %v687_v37  ;;  %vm712_vm4 = vcmp.ge.f32.partialorder %v689_v45, 1.0 }
 0x140   : > { %v720_v52 = vsel %vm712_vm4, 1.0, %v1946_v42  ;;  %v756_v53 = vsel %vm712_vm4, 0.0, %v689_v45  ;;  %v2311_v54 = vadd.f32 %v907_v39, %v754_v47  ;;  %v2313_v55 = vadd.f32 %v909_v40, %v755_v51 }
 0x141   : > { %749 = vst [vmem:[%s2317_s12] sm:$0xff] %v1760_v49  ;;  %v1761_v57 = vpack.c.bf16 %v720_v52, %v719_v50  ;;  %v911_v58 = vadd.f32 %v910_v41, %v2292_v26  ;;  %v692_v59 = vpop.f32.mrb[4].mxu0  ;;  %v914_v60 = vpop.f32.mrb[4].mxu1  ;;  %vm931_vm5 = vcmp.ge.f32.partialorder %v2307_v48, 1.0 }
 0x142   : > { %v693_v61 = vadd.f32 %v692_v59, %v2294_v27  ;;  %v694_v62 = vpop.f32.mrb[5].mxu0  ;;  %v915_v63 = vadd.f32 %v914_v60, %v2294_v27  ;;  %v916_v0 = vpop.f32.mrb[5].mxu1  ;;  %v939_v1 = vsel %vm931_vm5, 1.0, %v1946_v42  ;;  %vm932_vm6 = vcmp.ge.f32.partialorder %v2311_v54, 1.0 }
 0x143   : > { %750 = vst [vmem:[%s2317_s12 + $0x8] sm:$0xff] %v1761_v57  ;;  %v2328_v2 = vadd.f32 %v911_v58, %v756_v53  ;;  %v695_v3 = vadd.f32 %v694_v62, %v2294_v27  ;;  %v696_v4 = vpop.f32.mrb[6].mxu0  ;;  %v917_v5 = vadd.f32 %v916_v0, %v2294_v27  ;;  %v918_v6 = vpop.f32.mrb[6].mxu1  ;;  %v940_v12 = vsel %vm932_vm6, 1.0, %v1946_v42 }
 0x144   : > { %vm713_vm7 = vcmp.ge.f32.partialorder %v693_v61, 1.0  ;;  %v697_v7 = vadd.f32 %v696_v4, %v2315_v56  ;;  %v698_v9 = vpop.f32.mrb[7].mxu0  ;;  %v919_v10 = vadd.f32 %v918_v6, %v2315_v56  ;;  %v920_v11 = vpop.f32.mrb[7].mxu1  ;;  %v1764_v30 = vpack.c.bf16 %v940_v12, %v939_v1 }
 0x145   : > { %v721_v13 = vsel %vm713_vm7, 1.0, %v1946_v42  ;;  %v757_v8 = vsel %vm713_vm7, 0.0, %v693_v61  ;;  %vm714_vm8 = vcmp.ge.f32.partialorder %v695_v3, 1.0  ;;  %v699_v14 = vadd.f32 %v698_v9, %v2315_v56 }
 0x146   : > { %v722_v15 = vsel %vm714_vm8, 1.0, %v1946_v42  ;;  %v758_v16 = vsel %vm714_vm8, 0.0, %v695_v3  ;;  %v927_v17 = vadd.f32 %v915_v63, %v757_v8  ;;  %vm715_vm9 = vcmp.ge.f32.partialorder %v697_v7, 1.0  ;;  %1658 = vst [vmem:[%s2317_s12 + $0x20] sm:$0xff] %v1764_v30 }
 0x147   : > { %v1762_v18 = vpack.c.bf16 %v722_v15, %v721_v13  ;;  %vm716_vm10 = vcmp.ge.f32.partialorder %v699_v14, 1.0  ;;  %v723_v19 = vsel %vm715_vm9, 1.0, %v1946_v42  ;;  %v2342_v20 = vadd.f32 %v917_v5, %v758_v16 }
 0x148   : > { %v724_v21 = vsel %vm716_vm10, 1.0, %v1946_v42  ;;  %v760_v22 = vsel %vm716_vm10, 0.0, %v699_v14  ;;  %v759_v23 = vsel %vm715_vm9, 0.0, %v697_v7  ;;  %v921_v24 = vadd.f32 %v920_v11, %v2315_v56 }
 0x149   : > { %751 = vst [vmem:[%s2317_s12 + $0x10] sm:$0xff] %v1762_v18  ;;  %v1763_v28 = vpack.c.bf16 %v724_v21, %v723_v19  ;;  %v2347_v29 = vadd.f32 %v919_v10, %v759_v23  ;;  %vm933_vm11 = vcmp.ge.f32.partialorder %v2313_v55, 1.0  ;;  %vm934_vm12 = vcmp.ge.f32.partialorder %v2328_v2, 1.0 }
 0x14a   : > { %v2349_v31 = vadd.f32 %v921_v24, %v760_v22  ;;  %vm935_vm13 = vcmp.ge.f32.partialorder %v927_v17, 1.0  ;;  %v941_v32 = vsel %vm933_vm11, 1.0, %v1946_v42  ;;  %v942_v33 = vsel %vm934_vm12, 1.0, %v1946_v42 }
 0x14b   : > { %752 = vst [vmem:[%s2317_s12 + $0x18] sm:$0xff] %v1763_v28  ;;  %v1765_v34 = vpack.c.bf16 %v942_v33, %v941_v32  ;;  %v943_v35 = vsel %vm935_vm13, 1.0, %v1946_v42  ;;  %vm936_vm14 = vcmp.ge.f32.partialorder %v2342_v20, 1.0  ;;  %vm937_vm15 = vcmp.ge.f32.partialorder %v2347_v29, 1.0 }
 0x14c   : > { %v944_v36 = vsel %vm936_vm14, 1.0, %v1946_v42  ;;  %vm938_vm0 = vcmp.ge.f32.partialorder %v2349_v31, 1.0  ;;  %v945_v38 = vsel %vm937_vm15, 1.0, %v1946_v42  ;;  %v976_v47 = vsel %vm931_vm5, 0.0, %v2307_v48 }
 0x14d   : > { %1659 = vst [vmem:[%s2317_s12 + $0x28] sm:$0xff] %v1765_v34  ;;  %v1766_v37 = vpack.c.bf16 %v944_v36, %v943_v35  ;;  %v946_v39 = vsel %vm938_vm0, 1.0, %v1946_v42  ;;  %v977_v49 = vsel %vm932_vm6, 0.0, %v2311_v54  ;;  %v978_v51 = vsel %vm933_vm11, 0.0, %v2313_v55 }
 0x14e   : > { %v1767_v40 = vpack.c.bf16 %v946_v39, %v945_v38  ;;  %v979_v59 = vsel %vm934_vm12, 0.0, %v2328_v2  ;;  %v980_v61 = vsel %vm935_vm13, 0.0, %v927_v17  ;;  %v981_v36 = vsel %vm936_vm14, 0.0, %v2342_v20 }
 0x14f   : > { %1660 = vst [vmem:[%s2317_s12 + $0x30] sm:$0xff] %v1766_v37  ;;  %v982_v38 = vsel %vm937_vm15, 0.0, %v2347_v29 }
 0x150   : > { %1661 = vst [vmem:[%s2317_s12 + $0x38] sm:$0xff] %v1767_v40 }
 0x15d   : > { %v1127_v41 = vpop.f32.mrb[8].mxu0  ;;  %v1350_v43 = vpop.f32.mrb[8].mxu1 }
 0x15e   : > { %v1128_v44 = vadd.f32 %v1127_v41, %v2290_v25  ;;  %v1129_v45 = vpop.f32.mrb[9].mxu0  ;;  %v1352_v46 = vpop.f32.mrb[9].mxu1  ;;  %v1351_v54 = vadd.f32 %v1350_v43, %v2290_v25 }
 0x15f   : > { %v1130_v50 = vadd.f32 %v1129_v45, %v2290_v25  ;;  %v1131_v52 = vpop.f32.mrb[10].mxu0  ;;  %v1354_v53 = vpop.f32.mrb[10].mxu1  ;;  %v1353_v63 = vadd.f32 %v1352_v46, %v2290_v25  ;;  %v983_v46 = vsel %vm938_vm0, 0.0, %v2349_v31 }
 0x160   : > { %v1146_v57 = vadd.f32 %v1128_v44, %v976_v47  ;;  %v1132_v58 = vadd.f32 %v1131_v52, %v2292_v26  ;;  %v1133_v48 = vpop.f32.mrb[11].mxu0  ;;  %v1356_v60 = vpop.f32.mrb[11].mxu1  ;;  %v1355_v1 = vadd.f32 %v1354_v53, %v2292_v26 }
 0x161   : > { %v1147_v62 = vadd.f32 %v1130_v50, %v977_v49  ;;  %v1134_v55 = vadd.f32 %v1133_v48, %v2292_v26  ;;  %v1357_v3 = vadd.f32 %v1356_v60, %v2292_v26 }
 0x162   : > { %vm1154_vm1 = vcmp.ge.f32.partialorder %v1146_v57, 1.0  ;;  %v1148_v0 = vadd.f32 %v1132_v58, %v978_v51 }
 0x163   : > { %v1162_v4 = vsel %vm1154_vm1, 1.0, %v1946_v42  ;;  %v1199_v2 = vsel %vm1154_vm1, 0.0, %v1146_v57  ;;  %vm1155_vm2 = vcmp.ge.f32.partialorder %v1147_v62, 1.0  ;;  %v1149_v5 = vadd.f32 %v1134_v55, %v979_v59 }
 0x164   : > { %v1369_v6 = vadd.f32 %v1351_v54, %v1199_v2  ;;  %v1163_v7 = vsel %vm1155_vm2, 1.0, %v1946_v42  ;;  %v1200_v9 = vsel %vm1155_vm2, 0.0, %v1147_v62  ;;  %vm1156_vm3 = vcmp.ge.f32.partialorder %v1148_v0, 1.0  ;;  %v1489_v2 = vld [vmem:[%s2317_s12] sm:$0xff] (%p1997_p5) }
 0x165   : > { %v1768_v25 = vpack.c.bf16 %v1163_v7, %v1162_v4  ;;  %v1370_v10 = vadd.f32 %v1353_v63, %v1200_v9  ;;  %v1164_v11 = vsel %vm1156_vm3, 1.0, %v1946_v42  ;;  %v1201_v12 = vsel %vm1156_vm3, 0.0, %v1148_v0  ;;  %v1137_v13 = vpop.f32.mrb[12].mxu0  ;;  %v1360_v8 = vpop.f32.mrb[12].mxu1  ;;  %v1497_v7 = vld [vmem:[%s2317_s12 + $0x20] sm:$0xff] (%p1997_p5)  ;;  %v1499_v9 = vld [vmem:[%s2317_s12 + $0x28] sm:$0xff] (%p1997_p5)  ;;  %1490 = vst [vmem:[%s1431_s20] sm:$0xff] (%p1997_p5), %v1489_v2 }
 0x166   : > { %vm1377_vm4 = vcmp.ge.f32.partialorder %v1369_v6, 1.0  ;;  %v1371_v26 = vadd.f32 %v1355_v1, %v1201_v12  ;;  %vm1157_vm5 = vcmp.ge.f32.partialorder %v1149_v5, 1.0  ;;  %v1138_v14 = vadd.f32 %v1137_v13, %v2294_v27  ;;  %v1139_v15 = vpop.f32.mrb[13].mxu0  ;;  %v1362_v16 = vpop.f32.mrb[13].mxu1  ;;  %v1495_v6 = vld [vmem:[%s2317_s12 + $0x18] sm:$0xff] (%p1997_p5)  ;;  %1498 = vst [vmem:[%s1431_s20 + $0x40] sm:$0xff] (%p1997_p5), %v1497_v7 }
 0x167   : > { %v1385_v17 = vsel %vm1377_vm4, 1.0, %v1946_v42  ;;  %1704 = vst [vmem:[%s2317_s12 + $0x40] sm:$0xff] %v1768_v25  ;;  %vm1378_vm6 = vcmp.ge.f32.partialorder %v1370_v10, 1.0  ;;  %v1165_v18 = vsel %vm1157_vm5, 1.0, %v1946_v42  ;;  %v1202_v19 = vsel %vm1157_vm5, 0.0, %v1149_v5  ;;  %v1141_v21 = vpop.f32.mrb[14].mxu0 }
 0x168   : > { %v1364_v22 = vpop.f32.mrb[14].mxu1  ;;  %v1386_v23 = vsel %vm1378_vm6, 1.0, %v1946_v42  ;;  %vm1379_vm7 = vcmp.ge.f32.partialorder %v1371_v26, 1.0  ;;  %v1769_v24 = vpack.c.bf16 %v1165_v18, %v1164_v11  ;;  %v1372_v28 = vadd.f32 %v1357_v3, %v1202_v19  ;;  %v1143_v30 = vpop.f32.mrb[15].mxu0  ;;  %v1491_v5 = vld [vmem:[%s2317_s12 + $0x8] sm:$0xff] (%p1997_p5)  ;;  %1496 = vst [vmem:[%s1431_s20 + $0x30] sm:$0xff] (%p1997_p5), %v1495_v6 }
 0x169   : > { %v1366_v32 = vpop.f32.mrb[15].mxu1  ;;  %v1772_v33 = vpack.c.bf16 %v1386_v23, %v1385_v17  ;;  %v1387_v34 = vsel %vm1379_vm7, 1.0, %v1946_v42  ;;  %v1150_v35 = vadd.f32 %v1138_v14, %v980_v61  ;;  %v1140_v37 = vadd.f32 %v1139_v15, %v2294_v27  ;;  %1492 = vst [vmem:[%s1431_s20 + $0x10] sm:$0xff] (%p1997_p5), %v1491_v5  ;;  %1500 = vst [vmem:[%s1431_s20 + $0x50] sm:$0xff] (%p1997_p5), %v1499_v9  ;;  %v1501_v25 = vld [vmem:[%s2317_s12 + $0x30] sm:$0xff] (%p1997_p5)  ;;  %v1503_v10 = vld [vmem:[%s2317_s12 + $0x38] sm:$0xff] (%p1997_p5) }
 0x16a   : > { %1705 = vst [vmem:[%s2317_s12 + $0x48] sm:$0xff] %v1769_v24  ;;  %vm1380_vm8 = vcmp.ge.f32.partialorder %v1372_v28, 1.0  ;;  %v1142_v39 = vadd.f32 %v1141_v21, %v2315_v56  ;;  %v1361_v41 = vadd.f32 %v1360_v8, %v2294_v27  ;;  %v1144_v43 = vadd.f32 %v1143_v30, %v2315_v56  ;;  %1502 = vst [vmem:[%s1431_s20 + $0x60] sm:$0xff] (%p1997_p5), %v1501_v25 }
 0x16b   : > { %1750 = vst [vmem:[%s2317_s12 + $0x60] sm:$0xff] %v1772_v33  ;;  %v1388_v40 = vsel %vm1380_vm8, 1.0, %v1946_v42  ;;  %vm1158_vm9 = vcmp.ge.f32.partialorder %v1150_v35, 1.0  ;;  %v1151_v45 = vadd.f32 %v1140_v37, %v981_v36  ;;  %v1363_v51 = vadd.f32 %v1362_v16, %v2294_v27  ;;  %1504 = vst [vmem:[%s1431_s20 + $0x70] sm:$0xff] (%p1997_p5), %v1503_v10 }
 0x16c   : > { %v1773_v20 = vpack.c.bf16 %v1388_v40, %v1387_v34  ;;  %v1203_v44 = vsel %vm1158_vm9, 0.0, %v1150_v35  ;;  %v1166_v47 = vsel %vm1158_vm9, 1.0, %v1946_v42  ;;  %v1152_v49 = vadd.f32 %v1142_v39, %v982_v38 }
 0x16d   : > { %v1373_v29 = vadd.f32 %v1361_v41, %v1203_v44  ;;  %v1153_v50 = vadd.f32 %v1144_v43, %v983_v46  ;;  %vm1159_vm10 = vcmp.ge.f32.partialorder %v1151_v45, 1.0  ;;  %v1365_v31 = vadd.f32 %v1364_v22, %v2315_v56 }
 0x16e   : > { %1751 = vst [vmem:[%s2317_s12 + $0x68] sm:$0xff] %v1773_v20  ;;  %v1167_v52 = vsel %vm1159_vm10, 1.0, %v1946_v42  ;;  %v1204_v53 = vsel %vm1159_vm10, 0.0, %v1151_v45  ;;  %vm1160_vm12 = vcmp.ge.f32.partialorder %v1152_v49, 1.0  ;;  %v1367_v61 = vadd.f32 %v1366_v32, %v2315_v56  ;;  %v1505_v11 = vld [vmem:[%s2317_s12 + $0x40] sm:$0xff] (%p1997_p5) }
 0x16f   : > { %vm1381_vm11 = vcmp.ge.f32.partialorder %v1373_v29, 1.0  ;;  %v1770_v57 = vpack.c.bf16 %v1167_v52, %v1166_v47  ;;  %v1374_v58 = vadd.f32 %v1363_v51, %v1204_v53  ;;  %v1168_v59 = vsel %vm1160_vm12, 1.0, %v1946_v42  ;;  %1506 = vst [vmem:[%s1431_s20 + $0x80] sm:$0xff] (%p1997_p5), %v1505_v11 }
 0x170   : > { %v1389_v48 = vsel %vm1381_vm11, 1.0, %v1946_v42  ;;  %v1205_v60 = vsel %vm1160_vm12, 0.0, %v1152_v49  ;;  %vm1161_vm13 = vcmp.ge.f32.partialorder %v1153_v50, 1.0 }
 0x171   : > { %1706 = vst [vmem:[%s2317_s12 + $0x50] sm:$0xff] %v1770_v57  ;;  %vm1382_vm14 = vcmp.ge.f32.partialorder %v1374_v58, 1.0  ;;  %v1375_v27 = vadd.f32 %v1365_v31, %v1205_v60  ;;  %v1169_v54 = vsel %vm1161_vm13, 1.0, %v1946_v42  ;;  %v1206_v62 = vsel %vm1161_vm13, 0.0, %v1153_v50  ;;  %v1507_v12 = vld [vmem:[%s2317_s12 + $0x48] sm:$0xff] (%p1997_p5) }
 0x172   : > { %v1390_v63 = vsel %vm1382_vm14, 1.0, %v1946_v42  ;;  %v1771_v55 = vpack.c.bf16 %v1169_v54, %v1168_v59  ;;  %v1376_v0 = vadd.f32 %v1367_v61, %v1206_v62  ;;  %1428 = sbr.rel (!%p1997_p5) target bundleno = 385 (0x181), region = 74  ;;  %1508 = vst [vmem:[%s1431_s20 + $0x90] sm:$0xff] (%p1997_p5), %v1507_v12  ;;  %v1513_v26 = vld [vmem:[%s2317_s12 + $0x60] sm:$0xff] (%p1997_p5) }
 0x173   : > { %v1774_v1 = vpack.c.bf16 %v1390_v63, %v1389_v48  ;;  %vm1383_vm15 = vcmp.ge.f32.partialorder %v1375_v27, 1.0  ;;  %1514 = vst [vmem:[%s1431_s20 + $0xc0] sm:$0xff] (%p1997_p5), %v1513_v26 }
 0x174   : > { %v1391_v3 = vsel %vm1383_vm15, 1.0, %v1946_v42  ;;  %1707 = vst [vmem:[%s2317_s12 + $0x58] sm:$0xff] %v1771_v55  ;;  %vm1384_vm0 = vcmp.ge.f32.partialorder %v1376_v0, 1.0 }
 0x175   : > { %1752 = vst [vmem:[%s2317_s12 + $0x70] sm:$0xff] %v1774_v1  ;;  %v1392_v56 = vsel %vm1384_vm0, 1.0, %v1946_v42  ;;  %v1493_v42 = vld [vmem:[%s2317_s12 + $0x10] sm:$0xff] (%p1997_p5)  ;;  %v1515_v14 = vld [vmem:[%s2317_s12 + $0x68] sm:$0xff] (%p1997_p5) }
 0x176   : > { %v1775_v4 = vpack.c.bf16 %v1392_v56, %v1391_v3  ;;  %1494 = vst [vmem:[%s1431_s20 + $0x20] sm:$0xff] (%p1997_p5), %v1493_v42  ;;  %1516 = vst [vmem:[%s1431_s20 + $0xd0] sm:$0xff] (%p1997_p5), %v1515_v14 }
 0x178   : > { %1753 = vst [vmem:[%s2317_s12 + $0x78] sm:$0xff] %v1775_v4  ;;  %v1509_v13 = vld [vmem:[%s2317_s12 + $0x50] sm:$0xff] (%p1997_p5) }
 0x179   : > { %1510 = vst [vmem:[%s1431_s20 + $0xa0] sm:$0xff] %v1509_v13 }
 0x17b   : > { %v1511_v8 = vld [vmem:[%s2317_s12 + $0x58] sm:$0xff] }
 0x17c   : > { %1512 = vst [vmem:[%s1431_s20 + $0xb0] sm:$0xff] %v1511_v8  ;;  %v1517_v15 = vld [vmem:[%s2317_s12 + $0x70] sm:$0xff] }
 0x17d   : > { %1518 = vst [vmem:[%s1431_s20 + $0xe0] sm:$0xff] %v1517_v15 }
 0x17f   : > { %v1519_v16 = vld [vmem:[%s2317_s12 + $0x78] sm:$0xff] }
 0x180   : > { %1520 = vst [vmem:[%s1431_s20 + $0xf0] sm:$0xff] %v1519_v16 }
 0x181 PF: > { %p10_p10 = scmp.ge.s32.totalorder %s1984_s16, 4   ;;  %s2478_s12 = smov %s1939_s13 }
 0x182   : > { %s2479_s13 = smov %s1995_s19  ;;  %s2480_s14 = smov %s1984_s16 }
 0x183   :  { %12 = sbr.rel (!%p10_p10) target bundleno = 2 (0x2), region = 149 }

// kernel: dvs_event_net_forward.9
= control target key start
LH: loop header
LB: loop body
LE: loop exit
PB: predicated region body
PF: predicated region fallthrough
CT: control target
= control target key end

     0   :  { %v1715_v1 = vmov 0   ;;  %vm221_vm0 = vcmask 261120   ;;  %s2115_s0 = inlined_call_operand.vmem [shape: bf16[4,288,128], index: 0, kind: input, shape index: {}]   ;;  %s2116_s1 = inlined_call_operand.vmem [shape: bf16[32,288], index: 1, kind: input, shape index: {}]   ;;  %s2117_s2 = inlined_call_operand.vmem [shape: f32[32,1], index: 2, kind: input, shape index: {}]   ;;  %s2118_s3 = inlined_call_operand.vmem [shape: bf16[4,32,128], index: 3, kind: output, shape index: {}]  }
   0x1   :  { %v1635_v0 = vld [vmem:[%s2115_s0 + $0x40] sm:$0xff]   ;;  %1633 = vset.pattern.permute.xlu0 %v1715_v1  ;;  %1634 = vset.pattern.permute.xlu1 %v1715_v1  ;;  %v1638_v4 = vld [vmem:[%s2115_s0 + $0x48] sm:$0xff]   ;;  %v1641_v7 = vld [vmem:[%s2115_s0 + $0x50] sm:$0xff]  }
   0x2   :  { %v1636_v2 = vld [vmem:[%s2115_s0 + $0x80] sm:$0xff]   ;;  %1471 = vmatprep.subr.bf16.mxu0 %v1635_v0  ;;  %v1639_v5 = vld [vmem:[%s2115_s0 + $0x88] sm:$0xff]   ;;  %v1643_v9 = vld [vmem:[%s2115_s0 + $0xd0] sm:$0xff]  }
   0x3   :  { %v1637_v3 = vld [vmem:[%s2115_s0] sm:$0xff]   ;;  %1599 = vmatprep.subr.bf16.mxu1 %v1636_v2  ;;  %v1640_v6 = vld [vmem:[%s2115_s0 + $0x8] sm:$0xff]   ;;  %v1644_v10 = vld [vmem:[%s2115_s0 + $0x10] sm:$0xff]  }
   0x4   :  { %1472 = vmatpush3.bf16.msra.mxu0 %v1637_v3  ;;  %1600 = vmatpush3.bf16.msra.mxu1 %v1636_v2  ;;  %v1761_v8 = vld [vmem:[%s2116_s1 + $0x8] ss:$12 sps:$4 sm:$0xff]   ;;  %v1774_v11 = vld [vmem:[%s2116_s1 + $0x20] ss:$12 sps:$4 sm:$0xff]   ;;  %v1647_v13 = vld [vmem:[%s2115_s0 + $0x58] sm:$0xff]  }
   0x5   :  { %1473 = vmatprep.subr.bf16.mxu0 %v1638_v4  ;;  %1601 = vmatprep.subr.bf16.mxu1 %v1639_v5  ;;  %v1646_v12 = vld [vmem:[%s2115_s0 + $0x90] sm:$0xff]   ;;  %v1648_v14 = vld [vmem:[%s2115_s0 + $0xd8] sm:$0xff]   ;;  %v1651_v17 = vld [vmem:[%s2115_s0 + $0x60] sm:$0xff]  }
   0x6   :  { %1603 = vmatprep.mubr.msk.bf16.mxu1 %vm221_vm0, %v1761_v8  ;;  %v1649_v15 = vld [vmem:[%s2115_s0 + $0x18] sm:$0xff]   ;;  %v1652_v18 = vld [vmem:[%s2115_s0 + $0xe0] sm:$0xff]   ;;  %v1655_v21 = vld [vmem:[%s2115_s0 + $0x68] sm:$0xff]  }
   0x7   :  { %v1650_v16 = vld [vmem:[%s2115_s0 + $0x98] sm:$0xff]   ;;  %v1653_v19 = vld [vmem:[%s2115_s0 + $0x20] sm:$0xff]   ;;  %v1656_v22 = vld [vmem:[%s2115_s0 + $0xe8] sm:$0xff]  }
   0x8   :  { %1474 = vmatpush3.bf16.msra.mxu0 %v1640_v6  ;;  %1602 = vmatpush3.bf16.msra.mxu1 %v1639_v5  ;;  %v1654_v20 = vld [vmem:[%s2115_s0 + $0xa0] sm:$0xff]   ;;  %v1657_v23 = vld [vmem:[%s2115_s0 + $0x28] sm:$0xff]   ;;  %v1659_v25 = vld [vmem:[%s2115_s0 + $0x70] sm:$0xff]  }
   0x9   :  { %1475 = vmatprep.subr.bf16.mxu0 %v1641_v7  ;;  %1503 = vmatprep.subr.bf16.mxu1 %v1643_v9  ;;  %v1658_v24 = vld [vmem:[%s2115_s0 + $0xa8] sm:$0xff]   ;;  %v1660_v26 = vld [vmem:[%s2115_s0 + $0xf0] sm:$0xff]   ;;  %v1663_v29 = vld [vmem:[%s2115_s0 + $0x78] sm:$0xff]  }
   0xa   :  { %v1661_v27 = vld [vmem:[%s2115_s0 + $0x30] sm:$0xff]   ;;  %v1664_v30 = vld [vmem:[%s2115_s0 + $0xf8] sm:$0xff]   ;;  %v1849_v34 = vld [vmem:[%s2116_s1] ss:$12 sps:$4 sm:$0xff]  }
   0xb   :  { %1604 = vmatmul.mubr.msk.bf16.vlgmr.msra.gmra.mrb[0].mxu1 %vm221_vm0, %v1774_v11  ;;  %v1662_v28 = vld [vmem:[%s2115_s0 + $0xb0] sm:$0xff]   ;;  %v1665_v31 = vld [vmem:[%s2115_s0 + $0x38] sm:$0xff]   ;;  %v1670_v35 = vld [vmem:[%s2115_s0 + $0x100] sm:$0xff]  }
   0xc   :  { %1476 = vmatpush3.bf16.msra.mxu0 %v1644_v10  ;;  %1504 = vmatpush3.bf16.msra.mxu1 %v1646_v12  ;;  %v1666_v32 = vld [vmem:[%s2115_s0 + $0xb8] sm:$0xff]   ;;  %v1844_v33 = vld [vmem:[%s2116_s1 + $0x4] ss:$12 sps:$4 sm:$0xff]   ;;  %v1673_v38 = vld [vmem:[%s2115_s0 + $0x108] sm:$0xff]  }
   0xd   :  { %1477 = vmatprep.subr.bf16.mxu0 %v1647_v13  ;;  %1505 = vmatprep.subr.bf16.mxu1 %v1648_v14  ;;  %v1671_v36 = vld [vmem:[%s2115_s0 + $0x110] sm:$0xff]   ;;  %v1672_v37 = vld [vmem:[%s2115_s0 + $0xc0] sm:$0xff]   ;;  %v1674_v39 = vld [vmem:[%s2115_s0 + $0xc8] sm:$0xff]  }
   0xe   :  { %260 = vmatprep.mubr.bf16.mxu0 %v1844_v33  ;;  %539 = vmatprep.mubr.bf16.mxu1 %v1844_v33  ;;  %v1872_v40 = vld [vmem:[%s2116_s1 + $0x1c] ss:$12 sps:$4 sm:$0xff]   ;;  %v1877_v41 = vld [vmem:[%s2116_s1 + $0x18] ss:$12 sps:$4 sm:$0xff]   ;;  %v1684_v48 = vld [vmem:[%s2115_s0 + $0x170] sm:$0xff]  }
   0xf   :  { %v1678_v42 = vld [vmem:[%s2115_s0 + $0x118] sm:$0xff]   ;;  %v1679_v43 = vld [vmem:[%s2115_s0 + $0x160] sm:$0xff]   ;;  %v1681_v45 = vld [vmem:[%s2115_s0 + $0x168] sm:$0xff]  }
  0x10   :  { %1478 = vmatpush3.bf16.msra.mxu0 %v1649_v15  ;;  %1506 = vmatpush3.bf16.msra.mxu1 %v1650_v16  ;;  %v1680_v44 = vld [vmem:[%s2115_s0 + $0x120] sm:$0xff]   ;;  %v1682_v47 = vld [vmem:[%s2115_s0 + $0x128] sm:$0xff]   ;;  %v1685_v50 = vld [vmem:[%s2115_s0 + $0x130] sm:$0xff]  }
  0x11   :  { %1479 = vmatprep.subr.bf16.mxu0 %v1651_v17  ;;  %1507 = vmatprep.subr.bf16.mxu1 %v1652_v18  ;;  %v1683_v46 = vld [vmem:[%s2115_s0 + $0x1a0] sm:$0xff]   ;;  %v1686_v49 = vld [vmem:[%s2115_s0 + $0x1a8] sm:$0xff]   ;;  %v1687_v51 = vld [vmem:[%s2115_s0 + $0x178] sm:$0xff]  }
  0x12   :  { %v1689_v52 = vld [vmem:[%s2115_s0 + $0x1f0] sm:$0xff]   ;;  %v1688_v53 = vld [vmem:[%s2115_s0 + $0x138] sm:$0xff]   ;;  %v1690_v54 = vld [vmem:[%s2115_s0 + $0x180] sm:$0xff]  }
  0x13   :  { %v1691_v55 = vld [vmem:[%s2115_s0 + $0x1b0] sm:$0xff]   ;;  %v1693_v56 = vld [vmem:[%s2115_s0 + $0x1f8] sm:$0xff]   ;;  %v1692_v57 = vld [vmem:[%s2115_s0 + $0x140] sm:$0xff]  }
  0x14   :  { %1480 = vmatpush3.bf16.msra.mxu0 %v1653_v19  ;;  %1508 = vmatpush3.bf16.msra.mxu1 %v1654_v20  ;;  %v1694_v58 = vld [vmem:[%s2115_s0 + $0x188] sm:$0xff]   ;;  %v1695_v59 = vld [vmem:[%s2115_s0 + $0x1b8] sm:$0xff]   ;;  %v1697_v60 = vld [vmem:[%s2115_s0 + $0x200] sm:$0xff]  }
  0x15   :  { %1481 = vmatprep.subr.bf16.mxu0 %v1655_v21  ;;  %1509 = vmatprep.subr.bf16.mxu1 %v1656_v22  ;;  %v1696_v61 = vld [vmem:[%s2115_s0 + $0x148] sm:$0xff]   ;;  %v1698_v62 = vld [vmem:[%s2115_s0 + $0x190] sm:$0xff]   ;;  %v1699_v63 = vld [vmem:[%s2115_s0 + $0x1c0] sm:$0xff]  }
  0x16   :  { %v1701_v0 = vld [vmem:[%s2115_s0 + $0x208] sm:$0xff]   ;;  %v1700_v1 = vld [vmem:[%s2115_s0 + $0x150] sm:$0xff]   ;;  %v1702_v2 = vld [vmem:[%s2115_s0 + $0x198] sm:$0xff]  }
  0x17   :  { %v1703_v3 = vld [vmem:[%s2115_s0 + $0x1c8] sm:$0xff]   ;;  %v1705_v4 = vld [vmem:[%s2115_s0 + $0x210] sm:$0xff]   ;;  %v1704_v5 = vld [vmem:[%s2115_s0 + $0x158] sm:$0xff]  }
  0x18   :  { %1482 = vmatpush3.bf16.msra.mxu0 %v1657_v23  ;;  %1510 = vmatpush3.bf16.msra.mxu1 %v1658_v24  ;;  %v1706_v6 = vld [vmem:[%s2115_s0 + $0x1d0] sm:$0xff]   ;;  %v1707_v7 = vld [vmem:[%s2115_s0 + $0x218] sm:$0xff]   ;;  %v23_v13 = vld [vmem:[%s2117_s2] sm:$0xff] }
  0x19   :  { %1483 = vmatprep.subr.bf16.mxu0 %v1659_v25  ;;  %1511 = vmatprep.subr.bf16.mxu1 %v1660_v26  ;;  %v1712_v9 = vld [vmem:[%s2115_s0 + $0x230] sm:$0xff]   ;;  %v1708_v10 = vld [vmem:[%s2115_s0 + $0x1d8] sm:$0xff]   ;;  %v1709_v14 = vld [vmem:[%s2115_s0 + $0x220] sm:$0xff]  }
  0x1a   :  { %v1714_v12 = vld [vmem:[%s2115_s0 + $0x238] sm:$0xff]   ;;  %v25_v15 = vld [vmem:[%s2117_s2 + $0x10] sm:$0xff]  ;;  %29 = vperm.xlu0 %1633, %v23_v13   ;;  %v1710_v16 = vld [vmem:[%s2115_s0 + $0x1e0] sm:$0xff]  }
  0x1b   :  { %v24_v17 = vld [vmem:[%s2117_s2 + $0x8] sm:$0xff]  ;;  %39 = vperm.xlu1 %1634, %v25_v15   ;;  %v26_v19 = vld [vmem:[%s2117_s2 + $0x18] sm:$0xff] }
  0x1c   :  { %1484 = vmatpush3.bf16.msra.mxu0 %v1661_v27  ;;  %1512 = vmatpush3.bf16.msra.mxu1 %v1662_v28  ;;  %v1711_v18 = vld [vmem:[%s2115_s0 + $0x228] sm:$0xff]  }
  0x1d   :  { %1485 = vmatprep.subr.bf16.mxu0 %v1663_v29  ;;  %1513 = vmatprep.subr.bf16.mxu1 %v1664_v30  ;;  %v1713_v20 = vld [vmem:[%s2115_s0 + $0x1e8] sm:$0xff]  }
  0x1e   :  { %34 = vperm.xlu0 %1633, %v24_v17  }
  0x1f   :  { %44 = vperm.xlu1 %1634, %v26_v19  }
  0x20   :  { %1486 = vmatpush3.bf16.msra.mxu0 %v1665_v31  ;;  %1514 = vmatpush3.bf16.msra.mxu1 %v1666_v32 }
  0x21   :  { %1515 = vmatprep.subr.bf16.mxu1 %v1670_v35  ;;  %1607 = vmatprep.subr.bf16.mxu0 %v1671_v36 }
  0x23   :  { %261 = vmatmul.mubr.bf16.vlgmr.msra.gmra.mrb[0].mxu0 %v1849_v34 }
  0x24   :  { %1516 = vmatpush3.bf16.msra.mxu1 %v1672_v37  ;;  %1608 = vmatpush3.bf16.msra.mxu0 %v1671_v36 }
  0x25   :  { %1517 = vmatprep.subr.bf16.mxu1 %v1673_v38  ;;  %268 = vmatprep.mubr.bf16.mxu0 %v1872_v40 }
  0x26   :  { %1609 = vmatprep.subr.bf16.mxu0 %v1678_v42 }
  0x28   :  { %1518 = vmatpush3.bf16.msra.mxu1 %v1674_v39  ;;  %1610 = vmatpush3.bf16.msra.mxu0 %v1678_v42 }
  0x29   :  { %1535 = vmatprep.subr.bf16.mxu1 %v1679_v43  ;;  %1615 = vmatprep.subr.bf16.mxu0 %v1683_v46 }
  0x2b   :  { %269 = vmatmul.mubr.bf16.gmra.mrb[4].mxu0 %v1877_v41  ;;  %540 = vmatmul.mubr.bf16.vlgmr.msra.gmra.mrb[4].mxu1 %v1849_v34 }
  0x2c   :  { %1611 = vmatprep.mubr.msk.bf16.mxu0 %vm221_vm0, %v1761_v8  ;;  %1536 = vmatpush3.bf16.msra.mxu1 %v1680_v44  ;;  %v1716_v44 = vmov 0.0  }
  0x2d   :  { %547 = vmatprep.mubr.bf16.mxu1 %v1872_v40  ;;  %1537 = vmatprep.subr.bf16.mxu1 %v1681_v45 }
  0x30   :  { %1538 = vmatpush3.bf16.msra.mxu1 %v1682_v47 }
  0x31   :  { %1539 = vmatprep.subr.bf16.mxu1 %v1684_v48 }
  0x33   :  { %1612 = vmatmul.mubr.msk.bf16.vlgmr.msra.gmra.mrb[8].mxu0 %vm221_vm0, %v1774_v11  ;;  %548 = vmatmul.mubr.bf16.gmra.mrb[8].mxu1 %v1877_v41 }
  0x34   :  { %1616 = vmatpush3.bf16.msra.mxu0 %v1683_v46  ;;  %1619 = vmatprep.mubr.msk.bf16.mxu0 %vm221_vm0, %v1761_v8 }
  0x35   :  { %1617 = vmatprep.subr.bf16.mxu0 %v1686_v49  ;;  %1540 = vmatpush3.bf16.msra.mxu1 %v1685_v50 }
  0x36   :  { %819 = vmatprep.mubr.bf16.mxu1 %v1844_v33  ;;  %1541 = vmatprep.subr.bf16.mxu1 %v1687_v51 }
  0x38   :  { %1618 = vmatpush3.bf16.msra.mxu0 %v1686_v49 }
  0x39   :  { %1567 = vmatprep.subr.bf16.mxu0 %v1689_v52  ;;  %1542 = vmatpush3.bf16.msra.mxu1 %v1688_v53 }
  0x3a   :  { %1543 = vmatprep.subr.bf16.mxu1 %v1690_v54 }
  0x3b   :  { %1620 = vmatmul.mubr.msk.bf16.vlgmr.msra.gmra.mrb[12].mxu0 %vm221_vm0, %v1774_v11 }
  0x3c   :  { %1568 = vmatpush3.bf16.msra.mxu0 %v1691_v55  ;;  %1099 = vmatprep.mubr.bf16.mxu0 %v1844_v33 }
  0x3d   :  { %1569 = vmatprep.subr.bf16.mxu0 %v1693_v56  ;;  %1544 = vmatpush3.bf16.msra.mxu1 %v1692_v57 }
  0x3e   :  { %1545 = vmatprep.subr.bf16.mxu1 %v1694_v58 }
  0x40   :  { %1570 = vmatpush3.bf16.msra.mxu0 %v1695_v59 }
  0x41   :  { %1571 = vmatprep.subr.bf16.mxu0 %v1697_v60  ;;  %1546 = vmatpush3.bf16.msra.mxu1 %v1696_v61 }
  0x42   :  { %1547 = vmatprep.subr.bf16.mxu1 %v1698_v62 }
  0x44   :  { %1572 = vmatpush3.bf16.msra.mxu0 %v1699_v63 }
  0x45   :  { %1573 = vmatprep.subr.bf16.mxu0 %v1701_v0  ;;  %1548 = vmatpush3.bf16.msra.mxu1 %v1700_v1 }
  0x46   :  { %1549 = vmatprep.subr.bf16.mxu1 %v1702_v2 }
  0x48   :  { %1574 = vmatpush3.bf16.msra.mxu0 %v1703_v3 }
  0x49   :  { %1575 = vmatprep.subr.bf16.mxu0 %v1705_v4  ;;  %1550 = vmatpush3.bf16.msra.mxu1 %v1704_v5 }
  0x4a   :  { %1623 = vmatprep.subr.bf16.mxu1 %v1712_v9 }
  0x4c   :  { %1576 = vmatpush3.bf16.msra.mxu0 %v1706_v6  ;;  %820 = vmatmul.mubr.bf16.vlgmr.msra.gmra.mrb[12].mxu1 %v1849_v34 }
  0x4d   :  { %1577 = vmatprep.subr.bf16.mxu0 %v1707_v7  ;;  %827 = vmatprep.mubr.bf16.mxu1 %v1872_v40 }
  0x4e   :  { %1624 = vmatpush3.bf16.msra.mxu1 %v1712_v9 }
  0x4f   :  { %1625 = vmatprep.subr.bf16.mxu1 %v1714_v12 }
  0x50   :  { %1578 = vmatpush3.bf16.msra.mxu0 %v1708_v10 }
  0x51   :  { %1579 = vmatprep.subr.bf16.mxu0 %v1709_v14 }
  0x52   :  { %1626 = vmatpush3.bf16.msra.mxu1 %v1714_v12 }
  0x54   :  { %1580 = vmatpush3.bf16.msra.mxu0 %v1710_v16  ;;  %828 = vmatmul.mubr.bf16.gmra.mrb[16].mxu1 %v1877_v41 }
  0x55   :  { %1581 = vmatprep.subr.bf16.mxu0 %v1711_v18  ;;  %1627 = vmatprep.mubr.msk.bf16.mxu1 %vm221_vm0, %v1761_v8 }
  0x58   :  { %1582 = vmatpush3.bf16.msra.mxu0 %v1713_v20 }
  0x5b   :  { %1100 = vmatmul.mubr.bf16.vlgmr.msra.gmra.mrb[16].mxu0 %v1849_v34 }
  0x5c   :  { %1107 = vmatprep.mubr.bf16.mxu0 %v1872_v40  ;;  %1628 = vmatmul.mubr.msk.bf16.vlgmr.msra.gmra.mrb[20].mxu1 %vm221_vm0, %v1774_v11 }
  0x63   :  { %1108 = vmatmul.mubr.bf16.gmra.mrb[20].mxu0 %v1877_v41 }
  0x99   :  { %v2027_v25 = vpop.permute.xlu0 %29 }
  0x9a   :  { %v2029_v29 = vpop.permute.xlu1 %39 }
  0x9d   :  { %v2031_v31 = vpop.permute.xlu0 %34 }
  0x9e   :  { %v2035_v38 = vpop.permute.xlu1 %44 }
  0xde   :  { %v1605_v21 = vpop.f32.mrb[0].mxu1 }
  0xdf   :  { %v311_v22 = vpop.f32.mrb[1].mxu1 }
  0xe0   :  { %v1606_v23 = vpop.f32.mrb[2].mxu1 }
  0xe1   :  { %v314_v24 = vpop.f32.mrb[3].mxu1 }
  0xf6   :  { %v1487_v26 = vpop.f32.mrb[0].mxu0 }
  0xf7   :  { %v1488_v27 = vpop.f32.mrb[1].mxu0 }
  0xf8   :  { %v1489_v28 = vadd.f32 %v1488_v27, %v1487_v26  ;;  %v1490_v8 = vpop.f32.mrb[2].mxu0 }
  0xf9   :  { %v1491_v30 = vpop.f32.mrb[3].mxu0 }
  0xfa   :  { %v263_v32 = vadd.f32 %v1489_v28, %v2027_v25  ;;  %v1492_v11 = vadd.f32 %v1491_v30, %v1490_v8 }
  0xfc   :  { %v312_v33 = vadd.f32 %v311_v22, %v263_v32  ;;  %v266_v34 = vadd.f32 %v1492_v11, %v2031_v31 }
  0xfe   :  { %v1493_v35 = vpop.f32.mrb[4].mxu0  ;;  %vm330_vm1 = vcmp.ge.f32.partialorder %v312_v33, 1.0  ;;  %v315_v36 = vadd.f32 %v314_v24, %v266_v34  ;;  %v1519_v41 = vpop.f32.mrb[4].mxu1 }
  0xff   :  { %v1494_v37 = vpop.f32.mrb[5].mxu0  ;;  %v1520_v43 = vpop.f32.mrb[5].mxu1  ;;  %v334_v45 = vsel %vm330_vm1, 1.0, %v1716_v44  ;;  %v358_v3 = vsel %vm330_vm1, 0.0, %v312_v33 }
 0x100   :  { %v1495_v39 = vadd.f32 %v1494_v37, %v1493_v35  ;;  %v1496_v40 = vpop.f32.mrb[6].mxu0  ;;  %vm331_vm2 = vcmp.ge.f32.partialorder %v315_v36, 1.0  ;;  %v1521_v49 = vadd.f32 %v1520_v43, %v1519_v41  ;;  %v1522_v50 = vpop.f32.mrb[6].mxu1 }
 0x101   :  { %v1497_v42 = vpop.f32.mrb[7].mxu0  ;;  %v335_v46 = vsel %vm331_vm2, 1.0, %v1716_v44  ;;  %v1523_v52 = vpop.f32.mrb[7].mxu1  ;;  %v359_v13 = vsel %vm331_vm2, 0.0, %v315_v36 }
 0x102   :  { %v271_v47 = vadd.f32 %v1495_v39, %v2029_v29  ;;  %v1498_v48 = vadd.f32 %v1497_v42, %v1496_v40  ;;  %v1441_v51 = vpack.c.bf16 %v335_v46, %v334_v45  ;;  %v1524_v55 = vadd.f32 %v1523_v52, %v1522_v50 }
 0x103   :  { %v542_v56 = vadd.f32 %v1521_v49, %v2027_v25 }
 0x104   :  { %v320_v53 = vadd.f32 %v1605_v21, %v271_v47  ;;  %v274_v54 = vadd.f32 %v1498_v48, %v2035_v38  ;;  %1442 = vst [vmem:[%s2118_s3] sm:$0xff] %v1441_v51   ;;  %v545_v59 = vadd.f32 %v1524_v55, %v2031_v31 }
 0x106   :  { %vm332_vm3 = vcmp.ge.f32.partialorder %v320_v53, 1.0  ;;  %v323_v57 = vadd.f32 %v1606_v23, %v274_v54  ;;  %v1613_v58 = vpop.f32.mrb[8].mxu0  ;;  %v1525_v61 = vpop.f32.mrb[8].mxu1 }
 0x107   :  { %v590_v60 = vpop.f32.mrb[9].mxu0  ;;  %v336_v0 = vsel %vm332_vm3, 1.0, %v1716_v44  ;;  %v1526_v2 = vpop.f32.mrb[9].mxu1  ;;  %v360_v20 = vsel %vm332_vm3, 0.0, %v320_v53 }
 0x108   :  { %vm333_vm4 = vcmp.ge.f32.partialorder %v323_v57, 1.0  ;;  %v591_v62 = vadd.f32 %v590_v60, %v542_v56  ;;  %v1614_v63 = vpop.f32.mrb[10].mxu0  ;;  %v1527_v6 = vadd.f32 %v1526_v2, %v1525_v61  ;;  %v1528_v9 = vpop.f32.mrb[10].mxu1 }
 0x109   :  { %v337_v1 = vsel %vm333_vm4, 1.0, %v1716_v44  ;;  %v593_v4 = vpop.f32.mrb[11].mxu0  ;;  %v1529_v12 = vpop.f32.mrb[11].mxu1  ;;  %v361_v8 = vsel %vm333_vm4, 0.0, %v323_v57 }
 0x10a   :  { %v1444_v5 = vpack.c.bf16 %v337_v1, %v336_v0  ;;  %v605_v7 = vadd.f32 %v591_v62, %v358_v3  ;;  %v594_v10 = vadd.f32 %v593_v4, %v545_v59  ;;  %v550_v14 = vadd.f32 %v1527_v6, %v2029_v29 }
 0x10b   :  { %v1530_v15 = vadd.f32 %v1529_v12, %v1528_v9 }
 0x10c   :  { %1464 = vst [vmem:[%s2118_s3 + $0x8] sm:$0xff] %v1444_v5   ;;  %vm609_vm5 = vcmp.ge.f32.partialorder %v605_v7, 1.0  ;;  %v606_v16 = vadd.f32 %v594_v10, %v359_v13  ;;  %v599_v17 = vadd.f32 %v1613_v58, %v550_v14 }
 0x10d   :  { %v553_v18 = vadd.f32 %v1530_v15, %v2035_v38  ;;  %v613_v21 = vsel %vm609_vm5, 1.0, %v1716_v44  ;;  %v638_v46 = vsel %vm609_vm5, 0.0, %v605_v7 }
 0x10e   :  { %vm610_vm6 = vcmp.ge.f32.partialorder %v606_v16, 1.0  ;;  %v1621_v19 = vpop.f32.mrb[12].mxu0  ;;  %v607_v24 = vadd.f32 %v599_v17, %v360_v20 }
 0x10f   :  { %v614_v22 = vsel %vm610_vm6, 1.0, %v1716_v44  ;;  %v870_v23 = vpop.f32.mrb[13].mxu0  ;;  %v602_v26 = vadd.f32 %v1614_v63, %v553_v18  ;;  %v639_v50 = vsel %vm610_vm6, 0.0, %v606_v16 }
 0x110   :  { %v1447_v27 = vpack.c.bf16 %v614_v22, %v613_v21  ;;  %v1622_v28 = vpop.f32.mrb[14].mxu0  ;;  %vm611_vm7 = vcmp.ge.f32.partialorder %v607_v24, 1.0 }
 0x111   :  { %v873_v30 = vpop.f32.mrb[15].mxu0  ;;  %v608_v32 = vadd.f32 %v602_v26, %v361_v8  ;;  %v615_v11 = vsel %vm611_vm7, 1.0, %v1716_v44  ;;  %v640_v0 = vsel %vm611_vm7, 0.0, %v607_v24 }
 0x112   :  { %1465 = vst [vmem:[%s2118_s3 + $0x10] sm:$0xff] %v1447_v27  }
 0x113   :  { %vm612_vm8 = vcmp.ge.f32.partialorder %v608_v32, 1.0 }
 0x114   :  { %v616_v33 = vsel %vm612_vm8, 1.0, %v1716_v44  ;;  %v641_v7 = vsel %vm612_vm8, 0.0, %v608_v32 }
 0x115   :  { %v1450_v34 = vpack.c.bf16 %v616_v33, %v615_v11 }
 0x117   :  { %1466 = vst [vmem:[%s2118_s3 + $0x18] sm:$0xff] %v1450_v34  }
 0x11f   :  { %v1551_v35 = vpop.f32.mrb[12].mxu1 }
 0x120   :  { %v1552_v36 = vpop.f32.mrb[13].mxu1 }
 0x121   :  { %v1553_v37 = vadd.f32 %v1552_v36, %v1551_v35  ;;  %v1554_v39 = vpop.f32.mrb[14].mxu1 }
 0x122   :  { %v1555_v40 = vpop.f32.mrb[15].mxu1 }
 0x123   :  { %v822_v41 = vadd.f32 %v1553_v37, %v2027_v25  ;;  %v1556_v42 = vadd.f32 %v1555_v40, %v1554_v39 }
 0x125   :  { %v871_v43 = vadd.f32 %v870_v23, %v822_v41  ;;  %v825_v45 = vadd.f32 %v1556_v42, %v2031_v31 }
 0x127   :  { %v874_v47 = vadd.f32 %v873_v30, %v825_v45  ;;  %v1557_v48 = vpop.f32.mrb[16].mxu1  ;;  %v885_v49 = vadd.f32 %v871_v43, %v638_v46 }
 0x128   :  { %v1558_v51 = vpop.f32.mrb[17].mxu1 }
 0x129   :  { %v1559_v52 = vadd.f32 %v1558_v51, %v1557_v48  ;;  %v1560_v53 = vpop.f32.mrb[18].mxu1  ;;  %vm889_vm9 = vcmp.ge.f32.partialorder %v885_v49, 1.0  ;;  %v886_v54 = vadd.f32 %v874_v47, %v639_v50 }
 0x12a   :  { %v1561_v55 = vpop.f32.mrb[19].mxu1  ;;  %v893_v58 = vsel %vm889_vm9, 1.0, %v1716_v44 }
 0x12b   :  { %v830_v56 = vadd.f32 %v1559_v52, %v2029_v29  ;;  %v1562_v57 = vadd.f32 %v1561_v55, %v1560_v53  ;;  %vm890_vm10 = vcmp.ge.f32.partialorder %v886_v54, 1.0 }
 0x12c   :  { %v894_v59 = vsel %vm890_vm10, 1.0, %v1716_v44 }
 0x12d   :  { %v879_v60 = vadd.f32 %v1621_v19, %v830_v56  ;;  %v833_v61 = vadd.f32 %v1562_v57, %v2035_v38  ;;  %v1453_v63 = vpack.c.bf16 %v894_v59, %v893_v58  ;;  %v918_v19 = vsel %vm889_vm9, 0.0, %v885_v49 }
 0x12e   :  { %v1583_v62 = vpop.f32.mrb[16].mxu0 }
 0x12f   :  { %v1584_v1 = vpop.f32.mrb[17].mxu0  ;;  %v887_v2 = vadd.f32 %v879_v60, %v640_v0  ;;  %v882_v3 = vadd.f32 %v1622_v28, %v833_v61  ;;  %v1629_v6 = vpop.f32.mrb[20].mxu1  ;;  %1467 = vst [vmem:[%s2118_s3 + $0x20] sm:$0xff] %v1453_v63  }
 0x130   :  { %v1585_v4 = vadd.f32 %v1584_v1, %v1583_v62  ;;  %v1586_v5 = vpop.f32.mrb[18].mxu0  ;;  %v1150_v10 = vpop.f32.mrb[21].mxu1 }
 0x131   :  { %v1587_v9 = vpop.f32.mrb[19].mxu0  ;;  %v888_v12 = vadd.f32 %v882_v3, %v641_v7  ;;  %v1630_v15 = vpop.f32.mrb[22].mxu1  ;;  %vm891_vm11 = vcmp.ge.f32.partialorder %v887_v2, 1.0 }
 0x132   :  { %v1588_v13 = vadd.f32 %v1587_v9, %v1586_v5  ;;  %v1102_v14 = vadd.f32 %v1585_v4, %v2027_v25  ;;  %v1153_v16 = vpop.f32.mrb[23].mxu1  ;;  %v895_v20 = vsel %vm891_vm11, 1.0, %v1716_v44  ;;  %v919_v25 = vsel %vm890_vm10, 0.0, %v886_v54 }
 0x133   :  { %vm892_vm12 = vcmp.ge.f32.partialorder %v888_v12, 1.0  ;;  %v920_v39 = vsel %vm891_vm11, 0.0, %v887_v2 }
 0x134   :  { %v1151_v17 = vadd.f32 %v1150_v10, %v1102_v14  ;;  %v1105_v18 = vadd.f32 %v1588_v13, %v2031_v31  ;;  %v896_v21 = vsel %vm892_vm12, 1.0, %v1716_v44  ;;  %v921_v42 = vsel %vm892_vm12, 0.0, %v888_v12 }
 0x135   :  { %v1456_v26 = vpack.c.bf16 %v896_v21, %v895_v20 }
 0x136   :  { %v1165_v22 = vadd.f32 %v1151_v17, %v918_v19  ;;  %v1154_v23 = vadd.f32 %v1153_v16, %v1105_v18  ;;  %v1589_v24 = vpop.f32.mrb[20].mxu0 }
 0x137   :  { %v1590_v27 = vpop.f32.mrb[21].mxu0  ;;  %1468 = vst [vmem:[%s2118_s3 + $0x28] sm:$0xff] %v1456_v26  }
 0x138   :  { %vm1169_vm13 = vcmp.ge.f32.partialorder %v1165_v22, 1.0  ;;  %v1166_v28 = vadd.f32 %v1154_v23, %v919_v25  ;;  %v1591_v8 = vadd.f32 %v1590_v27, %v1589_v24  ;;  %v1592_v31 = vpop.f32.mrb[22].mxu0 }
 0x139   :  { %v1593_v30 = vpop.f32.mrb[23].mxu0  ;;  %v1173_v33 = vsel %vm1169_vm13, 1.0, %v1716_v44 }
 0x13a   :  { %vm1170_vm14 = vcmp.ge.f32.partialorder %v1166_v28, 1.0  ;;  %v1110_v32 = vadd.f32 %v1591_v8, %v2029_v29  ;;  %v1594_v11 = vadd.f32 %v1593_v30, %v1592_v31 }
 0x13b   :  { %v1174_v34 = vsel %vm1170_vm14, 1.0, %v1716_v44 }
 0x13c   :  { %v1459_v35 = vpack.c.bf16 %v1174_v34, %v1173_v33  ;;  %v1159_v36 = vadd.f32 %v1629_v6, %v1110_v32  ;;  %v1113_v37 = vadd.f32 %v1594_v11, %v2035_v38 }
 0x13e   :  { %1469 = vst [vmem:[%s2118_s3 + $0x30] sm:$0xff] %v1459_v35   ;;  %v1167_v40 = vadd.f32 %v1159_v36, %v920_v39  ;;  %v1162_v41 = vadd.f32 %v1630_v15, %v1113_v37 }
 0x140   :  { %vm1171_vm15 = vcmp.ge.f32.partialorder %v1167_v40, 1.0  ;;  %v1168_v29 = vadd.f32 %v1162_v41, %v921_v42 }
 0x141   :  { %v1175_v43 = vsel %vm1171_vm15, 1.0, %v1716_v44 }
 0x142   :  { %vm1172_vm0 = vcmp.ge.f32.partialorder %v1168_v29, 1.0 }
 0x143   :  { %v1176_v45 = vsel %vm1172_vm0, 1.0, %v1716_v44 }
 0x144   :  { %v1462_v46 = vpack.c.bf16 %v1176_v45, %v1175_v43 }
 0x146   :  { %1470 = vst [vmem:[%s2118_s3 + $0x38] sm:$0xff] %v1462_v46  }

// kernel: dvs_event_net_forward.10
= control target key start
LH: loop header
LB: loop body
LE: loop exit
PB: predicated region body
PF: predicated region fallthrough
CT: control target
= control target key end

     0   :  { %v2159_v1 = vmov 0   ;;  %vm283_vm0 = vcmask 261120   ;;  %vm482_vm2 = vcmask 257024   ;;  %s2999_s0 = inlined_call_operand.vmem [shape: bf16[4,288,32], index: 0, kind: input, shape index: {}]   ;;  %s3000_s1 = inlined_call_operand.vmem [shape: bf16[64,288], index: 1, kind: input, shape index: {}]   ;;  %s3001_s2 = inlined_call_operand.vmem [shape: f32[64,1], index: 2, kind: input, shape index: {}]   ;;  %s3002_s3 = inlined_call_operand.vmem [shape: bf16[4,64,32], index: 3, kind: output, shape index: {}]  }
   0x1   :  { %v2071_v0 = vld [vmem:[%s2999_s0 + $0x40] sm:$0xff]   ;;  %2069 = vset.pattern.permute.xlu0 %v2159_v1  ;;  %2070 = vset.pattern.permute.xlu1 %v2159_v1  ;;  %v2072_v2 = vld [vmem:[%s2999_s0 + $0xd0] sm:$0xff]   ;;  %v2075_v5 = vld [vmem:[%s2999_s0 + $0x48] sm:$0xff]  }
   0x2   :  { %1835 = vmatprep.subr.bf16.mxu0 %v2071_v0  ;;  %v2073_v3 = vld [vmem:[%s2999_s0] sm:$0xff]   ;;  %1881 = vmatprep.subr.bf16.mxu1 %v2072_v2  ;;  %v2074_v4 = vld [vmem:[%s2999_s0 + $0x90] sm:$0xff]   ;;  %v2076_v6 = vld [vmem:[%s2999_s0 + $0xd8] sm:$0xff]  }
   0x3   :  { %1836 = vmatpush3.bf16.msra.mxu0 %v2073_v3  ;;  %1882 = vmatpush3.bf16.msra.mxu1 %v2074_v4  ;;  %v2077_v7 = vld [vmem:[%s2999_s0 + $0x8] sm:$0xff]   ;;  %v2078_v8 = vld [vmem:[%s2999_s0 + $0x98] sm:$0xff]   ;;  %v2079_v9 = vld [vmem:[%s2999_s0 + $0x50] sm:$0xff]  }
   0x4   :  { %1837 = vmatprep.subr.bf16.mxu0 %v2075_v5  ;;  %1883 = vmatprep.subr.bf16.mxu1 %v2076_v6  ;;  %v2080_v10 = vld [vmem:[%s2999_s0 + $0xe0] sm:$0xff]   ;;  %v2081_v11 = vld [vmem:[%s2999_s0 + $0x10] sm:$0xff]   ;;  %v2083_v13 = vld [vmem:[%s2999_s0 + $0x58] sm:$0xff]  }
   0x5   :  { %v2082_v12 = vld [vmem:[%s2999_s0 + $0xa0] sm:$0xff]   ;;  %v2084_v14 = vld [vmem:[%s2999_s0 + $0xe8] sm:$0xff]   ;;  %v2085_v15 = vld [vmem:[%s2999_s0 + $0x18] sm:$0xff]  }
   0x6   :  { %v2086_v16 = vld [vmem:[%s2999_s0 + $0xa8] sm:$0xff]   ;;  %v2087_v17 = vld [vmem:[%s2999_s0 + $0x60] sm:$0xff]   ;;  %v2088_v18 = vld [vmem:[%s2999_s0 + $0xf0] sm:$0xff]  }
   0x7   :  { %1838 = vmatpush3.bf16.msra.mxu0 %v2077_v7  ;;  %1884 = vmatpush3.bf16.msra.mxu1 %v2078_v8  ;;  %v2089_v19 = vld [vmem:[%s2999_s0 + $0x20] sm:$0xff]   ;;  %v2090_v20 = vld [vmem:[%s2999_s0 + $0xb0] sm:$0xff]   ;;  %v2091_v21 = vld [vmem:[%s2999_s0 + $0x68] sm:$0xff]  }
   0x8   :  { %1839 = vmatprep.subr.bf16.mxu0 %v2079_v9  ;;  %1885 = vmatprep.subr.bf16.mxu1 %v2080_v10  ;;  %v2092_v22 = vld [vmem:[%s2999_s0 + $0xf8] sm:$0xff]   ;;  %v2093_v23 = vld [vmem:[%s2999_s0 + $0x28] sm:$0xff]   ;;  %v2095_v25 = vld [vmem:[%s2999_s0 + $0x70] sm:$0xff]  }
   0x9   :  { %v2094_v24 = vld [vmem:[%s2999_s0 + $0xb8] sm:$0xff]   ;;  %v2096_v26 = vld [vmem:[%s2999_s0 + $0x100] sm:$0xff]   ;;  %v2097_v27 = vld [vmem:[%s2999_s0 + $0x30] sm:$0xff]  }
   0xa   :  { %v2098_v28 = vld [vmem:[%s2999_s0 + $0xc0] sm:$0xff]   ;;  %v2099_v29 = vld [vmem:[%s2999_s0 + $0x78] sm:$0xff]   ;;  %v2100_v30 = vld [vmem:[%s2999_s0 + $0x108] sm:$0xff]  }
   0xb   :  { %1840 = vmatpush3.bf16.msra.mxu0 %v2081_v11  ;;  %1886 = vmatpush3.bf16.msra.mxu1 %v2082_v12  ;;  %v2101_v31 = vld [vmem:[%s2999_s0 + $0x38] sm:$0xff]   ;;  %v2102_v32 = vld [vmem:[%s2999_s0 + $0xc8] sm:$0xff]   ;;  %v2280_v33 = vld [vmem:[%s3000_s1 + $0x4] ss:$12 sps:$4 sm:$0xff]  }
   0xc   :  { %1841 = vmatprep.subr.bf16.mxu0 %v2083_v13  ;;  %1887 = vmatprep.subr.bf16.mxu1 %v2084_v14  ;;  %v2285_v34 = vld [vmem:[%s3000_s1] ss:$12 sps:$4 sm:$0xff]   ;;  %v2309_v40 = vld [vmem:[%s3000_s1 + $0x1c] ss:$12 sps:$4 sm:$0xff]   ;;  %v2314_v41 = vld [vmem:[%s3000_s1 + $0x18] ss:$12 sps:$4 sm:$0xff]  }
   0xd   :  { %328 = vmatprep.mubr.bf16.mxu0 %v2280_v33  ;;  %676 = vmatprep.mubr.bf16.mxu1 %v2280_v33  ;;  %v2106_v35 = vld [vmem:[%s2999_s0 + $0x160] sm:$0xff]   ;;  %v2109_v38 = vld [vmem:[%s2999_s0 + $0x168] sm:$0xff]   ;;  %v2114_v42 = vld [vmem:[%s2999_s0 + $0x170] sm:$0xff]  }
   0xe   :  { %v2107_v36 = vld [vmem:[%s2999_s0 + $0x120] sm:$0xff]   ;;  %v2110_v39 = vld [vmem:[%s2999_s0 + $0x128] sm:$0xff]   ;;  %v2115_v43 = vld [vmem:[%s2999_s0 + $0x130] sm:$0xff]  }
   0xf   :  { %1842 = vmatpush3.bf16.msra.mxu0 %v2085_v15  ;;  %1888 = vmatpush3.bf16.msra.mxu1 %v2086_v16  ;;  %v2108_v37 = vld [vmem:[%s2999_s0 + $0x80] sm:$0xff]   ;;  %v2116_v44 = vld [vmem:[%s2999_s0 + $0x178] sm:$0xff]   ;;  %v2123_v49 = vld [vmem:[%s2999_s0 + $0x88] sm:$0xff]  }
  0x10   :  { %1843 = vmatprep.subr.bf16.mxu0 %v2087_v17  ;;  %1889 = vmatprep.subr.bf16.mxu1 %v2088_v18  ;;  %v2117_v45 = vld [vmem:[%s2999_s0 + $0x138] sm:$0xff]   ;;  %v2335_v46 = vld [vmem:[%s3000_s1 + $0x34] ss:$12 sps:$4 sm:$0xff]   ;;  %v2124_v51 = vld [vmem:[%s2999_s0 + $0x188] sm:$0xff]  }
  0x11   :  { %v2340_v47 = vld [vmem:[%s3000_s1 + $0x30] ss:$12 sps:$4 sm:$0xff]   ;;  %v2121_v48 = vld [vmem:[%s2999_s0 + $0x180] sm:$0xff]   ;;  %v2359_v52 = vld [vmem:[%s3000_s1 + $0x4c] ss:$12 sps:$4 sm:$0xff]  }
  0x12   :  { %v2122_v50 = vld [vmem:[%s2999_s0 + $0x140] sm:$0xff]   ;;  %v2125_v53 = vld [vmem:[%s2999_s0 + $0x148] sm:$0xff]   ;;  %v2129_v54 = vld [vmem:[%s2999_s0 + $0x190] sm:$0xff]  }
  0x13   :  { %1844 = vmatpush3.bf16.msra.mxu0 %v2089_v19  ;;  %1890 = vmatpush3.bf16.msra.mxu1 %v2090_v20  ;;  %v2374_v55 = vld [vmem:[%s3000_s1 + $0x48] ss:$12 sps:$4 sm:$0xff]   ;;  %v2131_v58 = vld [vmem:[%s2999_s0 + $0x198] sm:$0xff]   ;;  %v2404_v62 = vld [vmem:[%s3000_s1 + $0x20] ss:$12 sps:$4 sm:$0xff]  }
  0x14   :  { %1845 = vmatprep.subr.bf16.mxu0 %v2091_v21  ;;  %1891 = vmatprep.subr.bf16.mxu1 %v2092_v22  ;;  %v2379_v56 = vld [vmem:[%s3000_s1 + $0x8] ss:$12 sps:$4 sm:$0xff]   ;;  %v2132_v60 = vld [vmem:[%s2999_s0 + $0x158] sm:$0xff]   ;;  %v2142_v4 = vld [vmem:[%s2999_s0 + $0x200] sm:$0xff]  }
  0x15   :  { %v2130_v57 = vld [vmem:[%s2999_s0 + $0x150] sm:$0xff]   ;;  %v2412_v0 = vld [vmem:[%s3000_s1 + $0x38] ss:$12 sps:$4 sm:$0xff]   ;;  %v2145_v8 = vld [vmem:[%s2999_s0 + $0x208] sm:$0xff]  }
  0x16   :  { %v2137_v59 = vld [vmem:[%s2999_s0 + $0x110] sm:$0xff]   ;;  %v2138_v1 = vld [vmem:[%s2999_s0 + $0x1f8] sm:$0xff]   ;;  %v2149_v6 = vld [vmem:[%s2999_s0 + $0x1a0] sm:$0xff]  }
  0x17   :  { %1846 = vmatpush3.bf16.msra.mxu0 %v2093_v23  ;;  %1892 = vmatpush3.bf16.msra.mxu1 %v2094_v24  ;;  %v2135_v61 = vld [vmem:[%s2999_s0 + $0x1f0] sm:$0xff]   ;;  %v2144_v2 = vld [vmem:[%s2999_s0 + $0x118] sm:$0xff]   ;;  %v2143_v7 = vld [vmem:[%s2999_s0 + $0x1c0] sm:$0xff]  }
  0x18   :  { %1847 = vmatprep.subr.bf16.mxu0 %v2095_v25  ;;  %1893 = vmatprep.subr.bf16.mxu1 %v2096_v26  ;;  %v2136_v63 = vld [vmem:[%s2999_s0 + $0x1b0] sm:$0xff]   ;;  %v2139_v3 = vld [vmem:[%s2999_s0 + $0x1b8] sm:$0xff]   ;;  %v2146_v9 = vld [vmem:[%s2999_s0 + $0x1c8] sm:$0xff]  }
  0x19   :  { %v2435_v5 = vld [vmem:[%s3000_s1 + $0x50] ss:$12 sps:$4 sm:$0xff]   ;;  %v31_v12 = vld [vmem:[%s3001_s2] sm:$0xff]  ;;  %v2154_v15 = vld [vmem:[%s2999_s0 + $0x1a8] sm:$0xff]  }
  0x1a   :  { %v2147_v10 = vld [vmem:[%s2999_s0 + $0x210] sm:$0xff]   ;;  %v2150_v13 = vld [vmem:[%s2999_s0 + $0x218] sm:$0xff]   ;;  %41 = vperm.xlu0 %2069, %v31_v12   ;;  %v32_v16 = vld [vmem:[%s3001_s2 + $0x8] sm:$0xff] }
  0x1b   :  { %1848 = vmatpush3.bf16.msra.mxu0 %v2097_v27  ;;  %1894 = vmatpush3.bf16.msra.mxu1 %v2098_v28  ;;  %v2148_v11 = vld [vmem:[%s2999_s0 + $0x1d0] sm:$0xff]   ;;  %v2151_v17 = vld [vmem:[%s2999_s0 + $0x1d8] sm:$0xff]   ;;  %v2152_v20 = vld [vmem:[%s2999_s0 + $0x220] sm:$0xff]  }
  0x1c   :  { %1849 = vmatprep.subr.bf16.mxu0 %v2099_v29  ;;  %1895 = vmatprep.subr.bf16.mxu1 %v2100_v30  ;;  %v33_v14 = vld [vmem:[%s3001_s2 + $0x10] sm:$0xff]  ;;  %v34_v19 = vld [vmem:[%s3001_s2 + $0x18] sm:$0xff]  ;;  %v35_v21 = vld [vmem:[%s3001_s2 + $0x20] sm:$0xff] }
  0x1d   :  { %51 = vperm.xlu1 %2070, %v33_v14   ;;  %v2157_v18 = vld [vmem:[%s2999_s0 + $0x230] sm:$0xff]   ;;  %v2153_v22 = vld [vmem:[%s2999_s0 + $0x1e0] sm:$0xff]   ;;  %v2155_v23 = vld [vmem:[%s2999_s0 + $0x228] sm:$0xff]  }
  0x1e   :  { %46 = vperm.xlu0 %2069, %v32_v16   ;;  %v36_v24 = vld [vmem:[%s3001_s2 + $0x28] sm:$0xff]  ;;  %v37_v25 = vld [vmem:[%s3001_s2 + $0x30] sm:$0xff]  ;;  %v38_v27 = vld [vmem:[%s3001_s2 + $0x38] sm:$0xff] }
  0x1f   :  { %1850 = vmatpush3.bf16.msra.mxu0 %v2101_v31  ;;  %1896 = vmatpush3.bf16.msra.mxu1 %v2102_v32  ;;  %v2156_v26 = vld [vmem:[%s2999_s0 + $0x1e8] sm:$0xff]   ;;  %v2158_v28 = vld [vmem:[%s2999_s0 + $0x238] sm:$0xff]  }
  0x20   :  { %1927 = vmatprep.subr.bf16.mxu1 %v2106_v35  ;;  %2019 = vmatprep.subr.bf16.mxu0 %v2108_v37 }
  0x21   :  { %56 = vperm.xlu1 %2070, %v34_v19  }
  0x22   :  { %329 = vmatmul.mubr.bf16.vlgmr.msra.gmra.mrb[0].mxu0 %v2285_v34  ;;  %677 = vmatmul.mubr.bf16.vlgmr.msra.gmra.mrb[0].mxu1 %v2285_v34 }
  0x23   :  { %1928 = vmatpush3.bf16.msra.mxu1 %v2107_v36  ;;  %2020 = vmatpush3.bf16.msra.mxu0 %v2108_v37 }
  0x24   :  { %1929 = vmatprep.subr.bf16.mxu1 %v2109_v38  ;;  %336 = vmatprep.mubr.bf16.mxu0 %v2309_v40 }
  0x25   :  { %684 = vmatprep.mubr.bf16.mxu1 %v2309_v40  ;;  %2021 = vmatprep.subr.bf16.mxu0 %v2123_v49 }
  0x26   :  { %61 = vperm.xlu0 %2069, %v35_v21   ;;  %66 = vperm.xlu1 %2070, %v36_v24  }
  0x27   :  { %1930 = vmatpush3.bf16.msra.mxu1 %v2110_v39  ;;  %2022 = vmatpush3.bf16.msra.mxu0 %v2123_v49 }
  0x28   :  { %1931 = vmatprep.subr.bf16.mxu1 %v2114_v42  ;;  %2031 = vmatprep.subr.bf16.mxu0 %v2137_v59 }
  0x2a   :  { %337 = vmatmul.mubr.bf16.gmra.mrb[4].mxu0 %v2314_v41  ;;  %685 = vmatmul.mubr.bf16.gmra.mrb[4].mxu1 %v2314_v41 }
  0x2b   :  { %1932 = vmatpush3.bf16.msra.mxu1 %v2115_v43  ;;  %344 = vmatprep.mubr.bf16.mxu0 %v2335_v46 }
  0x2c   :  { %1933 = vmatprep.subr.bf16.mxu1 %v2116_v44  ;;  %692 = vmatprep.mubr.bf16.mxu1 %v2335_v46 }
  0x2d   :  { %71 = vperm.xlu0 %2069, %v37_v25   ;;  %76 = vperm.xlu1 %2070, %v38_v27  }
  0x2f   :  { %1934 = vmatpush3.bf16.msra.mxu1 %v2117_v45 }
  0x30   :  { %1935 = vmatprep.subr.bf16.mxu1 %v2121_v48 }
  0x32   :  { %345 = vmatmul.mubr.bf16.gmra.mrb[8].mxu0 %v2340_v47  ;;  %693 = vmatmul.mubr.bf16.gmra.mrb[8].mxu1 %v2340_v47 }
  0x33   :  { %352 = vmatprep.mubr.bf16.mxu0 %v2359_v52  ;;  %1936 = vmatpush3.bf16.msra.mxu1 %v2122_v50 }
  0x34   :  { %700 = vmatprep.mubr.bf16.mxu1 %v2359_v52  ;;  %1937 = vmatprep.subr.bf16.mxu1 %v2124_v51 }
  0x37   :  { %1938 = vmatpush3.bf16.msra.mxu1 %v2125_v53 }
  0x38   :  { %1939 = vmatprep.subr.bf16.mxu1 %v2129_v54 }
  0x3a   :  { %353 = vmatmul.mubr.bf16.gmra.mrb[12].mxu0 %v2374_v55  ;;  %701 = vmatmul.mubr.bf16.gmra.mrb[12].mxu1 %v2374_v55 }
  0x3b   :  { %2023 = vmatprep.mubr.msk.bf16.mxu0 %vm283_vm0, %v2379_v56  ;;  %1940 = vmatpush3.bf16.msra.mxu1 %v2130_v57 }
  0x3c   :  { %1024 = vmatprep.mubr.bf16.mxu1 %v2280_v33  ;;  %1941 = vmatprep.subr.bf16.mxu1 %v2131_v58 }
  0x3f   :  { %1942 = vmatpush3.bf16.msra.mxu1 %v2132_v60 }
  0x40   :  { %1973 = vmatprep.subr.bf16.mxu1 %v2135_v61 }
  0x42   :  { %2024 = vmatmul.mubr.msk.bf16.vlgmr.msra.gmra.mrb[16].mxu0 %vm283_vm0, %v2404_v62  ;;  %1025 = vmatmul.mubr.bf16.vlgmr.msra.gmra.mrb[16].mxu1 %v2285_v34 }
  0x43   :  { %2032 = vmatpush3.bf16.msra.mxu0 %v2137_v59  ;;  %1974 = vmatpush3.bf16.msra.mxu1 %v2136_v63 }
  0x44   :  { %2027 = vmatprep.mubr.msk.bf16.mxu0 %vm283_vm0, %v2412_v0  ;;  %1975 = vmatprep.subr.bf16.mxu1 %v2138_v1 }
  0x45   :  { %1032 = vmatprep.mubr.bf16.mxu1 %v2309_v40  ;;  %2033 = vmatprep.subr.bf16.mxu0 %v2144_v2 }
  0x47   :  { %2034 = vmatpush3.bf16.msra.mxu0 %v2144_v2  ;;  %1976 = vmatpush3.bf16.msra.mxu1 %v2139_v3 }
  0x48   :  { %1977 = vmatprep.subr.bf16.mxu1 %v2142_v4  ;;  %2043 = vmatprep.subr.bf16.mxu0 %v2149_v6 }
  0x4a   :  { %2028 = vmatmul.mubr.msk.bf16.gmra.mrb[20].mxu0 %vm283_vm0, %v2435_v5  ;;  %1033 = vmatmul.mubr.bf16.gmra.mrb[20].mxu1 %v2314_v41 }
  0x4b   :  { %2035 = vmatprep.mubr.msk.bf16.mxu0 %vm283_vm0, %v2379_v56  ;;  %1978 = vmatpush3.bf16.msra.mxu1 %v2143_v7 }
  0x4c   :  { %1040 = vmatprep.mubr.bf16.mxu1 %v2335_v46  ;;  %1979 = vmatprep.subr.bf16.mxu1 %v2145_v8 }
  0x4f   :  { %1980 = vmatpush3.bf16.msra.mxu1 %v2146_v9 }
  0x50   :  { %1981 = vmatprep.subr.bf16.mxu1 %v2147_v10 }
  0x52   :  { %2036 = vmatmul.mubr.msk.bf16.vlgmr.msra.gmra.mrb[24].mxu0 %vm283_vm0, %v2404_v62  ;;  %1041 = vmatmul.mubr.bf16.gmra.mrb[24].mxu1 %v2340_v47 }
  0x53   :  { %2044 = vmatpush3.bf16.msra.mxu0 %v2149_v6  ;;  %1982 = vmatpush3.bf16.msra.mxu1 %v2148_v11 }
  0x54   :  { %2039 = vmatprep.mubr.msk.bf16.mxu0 %vm283_vm0, %v2412_v0  ;;  %1983 = vmatprep.subr.bf16.mxu1 %v2150_v13 }
  0x55   :  { %1048 = vmatprep.mubr.bf16.mxu1 %v2359_v52  ;;  %2045 = vmatprep.subr.bf16.mxu0 %v2154_v15 }
  0x57   :  { %2046 = vmatpush3.bf16.msra.mxu0 %v2154_v15  ;;  %1984 = vmatpush3.bf16.msra.mxu1 %v2151_v17 }
  0x58   :  { %2055 = vmatprep.subr.bf16.mxu0 %v2157_v18  ;;  %1985 = vmatprep.subr.bf16.mxu1 %v2152_v20 }
  0x5a   :  { %2040 = vmatmul.mubr.msk.bf16.gmra.mrb[28].mxu0 %vm283_vm0, %v2435_v5  ;;  %1049 = vmatmul.mubr.bf16.gmra.mrb[28].mxu1 %v2374_v55 }
  0x5b   :  { %2047 = vmatprep.mubr.msk.bf16.mxu0 %vm283_vm0, %v2379_v56  ;;  %1986 = vmatpush3.bf16.msra.mxu1 %v2153_v22 }
  0x5c   :  { %1372 = vmatprep.mubr.bf16.mxu1 %v2280_v33  ;;  %1987 = vmatprep.subr.bf16.mxu1 %v2155_v23 }
  0x5f   :  { %1988 = vmatpush3.bf16.msra.mxu1 %v2156_v26 }
  0x62   :  { %2048 = vmatmul.mubr.msk.bf16.vlgmr.msra.gmra.mrb[32].mxu0 %vm283_vm0, %v2404_v62  ;;  %1373 = vmatmul.mubr.bf16.vlgmr.msra.gmra.mrb[32].mxu1 %v2285_v34 }
  0x63   :  { %2056 = vmatpush3.bf16.msra.mxu0 %v2157_v18  ;;  %2051 = vmatprep.mubr.msk.bf16.mxu0 %vm283_vm0, %v2412_v0 }
  0x64   :  { %1380 = vmatprep.mubr.bf16.mxu1 %v2309_v40  ;;  %2057 = vmatprep.subr.bf16.mxu0 %v2158_v28 }
  0x67   :  { %2058 = vmatpush3.bf16.msra.mxu0 %v2158_v28 }
  0x6a   :  { %2052 = vmatmul.mubr.msk.bf16.gmra.mrb[36].mxu0 %vm283_vm0, %v2435_v5  ;;  %1381 = vmatmul.mubr.bf16.gmra.mrb[36].mxu1 %v2314_v41 }
  0x6b   :  { %2059 = vmatprep.mubr.msk.bf16.mxu0 %vm283_vm0, %v2379_v56  ;;  %1388 = vmatprep.mubr.bf16.mxu1 %v2335_v46 }
  0x72   :  { %2060 = vmatmul.mubr.msk.bf16.vlgmr.msra.gmra.mrb[40].mxu0 %vm283_vm0, %v2404_v62  ;;  %1389 = vmatmul.mubr.bf16.gmra.mrb[40].mxu1 %v2340_v47 }
  0x73   :  { %2063 = vmatprep.mubr.msk.bf16.mxu0 %vm283_vm0, %v2412_v0  ;;  %1396 = vmatprep.mubr.bf16.mxu1 %v2359_v52 }
  0x7a   :  { %2064 = vmatmul.mubr.msk.bf16.gmra.mrb[44].mxu0 %vm283_vm0, %v2435_v5  ;;  %1397 = vmatmul.mubr.bf16.gmra.mrb[44].mxu1 %v2374_v55 }
  0x99   :  { %v2553_v53 = vpop.permute.xlu0 %41 }
  0x9c   :  { %v2563_v2 = vpop.permute.xlu1 %51 }
  0x9d   :  { %v2565_v3 = vpop.permute.xlu0 %46 }
  0xa0   :  { %v2569_v13 = vpop.permute.xlu1 %56 }
  0xa5   :  { %v2573_v17 = vpop.permute.xlu0 %61  ;;  %v2576_v19 = vpop.permute.xlu1 %66 }
  0xf5   :  { %v1851_v29 = vpop.f32.mrb[0].mxu0  ;;  %v1897_v30 = vpop.f32.mrb[0].mxu1 }
  0xf6   :  { %v1852_v31 = vpop.f32.mrb[1].mxu0  ;;  %v1898_v32 = vpop.f32.mrb[1].mxu1 }
  0xf7   :  { %v1853_v33 = vadd.f32 %v1852_v31, %v1851_v29  ;;  %v1854_v34 = vpop.f32.mrb[2].mxu0  ;;  %v2545_v35 = vadd.f32 %v1898_v32, %v1897_v30  ;;  %v1900_v36 = vpop.f32.mrb[2].mxu1 }
  0xf8   :  { %v1855_v37 = vpop.f32.mrb[3].mxu0  ;;  %v1901_v38 = vpop.f32.mrb[3].mxu1 }
  0xf9   :  { %v1856_v39 = vadd.f32 %v1855_v37, %v1854_v34  ;;  %v2547_v40 = vadd.f32 %v1901_v38, %v1900_v36  ;;  %v331_v21 = vadd.f32 %v1853_v33, %v2553_v53  ;;  %v2160_v34 = vmov 0.0  }
  0xfb   :  { %v334_v29 = vadd.f32 %v1856_v39, %v2565_v3 }
  0xfd   :  { %v1857_v41 = vpop.f32.mrb[4].mxu0  ;;  %v1903_v42 = vpop.f32.mrb[4].mxu1 }
  0xfe   :  { %v1858_v43 = vpop.f32.mrb[5].mxu0  ;;  %v1904_v44 = vpop.f32.mrb[5].mxu1 }
  0xff   :  { %v1859_v45 = vadd.f32 %v1858_v43, %v1857_v41  ;;  %v1860_v46 = vpop.f32.mrb[6].mxu0  ;;  %v2549_v47 = vadd.f32 %v1904_v44, %v1903_v42  ;;  %v1906_v48 = vpop.f32.mrb[6].mxu1 }
 0x100   :  { %v1861_v49 = vpop.f32.mrb[7].mxu0  ;;  %v1907_v50 = vpop.f32.mrb[7].mxu1 }
 0x101   :  { %v1862_v51 = vadd.f32 %v1861_v49, %v1860_v46  ;;  %v2551_v52 = vadd.f32 %v1907_v50, %v1906_v48  ;;  %v339_v18 = vadd.f32 %v1859_v45, %v2563_v2  ;;  %v2600_v42 = vpop.permute.xlu0 %71  ;;  %v2602_v43 = vpop.permute.xlu1 %76 }
 0x103   :  { %v342_v25 = vadd.f32 %v1862_v51, %v2569_v13 }
 0x105   :  { %v1863_v54 = vpop.f32.mrb[8].mxu0  ;;  %v1909_v55 = vpop.f32.mrb[8].mxu1 }
 0x106   :  { %v1864_v56 = vpop.f32.mrb[9].mxu0  ;;  %v1910_v57 = vpop.f32.mrb[9].mxu1 }
 0x107   :  { %v2555_v58 = vadd.f32 %v1864_v56, %v1863_v54  ;;  %v1866_v59 = vpop.f32.mrb[10].mxu0  ;;  %v2557_v60 = vadd.f32 %v1910_v57, %v1909_v55  ;;  %v1912_v61 = vpop.f32.mrb[10].mxu1 }
 0x108   :  { %v1867_v62 = vpop.f32.mrb[11].mxu0  ;;  %v1913_v63 = vpop.f32.mrb[11].mxu1 }
 0x109   :  { %v2559_v0 = vadd.f32 %v1867_v62, %v1866_v59  ;;  %v2561_v1 = vadd.f32 %v1913_v63, %v1912_v61  ;;  %v347_v55 = vadd.f32 %v2555_v58, %v2573_v17 }
 0x10d   :  { %v1869_v4 = vpop.f32.mrb[12].mxu0  ;;  %v1915_v5 = vpop.f32.mrb[12].mxu1 }
 0x10e   :  { %v1870_v6 = vpop.f32.mrb[13].mxu0  ;;  %v1916_v7 = vpop.f32.mrb[13].mxu1 }
 0x10f   :  { %v1871_v8 = vadd.f32 %v1870_v6, %v1869_v4  ;;  %v1872_v9 = vpop.f32.mrb[14].mxu0  ;;  %v2567_v10 = vadd.f32 %v1916_v7, %v1915_v5  ;;  %v1918_v11 = vpop.f32.mrb[14].mxu1  ;;  %v350_v4 = vadd.f32 %v2559_v0, %v2576_v19 }
 0x110   :  { %v1873_v12 = vpop.f32.mrb[15].mxu0  ;;  %v1919_v14 = vpop.f32.mrb[15].mxu1 }
 0x111   :  { %v1874_v15 = vadd.f32 %v1873_v12, %v1872_v9  ;;  %v2571_v16 = vadd.f32 %v1919_v14, %v1918_v11  ;;  %v355_v50 = vadd.f32 %v1871_v8, %v2600_v42 }
 0x113   :  { %v358_v61 = vadd.f32 %v1874_v15, %v2602_v43 }
 0x115   :  { %v2025_v20 = vpop.f32.mrb[16].mxu0  ;;  %v1943_v23 = vpop.f32.mrb[16].mxu1 }
 0x116   :  { %v2579_v22 = vadd.f32 %v2025_v20, %v339_v18  ;;  %v395_v24 = vpop.f32.mrb[17].mxu0  ;;  %v1944_v27 = vpop.f32.mrb[17].mxu1 }
 0x117   :  { %v2582_v26 = vadd.f32 %v395_v24, %v331_v21  ;;  %v2026_v28 = vpop.f32.mrb[18].mxu0  ;;  %v2586_v30 = vadd.f32 %v1944_v27, %v1943_v23  ;;  %v1946_v32 = vpop.f32.mrb[18].mxu1  ;;  %v687_v24 = vadd.f32 %v2549_v47, %v2563_v2  ;;  %v690_v47 = vadd.f32 %v2551_v52, %v2569_v13 }
 0x118   :  { %vm436_vm1 = vcmp.ge.f32.partialorder %v2579_v22, 1.0  ;;  %v2588_v31 = vadd.f32 %v2026_v28, %v342_v25  ;;  %v398_v33 = vpop.f32.mrb[19].mxu0  ;;  %v1947_v38 = vpop.f32.mrb[19].mxu1  ;;  %v679_v28 = vadd.f32 %v2545_v35, %v2553_v53 }
 0x119   :  { %v444_v36 = vsel %vm436_vm1, 1.0, %v2160_v34  ;;  %vm434_vm3 = vcmp.ge.f32.partialorder %v2582_v26, 1.0  ;;  %v2594_v37 = vadd.f32 %v398_v33, %v334_v29  ;;  %v2615_v49 = vadd.f32 %v1947_v38, %v1946_v32 }
 0x11a   :  { %v1805_v39 = vpack.c.bf16 %v444_v36, %v444_v36  ;;  %v442_v41 = vsel %vm434_vm3, 1.0, %v2160_v34  ;;  %vm437_vm4 = vcmp.ge.f32.partialorder %v2588_v31, 1.0  ;;  %v493_v36 = vsel %vm436_vm1, 0.0, %v2579_v22 }
 0x11b   :  { %v1803_v44 = vpack.c.bf16 %v442_v41, %v442_v41  ;;  %v445_v45 = vsel %vm437_vm4, 1.0, %v2160_v34  ;;  %vm435_vm5 = vcmp.ge.f32.partialorder %v2594_v37, 1.0  ;;  %v682_v41 = vadd.f32 %v2547_v40, %v2565_v3 }
 0x11c   :  { %485 = vst.msk [vmem:[%s3002_s3 + $0x8] sm:$0xf] %vm482_vm2, %v1805_v39  ;;  %v1806_v46 = vpack.c.bf16 %v445_v45, %v445_v45  ;;  %v443_v48 = vsel %vm435_vm5, 1.0, %v2160_v34  ;;  %v492_v40 = vsel %vm435_vm5, 0.0, %v2594_v37 }
 0x11d   :  { %483 = vst.msk [vmem:[%s3002_s3] sm:$0xf] %vm482_vm2, %v1803_v44  ;;  %v1804_v51 = vpack.c.bf16 %v443_v48, %v443_v48  ;;  %v2029_v54 = vpop.f32.mrb[20].mxu0  ;;  %v1949_v57 = vpop.f32.mrb[20].mxu1  ;;  %v491_v44 = vsel %vm434_vm3, 0.0, %v2582_v26 }
 0x11e   :  { %486 = vst.msk [vmem:[%s3002_s3 + $0xc] sm:$0xf] %vm482_vm2, %v1806_v46  ;;  %v2628_v56 = vadd.f32 %v2029_v54, %v355_v50  ;;  %v411_v59 = vpop.f32.mrb[21].mxu0  ;;  %v1950_v63 = vpop.f32.mrb[21].mxu1  ;;  %v494_v50 = vsel %vm437_vm4, 0.0, %v2588_v31 }
 0x11f   :  { %484 = vst.msk [vmem:[%s3002_s3 + $0x4] sm:$0xf] %vm482_vm2, %v1804_v51  ;;  %v2635_v62 = vadd.f32 %v411_v59, %v347_v55  ;;  %v2030_v58 = vpop.f32.mrb[22].mxu0  ;;  %v2640_v5 = vadd.f32 %v1950_v63, %v1949_v57  ;;  %v1952_v7 = vpop.f32.mrb[22].mxu1 }
 0x120   :  { %vm440_vm6 = vcmp.ge.f32.partialorder %v2628_v56, 1.0  ;;  %v2642_v6 = vadd.f32 %v2030_v58, %v358_v61  ;;  %v414_v8 = vpop.f32.mrb[23].mxu0  ;;  %v1953_v12 = vpop.f32.mrb[23].mxu1  ;;  %v703_v61 = vadd.f32 %v2567_v10, %v2600_v42 }
 0x121   :  { %v448_v9 = vsel %vm440_vm6, 1.0, %v2160_v34  ;;  %vm438_vm7 = vcmp.ge.f32.partialorder %v2635_v62, 1.0  ;;  %v2648_v11 = vadd.f32 %v414_v8, %v350_v4  ;;  %v2665_v23 = vadd.f32 %v1953_v12, %v1952_v7 }
 0x122   :  { %v1809_v14 = vpack.c.bf16 %v448_v9, %v448_v9  ;;  %v446_v0 = vsel %vm438_vm7, 1.0, %v2160_v34  ;;  %vm441_vm8 = vcmp.ge.f32.partialorder %v2642_v6, 1.0  ;;  %v695_v4 = vadd.f32 %v2557_v60, %v2573_v17 }
 0x123   :  { %v1807_v15 = vpack.c.bf16 %v446_v0, %v446_v0  ;;  %v449_v18 = vsel %vm441_vm8, 1.0, %v2160_v34  ;;  %vm439_vm9 = vcmp.ge.f32.partialorder %v2648_v11, 1.0 }
 0x124   :  { %489 = vst.msk [vmem:[%s3002_s3 + $0x18] sm:$0xf] %vm482_vm2, %v1809_v14  ;;  %v1810_v20 = vpack.c.bf16 %v449_v18, %v449_v18  ;;  %v447_v21 = vsel %vm439_vm9, 1.0, %v2160_v34  ;;  %v706_v14 = vadd.f32 %v2571_v16, %v2602_v43  ;;  %v698_v16 = vadd.f32 %v2561_v1, %v2576_v19 }
 0x125   :  { %487 = vst.msk [vmem:[%s3002_s3 + $0x10] sm:$0xf] %vm482_vm2, %v1807_v15  ;;  %v1808_v25 = vpack.c.bf16 %v447_v21, %v447_v21  ;;  %v2037_v27 = vpop.f32.mrb[24].mxu0  ;;  %v1955_v32 = vpop.f32.mrb[24].mxu1  ;;  %v497_v15 = vsel %vm440_vm6, 0.0, %v2628_v56  ;;  %v498_v1 = vsel %vm441_vm8, 0.0, %v2642_v6 }
 0x126   :  { %490 = vst.msk [vmem:[%s3002_s3 + $0x1c] sm:$0xf] %vm482_vm2, %v1810_v20  ;;  %v752_v29 = vadd.f32 %v2037_v27, %v687_v24  ;;  %v743_v33 = vpop.f32.mrb[25].mxu0  ;;  %v1956_v38 = vpop.f32.mrb[25].mxu1 }
 0x127   :  { %488 = vst.msk [vmem:[%s3002_s3 + $0x14] sm:$0xf] %vm482_vm2, %v1808_v25  ;;  %v744_v35 = vadd.f32 %v743_v33, %v679_v28  ;;  %v2038_v39 = vpop.f32.mrb[26].mxu0  ;;  %v2695_v45 = vadd.f32 %v1956_v38, %v1955_v32  ;;  %v1958_v46 = vpop.f32.mrb[26].mxu1  ;;  %v495_v25 = vsel %vm438_vm7, 0.0, %v2635_v62  ;;  %v496_v62 = vsel %vm439_vm9, 0.0, %v2648_v11 }
 0x128   :  { %v2693_v52 = vadd.f32 %v752_v29, %v493_v36  ;;  %v755_v22 = vadd.f32 %v2038_v39, %v690_v47  ;;  %v746_v48 = vpop.f32.mrb[27].mxu0  ;;  %v1959_v55 = vpop.f32.mrb[27].mxu1 }
 0x129   :  { %v2700_v51 = vadd.f32 %v744_v35, %v491_v44  ;;  %v747_v54 = vadd.f32 %v746_v48, %v682_v41  ;;  %v2707_v57 = vadd.f32 %v1959_v55, %v1958_v46  ;;  %v1035_v41 = vadd.f32 %v2640_v5, %v2563_v2 }
 0x12a   :  { %v2705_v26 = vadd.f32 %v755_v22, %v494_v50  ;;  %vm784_vm10 = vcmp.ge.f32.partialorder %v2693_v52, 1.0  ;;  %v1027_v46 = vadd.f32 %v2586_v30, %v2553_v53  ;;  %v1030_v48 = vadd.f32 %v2615_v49, %v2565_v3 }
 0x12b   :  { %v2710_v59 = vadd.f32 %v747_v54, %v492_v40  ;;  %v792_v31 = vsel %vm784_vm10, 1.0, %v2160_v34  ;;  %vm782_vm11 = vcmp.ge.f32.partialorder %v2700_v51, 1.0  ;;  %v841_v49 = vsel %vm784_vm10, 0.0, %v2693_v52 }
 0x12c   :  { %v1813_v63 = vpack.c.bf16 %v792_v31, %v792_v31  ;;  %v790_v37 = vsel %vm782_vm11, 1.0, %v2160_v34  ;;  %vm785_vm12 = vcmp.ge.f32.partialorder %v2705_v26, 1.0  ;;  %v1038_v31 = vadd.f32 %v2665_v23, %v2569_v13 }
 0x12d   :  { %v2041_v58 = vpop.f32.mrb[28].mxu0  ;;  %v1811_v7 = vpack.c.bf16 %v790_v37, %v790_v37  ;;  %v793_v8 = vsel %vm785_vm12, 1.0, %v2160_v34  ;;  %vm783_vm13 = vcmp.ge.f32.partialorder %v2710_v59, 1.0  ;;  %v1961_v10 = vpop.f32.mrb[28].mxu1 }
 0x12e   :  { %v768_v9 = vadd.f32 %v2041_v58, %v703_v61  ;;  %v759_v12 = vpop.f32.mrb[29].mxu0  ;;  %1649 = vst.msk [vmem:[%s3002_s3 + $0x28] sm:$0xf] %vm482_vm2, %v1813_v63  ;;  %v1814_v0 = vpack.c.bf16 %v793_v8, %v793_v8  ;;  %v791_v60 = vsel %vm783_vm13, 1.0, %v2160_v34  ;;  %v1962_v20 = vpop.f32.mrb[29].mxu1  ;;  %v839_v61 = vsel %vm782_vm11, 0.0, %v2700_v51 }
 0x12f   :  { %v760_v18 = vadd.f32 %v759_v12, %v695_v4  ;;  %v2042_v21 = vpop.f32.mrb[30].mxu0  ;;  %1647 = vst.msk [vmem:[%s3002_s3 + $0x20] sm:$0xf] %vm482_vm2, %v1811_v7  ;;  %v1812_v24 = vpack.c.bf16 %v791_v60, %v791_v60  ;;  %v1963_v28 = vadd.f32 %v1962_v20, %v1961_v10  ;;  %v1964_v29 = vpop.f32.mrb[30].mxu1  ;;  %v842_v12 = vsel %vm785_vm12, 0.0, %v2705_v26 }
 0x130   :  { %v2749_v27 = vadd.f32 %v768_v9, %v497_v15  ;;  %v771_v56 = vadd.f32 %v2042_v21, %v706_v14  ;;  %v762_v32 = vpop.f32.mrb[31].mxu0  ;;  %1650 = vst.msk [vmem:[%s3002_s3 + $0x2c] sm:$0xf] %vm482_vm2, %v1814_v0  ;;  %v1965_v36 = vpop.f32.mrb[31].mxu1  ;;  %v840_v15 = vsel %vm783_vm13, 0.0, %v2710_v59 }
 0x131   :  { %v2758_v33 = vadd.f32 %v760_v18, %v495_v25  ;;  %v763_v47 = vadd.f32 %v762_v32, %v698_v16  ;;  %1648 = vst.msk [vmem:[%s3002_s3 + $0x24] sm:$0xf] %vm482_vm2, %v1812_v24  ;;  %v1966_v38 = vadd.f32 %v1965_v36, %v1964_v29  ;;  %v1051_v21 = vadd.f32 %v1963_v28, %v2600_v42 }
 0x132   :  { %v2767_v35 = vadd.f32 %v771_v56, %v498_v1  ;;  %vm788_vm14 = vcmp.ge.f32.partialorder %v2749_v27, 1.0  ;;  %v1043_v25 = vadd.f32 %v2695_v45, %v2573_v17 }
 0x133   :  { %v2770_v39 = vadd.f32 %v763_v47, %v496_v62  ;;  %v796_v6 = vsel %vm788_vm14, 1.0, %v2160_v34  ;;  %vm786_vm15 = vcmp.ge.f32.partialorder %v2758_v33, 1.0  ;;  %v1054_v47 = vadd.f32 %v1966_v38, %v2602_v43 }
 0x134   :  { %v1817_v44 = vpack.c.bf16 %v796_v6, %v796_v6  ;;  %v794_v11 = vsel %vm786_vm15, 1.0, %v2160_v34  ;;  %vm789_vm0 = vcmp.ge.f32.partialorder %v2767_v35, 1.0  ;;  %v845_v62 = vsel %vm788_vm14, 0.0, %v2749_v27 }
 0x135   :  { %v2049_v22 = vpop.f32.mrb[32].mxu0  ;;  %v1815_v50 = vpack.c.bf16 %v794_v11, %v794_v11  ;;  %v797_v54 = vsel %vm789_vm0, 1.0, %v2160_v34  ;;  %v1989_v55 = vpop.f32.mrb[32].mxu1  ;;  %vm787_vm1 = vcmp.ge.f32.partialorder %v2770_v39, 1.0  ;;  %v1046_v38 = vadd.f32 %v2707_v57, %v2576_v19 }
 0x136   :  { %v1100_v5 = vadd.f32 %v2049_v22, %v1035_v41  ;;  %v1091_v40 = vpop.f32.mrb[33].mxu0  ;;  %1653 = vst.msk [vmem:[%s3002_s3 + $0x38] sm:$0xf] %vm482_vm2, %v1817_v44  ;;  %v1818_v30 = vpack.c.bf16 %v797_v54, %v797_v54  ;;  %v1990_v37 = vpop.f32.mrb[33].mxu1  ;;  %v795_v23 = vsel %vm787_vm1, 1.0, %v2160_v34 }
 0x137   :  { %v1092_v63 = vadd.f32 %v1091_v40, %v1027_v46  ;;  %v2050_v58 = vpop.f32.mrb[34].mxu0  ;;  %1651 = vst.msk [vmem:[%s3002_s3 + $0x30] sm:$0xf] %vm482_vm2, %v1815_v50  ;;  %v2811_v7 = vadd.f32 %v1990_v37, %v1989_v55  ;;  %v1992_v8 = vpop.f32.mrb[34].mxu1  ;;  %v1816_v51 = vpack.c.bf16 %v795_v23, %v795_v23  ;;  %v843_v46 = vsel %vm786_vm15, 0.0, %v2758_v33 }
 0x138   :  { %v2809_v4 = vadd.f32 %v1100_v5, %v841_v49  ;;  %v1103_v52 = vadd.f32 %v2050_v58, %v1038_v31  ;;  %v1094_v9 = vpop.f32.mrb[35].mxu0  ;;  %1654 = vst.msk [vmem:[%s3002_s3 + $0x3c] sm:$0xf] %vm482_vm2, %v1818_v30  ;;  %v1993_v0 = vpop.f32.mrb[35].mxu1  ;;  %v846_v5 = vsel %vm789_vm0, 0.0, %v2767_v35  ;;  %v844_v31 = vsel %vm787_vm1, 0.0, %v2770_v39 }
 0x139   :  { %v2817_v10 = vadd.f32 %v1092_v63, %v839_v61  ;;  %v1095_v14 = vadd.f32 %v1094_v9, %v1030_v48  ;;  %v2827_v18 = vadd.f32 %v1993_v0, %v1992_v8  ;;  %1652 = vst.msk [vmem:[%s3002_s3 + $0x34] sm:$0xf] %vm482_vm2, %v1816_v51 }
 0x13a   :  { %v2822_v60 = vadd.f32 %v1103_v52, %v842_v12  ;;  %vm1132_vm3 = vcmp.ge.f32.partialorder %v2809_v4, 1.0  ;;  %v1375_v52 = vadd.f32 %v2811_v7, %v2553_v53 }
 0x13b   :  { %v2834_v20 = vadd.f32 %v1095_v14, %v840_v15  ;;  %v1140_v26 = vsel %vm1132_vm3, 1.0, %v2160_v34  ;;  %vm1130_vm4 = vcmp.ge.f32.partialorder %v2817_v10, 1.0  ;;  %v1189_v58 = vsel %vm1132_vm3, 0.0, %v2809_v4 }
 0x13c   :  { %v1821_v59 = vpack.c.bf16 %v1140_v26, %v1140_v26  ;;  %v1138_v16 = vsel %vm1130_vm4, 1.0, %v2160_v34  ;;  %vm1133_vm5 = vcmp.ge.f32.partialorder %v2822_v60, 1.0  ;;  %v1187_v4 = vsel %vm1130_vm4, 0.0, %v2817_v10 }
 0x13d   :  { %v2053_v24 = vpop.f32.mrb[36].mxu0  ;;  %v1819_v56 = vpack.c.bf16 %v1138_v16, %v1138_v16  ;;  %v1141_v29 = vsel %vm1133_vm5, 1.0, %v2160_v34  ;;  %vm1131_vm6 = vcmp.ge.f32.partialorder %v2834_v20, 1.0  ;;  %v1995_v28 = vpop.f32.mrb[36].mxu1  ;;  %v1378_v15 = vadd.f32 %v2827_v18, %v2565_v3 }
 0x13e   :  { %v1116_v32 = vadd.f32 %v2053_v24, %v1051_v21  ;;  %v1107_v1 = vpop.f32.mrb[37].mxu0  ;;  %1723 = vst.msk [vmem:[%s3002_s3 + $0x48] sm:$0xf] %vm482_vm2, %v1821_v59  ;;  %v1822_v36 = vpack.c.bf16 %v1141_v29, %v1141_v29  ;;  %v1139_v45 = vsel %vm1131_vm6, 1.0, %v2160_v34  ;;  %v1996_v41 = vpop.f32.mrb[37].mxu1  ;;  %v1190_v24 = vsel %vm1133_vm5, 0.0, %v2822_v60 }
 0x13f   :  { %v1108_v6 = vadd.f32 %v1107_v1, %v1043_v25  ;;  %v2054_v44 = vpop.f32.mrb[38].mxu0  ;;  %1721 = vst.msk [vmem:[%s3002_s3 + $0x40] sm:$0xf] %vm482_vm2, %v1819_v56  ;;  %v1820_v11 = vpack.c.bf16 %v1139_v45, %v1139_v45  ;;  %v1997_v48 = vadd.f32 %v1996_v41, %v1995_v28  ;;  %v1998_v50 = vpop.f32.mrb[38].mxu1  ;;  %v1188_v28 = vsel %vm1131_vm6, 0.0, %v2834_v20 }
 0x140   :  { %v2868_v22 = vadd.f32 %v1116_v32, %v845_v62  ;;  %v1119_v27 = vadd.f32 %v2054_v44, %v1054_v47  ;;  %v1110_v54 = vpop.f32.mrb[39].mxu0  ;;  %1724 = vst.msk [vmem:[%s3002_s3 + $0x4c] sm:$0xf] %vm482_vm2, %v1822_v36  ;;  %v1999_v40 = vpop.f32.mrb[39].mxu1 }
 0x141   :  { %v2877_v57 = vadd.f32 %v1108_v6, %v843_v46  ;;  %v1111_v55 = vadd.f32 %v1110_v54, %v1046_v38  ;;  %1722 = vst.msk [vmem:[%s3002_s3 + $0x44] sm:$0xf] %vm482_vm2, %v1820_v11  ;;  %v2000_v30 = vadd.f32 %v1999_v40, %v1998_v50  ;;  %v1383_v63 = vadd.f32 %v1997_v48, %v2563_v2 }
 0x142   :  { %vm1136_vm7 = vcmp.ge.f32.partialorder %v2868_v22, 1.0  ;;  %v2887_v33 = vadd.f32 %v1119_v27, %v846_v5 }
 0x143   :  { %v1144_v35 = vsel %vm1136_vm7, 1.0, %v2160_v34  ;;  %v2895_v49 = vadd.f32 %v1111_v55, %v844_v31  ;;  %vm1134_vm8 = vcmp.ge.f32.partialorder %v2877_v57, 1.0  ;;  %v1386_v14 = vadd.f32 %v2000_v30, %v2569_v13 }
 0x144   :  { %v1825_v61 = vpack.c.bf16 %v1144_v35, %v1144_v35  ;;  %vm1137_vm9 = vcmp.ge.f32.partialorder %v2887_v33, 1.0  ;;  %v1142_v37 = vsel %vm1134_vm8, 1.0, %v2160_v34  ;;  %v1191_v5 = vsel %vm1134_vm8, 0.0, %v2877_v57 }
 0x145   :  { %v1145_v39 = vsel %vm1137_vm9, 1.0, %v2160_v34  ;;  %v2061_v23 = vpop.f32.mrb[40].mxu0  ;;  %v1823_v8 = vpack.c.bf16 %v1142_v37, %v1142_v37  ;;  %v2001_v9 = vpop.f32.mrb[40].mxu1  ;;  %vm1135_vm10 = vcmp.ge.f32.partialorder %v2895_v49, 1.0 }
 0x146   :  { %1727 = vst.msk [vmem:[%s3002_s3 + $0x58] sm:$0xf] %vm482_vm2, %v1825_v61  ;;  %v1826_v2 = vpack.c.bf16 %v1145_v39, %v1145_v39  ;;  %v1448_v51 = vadd.f32 %v2061_v23, %v1383_v63  ;;  %v1439_v12 = vpop.f32.mrb[41].mxu0  ;;  %v2002_v0 = vpop.f32.mrb[41].mxu1  ;;  %v1143_v13 = vsel %vm1135_vm10, 1.0, %v2160_v34  ;;  %v1192_v63 = vsel %vm1135_vm10, 0.0, %v2895_v49 }
 0x147   :  { %v1440_v53 = vadd.f32 %v1439_v12, %v1375_v52  ;;  %v2062_v7 = vpop.f32.mrb[42].mxu0  ;;  %1725 = vst.msk [vmem:[%s3002_s3 + $0x50] sm:$0xf] %vm482_vm2, %v1823_v8  ;;  %v2003_v26 = vadd.f32 %v2002_v0, %v2001_v9  ;;  %v2004_v21 = vpop.f32.mrb[42].mxu1  ;;  %v1824_v3 = vpack.c.bf16 %v1143_v13, %v1143_v13  ;;  %v1193_v23 = vsel %vm1136_vm7, 0.0, %v2868_v22 }
 0x148   :  { %1728 = vst.msk [vmem:[%s3002_s3 + $0x5c] sm:$0xf] %vm482_vm2, %v1826_v2  ;;  %v1472_v10 = vadd.f32 %v1448_v51, %v1189_v58  ;;  %v1451_v59 = vadd.f32 %v2062_v7, %v1386_v14  ;;  %v1442_v16 = vpop.f32.mrb[43].mxu0  ;;  %v2005_v25 = vpop.f32.mrb[43].mxu1  ;;  %v1194_v49 = vsel %vm1137_vm9, 0.0, %v2887_v33 }
 0x149   :  { %v1470_v18 = vadd.f32 %v1440_v53, %v1187_v4  ;;  %v1443_v56 = vadd.f32 %v1442_v16, %v1378_v15  ;;  %v2006_v32 = vadd.f32 %v2005_v25, %v2004_v21  ;;  %1726 = vst.msk [vmem:[%s3002_s3 + $0x54] sm:$0xf] %vm482_vm2, %v1824_v3  ;;  %v1391_v20 = vadd.f32 %v2003_v26, %v2573_v17 }
 0x14a   :  { %vm1480_vm11 = vcmp.ge.f32.partialorder %v1472_v10, 1.0  ;;  %v1473_v29 = vadd.f32 %v1451_v59, %v1190_v24 }
 0x14b   :  { %v1488_v1 = vsel %vm1480_vm11, 1.0, %v2160_v34  ;;  %vm1478_vm12 = vcmp.ge.f32.partialorder %v1470_v18, 1.0  ;;  %v1471_v47 = vadd.f32 %v1443_v56, %v1188_v28  ;;  %v1394_v17 = vadd.f32 %v2006_v32, %v2576_v19 }
 0x14c   :  { %v1829_v36 = vpack.c.bf16 %v1488_v1, %v1488_v1  ;;  %v1486_v60 = vsel %vm1478_vm12, 1.0, %v2160_v34  ;;  %vm1481_vm13 = vcmp.ge.f32.partialorder %v1473_v29, 1.0 }
 0x14d   :  { %v1827_v45 = vpack.c.bf16 %v1486_v60, %v1486_v60  ;;  %v1489_v62 = vsel %vm1481_vm13, 1.0, %v2160_v34  ;;  %vm1479_vm14 = vcmp.ge.f32.partialorder %v1471_v47, 1.0  ;;  %v2065_v6 = vpop.f32.mrb[44].mxu0  ;;  %v2007_v38 = vpop.f32.mrb[44].mxu1 }
 0x14e   :  { %1797 = vst.msk [vmem:[%s3002_s3 + $0x68] sm:$0xf] %vm482_vm2, %v1829_v36  ;;  %v1830_v41 = vpack.c.bf16 %v1489_v62, %v1489_v62  ;;  %v1487_v44 = vsel %vm1479_vm14, 1.0, %v2160_v34  ;;  %v1455_v11 = vpop.f32.mrb[45].mxu0  ;;  %v2008_v48 = vpop.f32.mrb[45].mxu1 }
 0x14f   :  { %1795 = vst.msk [vmem:[%s3002_s3 + $0x60] sm:$0xf] %vm482_vm2, %v1827_v45  ;;  %v1828_v46 = vpack.c.bf16 %v1487_v44, %v1487_v44  ;;  %v1456_v27 = vadd.f32 %v1455_v11, %v1391_v20  ;;  %v2066_v50 = vpop.f32.mrb[46].mxu0  ;;  %v2009_v54 = vadd.f32 %v2008_v48, %v2007_v38  ;;  %v2010_v55 = vpop.f32.mrb[46].mxu1 }
 0x150   :  { %1798 = vst.msk [vmem:[%s3002_s3 + $0x6c] sm:$0xf] %vm482_vm2, %v1830_v41  ;;  %v1458_v40 = vpop.f32.mrb[47].mxu0  ;;  %v2011_v30 = vpop.f32.mrb[47].mxu1 }
 0x151   :  { %1796 = vst.msk [vmem:[%s3002_s3 + $0x64] sm:$0xf] %vm482_vm2, %v1828_v46  ;;  %v1474_v31 = vadd.f32 %v1456_v27, %v1191_v5  ;;  %v1459_v19 = vadd.f32 %v1458_v40, %v1394_v17  ;;  %v1399_v35 = vadd.f32 %v2009_v54, %v2600_v42  ;;  %v2012_v61 = vadd.f32 %v2011_v30, %v2010_v55 }
 0x153   :  { %vm1482_vm15 = vcmp.ge.f32.partialorder %v1474_v31, 1.0  ;;  %v1475_v37 = vadd.f32 %v1459_v19, %v1192_v63  ;;  %v1464_v57 = vadd.f32 %v2065_v6, %v1399_v35  ;;  %v1402_v58 = vadd.f32 %v2012_v61, %v2602_v43 }
 0x154   :  { %v1490_v39 = vsel %vm1482_vm15, 1.0, %v2160_v34 }
 0x155   :  { %v1831_v52 = vpack.c.bf16 %v1490_v39, %v1490_v39  ;;  %vm1483_vm0 = vcmp.ge.f32.partialorder %v1475_v37, 1.0  ;;  %v1476_v8 = vadd.f32 %v1464_v57, %v1193_v23  ;;  %v1467_v42 = vadd.f32 %v2066_v50, %v1402_v58 }
 0x156   :  { %v1491_v2 = vsel %vm1483_vm0, 1.0, %v2160_v34 }
 0x157   :  { %1799 = vst.msk [vmem:[%s3002_s3 + $0x70] sm:$0xf] %vm482_vm2, %v1831_v52  ;;  %v1832_v43 = vpack.c.bf16 %v1491_v2, %v1491_v2  ;;  %vm1484_vm1 = vcmp.ge.f32.partialorder %v1476_v8, 1.0  ;;  %v1477_v9 = vadd.f32 %v1467_v42, %v1194_v49 }
 0x158   :  { %v1492_v22 = vsel %vm1484_vm1, 1.0, %v2160_v34 }
 0x159   :  { %1800 = vst.msk [vmem:[%s3002_s3 + $0x74] sm:$0xf] %vm482_vm2, %v1832_v43  ;;  %v1833_v51 = vpack.c.bf16 %v1492_v22, %v1492_v22  ;;  %vm1485_vm3 = vcmp.ge.f32.partialorder %v1477_v9, 1.0 }
 0x15a   :  { %v1493_v12 = vsel %vm1485_vm3, 1.0, %v2160_v34 }
 0x15b   :  { %1801 = vst.msk [vmem:[%s3002_s3 + $0x78] sm:$0xf] %vm482_vm2, %v1833_v51  ;;  %v1834_v33 = vpack.c.bf16 %v1493_v12, %v1493_v12 }
 0x15d   :  { %1802 = vst.msk [vmem:[%s3002_s3 + $0x7c] sm:$0xf] %vm482_vm2, %v1834_v33 }

// kernel: dvs_event_net_forward.11
= control target key start
LH: loop header
LB: loop body
LE: loop exit
PB: predicated region body
PF: predicated region fallthrough
CT: control target
= control target key end

     0   :  { %v3510_v1 = vmov 0   ;;  %vm475_vm0 = vcmask 523264   ;;  %vm739_vm2 = vcmask 60416   ;;  %s4630_s0 = inlined_call_operand.vmem [shape: bf16[4,576,8], index: 0, kind: input, shape index: {}]   ;;  %s4631_s1 = inlined_call_operand.vmem [shape: bf16[64,576], index: 1, kind: input, shape index: {}]   ;;  %s4632_s2 = inlined_call_operand.vmem [shape: f32[64,1], index: 2, kind: input, shape index: {}]   ;;  %s4633_s3 = inlined_call_operand.vmem [shape: bf16[4,64,8], index: 3, kind: output, shape index: {}]  }
   0x1   :  { %v3327_v0 = vld [vmem:[%s4630_s0 + $0x40] sm:$0xff]   ;;  %3325 = vset.pattern.permute.xlu0 %v3510_v1  ;;  %3326 = vset.pattern.permute.xlu1 %v3510_v1  ;;  %v3331_v5 = vld [vmem:[%s4630_s0 + $0x48] sm:$0xff]   ;;  %v3335_v9 = vld [vmem:[%s4630_s0 + $0x50] sm:$0xff]  }
   0x2   :  { %v3328_v2 = vld [vmem:[%s4630_s0] sm:$0xff]   ;;  %2907 = vmatprep.subr.bf16.mxu0 %v3327_v0  ;;  %v3332_v6 = vld [vmem:[%s4630_s0 + $0x8] sm:$0xff]   ;;  %v3336_v10 = vld [vmem:[%s4630_s0 + $0x10] sm:$0xff]  }
   0x3   :  { %v3329_v3 = vld [vmem:[%s4630_s0 + $0xc0] sm:$0xff]   ;;  %2908 = vmatpush3.bf16.msra.mxu0 %v3328_v2  ;;  %v3333_v7 = vld [vmem:[%s4630_s0 + $0xc8] sm:$0xff]   ;;  %v3337_v11 = vld [vmem:[%s4630_s0 + $0xd0] sm:$0xff]  }
   0x4   :  { %v3330_v4 = vld [vmem:[%s4630_s0 + $0x80] sm:$0xff]   ;;  %2947 = vmatprep.subr.bf16.mxu1 %v3329_v3  ;;  %2909 = vmatprep.subr.bf16.mxu0 %v3331_v5  ;;  %v3334_v8 = vld [vmem:[%s4630_s0 + $0x88] sm:$0xff]   ;;  %v3338_v12 = vld [vmem:[%s4630_s0 + $0x90] sm:$0xff]  }
   0x5   :  { %2948 = vmatpush3.bf16.msra.mxu1 %v3330_v4  ;;  %v3339_v13 = vld [vmem:[%s4630_s0 + $0x58] sm:$0xff]   ;;  %v3343_v17 = vld [vmem:[%s4630_s0 + $0x60] sm:$0xff]   ;;  %v3347_v21 = vld [vmem:[%s4630_s0 + $0x68] sm:$0xff]  }
   0x6   :  { %2949 = vmatprep.subr.bf16.mxu1 %v3333_v7  ;;  %v3340_v14 = vld [vmem:[%s4630_s0 + $0x18] sm:$0xff]   ;;  %v3344_v18 = vld [vmem:[%s4630_s0 + $0x20] sm:$0xff]   ;;  %v3348_v22 = vld [vmem:[%s4630_s0 + $0x28] sm:$0xff]  }
   0x7   :  { %2910 = vmatpush3.bf16.msra.mxu0 %v3332_v6  ;;  %v3341_v15 = vld [vmem:[%s4630_s0 + $0xd8] sm:$0xff]   ;;  %v3345_v19 = vld [vmem:[%s4630_s0 + $0xe0] sm:$0xff]   ;;  %v3349_v23 = vld [vmem:[%s4630_s0 + $0xe8] sm:$0xff]  }
   0x8   :  { %2911 = vmatprep.subr.bf16.mxu0 %v3335_v9  ;;  %v3342_v16 = vld [vmem:[%s4630_s0 + $0x98] sm:$0xff]   ;;  %v3346_v20 = vld [vmem:[%s4630_s0 + $0xa0] sm:$0xff]   ;;  %v3350_v24 = vld [vmem:[%s4630_s0 + $0xa8] sm:$0xff]  }
   0x9   :  { %2950 = vmatpush3.bf16.msra.mxu1 %v3334_v8  ;;  %v3351_v25 = vld [vmem:[%s4630_s0 + $0x70] sm:$0xff]   ;;  %v3355_v29 = vld [vmem:[%s4630_s0 + $0x78] sm:$0xff]   ;;  %v3362_v35 = vld [vmem:[%s4630_s0 + $0x100] sm:$0xff]  }
   0xa   :  { %2951 = vmatprep.subr.bf16.mxu1 %v3337_v11  ;;  %v3352_v26 = vld [vmem:[%s4630_s0 + $0x30] sm:$0xff]   ;;  %v3356_v30 = vld [vmem:[%s4630_s0 + $0x38] sm:$0xff]   ;;  %v3646_v36 = vld [vmem:[%s4631_s1 + $0xc] ss:$20 sps:$4 sm:$0xff]  }
   0xb   :  { %2912 = vmatpush3.bf16.msra.mxu0 %v3336_v10  ;;  %v3353_v27 = vld [vmem:[%s4630_s0 + $0xf0] sm:$0xff]   ;;  %v3357_v31 = vld [vmem:[%s4630_s0 + $0xf8] sm:$0xff]   ;;  %v3366_v38 = vld [vmem:[%s4630_s0 + $0x160] sm:$0xff]   ;;  %585 = vmatprep.mubr.bf16.mxu1 %v3646_v36 }
   0xc   :  { %2913 = vmatprep.subr.bf16.mxu0 %v3339_v13  ;;  %v3354_v28 = vld [vmem:[%s4630_s0 + $0xb0] sm:$0xff]   ;;  %v3628_v32 = vld [vmem:[%s4631_s1 + $0x4] ss:$20 sps:$4 sm:$0xff]   ;;  %v3651_v37 = vld [vmem:[%s4631_s1 + $0x8] ss:$20 sps:$4 sm:$0xff]  }
   0xd   :  { %2952 = vmatpush3.bf16.msra.mxu1 %v3338_v12  ;;  %v3360_v33 = vld [vmem:[%s4630_s0 + $0xb8] sm:$0xff]   ;;  %520 = vmatprep.mubr.bf16.mxu0 %v3628_v32  ;;  %v3637_v34 = vld [vmem:[%s4631_s1] ss:$20 sps:$4 sm:$0xff]   ;;  %v3368_v40 = vld [vmem:[%s4630_s0 + $0x168] sm:$0xff]  }
   0xe   :  { %2953 = vmatprep.subr.bf16.mxu1 %v3341_v15  ;;  %v3367_v39 = vld [vmem:[%s4630_s0 + $0x120] sm:$0xff]   ;;  %v3371_v42 = vld [vmem:[%s4630_s0 + $0x128] sm:$0xff]   ;;  %v3377_v47 = vld [vmem:[%s4630_s0 + $0x170] sm:$0xff]  }
   0xf   :  { %2914 = vmatpush3.bf16.msra.mxu0 %v3340_v14  ;;  %v3667_v41 = vld [vmem:[%s4631_s1 + $0x2c] ss:$20 sps:$4 sm:$0xff]   ;;  %v3675_v43 = vld [vmem:[%s4631_s1 + $0x28] ss:$20 sps:$4 sm:$0xff]   ;;  %v3690_v46 = vld [vmem:[%s4631_s1 + $0x30] ss:$20 sps:$4 sm:$0xff]  }
  0x10   :  { %2915 = vmatprep.subr.bf16.mxu0 %v3343_v17  ;;  %v3373_v44 = vld [vmem:[%s4630_s0 + $0x108] sm:$0xff]   ;;  %v3378_v48 = vld [vmem:[%s4630_s0 + $0x130] sm:$0xff]   ;;  %v3379_v49 = vld [vmem:[%s4630_s0 + $0x178] sm:$0xff]  }
  0x11   :  { %2954 = vmatpush3.bf16.msra.mxu1 %v3342_v16  ;;  %v3684_v45 = vld [vmem:[%s4631_s1 + $0x34] ss:$20 sps:$4 sm:$0xff]   ;;  %v3382_v51 = vld [vmem:[%s4630_s0 + $0x138] sm:$0xff]   ;;  %v3714_v52 = vld [vmem:[%s4631_s1 + $0x50] ss:$20 sps:$4 sm:$0xff]  }
  0x12   :  { %2955 = vmatprep.subr.bf16.mxu1 %v3345_v19  ;;  %v3706_v50 = vld [vmem:[%s4631_s1 + $0x54] ss:$20 sps:$4 sm:$0xff]   ;;  %v3723_v54 = vld [vmem:[%s4631_s1 + $0x5c] ss:$20 sps:$4 sm:$0xff]   ;;  %v3728_v55 = vld [vmem:[%s4631_s1 + $0x58] ss:$20 sps:$4 sm:$0xff]  }
  0x13   :  { %2916 = vmatpush3.bf16.msra.mxu0 %v3344_v18  ;;  %v3384_v53 = vld [vmem:[%s4630_s0 + $0x110] sm:$0xff]   ;;  %v3388_v56 = vld [vmem:[%s4630_s0 + $0x180] sm:$0xff]   ;;  %v3390_v58 = vld [vmem:[%s4630_s0 + $0x188] sm:$0xff]  }
  0x14   :  { %2917 = vmatprep.subr.bf16.mxu0 %v3347_v21  ;;  %v3389_v57 = vld [vmem:[%s4630_s0 + $0x140] sm:$0xff]   ;;  %v3745_v59 = vld [vmem:[%s4631_s1 + $0x7c] ss:$20 sps:$4 sm:$0xff]   ;;  %v3393_v60 = vld [vmem:[%s4630_s0 + $0x148] sm:$0xff]  }
  0x15   :  { %2956 = vmatpush3.bf16.msra.mxu1 %v3346_v20  ;;  %v3754_v61 = vld [vmem:[%s4631_s1 + $0x78] ss:$20 sps:$4 sm:$0xff]   ;;  %v3767_v0 = vld [vmem:[%s4631_s1 + $0x80] ss:$20 sps:$4 sm:$0xff]   ;;  %v3784_v4 = vld [vmem:[%s4631_s1 + $0x10] ss:$20 sps:$4 sm:$0xff]  }
  0x16   :  { %2957 = vmatprep.subr.bf16.mxu1 %v3349_v23  ;;  %v3395_v62 = vld [vmem:[%s4630_s0 + $0x118] sm:$0xff]   ;;  %v3399_v1 = vld [vmem:[%s4630_s0 + $0x190] sm:$0xff]   ;;  %v3404_v6 = vld [vmem:[%s4630_s0 + $0x1e0] sm:$0xff]  }
  0x17   :  { %2918 = vmatpush3.bf16.msra.mxu0 %v3348_v22  ;;  %v3762_v63 = vld [vmem:[%s4631_s1 + $0x84] ss:$20 sps:$4 sm:$0xff]   ;;  %v3400_v2 = vld [vmem:[%s4630_s0 + $0x150] sm:$0xff]   ;;  %v3407_v9 = vld [vmem:[%s4630_s0 + $0x1e8] sm:$0xff]  }
  0x18   :  { %2919 = vmatprep.subr.bf16.mxu0 %v3351_v25  ;;  %v3401_v3 = vld [vmem:[%s4630_s0 + $0x198] sm:$0xff]   ;;  %v3406_v8 = vld [vmem:[%s4630_s0 + $0x1a0] sm:$0xff]   ;;  %v3408_v10 = vld [vmem:[%s4630_s0 + $0x1a8] sm:$0xff]  }
  0x19   :  { %2958 = vmatpush3.bf16.msra.mxu1 %v3350_v24  ;;  %v3403_v5 = vld [vmem:[%s4630_s0 + $0x158] sm:$0xff]   ;;  %v3814_v11 = vld [vmem:[%s4631_s1 + $0x60] ss:$20 sps:$4 sm:$0xff]   ;;  %v3420_v20 = vld [vmem:[%s4630_s0 + $0x228] sm:$0xff]  }
  0x1a   :  { %2959 = vmatprep.subr.bf16.mxu1 %v3353_v27  ;;  %v3798_v7 = vld [vmem:[%s4631_s1 + $0x38] ss:$20 sps:$4 sm:$0xff]   ;;  %v3410_v12 = vld [vmem:[%s4630_s0 + $0x1f0] sm:$0xff]   ;;  %v3825_v13 = vld [vmem:[%s4631_s1 + $0x88] ss:$20 sps:$4 sm:$0xff]  }
  0x1b   :  { %2920 = vmatpush3.bf16.msra.mxu0 %v3352_v26  ;;  %v3412_v14 = vld [vmem:[%s4630_s0 + $0x1b0] sm:$0xff]   ;;  %v3413_v15 = vld [vmem:[%s4630_s0 + $0x1f8] sm:$0xff]   ;;  %v3415_v17 = vld [vmem:[%s4630_s0 + $0x200] sm:$0xff]  }
  0x1c   :  { %2921 = vmatprep.subr.bf16.mxu0 %v3355_v29  ;;  %v3414_v16 = vld [vmem:[%s4630_s0 + $0x1b8] sm:$0xff]   ;;  %v3417_v18 = vld [vmem:[%s4630_s0 + $0x220] sm:$0xff]   ;;  %v3418_v21 = vld [vmem:[%s4630_s0 + $0x208] sm:$0xff]  }
  0x1d   :  { %2960 = vmatpush3.bf16.msra.mxu1 %v3354_v28  ;;  %v3416_v19 = vld [vmem:[%s4630_s0 + $0x1c0] sm:$0xff]   ;;  %v3423_v22 = vld [vmem:[%s4630_s0 + $0x230] sm:$0xff]   ;;  %v3419_v23 = vld [vmem:[%s4630_s0 + $0x1c8] sm:$0xff]  }
  0x1e   :  { %2961 = vmatprep.subr.bf16.mxu1 %v3357_v31  ;;  %v3421_v24 = vld [vmem:[%s4630_s0 + $0x210] sm:$0xff]   ;;  %v3426_v25 = vld [vmem:[%s4630_s0 + $0x238] sm:$0xff]   ;;  %v3429_v28 = vld [vmem:[%s4630_s0 + $0x300] sm:$0xff]  }
  0x1f   :  { %2922 = vmatpush3.bf16.msra.mxu0 %v3356_v30  ;;  %v3422_v26 = vld [vmem:[%s4630_s0 + $0x1d0] sm:$0xff]   ;;  %v3424_v27 = vld [vmem:[%s4630_s0 + $0x218] sm:$0xff]   ;;  %v3427_v30 = vld [vmem:[%s4630_s0 + $0x280] sm:$0xff]  }
  0x20   :  { %3259 = vmatprep.subr.bf16.mxu0 %v3362_v35  ;;  %v3425_v29 = vld [vmem:[%s4630_s0 + $0x1d8] sm:$0xff]   ;;  %v3428_v31 = vld [vmem:[%s4630_s0 + $0x240] sm:$0xff]  }
  0x21   :  { %2962 = vmatpush3.bf16.msra.mxu1 %v3360_v33  ;;  %v3431_v33 = vld [vmem:[%s4630_s0 + $0x288] sm:$0xff]  }
  0x22   :  { %521 = vmatmul.mubr.bf16.vlgmr.msra.gmra.mrb[0].mxu0 %v3637_v34  ;;  %2995 = vmatprep.subr.bf16.mxu1 %v3366_v38  ;;  %v3432_v38 = vld [vmem:[%s4630_s0 + $0x248] sm:$0xff]  }
  0x23   :  { %3260 = vmatpush3.bf16.msra.mxu0 %v3362_v35  ;;  %528 = vmatprep.mubr.bf16.mxu0 %v3667_v41  ;;  %v3430_v35 = vld [vmem:[%s4630_s0 + $0x2c0] sm:$0xff]  }
  0x24   :  { %586 = vmatmul.mubr.bf16.vlgmr.msra.gmra.mrb[0].mxu1 %v3651_v37  ;;  %3261 = vmatprep.subr.bf16.mxu0 %v3373_v44 }
  0x25   :  { %2996 = vmatpush3.bf16.msra.mxu1 %v3367_v39  ;;  %593 = vmatprep.mubr.bf16.mxu1 %v3684_v45  ;;  %v3433_v39 = vld [vmem:[%s4630_s0 + $0x308] sm:$0xff]  }
  0x26   :  { %2997 = vmatprep.subr.bf16.mxu1 %v3368_v40  ;;  %v3435_v40 = vld [vmem:[%s4630_s0 + $0x290] sm:$0xff]  }
  0x27   :  { %3262 = vmatpush3.bf16.msra.mxu0 %v3373_v44  ;;  %v3436_v44 = vld [vmem:[%s4630_s0 + $0x250] sm:$0xff]  }
  0x28   :  { %3263 = vmatprep.subr.bf16.mxu0 %v3384_v53 }
  0x29   :  { %2998 = vmatpush3.bf16.msra.mxu1 %v3371_v42  ;;  %v3434_v42 = vld [vmem:[%s4630_s0 + $0x2c8] sm:$0xff]  }
  0x2a   :  { %529 = vmatmul.mubr.bf16.gmra.mrb[4].mxu0 %v3675_v43  ;;  %2999 = vmatprep.subr.bf16.mxu1 %v3377_v47  ;;  %v3437_v47 = vld [vmem:[%s4630_s0 + $0x310] sm:$0xff]  }
  0x2b   :  { %536 = vmatprep.mubr.bf16.mxu0 %v3706_v50  ;;  %3264 = vmatpush3.bf16.msra.mxu0 %v3384_v53  ;;  %v3441_v53 = vld [vmem:[%s4630_s0 + $0x318] sm:$0xff]  }
  0x2c   :  { %594 = vmatmul.mubr.bf16.gmra.mrb[4].mxu1 %v3690_v46  ;;  %3265 = vmatprep.subr.bf16.mxu0 %v3395_v62 }
  0x2d   :  { %3000 = vmatpush3.bf16.msra.mxu1 %v3378_v48  ;;  %601 = vmatprep.mubr.bf16.mxu1 %v3723_v54  ;;  %v3439_v48 = vld [vmem:[%s4630_s0 + $0x298] sm:$0xff]  }
  0x2e   :  { %3001 = vmatprep.subr.bf16.mxu1 %v3379_v49  ;;  %v3438_v49 = vld [vmem:[%s4630_s0 + $0x2d0] sm:$0xff]  }
  0x2f   :  { %3266 = vmatpush3.bf16.msra.mxu0 %v3395_v62  ;;  %v3445_v62 = vld [vmem:[%s4630_s0 + $0x320] sm:$0xff]  }
  0x30   :  { %3035 = vmatprep.subr.bf16.mxu0 %v3404_v6  ;;  %v3451_v6 = vld [vmem:[%s4630_s0 + $0x2b0] sm:$0xff]  }
  0x31   :  { %3002 = vmatpush3.bf16.msra.mxu1 %v3382_v51  ;;  %v3440_v51 = vld [vmem:[%s4630_s0 + $0x258] sm:$0xff]  }
  0x32   :  { %537 = vmatmul.mubr.bf16.gmra.mrb[8].mxu0 %v3714_v52  ;;  %3003 = vmatprep.subr.bf16.mxu1 %v3388_v56  ;;  %v39_v56 = vld [vmem:[%s4632_s2] sm:$0xff] }
  0x33   :  { %544 = vmatprep.mubr.bf16.mxu0 %v3745_v59  ;;  %49 = vperm.xlu0 %3325, %v39_v56   ;;  %v3484_v56 = vld [vmem:[%s4630_s0 + $0x3f0] sm:$0xff]  }
  0x34   :  { %602 = vmatmul.mubr.bf16.gmra.mrb[8].mxu1 %v3728_v55 }
  0x35   :  { %3004 = vmatpush3.bf16.msra.mxu1 %v3389_v57  ;;  %609 = vmatprep.mubr.bf16.mxu1 %v3762_v63  ;;  %v3442_v57 = vld [vmem:[%s4630_s0 + $0x2d8] sm:$0xff]  }
  0x36   :  { %3005 = vmatprep.subr.bf16.mxu1 %v3390_v58  ;;  %v3443_v58 = vld [vmem:[%s4630_s0 + $0x2a0] sm:$0xff]  }
  0x39   :  { %3006 = vmatpush3.bf16.msra.mxu1 %v3393_v60  ;;  %v3444_v60 = vld [vmem:[%s4630_s0 + $0x260] sm:$0xff]  }
  0x3a   :  { %545 = vmatmul.mubr.bf16.gmra.mrb[12].mxu0 %v3754_v61  ;;  %3007 = vmatprep.subr.bf16.mxu1 %v3399_v1  ;;  %v3447_v1 = vld [vmem:[%s4630_s0 + $0x2a8] sm:$0xff]  }
  0x3b   :  { %3267 = vmatprep.mubr.msk.bf16.mxu0 %vm475_vm0, %v3784_v4 }
  0x3c   :  { %610 = vmatmul.mubr.bf16.gmra.mrb[12].mxu1 %v3767_v0 }
  0x3d   :  { %3008 = vmatpush3.bf16.msra.mxu1 %v3400_v2  ;;  %1077 = vmatprep.mubr.bf16.mxu1 %v3628_v32  ;;  %v40_v2 = vld [vmem:[%s4632_s2 + $0x8] sm:$0xff] }
  0x3e   :  { %3009 = vmatprep.subr.bf16.mxu1 %v3401_v3  ;;  %v3446_v3 = vld [vmem:[%s4630_s0 + $0x2e0] sm:$0xff]   ;;  %54 = vperm.xlu0 %3325, %v40_v2  }
  0x3f   :  { %v3502_v2 = vld [vmem:[%s4631_s1 + $0xc] ss:$20 sps:$4 sm:$0xff]  }
  0x41   :  { %3010 = vmatpush3.bf16.msra.mxu1 %v3403_v5  ;;  %v3449_v5 = vld [vmem:[%s4630_s0 + $0x328] sm:$0xff]  }
  0x42   :  { %3268 = vmatmul.mubr.msk.bf16.vlgmr.msra.gmra.mrb[16].mxu0 %vm475_vm0, %v3798_v7  ;;  %3275 = vmatprep.subr.bf16.mxu1 %v3417_v18 }
  0x43   :  { %3036 = vmatpush3.bf16.msra.mxu0 %v3406_v8  ;;  %3271 = vmatprep.mubr.msk.bf16.mxu0 %vm475_vm0, %v3814_v11  ;;  %v41_v8 = vld [vmem:[%s4632_s2 + $0x10] sm:$0xff] }
  0x44   :  { %3037 = vmatprep.subr.bf16.mxu0 %v3407_v9  ;;  %1078 = vmatmul.mubr.bf16.vlgmr.msra.gmra.mrb[16].mxu1 %v3637_v34  ;;  %v3450_v9 = vld [vmem:[%s4630_s0 + $0x2e8] sm:$0xff]  }
  0x45   :  { %1085 = vmatprep.mubr.bf16.mxu1 %v3667_v41  ;;  %3276 = vmatpush3.bf16.msra.mxu1 %v3417_v18  ;;  %v3457_v18 = vld [vmem:[%s4630_s0 + $0x338] sm:$0xff]  }
  0x46   :  { %3277 = vmatprep.subr.bf16.mxu1 %v3420_v20  ;;  %59 = vperm.xlu1 %3326, %v41_v8   ;;  %v3504_v8 = vld [vmem:[%s4631_s1 + $0x50] ss:$20 sps:$4 sm:$0xff]  }
  0x47   :  { %3038 = vmatpush3.bf16.msra.mxu0 %v3408_v10  ;;  %v3452_v10 = vld [vmem:[%s4630_s0 + $0x270] sm:$0xff]  }
  0x48   :  { %3039 = vmatprep.subr.bf16.mxu0 %v3410_v12  ;;  %v3453_v12 = vld [vmem:[%s4630_s0 + $0x330] sm:$0xff]  }
  0x49   :  { %3278 = vmatpush3.bf16.msra.mxu1 %v3420_v20  ;;  %v3459_v20 = vld [vmem:[%s4630_s0 + $0x340] sm:$0xff]  }
  0x4a   :  { %3272 = vmatmul.mubr.msk.bf16.gmra.mrb[20].mxu0 %vm475_vm0, %v3825_v13  ;;  %3279 = vmatprep.subr.bf16.mxu1 %v3423_v22 }
  0x4b   :  { %3040 = vmatpush3.bf16.msra.mxu0 %v3412_v14  ;;  %1142 = vmatprep.mubr.bf16.mxu0 %v3646_v36  ;;  %v42_v14 = vld [vmem:[%s4632_s2 + $0x18] sm:$0xff] }
  0x4c   :  { %3041 = vmatprep.subr.bf16.mxu0 %v3413_v15  ;;  %1086 = vmatmul.mubr.bf16.gmra.mrb[20].mxu1 %v3675_v43  ;;  %v3454_v15 = vld [vmem:[%s4630_s0 + $0x2f0] sm:$0xff]  }
  0x4d   :  { %1093 = vmatprep.mubr.bf16.mxu1 %v3706_v50  ;;  %3280 = vmatpush3.bf16.msra.mxu1 %v3423_v22  ;;  %v3458_v22 = vld [vmem:[%s4630_s0 + $0x2f8] sm:$0xff]  }
  0x4e   :  { %3281 = vmatprep.subr.bf16.mxu1 %v3426_v25  ;;  %64 = vperm.xlu1 %3326, %v42_v14   ;;  %v3506_v14 = vld [vmem:[%s4631_s1 + $0x34] ss:$20 sps:$4 sm:$0xff]  }
  0x4f   :  { %3042 = vmatpush3.bf16.msra.mxu0 %v3414_v16  ;;  %v3455_v16 = vld [vmem:[%s4630_s0 + $0x2b8] sm:$0xff]  }
  0x50   :  { %3043 = vmatprep.subr.bf16.mxu0 %v3415_v17  ;;  %v3456_v17 = vld [vmem:[%s4630_s0 + $0x278] sm:$0xff]  }
  0x51   :  { %3282 = vmatpush3.bf16.msra.mxu1 %v3426_v25  ;;  %v3461_v25 = vld [vmem:[%s4630_s0 + $0x360] sm:$0xff]  }
  0x52   :  { %3123 = vmatprep.subr.bf16.mxu1 %v3429_v28  ;;  %v3468_v28 = vld [vmem:[%s4630_s0 + $0x350] sm:$0xff]  }
  0x53   :  { %3044 = vmatpush3.bf16.msra.mxu0 %v3416_v19  ;;  %v43_v19 = vld [vmem:[%s4632_s2 + $0x20] sm:$0xff] }
  0x54   :  { %3045 = vmatprep.subr.bf16.mxu0 %v3418_v21  ;;  %1094 = vmatmul.mubr.bf16.gmra.mrb[24].mxu1 %v3714_v52  ;;  %v44_v21 = vld [vmem:[%s4632_s2 + $0x28] sm:$0xff] }
  0x55   :  { %1101 = vmatprep.mubr.bf16.mxu1 %v3745_v59  ;;  %69 = vperm.xlu0 %3325, %v43_v19  }
  0x56   :  { %74 = vperm.xlu1 %3326, %v44_v21  }
  0x57   :  { %3046 = vmatpush3.bf16.msra.mxu0 %v3419_v23  ;;  %v3463_v23 = vld [vmem:[%s4630_s0 + $0x348] sm:$0xff]  }
  0x58   :  { %3047 = vmatprep.subr.bf16.mxu0 %v3421_v24  ;;  %v45_v24 = vld [vmem:[%s4632_s2 + $0x30] sm:$0xff] }
  0x59   :  { %79 = vperm.xlu0 %3325, %v45_v24  }
  0x5b   :  { %3048 = vmatpush3.bf16.msra.mxu0 %v3422_v26  ;;  %v3462_v26 = vld [vmem:[%s4630_s0 + $0x3a8] sm:$0xff]  }
  0x5c   :  { %3049 = vmatprep.subr.bf16.mxu0 %v3424_v27  ;;  %1102 = vmatmul.mubr.bf16.gmra.mrb[28].mxu1 %v3754_v61  ;;  %v46_v27 = vld [vmem:[%s4632_s2 + $0x38] sm:$0xff] }
  0x5d   :  { %3283 = vmatprep.mubr.msk.bf16.mxu1 %vm475_vm0, %v3784_v4  ;;  %84 = vperm.xlu1 %3326, %v46_v27  }
  0x5f   :  { %3050 = vmatpush3.bf16.msra.mxu0 %v3425_v29  ;;  %v3473_v29 = vld [vmem:[%s4630_s0 + $0x358] sm:$0xff]  }
  0x60   :  { %3083 = vmatprep.subr.bf16.mxu0 %v3427_v30  ;;  %v3469_v30 = vld [vmem:[%s4630_s0 + $0x378] sm:$0xff]  }
  0x62   :  { %1143 = vmatmul.mubr.bf16.vlgmr.msra.gmra.mrb[24].mxu0 %v3651_v37 }
  0x63   :  { %3084 = vmatpush3.bf16.msra.mxu0 %v3428_v31  ;;  %1150 = vmatprep.mubr.bf16.mxu0 %v3684_v45  ;;  %v3470_v31 = vld [vmem:[%s4630_s0 + $0x3c0] sm:$0xff]  }
  0x64   :  { %3085 = vmatprep.subr.bf16.mxu0 %v3431_v33  ;;  %3284 = vmatmul.mubr.msk.bf16.vlgmr.msra.gmra.mrb[32].mxu1 %vm475_vm0, %v3798_v7  ;;  %v3474_v33 = vld [vmem:[%s4630_s0 + $0x388] sm:$0xff]  }
  0x65   :  { %3124 = vmatpush3.bf16.msra.mxu1 %v3430_v35  ;;  %3287 = vmatprep.mubr.msk.bf16.mxu1 %vm475_vm0, %v3814_v11  ;;  %v3476_v35 = vld [vmem:[%s4630_s0 + $0x390] sm:$0xff]  }
  0x66   :  { %3125 = vmatprep.subr.bf16.mxu1 %v3433_v39  ;;  %v3499_v39 = vld [vmem:[%s4631_s1 + $0x4] ss:$20 sps:$4 sm:$0xff]  }
  0x67   :  { %3086 = vmatpush3.bf16.msra.mxu0 %v3432_v38  ;;  %v3479_v38 = vld [vmem:[%s4630_s0 + $0x398] sm:$0xff]  }
  0x68   :  { %3087 = vmatprep.subr.bf16.mxu0 %v3435_v40  ;;  %v3480_v40 = vld [vmem:[%s4630_s0 + $0x3e0] sm:$0xff]  }
  0x69   :  { %3126 = vmatpush3.bf16.msra.mxu1 %v3434_v42  ;;  %v3481_v42 = vld [vmem:[%s4630_s0 + $0x428] sm:$0xff]  }
  0x6a   :  { %1151 = vmatmul.mubr.bf16.gmra.mrb[28].mxu0 %v3690_v46  ;;  %3127 = vmatprep.subr.bf16.mxu1 %v3437_v47  ;;  %v3482_v47 = vld [vmem:[%s4630_s0 + $0x3e8] sm:$0xff]  }
  0x6b   :  { %3088 = vmatpush3.bf16.msra.mxu0 %v3436_v44  ;;  %1158 = vmatprep.mubr.bf16.mxu0 %v3723_v54  ;;  %v3490_v44 = vld [vmem:[%s4630_s0 + $0x460] sm:$0xff]  }
  0x6c   :  { %3089 = vmatprep.subr.bf16.mxu0 %v3439_v48  ;;  %3288 = vmatmul.mubr.msk.bf16.gmra.mrb[36].mxu1 %vm475_vm0, %v3825_v13  ;;  %v3493_v48 = vld [vmem:[%s4630_s0 + $0x468] sm:$0xff]  }
  0x6d   :  { %3128 = vmatpush3.bf16.msra.mxu1 %v3438_v49  ;;  %1699 = vmatprep.mubr.bf16.mxu1 %v3646_v36  ;;  %v3448_v36 = vld [vmem:[%s4630_s0 + $0x268] sm:$0xff]   ;;  %v3483_v49 = vld [vmem:[%s4630_s0 + $0x430] sm:$0xff]  }
  0x6e   :  { %3129 = vmatprep.subr.bf16.mxu1 %v3441_v53  ;;  %v3501_v53 = vld [vmem:[%s4631_s1 + $0x2c] ss:$20 sps:$4 sm:$0xff]  }
  0x6f   :  { %3090 = vmatpush3.bf16.msra.mxu0 %v3440_v51  ;;  %v3500_v51 = vld [vmem:[%s4631_s1] ss:$20 sps:$4 sm:$0xff]  }
  0x70   :  { %3091 = vmatprep.subr.bf16.mxu0 %v3443_v58  ;;  %v3485_v58 = vld [vmem:[%s4630_s0 + $0x438] sm:$0xff]  }
  0x71   :  { %3130 = vmatpush3.bf16.msra.mxu1 %v3442_v57  ;;  %v3496_v57 = vld [vmem:[%s4630_s0 + $0x470] sm:$0xff]  }
  0x72   :  { %1159 = vmatmul.mubr.bf16.gmra.mrb[32].mxu0 %v3728_v55  ;;  %3131 = vmatprep.subr.bf16.mxu1 %v3445_v62  ;;  %v3498_v62 = vld [vmem:[%s4630_s0 + $0x478] sm:$0xff]  }
  0x73   :  { %3092 = vmatpush3.bf16.msra.mxu0 %v3444_v60  ;;  %1166 = vmatprep.mubr.bf16.mxu0 %v3762_v63  ;;  %v3486_v60 = vld [vmem:[%s4630_s0 + $0x3f8] sm:$0xff]  }
  0x74   :  { %3093 = vmatprep.subr.bf16.mxu0 %v3447_v1  ;;  %v3487_v1 = vld [vmem:[%s4630_s0 + $0x440] sm:$0xff]  }
  0x75   :  { %3132 = vmatpush3.bf16.msra.mxu1 %v3446_v3  ;;  %v3503_v3 = vld [vmem:[%s4631_s1 + $0x28] ss:$20 sps:$4 sm:$0xff]  }
  0x76   :  { %3133 = vmatprep.subr.bf16.mxu1 %v3449_v5  ;;  %v3489_v5 = vld [vmem:[%s4630_s0 + $0x448] sm:$0xff]  }
  0x77   :  { %3094 = vmatpush3.bf16.msra.mxu0 %v3448_v36  ;;  %v3488_v36 = vld [vmem:[%s4630_s0 + $0x400] sm:$0xff]  }
  0x78   :  { %3095 = vmatprep.subr.bf16.mxu0 %v3451_v6  ;;  %v3491_v6 = vld [vmem:[%s4630_s0 + $0x408] sm:$0xff]  }
  0x79   :  { %3134 = vmatpush3.bf16.msra.mxu1 %v3450_v9  ;;  %v3494_v9 = vld [vmem:[%s4630_s0 + $0x410] sm:$0xff]  }
  0x7a   :  { %1167 = vmatmul.mubr.bf16.gmra.mrb[36].mxu0 %v3767_v0  ;;  %3135 = vmatprep.subr.bf16.mxu1 %v3453_v12  ;;  %v3497_v12 = vld [vmem:[%s4630_s0 + $0x418] sm:$0xff]  }
  0x7b   :  { %3096 = vmatpush3.bf16.msra.mxu0 %v3452_v10  ;;  %1634 = vmatprep.mubr.bf16.mxu0 %v3628_v32  ;;  %v3460_v32 = vld [vmem:[%s4630_s0 + $0x3a0] sm:$0xff]   ;;  %v3495_v10 = vld [vmem:[%s4630_s0 + $0x458] sm:$0xff]  }
  0x7c   :  { %3097 = vmatprep.subr.bf16.mxu0 %v3455_v16 }
  0x7d   :  { %3136 = vmatpush3.bf16.msra.mxu1 %v3454_v15 }
  0x7e   :  { %3137 = vmatprep.subr.bf16.mxu1 %v3457_v18 }
  0x7f   :  { %3098 = vmatpush3.bf16.msra.mxu0 %v3456_v17 }
  0x80   :  { %3291 = vmatprep.subr.bf16.mxu0 %v3459_v20 }
  0x81   :  { %3138 = vmatpush3.bf16.msra.mxu1 %v3458_v22 }
  0x82   :  { %1635 = vmatmul.mubr.bf16.vlgmr.msra.gmra.mrb[40].mxu0 %v3637_v34  ;;  %3171 = vmatprep.subr.bf16.mxu1 %v3460_v32  ;;  %v3464_v34 = vld [vmem:[%s4630_s0 + $0x368] sm:$0xff]  }
  0x83   :  { %3292 = vmatpush3.bf16.msra.mxu0 %v3459_v20  ;;  %1642 = vmatprep.mubr.bf16.mxu0 %v3667_v41  ;;  %v3465_v41 = vld [vmem:[%s4630_s0 + $0x3b0] sm:$0xff]  }
  0x84   :  { %3293 = vmatprep.subr.bf16.mxu0 %v3463_v23  ;;  %1700 = vmatmul.mubr.bf16.vlgmr.msra.gmra.mrb[40].mxu1 %v3651_v37  ;;  %v3466_v37 = vld [vmem:[%s4630_s0 + $0x370] sm:$0xff]  }
  0x85   :  { %3172 = vmatpush3.bf16.msra.mxu1 %v3461_v25  ;;  %1707 = vmatprep.mubr.bf16.mxu1 %v3684_v45  ;;  %v3467_v45 = vld [vmem:[%s4630_s0 + $0x3b8] sm:$0xff]  }
  0x86   :  { %3173 = vmatprep.subr.bf16.mxu1 %v3462_v26 }
  0x87   :  { %3294 = vmatpush3.bf16.msra.mxu0 %v3463_v23 }
  0x88   :  { %3295 = vmatprep.subr.bf16.mxu0 %v3468_v28 }
  0x89   :  { %3174 = vmatpush3.bf16.msra.mxu1 %v3464_v34 }
  0x8a   :  { %1643 = vmatmul.mubr.bf16.gmra.mrb[44].mxu0 %v3675_v43  ;;  %3175 = vmatprep.subr.bf16.mxu1 %v3465_v41  ;;  %v3478_v43 = vld [vmem:[%s4630_s0 + $0x420] sm:$0xff]  }
  0x8b   :  { %1650 = vmatprep.mubr.bf16.mxu0 %v3706_v50  ;;  %3296 = vmatpush3.bf16.msra.mxu0 %v3468_v28 }
  0x8c   :  { %1708 = vmatmul.mubr.bf16.gmra.mrb[44].mxu1 %v3690_v46  ;;  %3297 = vmatprep.subr.bf16.mxu0 %v3473_v29  ;;  %v3471_v46 = vld [vmem:[%s4630_s0 + $0x380] sm:$0xff]  }
  0x8d   :  { %3176 = vmatpush3.bf16.msra.mxu1 %v3466_v37  ;;  %1715 = vmatprep.mubr.bf16.mxu1 %v3723_v54  ;;  %v3472_v54 = vld [vmem:[%s4630_s0 + $0x3c8] sm:$0xff]  }
  0x8e   :  { %3177 = vmatprep.subr.bf16.mxu1 %v3467_v45 }
  0x8f   :  { %3298 = vmatpush3.bf16.msra.mxu0 %v3473_v29 }
  0x90   :  { %3211 = vmatprep.subr.bf16.mxu0 %v3478_v43 }
  0x91   :  { %3178 = vmatpush3.bf16.msra.mxu1 %v3469_v30 }
  0x92   :  { %1651 = vmatmul.mubr.bf16.gmra.mrb[48].mxu0 %v3714_v52  ;;  %3179 = vmatprep.subr.bf16.mxu1 %v3470_v31  ;;  %v3475_v52 = vld [vmem:[%s4630_s0 + $0x3d0] sm:$0xff]  }
  0x93   :  { %1658 = vmatprep.mubr.bf16.mxu0 %v3745_v59 }
  0x94   :  { %1716 = vmatmul.mubr.bf16.gmra.mrb[48].mxu1 %v3728_v55  ;;  %v3477_v55 = vld [vmem:[%s4630_s0 + $0x3d8] sm:$0xff]  }
  0x95   :  { %3180 = vmatpush3.bf16.msra.mxu1 %v3471_v46  ;;  %1723 = vmatprep.mubr.bf16.mxu1 %v3762_v63 }
  0x96   :  { %3181 = vmatprep.subr.bf16.mxu1 %v3472_v54 }
  0x99   :  { %3182 = vmatpush3.bf16.msra.mxu1 %v3474_v33 }
  0x9a   :  { %1659 = vmatmul.mubr.bf16.gmra.mrb[52].mxu0 %v3754_v61  ;;  %3183 = vmatprep.subr.bf16.mxu1 %v3475_v52 }
  0x9b   :  { %3299 = vmatprep.mubr.msk.bf16.mxu0 %vm475_vm0, %v3784_v4 }
  0x9c   :  { %1724 = vmatmul.mubr.bf16.gmra.mrb[52].mxu1 %v3767_v0 }
  0x9d   :  { %3184 = vmatpush3.bf16.msra.mxu1 %v3476_v35  ;;  %2191 = vmatprep.mubr.bf16.mxu1 %v3499_v39 }
  0x9e   :  { %3185 = vmatprep.subr.bf16.mxu1 %v3477_v55 }
  0xa1   :  { %3186 = vmatpush3.bf16.msra.mxu1 %v3479_v38 }
  0xa2   :  { %3300 = vmatmul.mubr.msk.bf16.vlgmr.msra.gmra.mrb[56].mxu0 %vm475_vm0, %v3798_v7  ;;  %3307 = vmatprep.subr.bf16.mxu1 %v3490_v44 }
  0xa3   :  { %3212 = vmatpush3.bf16.msra.mxu0 %v3480_v40  ;;  %3303 = vmatprep.mubr.msk.bf16.mxu0 %vm475_vm0, %v3814_v11 }
  0xa4   :  { %3213 = vmatprep.subr.bf16.mxu0 %v3481_v42  ;;  %2192 = vmatmul.mubr.bf16.vlgmr.msra.gmra.mrb[56].mxu1 %v3500_v51 }
  0xa5   :  { %2199 = vmatprep.mubr.bf16.mxu1 %v3501_v53  ;;  %3308 = vmatpush3.bf16.msra.mxu1 %v3490_v44 }
  0xa6   :  { %3309 = vmatprep.subr.bf16.mxu1 %v3493_v48 }
  0xa7   :  { %3214 = vmatpush3.bf16.msra.mxu0 %v3482_v47 }
  0xa8   :  { %3215 = vmatprep.subr.bf16.mxu0 %v3483_v49 }
  0xa9   :  { %3310 = vmatpush3.bf16.msra.mxu1 %v3493_v48 }
  0xaa   :  { %3304 = vmatmul.mubr.msk.bf16.gmra.mrb[60].mxu0 %vm475_vm0, %v3825_v13  ;;  %3311 = vmatprep.subr.bf16.mxu1 %v3496_v57 }
  0xab   :  { %3216 = vmatpush3.bf16.msra.mxu0 %v3484_v56  ;;  %2256 = vmatprep.mubr.bf16.mxu0 %v3502_v2 }
  0xac   :  { %3217 = vmatprep.subr.bf16.mxu0 %v3485_v58  ;;  %2200 = vmatmul.mubr.bf16.gmra.mrb[60].mxu1 %v3503_v3 }
  0xad   :  { %2207 = vmatprep.mubr.bf16.mxu1 %v3706_v50  ;;  %3312 = vmatpush3.bf16.msra.mxu1 %v3496_v57  ;;  %v3492_v50 = vld [vmem:[%s4630_s0 + $0x450] sm:$0xff]  }
  0xae   :  { %3313 = vmatprep.subr.bf16.mxu1 %v3498_v62 }
  0xaf   :  { %3218 = vmatpush3.bf16.msra.mxu0 %v3486_v60 }
  0xb0   :  { %3219 = vmatprep.subr.bf16.mxu0 %v3487_v1 }
  0xb1   :  { %3314 = vmatpush3.bf16.msra.mxu1 %v3498_v62 }
  0xb3   :  { %3220 = vmatpush3.bf16.msra.mxu0 %v3488_v36 }
  0xb4   :  { %3221 = vmatprep.subr.bf16.mxu0 %v3489_v5  ;;  %2208 = vmatmul.mubr.bf16.gmra.mrb[64].mxu1 %v3504_v8 }
  0xb5   :  { %2215 = vmatprep.mubr.bf16.mxu1 %v3745_v59  ;;  %v3505_v59 = vld [vmem:[%s4631_s1 + $0x8] ss:$20 sps:$4 sm:$0xff]  }
  0xb7   :  { %3222 = vmatpush3.bf16.msra.mxu0 %v3491_v6 }
  0xb8   :  { %3223 = vmatprep.subr.bf16.mxu0 %v3492_v50 }
  0xbb   :  { %3224 = vmatpush3.bf16.msra.mxu0 %v3494_v9 }
  0xbc   :  { %3225 = vmatprep.subr.bf16.mxu0 %v3495_v10  ;;  %2216 = vmatmul.mubr.bf16.gmra.mrb[68].mxu1 %v3754_v61  ;;  %v3507_v61 = vld [vmem:[%s4631_s1 + $0x30] ss:$20 sps:$4 sm:$0xff]  }
  0xbd   :  { %3315 = vmatprep.mubr.msk.bf16.mxu1 %vm475_vm0, %v3784_v4  ;;  %v3508_v4 = vld [vmem:[%s4631_s1 + $0x5c] ss:$20 sps:$4 sm:$0xff]  }
  0xbf   :  { %3226 = vmatpush3.bf16.msra.mxu0 %v3497_v12 }
  0xc2   :  { %2257 = vmatmul.mubr.bf16.vlgmr.msra.gmra.mrb[64].mxu0 %v3505_v59 }
  0xc3   :  { %2264 = vmatprep.mubr.bf16.mxu0 %v3506_v14 }
  0xc4   :  { %3316 = vmatmul.mubr.msk.bf16.vlgmr.msra.gmra.mrb[72].mxu1 %vm475_vm0, %v3798_v7  ;;  %v3509_v7 = vld [vmem:[%s4631_s1 + $0x58] ss:$20 sps:$4 sm:$0xff]  }
  0xc5   :  { %3319 = vmatprep.mubr.msk.bf16.mxu1 %vm475_vm0, %v3814_v11  ;;  %v4206_v11 = vpop.permute.xlu0 %49  ;;  %v4211_v23 = vpop.permute.xlu1 %59 }
  0xc9   :  { %v4208_v19 = vpop.permute.xlu0 %54 }
  0xca   :  { %2265 = vmatmul.mubr.bf16.gmra.mrb[68].mxu0 %v3507_v61 }
  0xcb   :  { %2272 = vmatprep.mubr.bf16.mxu0 %v3508_v4 }
  0xcc   :  { %3320 = vmatmul.mubr.msk.bf16.gmra.mrb[76].mxu1 %vm475_vm0, %v3825_v13 }
  0xcd   :  { %v4216_v45 = vpop.permute.xlu1 %64 }
  0xd2   :  { %2273 = vmatmul.mubr.bf16.gmra.mrb[72].mxu0 %v3509_v7 }
  0xd3   :  { %2280 = vmatprep.mubr.bf16.mxu0 %v3762_v63 }
  0xd4   :  { %v4220_v44 = vpop.permute.xlu0 %69 }
  0xd5   :  { %v4222_v51 = vpop.permute.xlu1 %74 }
  0xd8   :  { %v4226_v8 = vpop.permute.xlu0 %79 }
  0xda   :  { %2281 = vmatmul.mubr.bf16.gmra.mrb[76].mxu0 %v3767_v0 }
  0xdc   :  { %v4228_v59 = vpop.permute.xlu1 %84 }
  0xf5   :  { %v2923_v15 = vpop.f32.mrb[0].mxu0 }
  0xf6   :  { %v2924_v16 = vpop.f32.mrb[1].mxu0 }
  0xf7   :  { %v2925_v17 = vadd.f32 %v2924_v16, %v2923_v15  ;;  %v2926_v18 = vpop.f32.mrb[2].mxu0  ;;  %v2963_v20 = vpop.f32.mrb[0].mxu1 }
  0xf8   :  { %v2927_v21 = vpop.f32.mrb[3].mxu0  ;;  %v2964_v32 = vpop.f32.mrb[1].mxu1 }
  0xf9   :  { %v523_v13 = vadd.f32 %v2925_v17, %v4206_v11  ;;  %v2928_v22 = vadd.f32 %v2927_v21, %v2926_v18  ;;  %v2965_v24 = vadd.f32 %v2964_v32, %v2963_v20  ;;  %v2966_v63 = vpop.f32.mrb[2].mxu1 }
  0xfa   :  { %v2967_v25 = vpop.f32.mrb[3].mxu1 }
  0xfb   :  { %v526_v0 = vadd.f32 %v2928_v22, %v4208_v19  ;;  %v2968_v26 = vadd.f32 %v2967_v25, %v2966_v63  ;;  %v588_v27 = vadd.f32 %v2965_v24, %v523_v13 }
  0xfd   :  { %v2929_v28 = vpop.f32.mrb[4].mxu0  ;;  %v4214_v41 = vadd.f32 %v2968_v26, %v526_v0 }
  0xfe   :  { %v2930_v34 = vpop.f32.mrb[5].mxu0 }
  0xff   :  { %v2931_v29 = vadd.f32 %v2930_v34, %v2929_v28  ;;  %v2932_v37 = vpop.f32.mrb[6].mxu0  ;;  %v2969_v43 = vpop.f32.mrb[4].mxu1 }
 0x100   :  { %v2933_v30 = vpop.f32.mrb[7].mxu0  ;;  %v2970_v54 = vpop.f32.mrb[5].mxu1 }
 0x101   :  { %v531_v31 = vadd.f32 %v2931_v29, %v4211_v23  ;;  %v2934_v46 = vadd.f32 %v2933_v30, %v2932_v37  ;;  %v2971_v33 = vadd.f32 %v2970_v54, %v2969_v43  ;;  %v2972_v52 = vpop.f32.mrb[6].mxu1  ;;  %v3511_v29 = vmov 0.0  }
 0x102   :  { %v2973_v35 = vpop.f32.mrb[7].mxu1 }
 0x103   :  { %v534_v55 = vadd.f32 %v2934_v46, %v4216_v45  ;;  %v2974_v38 = vadd.f32 %v2973_v35, %v2972_v52  ;;  %v596_v39 = vadd.f32 %v2971_v33, %v531_v31 }
 0x105   :  { %v2935_v40 = vpop.f32.mrb[8].mxu0  ;;  %v599_v47 = vadd.f32 %v2974_v38, %v534_v55 }
 0x106   :  { %v2936_v42 = vpop.f32.mrb[9].mxu0 }
 0x107   :  { %v2937_v48 = vadd.f32 %v2936_v42, %v2935_v40  ;;  %v2938_v49 = vpop.f32.mrb[10].mxu0  ;;  %v2975_v53 = vpop.f32.mrb[8].mxu1 }
 0x108   :  { %v2939_v56 = vpop.f32.mrb[11].mxu0  ;;  %v2976_v58 = vpop.f32.mrb[9].mxu1 }
 0x109   :  { %v2940_v57 = vadd.f32 %v2939_v56, %v2938_v49  ;;  %v539_v60 = vadd.f32 %v2937_v48, %v4220_v44  ;;  %v2977_v62 = vadd.f32 %v2976_v58, %v2975_v53  ;;  %v2978_v1 = vpop.f32.mrb[10].mxu1 }
 0x10a   :  { %v2979_v2 = vpop.f32.mrb[11].mxu1 }
 0x10b   :  { %v542_v3 = vadd.f32 %v2940_v57, %v4222_v51  ;;  %v2980_v36 = vadd.f32 %v2979_v2, %v2978_v1  ;;  %v604_v5 = vadd.f32 %v2977_v62, %v539_v60 }
 0x10d   :  { %v2941_v6 = vpop.f32.mrb[12].mxu0  ;;  %v607_v9 = vadd.f32 %v2980_v36, %v542_v3 }
 0x10e   :  { %v2942_v50 = vpop.f32.mrb[13].mxu0 }
 0x10f   :  { %v2943_v10 = vadd.f32 %v2942_v50, %v2941_v6  ;;  %v2944_v12 = vpop.f32.mrb[14].mxu0  ;;  %v2981_v14 = vpop.f32.mrb[12].mxu1 }
 0x110   :  { %v2945_v61 = vpop.f32.mrb[15].mxu0  ;;  %v2982_v15 = vpop.f32.mrb[13].mxu1 }
 0x111   :  { %v547_v4 = vadd.f32 %v2943_v10, %v4226_v8  ;;  %v2946_v7 = vadd.f32 %v2945_v61, %v2944_v12  ;;  %v2983_v16 = vadd.f32 %v2982_v15, %v2981_v14  ;;  %v2984_v17 = vpop.f32.mrb[14].mxu1 }
 0x112   :  { %v2985_v20 = vpop.f32.mrb[15].mxu1 }
 0x113   :  { %v550_v18 = vadd.f32 %v2946_v7, %v4228_v59  ;;  %v2986_v21 = vadd.f32 %v2985_v20, %v2984_v17  ;;  %v612_v13 = vadd.f32 %v2983_v16, %v547_v4 }
 0x115   :  { %v3269_v22 = vpop.f32.mrb[16].mxu0  ;;  %v615_v63 = vadd.f32 %v2986_v21, %v550_v18 }
 0x116   :  { %v4232_v32 = vadd.f32 %v3269_v22, %v596_v39  ;;  %v652_v24 = vpop.f32.mrb[17].mxu0 }
 0x117   :  { %v4234_v25 = vadd.f32 %v652_v24, %v588_v27  ;;  %v3270_v0 = vpop.f32.mrb[18].mxu0  ;;  %v3011_v34 = vpop.f32.mrb[16].mxu1 }
 0x118   :  { %vm693_vm1 = vcmp.ge.f32.partialorder %v4232_v32, 1.0  ;;  %v4237_v26 = vadd.f32 %v3270_v0, %v599_v47  ;;  %v655_v28 = vpop.f32.mrb[19].mxu0  ;;  %v3012_v27 = vpop.f32.mrb[17].mxu1 }
 0x119   :  { %v701_v37 = vsel %vm693_vm1, 1.0, %v3511_v29  ;;  %vm691_vm3 = vcmp.ge.f32.partialorder %v4234_v25, 1.0  ;;  %v4244_v43 = vadd.f32 %v655_v28, %v4214_v41  ;;  %v3014_v46 = vpop.f32.mrb[18].mxu1  ;;  %v3013_v55 = vadd.f32 %v3012_v27, %v3011_v34 }
 0x11a   :  { %v2877_v30 = vpack.c.bf16 %v701_v37, %v701_v37  ;;  %v699_v31 = vsel %vm691_vm3, 1.0, %v3511_v29  ;;  %vm694_vm4 = vcmp.ge.f32.partialorder %v4237_v26, 1.0  ;;  %v3015_v52 = vpop.f32.mrb[19].mxu1 }
 0x11b   :  { %v2875_v54 = vpack.c.bf16 %v699_v31, %v699_v31  ;;  %v702_v33 = vsel %vm694_vm4, 1.0, %v3511_v29  ;;  %vm692_vm5 = vcmp.ge.f32.partialorder %v4244_v43, 1.0  ;;  %v3016_v40 = vadd.f32 %v3015_v52, %v3014_v46 }
 0x11c   :  { %742 = vst.msk [vmem:[%s4633_s3 + $0x8] sm:$0xf] %vm739_vm2, %v2877_v30  ;;  %v2878_v41 = vpack.c.bf16 %v702_v33, %v702_v33  ;;  %v700_v35 = vsel %vm692_vm5, 1.0, %v3511_v29  ;;  %v1080_v28 = vadd.f32 %v3013_v55, %v4206_v11 }
 0x11d   :  { %740 = vst.msk [vmem:[%s4633_s3] sm:$0xf] %vm739_vm2, %v2875_v54  ;;  %v2876_v38 = vpack.c.bf16 %v700_v35, %v700_v35  ;;  %v3273_v39 = vpop.f32.mrb[20].mxu0  ;;  %v1083_v31 = vadd.f32 %v3016_v40, %v4208_v19 }
 0x11e   :  { %743 = vst.msk [vmem:[%s4633_s3 + $0xc] sm:$0xf] %vm739_vm2, %v2878_v41  ;;  %v4269_v42 = vadd.f32 %v3273_v39, %v612_v13  ;;  %v668_v47 = vpop.f32.mrb[21].mxu0  ;;  %v748_v39 = vsel %vm691_vm3, 0.0, %v4234_v25 }
 0x11f   :  { %741 = vst.msk [vmem:[%s4633_s3 + $0x4] sm:$0xf] %vm739_vm2, %v2876_v38  ;;  %v4275_v48 = vadd.f32 %v668_v47, %v604_v5  ;;  %v3274_v49 = vpop.f32.mrb[22].mxu0  ;;  %v3017_v57 = vpop.f32.mrb[20].mxu1 }
 0x120   :  { %vm697_vm6 = vcmp.ge.f32.partialorder %v4269_v42, 1.0  ;;  %v4278_v53 = vadd.f32 %v3274_v49, %v615_v63  ;;  %v671_v56 = vpop.f32.mrb[23].mxu0  ;;  %v3018_v62 = vpop.f32.mrb[21].mxu1 }
 0x121   :  { %v705_v58 = vsel %vm697_vm6, 1.0, %v3511_v29  ;;  %vm695_vm7 = vcmp.ge.f32.partialorder %v4275_v48, 1.0  ;;  %v4284_v60 = vadd.f32 %v671_v56, %v607_v9  ;;  %v3020_v3 = vpop.f32.mrb[22].mxu1  ;;  %v3019_v10 = vadd.f32 %v3018_v62, %v3017_v57 }
 0x122   :  { %v2881_v1 = vpack.c.bf16 %v705_v58, %v705_v58  ;;  %v703_v2 = vsel %vm695_vm7, 1.0, %v3511_v29  ;;  %vm698_vm8 = vcmp.ge.f32.partialorder %v4278_v53, 1.0  ;;  %v3021_v6 = vpop.f32.mrb[23].mxu1  ;;  %v749_v56 = vsel %vm692_vm5, 0.0, %v4244_v43 }
 0x123   :  { %v2879_v36 = vpack.c.bf16 %v703_v2, %v703_v2  ;;  %v706_v5 = vsel %vm698_vm8, 1.0, %v3511_v29  ;;  %vm696_vm9 = vcmp.ge.f32.partialorder %v4284_v60, 1.0  ;;  %v3022_v14 = vadd.f32 %v3021_v6, %v3020_v3 }
 0x124   :  { %746 = vst.msk [vmem:[%s4633_s3 + $0x18] sm:$0xf] %vm739_vm2, %v2881_v1  ;;  %v2882_v50 = vpack.c.bf16 %v706_v5, %v706_v5  ;;  %v704_v9 = vsel %vm696_vm9, 1.0, %v3511_v29  ;;  %v1088_v57 = vadd.f32 %v3019_v10, %v4211_v23 }
 0x125   :  { %744 = vst.msk [vmem:[%s4633_s3 + $0x10] sm:$0xf] %vm739_vm2, %v2879_v36  ;;  %v2880_v12 = vpack.c.bf16 %v704_v9, %v704_v9  ;;  %v1091_v2 = vadd.f32 %v3022_v14, %v4216_v45 }
 0x126   :  { %747 = vst.msk [vmem:[%s4633_s3 + $0x1c] sm:$0xf] %vm739_vm2, %v2882_v50 }
 0x127   :  { %745 = vst.msk [vmem:[%s4633_s3 + $0x14] sm:$0xf] %vm739_vm2, %v2880_v12  ;;  %v3023_v61 = vpop.f32.mrb[24].mxu1 }
 0x128   :  { %v3024_v4 = vpop.f32.mrb[25].mxu1 }
 0x129   :  { %v3025_v7 = vadd.f32 %v3024_v4, %v3023_v61  ;;  %v3026_v15 = vpop.f32.mrb[26].mxu1 }
 0x12a   :  { %v3027_v16 = vpop.f32.mrb[27].mxu1 }
 0x12b   :  { %v3028_v17 = vadd.f32 %v3027_v16, %v3026_v15  ;;  %v750_v15 = vsel %vm693_vm1, 0.0, %v4232_v32 }
 0x12f   :  { %v3029_v18 = vpop.f32.mrb[28].mxu1 }
 0x130   :  { %v3030_v20 = vpop.f32.mrb[29].mxu1 }
 0x131   :  { %v4313_v21 = vadd.f32 %v3030_v20, %v3029_v18  ;;  %v3032_v13 = vpop.f32.mrb[30].mxu1 }
 0x132   :  { %v3033_v22 = vpop.f32.mrb[31].mxu1 }
 0x133   :  { %v4315_v24 = vadd.f32 %v3033_v22, %v3032_v13  ;;  %v751_v13 = vsel %vm694_vm4, 0.0, %v4237_v26 }
 0x135   :  { %v3051_v63 = vpop.f32.mrb[24].mxu0 }
 0x136   :  { %v3052_v0 = vpop.f32.mrb[25].mxu0 }
 0x137   :  { %v3053_v34 = vadd.f32 %v3052_v0, %v3051_v63  ;;  %v3054_v37 = vpop.f32.mrb[26].mxu0  ;;  %v3285_v30 = vpop.f32.mrb[32].mxu1  ;;  %v1096_v63 = vadd.f32 %v3025_v7, %v4220_v44 }
 0x138   :  { %v3055_v27 = vpop.f32.mrb[27].mxu0  ;;  %v1209_v33 = vpop.f32.mrb[33].mxu1 }
 0x139   :  { %v3056_v46 = vadd.f32 %v3055_v27, %v3054_v37  ;;  %v1145_v54 = vadd.f32 %v3053_v34, %v1080_v28  ;;  %v3286_v52 = vpop.f32.mrb[34].mxu1  ;;  %v1099_v34 = vadd.f32 %v3028_v17, %v4222_v51 }
 0x13a   :  { %v1212_v38 = vpop.f32.mrb[35].mxu1 }
 0x13b   :  { %v1210_v41 = vadd.f32 %v1209_v33, %v1145_v54  ;;  %v1148_v35 = vadd.f32 %v3056_v46, %v1083_v31  ;;  %v752_v33 = vsel %vm695_vm7, 0.0, %v4275_v48 }
 0x13d   :  { %v4322_v47 = vadd.f32 %v1210_v41, %v748_v39  ;;  %v1213_v55 = vadd.f32 %v1212_v38, %v1148_v35  ;;  %v3057_v49 = vpop.f32.mrb[28].mxu0  ;;  %v753_v38 = vsel %vm696_vm9, 0.0, %v4284_v60 }
 0x13e   :  { %v3058_v40 = vpop.f32.mrb[29].mxu0 }
 0x13f   :  { %v4328_v58 = vadd.f32 %v1213_v55, %v749_v56  ;;  %v3059_v62 = vadd.f32 %v3058_v40, %v3057_v49  ;;  %v3060_v1 = vpop.f32.mrb[30].mxu0  ;;  %vm1248_vm10 = vcmp.ge.f32.partialorder %v4322_v47, 1.0  ;;  %v3289_v3 = vpop.f32.mrb[36].mxu1  ;;  %v1104_v55 = vadd.f32 %v4313_v21, %v4226_v8 }
 0x140   :  { %v3061_v25 = vpop.f32.mrb[31].mxu0  ;;  %v1256_v36 = vsel %vm1248_vm10, 1.0, %v3511_v29  ;;  %v1225_v43 = vpop.f32.mrb[37].mxu1  ;;  %v1107_v40 = vadd.f32 %v4315_v24, %v4228_v59 }
 0x141   :  { %v1153_v5 = vadd.f32 %v3059_v62, %v1088_v57  ;;  %v3062_v6 = vadd.f32 %v3061_v25, %v3060_v1  ;;  %v2883_v50 = vpack.c.bf16 %v1256_v36, %v1256_v36  ;;  %vm1249_vm11 = vcmp.ge.f32.partialorder %v4328_v58, 1.0  ;;  %v3290_v9 = vpop.f32.mrb[38].mxu1 }
 0x142   :  { %v1257_v10 = vsel %vm1249_vm11, 1.0, %v3511_v29  ;;  %v1228_v14 = vpop.f32.mrb[39].mxu1 }
 0x143   :  { %v1218_v12 = vadd.f32 %v3285_v30, %v1153_v5  ;;  %v1156_v61 = vadd.f32 %v3062_v6, %v1091_v2  ;;  %2611 = vst.msk [vmem:[%s4633_s3 + $0x20] sm:$0xf] %vm739_vm2, %v2883_v50  ;;  %v2884_v4 = vpack.c.bf16 %v1257_v10, %v1257_v10  ;;  %v754_v5 = vsel %vm697_vm6, 0.0, %v4269_v42 }
 0x145   :  { %v1221_v16 = vadd.f32 %v3286_v52, %v1156_v61  ;;  %v3063_v18 = vpop.f32.mrb[32].mxu0  ;;  %v4346_v20 = vadd.f32 %v1218_v12, %v750_v15  ;;  %2612 = vst.msk [vmem:[%s4633_s3 + $0x24] sm:$0xf] %vm739_vm2, %v2884_v4 }
 0x146   :  { %v3064_v22 = vpop.f32.mrb[33].mxu0 }
 0x147   :  { %v3065_v0 = vadd.f32 %v3064_v22, %v3063_v18  ;;  %v3066_v28 = vpop.f32.mrb[34].mxu0  ;;  %vm1250_vm12 = vcmp.ge.f32.partialorder %v4346_v20, 1.0  ;;  %v4357_v32 = vadd.f32 %v1221_v16, %v751_v13 }
 0x148   :  { %v3067_v37 = vpop.f32.mrb[35].mxu0  ;;  %v1258_v27 = vsel %vm1250_vm12, 1.0, %v3511_v29 }
 0x149   :  { %v3068_v30 = vadd.f32 %v3067_v37, %v3066_v28  ;;  %v1161_v31 = vadd.f32 %v3065_v0, %v1096_v63  ;;  %v2885_v46 = vpack.c.bf16 %v1258_v27, %v1258_v27  ;;  %vm1251_vm13 = vcmp.ge.f32.partialorder %v4357_v32, 1.0 }
 0x14a   :  { %v1259_v26 = vsel %vm1251_vm13, 1.0, %v3511_v29 }
 0x14b   :  { %v1226_v7 = vadd.f32 %v1225_v43, %v1161_v31  ;;  %v1164_v54 = vadd.f32 %v3068_v30, %v1099_v34  ;;  %2613 = vst.msk [vmem:[%s4633_s3 + $0x28] sm:$0xf] %vm739_vm2, %v2885_v46  ;;  %v2886_v17 = vpack.c.bf16 %v1259_v26, %v1259_v26 }
 0x14d   :  { %v4374_v52 = vadd.f32 %v1226_v7, %v752_v33  ;;  %v1229_v41 = vadd.f32 %v1228_v14, %v1164_v54  ;;  %v3069_v35 = vpop.f32.mrb[36].mxu0  ;;  %2614 = vst.msk [vmem:[%s4633_s3 + $0x2c] sm:$0xf] %vm739_vm2, %v2886_v17 }
 0x14e   :  { %v3070_v39 = vpop.f32.mrb[37].mxu0 }
 0x14f   :  { %v4385_v49 = vadd.f32 %v1229_v41, %v753_v38  ;;  %v3071_v48 = vadd.f32 %v3070_v39, %v3069_v35  ;;  %v3072_v56 = vpop.f32.mrb[38].mxu0  ;;  %vm1252_vm14 = vcmp.ge.f32.partialorder %v4374_v52, 1.0 }
 0x150   :  { %v3073_v57 = vpop.f32.mrb[39].mxu0  ;;  %v1260_v62 = vsel %vm1252_vm14, 1.0, %v3511_v29 }
 0x151   :  { %v1169_v1 = vadd.f32 %v3071_v48, %v1104_v55  ;;  %v3074_v60 = vadd.f32 %v3073_v57, %v3072_v56  ;;  %v2887_v2 = vpack.c.bf16 %v1260_v62, %v1260_v62  ;;  %vm1253_vm15 = vcmp.ge.f32.partialorder %v4385_v49, 1.0 }
 0x152   :  { %v1261_v21 = vsel %vm1253_vm15, 1.0, %v3511_v29 }
 0x153   :  { %v1234_v25 = vadd.f32 %v3289_v3, %v1169_v1  ;;  %v1172_v36 = vadd.f32 %v3074_v60, %v1107_v40  ;;  %2615 = vst.msk [vmem:[%s4633_s3 + $0x30] sm:$0xf] %vm739_vm2, %v2887_v2  ;;  %v2888_v24 = vpack.c.bf16 %v1261_v21, %v1261_v21  ;;  %v755_v3 = vsel %vm698_vm8, 0.0, %v4278_v53 }
 0x155   :  { %v1237_v6 = vadd.f32 %v3290_v9, %v1172_v36  ;;  %v3099_v43 = vpop.f32.mrb[40].mxu0  ;;  %v4404_v50 = vadd.f32 %v1234_v25, %v754_v5  ;;  %2616 = vst.msk [vmem:[%s4633_s3 + $0x34] sm:$0xf] %vm739_vm2, %v2888_v24 }
 0x156   :  { %v3100_v10 = vpop.f32.mrb[41].mxu0 }
 0x157   :  { %v3101_v12 = vadd.f32 %v3100_v10, %v3099_v43  ;;  %v3102_v61 = vpop.f32.mrb[42].mxu0  ;;  %vm1254_vm0 = vcmp.ge.f32.partialorder %v4404_v50, 1.0  ;;  %v4414_v14 = vadd.f32 %v1237_v6, %v755_v3  ;;  %v3139_v42 = vpop.f32.mrb[40].mxu1 }
 0x158   :  { %v3103_v9 = vpop.f32.mrb[43].mxu0  ;;  %v1262_v4 = vsel %vm1254_vm0, 1.0, %v3511_v29  ;;  %v3140_v18 = vpop.f32.mrb[41].mxu1 }
 0x159   :  { %v1637_v15 = vadd.f32 %v3101_v12, %v4206_v11  ;;  %v3104_v16 = vadd.f32 %v3103_v9, %v3102_v61  ;;  %v2889_v13 = vpack.c.bf16 %v1262_v4, %v1262_v4  ;;  %vm1255_vm1 = vcmp.ge.f32.partialorder %v4414_v14, 1.0  ;;  %v3142_v22 = vpop.f32.mrb[42].mxu1 }
 0x15a   :  { %v3141_v53 = vadd.f32 %v3140_v18, %v3139_v42  ;;  %v1263_v63 = vsel %vm1255_vm1, 1.0, %v3511_v29  ;;  %v3143_v28 = vpop.f32.mrb[43].mxu1 }
 0x15b   :  { %v1640_v0 = vadd.f32 %v3104_v16, %v4208_v19  ;;  %2617 = vst.msk [vmem:[%s4633_s3 + $0x38] sm:$0xf] %vm739_vm2, %v2889_v13  ;;  %v2890_v34 = vpack.c.bf16 %v1263_v63, %v1263_v63  ;;  %v3144_v37 = vadd.f32 %v3143_v28, %v3142_v22 }
 0x15c   :  { %v1702_v27 = vadd.f32 %v3141_v53, %v1637_v15 }
 0x15d   :  { %v3105_v30 = vpop.f32.mrb[44].mxu0  ;;  %2618 = vst.msk [vmem:[%s4633_s3 + $0x3c] sm:$0xf] %vm739_vm2, %v2890_v34  ;;  %v1705_v46 = vadd.f32 %v3144_v37, %v1640_v0 }
 0x15e   :  { %v3106_v31 = vpop.f32.mrb[45].mxu0 }
 0x15f   :  { %v3107_v26 = vadd.f32 %v3106_v31, %v3105_v30  ;;  %v3108_v7 = vpop.f32.mrb[46].mxu0  ;;  %v3145_v54 = vpop.f32.mrb[44].mxu1 }
 0x160   :  { %v3109_v17 = vpop.f32.mrb[47].mxu0  ;;  %v3146_v35 = vpop.f32.mrb[45].mxu1 }
 0x161   :  { %v1645_v33 = vadd.f32 %v3107_v26, %v4211_v23  ;;  %v3110_v41 = vadd.f32 %v3109_v17, %v3108_v7  ;;  %v3147_v38 = vadd.f32 %v3146_v35, %v3145_v54  ;;  %v3148_v39 = vpop.f32.mrb[46].mxu1 }
 0x162   :  { %v3149_v48 = vpop.f32.mrb[47].mxu1 }
 0x163   :  { %v1648_v55 = vadd.f32 %v3110_v41, %v4216_v45  ;;  %v3150_v56 = vadd.f32 %v3149_v48, %v3148_v39  ;;  %v1710_v40 = vadd.f32 %v3147_v38, %v1645_v33  ;;  %v1307_v33 = vsel %vm1250_vm12, 0.0, %v4346_v20 }
 0x164   :  { %v1305_v39 = vsel %vm1248_vm10, 0.0, %v4322_v47 }
 0x165   :  { %v3111_v57 = vpop.f32.mrb[48].mxu0  ;;  %v1713_v1 = vadd.f32 %v3150_v56, %v1648_v55 }
 0x166   :  { %v3112_v62 = vpop.f32.mrb[49].mxu0 }
 0x167   :  { %v3113_v60 = vadd.f32 %v3112_v62, %v3111_v57  ;;  %v3114_v2 = vpop.f32.mrb[50].mxu0  ;;  %v3151_v21 = vpop.f32.mrb[48].mxu1 }
 0x168   :  { %v3115_v25 = vpop.f32.mrb[51].mxu0  ;;  %v3152_v5 = vpop.f32.mrb[49].mxu1 }
 0x169   :  { %v1653_v36 = vadd.f32 %v3113_v60, %v4220_v44  ;;  %v3116_v24 = vadd.f32 %v3115_v25, %v3114_v2  ;;  %v3153_v6 = vadd.f32 %v3152_v5, %v3151_v21  ;;  %v3154_v43 = vpop.f32.mrb[50].mxu1 }
 0x16a   :  { %v3155_v10 = vpop.f32.mrb[51].mxu1 }
 0x16b   :  { %v1656_v3 = vadd.f32 %v3116_v24, %v4222_v51  ;;  %v3156_v12 = vadd.f32 %v3155_v10, %v3154_v43  ;;  %v1718_v61 = vadd.f32 %v3153_v6, %v1653_v36  ;;  %v1311_v10 = vsel %vm1254_vm0, 0.0, %v4404_v50 }
 0x16d   :  { %v3117_v42 = vpop.f32.mrb[52].mxu0  ;;  %v4437_v4 = vadd.f32 %v3156_v12, %v1656_v3 }
 0x16e   :  { %v3118_v9 = vpop.f32.mrb[53].mxu0 }
 0x16f   :  { %v3119_v15 = vadd.f32 %v3118_v9, %v3117_v42  ;;  %v3120_v16 = vpop.f32.mrb[54].mxu0  ;;  %v3157_v18 = vpop.f32.mrb[52].mxu1 }
 0x170   :  { %v3121_v13 = vpop.f32.mrb[55].mxu0  ;;  %v3158_v63 = vpop.f32.mrb[53].mxu1 }
 0x171   :  { %v1661_v53 = vadd.f32 %v3119_v15, %v4226_v8  ;;  %v3122_v22 = vadd.f32 %v3121_v13, %v3120_v16  ;;  %v3159_v0 = vadd.f32 %v3158_v63, %v3157_v18  ;;  %v3160_v28 = vpop.f32.mrb[54].mxu1  ;;  %v1309_v15 = vsel %vm1252_vm14, 0.0, %v4374_v52 }
 0x172   :  { %v3161_v37 = vpop.f32.mrb[55].mxu1 }
 0x173   :  { %v1664_v34 = vadd.f32 %v3122_v22, %v4228_v59  ;;  %v3162_v30 = vadd.f32 %v3161_v37, %v3160_v28  ;;  %v1726_v31 = vadd.f32 %v3159_v0, %v1661_v53  ;;  %v1312_v53 = vsel %vm1255_vm1, 0.0, %v4414_v14 }
 0x174   :  { %v1310_v28 = vsel %vm1253_vm15, 0.0, %v4385_v49 }
 0x175   :  { %v3301_v26 = vpop.f32.mrb[56].mxu0  ;;  %v1729_v17 = vadd.f32 %v3162_v30, %v1664_v34 }
 0x176   :  { %v1775_v7 = vadd.f32 %v3301_v26, %v1710_v40  ;;  %v1766_v54 = vpop.f32.mrb[57].mxu0  ;;  %v1308_v40 = vsel %vm1251_vm13, 0.0, %v4357_v32 }
 0x177   :  { %v1767_v41 = vadd.f32 %v1766_v54, %v1702_v27  ;;  %v3302_v35 = vpop.f32.mrb[58].mxu0  ;;  %v3187_v56 = vpop.f32.mrb[56].mxu1  ;;  %v1306_v27 = vsel %vm1249_vm11, 0.0, %v4328_v58 }
 0x178   :  { %v4444_v38 = vadd.f32 %v1775_v7, %v1307_v33  ;;  %v1778_v55 = vadd.f32 %v3302_v35, %v1713_v1  ;;  %v1769_v48 = vpop.f32.mrb[59].mxu0  ;;  %v3188_v60 = vpop.f32.mrb[57].mxu1 }
 0x179   :  { %v4449_v57 = vadd.f32 %v1767_v41, %v1305_v39  ;;  %v1770_v62 = vadd.f32 %v1769_v48, %v1705_v46  ;;  %v4460_v47 = vadd.f32 %v3188_v60, %v3187_v56  ;;  %v3190_v1 = vpop.f32.mrb[58].mxu1 }
 0x17a   :  { %vm1807_vm3 = vcmp.ge.f32.partialorder %v4444_v38, 1.0  ;;  %v4455_v20 = vadd.f32 %v1778_v55, %v1308_v40  ;;  %v3191_v32 = vpop.f32.mrb[59].mxu1 }
 0x17b   :  { %v1815_v2 = vsel %vm1807_vm3, 1.0, %v3511_v29  ;;  %v4465_v21 = vadd.f32 %v1770_v62, %v1306_v27  ;;  %vm1805_vm4 = vcmp.ge.f32.partialorder %v4449_v57, 1.0  ;;  %v4469_v25 = vadd.f32 %v3191_v32, %v3190_v1 }
 0x17c   :  { %v2893_v46 = vpack.c.bf16 %v1815_v2, %v1815_v2  ;;  %vm1808_vm5 = vcmp.ge.f32.partialorder %v4455_v20, 1.0  ;;  %v1813_v24 = vsel %vm1805_vm4, 1.0, %v3511_v29 }
 0x17d   :  { %v1816_v58 = vsel %vm1808_vm5, 1.0, %v3511_v29  ;;  %v3305_v36 = vpop.f32.mrb[60].mxu0  ;;  %v2891_v3 = vpack.c.bf16 %v1813_v24, %v1813_v24  ;;  %vm1806_vm6 = vcmp.ge.f32.partialorder %v4465_v21, 1.0 }
 0x17e   :  { %2741 = vst.msk [vmem:[%s4633_s3 + $0x48] sm:$0xf] %vm739_vm2, %v2893_v46  ;;  %v2894_v5 = vpack.c.bf16 %v1816_v58, %v1816_v58  ;;  %v1791_v6 = vadd.f32 %v3305_v36, %v1726_v31  ;;  %v1782_v43 = vpop.f32.mrb[61].mxu0  ;;  %v1814_v50 = vsel %vm1806_vm6, 1.0, %v3511_v29  ;;  %v2194_v36 = vadd.f32 %v4460_v47, %v4206_v11 }
 0x17f   :  { %v1783_v12 = vadd.f32 %v1782_v43, %v1718_v61  ;;  %v3306_v42 = vpop.f32.mrb[62].mxu0  ;;  %v3193_v13 = vpop.f32.mrb[60].mxu1  ;;  %2739 = vst.msk [vmem:[%s4633_s3 + $0x40] sm:$0xf] %vm739_vm2, %v2891_v3  ;;  %v2892_v63 = vpack.c.bf16 %v1814_v50, %v1814_v50  ;;  %v2197_v3 = vadd.f32 %v4469_v25, %v4208_v19  ;;  %v1862_v50 = vsel %vm1805_vm4, 0.0, %v4449_v57 }
 0x180   :  { %2742 = vst.msk [vmem:[%s4633_s3 + $0x4c] sm:$0xf] %vm739_vm2, %v2894_v5  ;;  %v4489_v9 = vadd.f32 %v1791_v6, %v1311_v10  ;;  %v1794_v16 = vadd.f32 %v3306_v42, %v1729_v17  ;;  %v1785_v18 = vpop.f32.mrb[63].mxu0  ;;  %v3194_v22 = vpop.f32.mrb[61].mxu1 }
 0x181   :  { %v4501_v61 = vadd.f32 %v1783_v12, %v1309_v15  ;;  %v1786_v52 = vadd.f32 %v1785_v18, %v4437_v4  ;;  %v3195_v34 = vadd.f32 %v3194_v22, %v3193_v13  ;;  %v3196_v37 = vpop.f32.mrb[62].mxu1  ;;  %2740 = vst.msk [vmem:[%s4633_s3 + $0x44] sm:$0xf] %vm739_vm2, %v2892_v63 }
 0x182   :  { %vm1811_vm7 = vcmp.ge.f32.partialorder %v4489_v9, 1.0  ;;  %v4508_v0 = vadd.f32 %v1794_v16, %v1312_v53  ;;  %v3197_v14 = vpop.f32.mrb[63].mxu1 }
 0x183   :  { %v1819_v30 = vsel %vm1811_vm7, 1.0, %v3511_v29  ;;  %v4516_v31 = vadd.f32 %v1786_v52, %v1310_v28  ;;  %vm1809_vm8 = vcmp.ge.f32.partialorder %v4501_v61, 1.0  ;;  %v3198_v49 = vadd.f32 %v3197_v14, %v3196_v37 }
 0x184   :  { %v2897_v4 = vpack.c.bf16 %v1819_v30, %v1819_v30  ;;  %vm1812_vm9 = vcmp.ge.f32.partialorder %v4508_v0, 1.0  ;;  %v1817_v7 = vsel %vm1809_vm8, 1.0, %v3511_v29  ;;  %v1863_v52 = vsel %vm1806_vm6, 0.0, %v4465_v21 }
 0x185   :  { %v1820_v26 = vsel %vm1812_vm9, 1.0, %v3511_v29  ;;  %v2895_v17 = vpack.c.bf16 %v1817_v7, %v1817_v7  ;;  %vm1810_vm10 = vcmp.ge.f32.partialorder %v4516_v31, 1.0  ;;  %v2202_v19 = vadd.f32 %v3195_v34, %v4211_v23 }
 0x186   :  { %2745 = vst.msk [vmem:[%s4633_s3 + $0x58] sm:$0xf] %vm739_vm2, %v2897_v4  ;;  %v2898_v54 = vpack.c.bf16 %v1820_v26, %v1820_v26  ;;  %v1818_v33 = vsel %vm1810_vm10, 1.0, %v3511_v29  ;;  %v2205_v37 = vadd.f32 %v3198_v49, %v4216_v45 }
 0x187   :  { %v3199_v41 = vpop.f32.mrb[64].mxu1  ;;  %2743 = vst.msk [vmem:[%s4633_s3 + $0x50] sm:$0xf] %vm739_vm2, %v2895_v17  ;;  %v2896_v35 = vpack.c.bf16 %v1818_v33, %v1818_v33  ;;  %v1864_v33 = vsel %vm1807_vm3, 0.0, %v4444_v38 }
 0x188   :  { %2746 = vst.msk [vmem:[%s4633_s3 + $0x5c] sm:$0xf] %vm739_vm2, %v2898_v54  ;;  %v3200_v39 = vpop.f32.mrb[65].mxu1 }
 0x189   :  { %v3201_v55 = vadd.f32 %v3200_v39, %v3199_v41  ;;  %v3202_v48 = vpop.f32.mrb[66].mxu1  ;;  %2744 = vst.msk [vmem:[%s4633_s3 + $0x54] sm:$0xf] %vm739_vm2, %v2896_v35 }
 0x18a   :  { %v3203_v56 = vpop.f32.mrb[67].mxu1 }
 0x18b   :  { %v3204_v40 = vadd.f32 %v3203_v56, %v3202_v48  ;;  %v1865_v48 = vsel %vm1808_vm5, 0.0, %v4455_v20 }
 0x18d   :  { %v2213_v38 = vadd.f32 %v3204_v40, %v4222_v51  ;;  %v1866_v51 = vsel %vm1809_vm8, 0.0, %v4501_v61 }
 0x18f   :  { %v3205_v62 = vpop.f32.mrb[68].mxu1 }
 0x190   :  { %v3206_v60 = vpop.f32.mrb[69].mxu1 }
 0x191   :  { %v4550_v27 = vadd.f32 %v3206_v60, %v3205_v62  ;;  %v3208_v1 = vpop.f32.mrb[70].mxu1  ;;  %v2210_v62 = vadd.f32 %v3201_v55, %v4220_v44 }
 0x192   :  { %v3209_v2 = vpop.f32.mrb[71].mxu1 }
 0x193   :  { %v4552_v32 = vadd.f32 %v3209_v2, %v3208_v1 }
 0x195   :  { %v3227_v46 = vpop.f32.mrb[64].mxu0 }
 0x196   :  { %v3228_v58 = vpop.f32.mrb[65].mxu0 }
 0x197   :  { %v3229_v24 = vadd.f32 %v3228_v58, %v3227_v46  ;;  %v3230_v5 = vpop.f32.mrb[66].mxu0  ;;  %v3317_v43 = vpop.f32.mrb[72].mxu1 }
 0x198   :  { %v3231_v6 = vpop.f32.mrb[67].mxu0  ;;  %v2323_v42 = vpop.f32.mrb[73].mxu1 }
 0x199   :  { %v3232_v10 = vadd.f32 %v3231_v6, %v3230_v5  ;;  %v2259_v12 = vadd.f32 %v3229_v24, %v2194_v36  ;;  %v3318_v15 = vpop.f32.mrb[74].mxu1 }
 0x19a   :  { %v2326_v13 = vpop.f32.mrb[75].mxu1 }
 0x19b   :  { %v2324_v16 = vadd.f32 %v2323_v42, %v2259_v12  ;;  %v2262_v18 = vadd.f32 %v3232_v10, %v2197_v3  ;;  %v1867_v10 = vsel %vm1810_vm10, 0.0, %v4516_v31  ;;  %v2218_v42 = vadd.f32 %v4550_v27, %v4226_v8 }
 0x19d   :  { %v2354_v53 = vadd.f32 %v2324_v16, %v1862_v50  ;;  %v2327_v11 = vadd.f32 %v2326_v13, %v2262_v18  ;;  %v3233_v47 = vpop.f32.mrb[68].mxu0  ;;  %v2221_v18 = vadd.f32 %v4552_v32, %v4228_v59  ;;  %v1868_v59 = vsel %vm1811_vm7, 0.0, %v4489_v9 }
 0x19e   :  { %v3234_v22 = vpop.f32.mrb[69].mxu0 }
 0x19f   :  { %vm2362_vm11 = vcmp.ge.f32.partialorder %v2354_v53, 1.0  ;;  %v2355_v25 = vadd.f32 %v2327_v11, %v1863_v52  ;;  %v3235_v63 = vadd.f32 %v3234_v22, %v3233_v47  ;;  %v3236_v28 = vpop.f32.mrb[70].mxu0  ;;  %v3321_v57 = vpop.f32.mrb[76].mxu1 }
 0x1a0   :  { %v2370_v30 = vsel %vm2362_vm11, 1.0, %v3511_v29  ;;  %v3237_v14 = vpop.f32.mrb[71].mxu0  ;;  %v2339_v54 = vpop.f32.mrb[77].mxu1 }
 0x1a1   :  { %v2899_v4 = vpack.c.bf16 %v2370_v30, %v2370_v30  ;;  %vm2363_vm12 = vcmp.ge.f32.partialorder %v2355_v25, 1.0  ;;  %v2267_v26 = vadd.f32 %v3235_v63, %v2202_v19  ;;  %v3238_v7 = vadd.f32 %v3237_v14, %v3236_v28  ;;  %v3322_v17 = vpop.f32.mrb[78].mxu1 }
 0x1a2   :  { %v2371_v21 = vsel %vm2363_vm12, 1.0, %v3511_v29  ;;  %v2342_v49 = vpop.f32.mrb[79].mxu1  ;;  %v1869_v19 = vsel %vm1812_vm9, 0.0, %v4508_v0 }
 0x1a3   :  { %2867 = vst.msk [vmem:[%s4633_s3 + $0x60] sm:$0xf] %vm739_vm2, %v2899_v4  ;;  %v2900_v23 = vpack.c.bf16 %v2371_v21, %v2371_v21  ;;  %v2332_v34 = vadd.f32 %v3317_v43, %v2267_v26  ;;  %v2270_v45 = vadd.f32 %v3238_v7, %v2205_v37 }
 0x1a5   :  { %2868 = vst.msk [vmem:[%s4633_s3 + $0x64] sm:$0xf] %vm739_vm2, %v2900_v23  ;;  %v2356_v41 = vadd.f32 %v2332_v34, %v1864_v33  ;;  %v2335_v35 = vadd.f32 %v3318_v15, %v2270_v45  ;;  %v3239_v39 = vpop.f32.mrb[72].mxu0 }
 0x1a6   :  { %v3240_v56 = vpop.f32.mrb[73].mxu0 }
 0x1a7   :  { %vm2364_vm13 = vcmp.ge.f32.partialorder %v2356_v41, 1.0  ;;  %v2357_v60 = vadd.f32 %v2335_v35, %v1865_v48  ;;  %v3241_v1 = vadd.f32 %v3240_v56, %v3239_v39  ;;  %v3242_v2 = vpop.f32.mrb[74].mxu0 }
 0x1a8   :  { %v2372_v46 = vsel %vm2364_vm13, 1.0, %v3511_v29  ;;  %v3243_v58 = vpop.f32.mrb[75].mxu0 }
 0x1a9   :  { %v2901_v36 = vpack.c.bf16 %v2372_v46, %v2372_v46  ;;  %vm2365_vm14 = vcmp.ge.f32.partialorder %v2357_v60, 1.0  ;;  %v3244_v24 = vadd.f32 %v3243_v58, %v3242_v2  ;;  %v2275_v5 = vadd.f32 %v3241_v1, %v2210_v62 }
 0x1aa   :  { %v2373_v6 = vsel %vm2365_vm14, 1.0, %v3511_v29 }
 0x1ab   :  { %2869 = vst.msk [vmem:[%s4633_s3 + $0x68] sm:$0xf] %vm739_vm2, %v2901_v36  ;;  %v2902_v44 = vpack.c.bf16 %v2373_v6, %v2373_v6  ;;  %v2340_v20 = vadd.f32 %v2339_v54, %v2275_v5  ;;  %v2278_v55 = vadd.f32 %v3244_v24, %v2213_v38 }
 0x1ad   :  { %2870 = vst.msk [vmem:[%s4633_s3 + $0x6c] sm:$0xf] %vm739_vm2, %v2902_v44  ;;  %v2358_v40 = vadd.f32 %v2340_v20, %v1866_v51  ;;  %v2343_v43 = vadd.f32 %v2342_v49, %v2278_v55  ;;  %v3245_v3 = vpop.f32.mrb[76].mxu0 }
 0x1ae   :  { %v3246_v12 = vpop.f32.mrb[77].mxu0 }
 0x1af   :  { %vm2366_vm15 = vcmp.ge.f32.partialorder %v2358_v40, 1.0  ;;  %v2359_v15 = vadd.f32 %v2343_v43, %v1867_v10  ;;  %v3247_v16 = vadd.f32 %v3246_v12, %v3245_v3  ;;  %v3248_v61 = vpop.f32.mrb[78].mxu0 }
 0x1b0   :  { %v2374_v13 = vsel %vm2366_vm15, 1.0, %v3511_v29  ;;  %v3249_v50 = vpop.f32.mrb[79].mxu0 }
 0x1b1   :  { %v2903_v53 = vpack.c.bf16 %v2374_v13, %v2374_v13  ;;  %vm2367_vm0 = vcmp.ge.f32.partialorder %v2359_v15, 1.0  ;;  %v2283_v11 = vadd.f32 %v3247_v16, %v2218_v42  ;;  %v3250_v47 = vadd.f32 %v3249_v50, %v3248_v61 }
 0x1b2   :  { %v2375_v31 = vsel %vm2367_vm0, 1.0, %v3511_v29 }
 0x1b3   :  { %2871 = vst.msk [vmem:[%s4633_s3 + $0x70] sm:$0xf] %vm739_vm2, %v2903_v53  ;;  %v2904_v8 = vpack.c.bf16 %v2375_v31, %v2375_v31  ;;  %v2348_v27 = vadd.f32 %v3321_v57, %v2283_v11  ;;  %v2286_v52 = vadd.f32 %v3250_v47, %v2221_v18 }
 0x1b5   :  { %2872 = vst.msk [vmem:[%s4633_s3 + $0x74] sm:$0xf] %vm739_vm2, %v2904_v8  ;;  %v2360_v32 = vadd.f32 %v2348_v27, %v1868_v59  ;;  %v2351_v22 = vadd.f32 %v3322_v17, %v2286_v52 }
 0x1b7   :  { %vm2368_vm1 = vcmp.ge.f32.partialorder %v2360_v32, 1.0  ;;  %v2361_v25 = vadd.f32 %v2351_v22, %v1869_v19 }
 0x1b8   :  { %v2376_v63 = vsel %vm2368_vm1, 1.0, %v3511_v29 }
 0x1b9   :  { %v2905_v28 = vpack.c.bf16 %v2376_v63, %v2376_v63  ;;  %vm2369_vm3 = vcmp.ge.f32.partialorder %v2361_v25, 1.0 }
 0x1ba   :  { %v2377_v37 = vsel %vm2369_vm3, 1.0, %v3511_v29 }
 0x1bb   :  { %2873 = vst.msk [vmem:[%s4633_s3 + $0x78] sm:$0xf] %vm739_vm2, %v2905_v28  ;;  %v2906_v9 = vpack.c.bf16 %v2377_v37, %v2377_v37 }
 0x1bd   :  { %2874 = vst.msk [vmem:[%s4633_s3 + $0x7c] sm:$0xf] %vm739_vm2, %v2906_v9 }

// kernel: dvs_event_net_forward.13
= control target key start
LH: loop header
LB: loop body
LE: loop exit
PB: predicated region body
PF: predicated region fallthrough
CT: control target
= control target key end

     0   :  { %v531_v0 = vmov 0.0   ;;  %vm532_vm0 = vmmov 0   ;;  %v533_v4 = vmov 0   ;;  %vm66_vm1 = vcmask 523264   ;;  %s653_s0 = inlined_call_operand.vmem [shape: bf16[4,64,2], index: 0, kind: input, shape index: {}]   ;;  %s654_s1 = inlined_call_operand.vmem [shape: bf16[10,64], index: 1, kind: input, shape index: {}]   ;;  %s655_s2 = inlined_call_operand.vmem [shape: f32[10,1], index: 2, kind: input, shape index: {}]   ;;  %s656_s3 = inlined_call_operand.vmem [shape: f32[10,2], index: 3, kind: output, shape index: {}]  }
   0x1   :  { %462 = vmatprep.subr.bf16.mxu0 %v531_v0  ;;  %474 = vmatprep.subr.bf16.mxu1 %v531_v0  ;;  %v514_v1 = vld [vmem:[%s653_s0] sm:$0xff]   ;;  %v516_v3 = vld [vmem:[%s653_s0 + $0x8] sm:$0xff]   ;;  %v518_v6 = vld [vmem:[%s653_s0 + $0x10] sm:$0xff]   ;;  %vm381_vm10 = vcmask 15360   ;;  %vm383_vm11 = vcmask 9216  }
   0x2   :  { %v515_v2 = vld [vmem:[%s653_s0 + $0x20] sm:$0xff]   ;;  %470 = vmatprep.mubr.msk.bf16.mxu0 %vm532_vm0, %v531_v0  ;;  %482 = vmatprep.mubr.msk.bf16.mxu1 %vm532_vm0, %v531_v0  ;;  %v517_v5 = vld [vmem:[%s653_s0 + $0x28] sm:$0xff]   ;;  %v519_v7 = vld [vmem:[%s653_s0 + $0x30] sm:$0xff]  }
   0x3   :  { %463 = vmatpush3.bf16.msra.mxu0 %v514_v1  ;;  %513 = vset.pattern.permute.xlu0 %v533_v4  ;;  %v520_v8 = vld [vmem:[%s653_s0 + $0x18] sm:$0xff]   ;;  %v522_v10 = vld [vmem:[%s654_s1] sm:$0x1f]   ;;  %v525_v13 = vld [vmem:[%s653_s0 + $0x48] sm:$0xff]  }
   0x4   :  { %475 = vmatpush3.bf16.msra.mxu1 %v515_v2  ;;  %464 = vmatprep.subr.bf16.mxu0 %v531_v0  ;;  %v521_v9 = vld [vmem:[%s653_s0 + $0x38] sm:$0xff]   ;;  %v523_v11 = vld [vmem:[%s653_s0 + $0x40] sm:$0xff]   ;;  %v526_v15 = vld [vmem:[%s653_s0 + $0x68] sm:$0xff]  }
   0x5   :  { %476 = vmatprep.subr.bf16.mxu1 %v531_v0  ;;  %v524_v12 = vld [vmem:[%s653_s0 + $0x60] sm:$0xff]   ;;  %v527_v16 = vld [vmem:[%s653_s0 + $0x50] sm:$0xff]   ;;  %v18_v17 = vld [vmem:[%s655_s2 + $0x8] sm:$0x3] }
   0x6   :  { %v17_v14 = vld [vmem:[%s655_s2] sm:$0xff]  ;;  %v528_v18 = vld [vmem:[%s653_s0 + $0x70] sm:$0xff]   ;;  %v529_v19 = vld [vmem:[%s653_s0 + $0x58] sm:$0xff]  }
   0x7   :  { %465 = vmatpush3.bf16.msra.mxu0 %v516_v3  ;;  %21 = vperm.xlu0 %513, %v17_v14   ;;  %v530_v20 = vld [vmem:[%s653_s0 + $0x78] sm:$0xff]  }
   0x8   :  { %477 = vmatpush3.bf16.msra.mxu1 %v517_v5  ;;  %466 = vmatprep.subr.bf16.mxu0 %v531_v0 }
   0x9   :  { %478 = vmatprep.subr.bf16.mxu1 %v531_v0 }
   0xb   :  { %467 = vmatpush3.bf16.msra.mxu0 %v518_v6  ;;  %26 = vperm.xlu0 %513, %v18_v17  }
   0xc   :  { %479 = vmatpush3.bf16.msra.mxu1 %v519_v7  ;;  %468 = vmatprep.subr.bf16.mxu0 %v531_v0 }
   0xd   :  { %480 = vmatprep.subr.bf16.mxu1 %v531_v0 }
   0xf   :  { %469 = vmatpush3.bf16.msra.mxu0 %v520_v8 }
  0x10   :  { %481 = vmatpush3.bf16.msra.mxu1 %v521_v9  ;;  %486 = vmatprep.subr.bf16.mxu0 %v531_v0 }
  0x11   :  { %498 = vmatprep.subr.bf16.mxu1 %v531_v0 }
  0x12   :  { %471 = vmatmul.mubr.msk.bf16.vlgmr.msra.gmra.mrb[0].mxu0 %vm66_vm1, %v522_v10 }
  0x13   :  { %483 = vmatmul.mubr.msk.bf16.vlgmr.msra.gmra.mrb[0].mxu1 %vm66_vm1, %v522_v10  ;;  %487 = vmatpush3.bf16.msra.mxu0 %v523_v11 }
  0x14   :  { %499 = vmatpush3.bf16.msra.mxu1 %v524_v12  ;;  %488 = vmatprep.subr.bf16.mxu0 %v531_v0 }
  0x15   :  { %500 = vmatprep.subr.bf16.mxu1 %v531_v0  ;;  %494 = vmatprep.mubr.msk.bf16.mxu0 %vm532_vm0, %v531_v0 }
  0x16   :  { %506 = vmatprep.mubr.msk.bf16.mxu1 %vm532_vm0, %v531_v0 }
  0x17   :  { %489 = vmatpush3.bf16.msra.mxu0 %v525_v13 }
  0x18   :  { %501 = vmatpush3.bf16.msra.mxu1 %v526_v15  ;;  %490 = vmatprep.subr.bf16.mxu0 %v531_v0 }
  0x19   :  { %502 = vmatprep.subr.bf16.mxu1 %v531_v0 }
  0x1b   :  { %491 = vmatpush3.bf16.msra.mxu0 %v527_v16 }
  0x1c   :  { %503 = vmatpush3.bf16.msra.mxu1 %v528_v18  ;;  %492 = vmatprep.subr.bf16.mxu0 %v531_v0 }
  0x1d   :  { %504 = vmatprep.subr.bf16.mxu1 %v531_v0 }
  0x1f   :  { %493 = vmatpush3.bf16.msra.mxu0 %v529_v19 }
  0x20   :  { %505 = vmatpush3.bf16.msra.mxu1 %v530_v20 }
  0x22   :  { %495 = vmatmul.mubr.msk.bf16.vlgmr.msra.gmra.mrb[4].mxu0 %vm66_vm1, %v522_v10 }
  0x23   :  { %507 = vmatmul.mubr.msk.bf16.vlgmr.msra.gmra.mrb[4].mxu1 %vm66_vm1, %v522_v10 }
  0x86   :  { %v22_v21 = vpop.permute.xlu0 %21 }
  0x8a   :  { %v27_v23 = vpop.permute.xlu0 %26 }
  0xe5   :  { %v104_v22 = vpop.f32.mrb[0].mxu0 }
  0xe6   :  { %v105_v24 = vadd.f32 %v104_v22, %v22_v21  ;;  %v472_v25 = vpop.f32.mrb[1].mxu0  ;;  %v190_v26 = vpop.f32.mrb[0].mxu1 }
  0xe7   :  { %v107_v27 = vpop.f32.mrb[2].mxu0  ;;  %v191_v28 = vadd.f32 %v190_v26, %v22_v21  ;;  %v484_v29 = vpop.f32.mrb[1].mxu1 }
  0xe8   :  { %vm113_vm2 = vcmp.ge.f32.partialorder %v105_v24, 1.0  ;;  %v108_v30 = vadd.f32 %v107_v27, %v27_v23  ;;  %v473_v31 = vpop.f32.mrb[3].mxu0  ;;  %v193_v32 = vpop.f32.mrb[2].mxu1 }
  0xe9   :  { %v121_v33 = vsel %vm113_vm2, 0.0, %v105_v24  ;;  %v194_v34 = vadd.f32 %v193_v32, %v27_v23  ;;  %v485_v35 = vpop.f32.mrb[3].mxu1  ;;  %v395_v39 = vsel %vm113_vm2, 1.0, %v531_v0 }
  0xea   :  { %vm114_vm3 = vcmp.ge.f32.partialorder %v108_v30, 1.0  ;;  %v197_v36 = vadd.f32 %v191_v28, %v121_v33 }
  0xeb   :  { %v122_v37 = vsel %vm114_vm3, 0.0, %v108_v30  ;;  %v396_v42 = vsel %vm114_vm3, 1.0, %v531_v0 }
  0xec   :  { %v198_v38 = vadd.f32 %v194_v34, %v122_v37  ;;  %vm199_vm4 = vcmp.ge.f32.partialorder %v197_v36, 1.0 }
  0xed   :  { %v410_v40 = vsel %vm199_vm4, 1.0, %v531_v0  ;;  %v207_v49 = vsel %vm199_vm4, 0.0, %v197_v36 }
  0xee   :  { %v205_v41 = vadd.f32 %v410_v40, %v395_v39  ;;  %vm200_vm5 = vcmp.ge.f32.partialorder %v198_v38, 1.0 }
  0xef   :  { %v411_v43 = vsel %vm200_vm5, 1.0, %v531_v0  ;;  %v208_v56 = vsel %vm200_vm5, 0.0, %v198_v38 }
  0xf0   :  { %v206_v44 = vadd.f32 %v411_v43, %v396_v42 }
  0xf5   :  { %v276_v45 = vpop.f32.mrb[4].mxu0 }
  0xf6   :  { %v277_v46 = vadd.f32 %v276_v45, %v22_v21  ;;  %v362_v47 = vpop.f32.mrb[4].mxu1  ;;  %v496_v48 = vpop.f32.mrb[5].mxu0 }
  0xf7   :  { %v508_v50 = vpop.f32.mrb[5].mxu1  ;;  %v279_v51 = vpop.f32.mrb[6].mxu0  ;;  %v363_v58 = vadd.f32 %v362_v47, %v22_v21 }
  0xf8   :  { %v283_v52 = vadd.f32 %v277_v46, %v207_v49  ;;  %v280_v53 = vadd.f32 %v279_v51, %v27_v23  ;;  %v365_v54 = vpop.f32.mrb[6].mxu1  ;;  %v497_v55 = vpop.f32.mrb[7].mxu0 }
  0xf9   :  { %v509_v57 = vpop.f32.mrb[7].mxu1  ;;  %v366_v1 = vadd.f32 %v365_v54, %v27_v23 }
  0xfa   :  { %vm285_vm6 = vcmp.ge.f32.partialorder %v283_v52, 1.0  ;;  %v284_v59 = vadd.f32 %v280_v53, %v208_v56 }
  0xfb   :  { %v425_v60 = vsel %vm285_vm6, 1.0, %v531_v0  ;;  %v293_v61 = vsel %vm285_vm6, 0.0, %v283_v52 }
  0xfc   :  { %v291_v62 = vadd.f32 %v425_v60, %v205_v41  ;;  %v369_v63 = vadd.f32 %v363_v58, %v293_v61  ;;  %vm286_vm7 = vcmp.ge.f32.partialorder %v284_v59, 1.0 }
  0xfd   :  { %v426_v2 = vsel %vm286_vm7, 1.0, %v531_v0  ;;  %v294_v3 = vsel %vm286_vm7, 0.0, %v284_v59 }
  0xfe   :  { %vm371_vm8 = vcmp.ge.f32.partialorder %v369_v63, 1.0  ;;  %v292_v4 = vadd.f32 %v426_v2, %v206_v44  ;;  %v370_v5 = vadd.f32 %v366_v1, %v294_v3 }
  0xff   :  { %v440_v6 = vsel %vm371_vm8, 1.0, %v531_v0 }
 0x100   :  { %v377_v7 = vadd.f32 %v440_v6, %v291_v62  ;;  %vm372_vm9 = vcmp.ge.f32.partialorder %v370_v5, 1.0 }
 0x101   :  { %v441_v8 = vsel %vm372_vm9, 1.0, %v531_v0 }
 0x102   :  { %v379_v9 = vmul.f32 0.25, %v377_v7  ;;  %v378_v10 = vadd.f32 %v441_v8, %v292_v4 }
 0x104   :  { %382 = vst.msk [vmem:[%s656_s3] sm:$0xff] %vm381_vm10, %v379_v9  ;;  %v380_v11 = vmul.f32 0.25, %v378_v10 }
 0x106   :  { %384 = vst.msk [vmem:[%s656_s3 + $0x8] sm:$0x3] %vm383_vm11, %v380_v11 }

// kernel: dvs_event_net_forward.12
= control target key start
LH: loop header
LB: loop body
LE: loop exit
PB: predicated region body
PF: predicated region fallthrough
CT: control target
= control target key end

     0   :  { %v3510_v1 = vmov 0   ;;  %vm475_vm0 = vcmask 523264   ;;  %vm739_vm2 = vcmask 11264   ;;  %s4630_s0 = inlined_call_operand.vmem [shape: bf16[4,576,2], index: 0, kind: input, shape index: {}]   ;;  %s4631_s1 = inlined_call_operand.vmem [shape: bf16[64,576], index: 1, kind: input, shape index: {}]   ;;  %s4632_s2 = inlined_call_operand.vmem [shape: f32[64,1], index: 2, kind: input, shape index: {}]   ;;  %s4633_s3 = inlined_call_operand.vmem [shape: bf16[4,64,2], index: 3, kind: output, shape index: {}]  }
   0x1   :  { %v3327_v0 = vld [vmem:[%s4630_s0 + $0x40] sm:$0xff]   ;;  %3325 = vset.pattern.permute.xlu0 %v3510_v1  ;;  %3326 = vset.pattern.permute.xlu1 %v3510_v1  ;;  %v3331_v5 = vld [vmem:[%s4630_s0 + $0x48] sm:$0xff]   ;;  %v3335_v9 = vld [vmem:[%s4630_s0 + $0x50] sm:$0xff]  }
   0x2   :  { %v3328_v2 = vld [vmem:[%s4630_s0] sm:$0xff]   ;;  %2907 = vmatprep.subr.bf16.mxu0 %v3327_v0  ;;  %v3332_v6 = vld [vmem:[%s4630_s0 + $0x8] sm:$0xff]   ;;  %v3336_v10 = vld [vmem:[%s4630_s0 + $0x10] sm:$0xff]  }
   0x3   :  { %v3329_v3 = vld [vmem:[%s4630_s0 + $0xc0] sm:$0xff]   ;;  %2908 = vmatpush3.bf16.msra.mxu0 %v3328_v2  ;;  %v3333_v7 = vld [vmem:[%s4630_s0 + $0xc8] sm:$0xff]   ;;  %v3337_v11 = vld [vmem:[%s4630_s0 + $0xd0] sm:$0xff]  }
   0x4   :  { %v3330_v4 = vld [vmem:[%s4630_s0 + $0x80] sm:$0xff]   ;;  %2947 = vmatprep.subr.bf16.mxu1 %v3329_v3  ;;  %2909 = vmatprep.subr.bf16.mxu0 %v3331_v5  ;;  %v3334_v8 = vld [vmem:[%s4630_s0 + $0x88] sm:$0xff]   ;;  %v3338_v12 = vld [vmem:[%s4630_s0 + $0x90] sm:$0xff]  }
   0x5   :  { %2948 = vmatpush3.bf16.msra.mxu1 %v3330_v4  ;;  %v3339_v13 = vld [vmem:[%s4630_s0 + $0x58] sm:$0xff]   ;;  %v3343_v17 = vld [vmem:[%s4630_s0 + $0x60] sm:$0xff]   ;;  %v3347_v21 = vld [vmem:[%s4630_s0 + $0x68] sm:$0xff]  }
   0x6   :  { %2949 = vmatprep.subr.bf16.mxu1 %v3333_v7  ;;  %v3340_v14 = vld [vmem:[%s4630_s0 + $0x18] sm:$0xff]   ;;  %v3344_v18 = vld [vmem:[%s4630_s0 + $0x20] sm:$0xff]   ;;  %v3348_v22 = vld [vmem:[%s4630_s0 + $0x28] sm:$0xff]  }
   0x7   :  { %2910 = vmatpush3.bf16.msra.mxu0 %v3332_v6  ;;  %v3341_v15 = vld [vmem:[%s4630_s0 + $0xd8] sm:$0xff]   ;;  %v3345_v19 = vld [vmem:[%s4630_s0 + $0xe0] sm:$0xff]   ;;  %v3349_v23 = vld [vmem:[%s4630_s0 + $0xe8] sm:$0xff]  }
   0x8   :  { %2911 = vmatprep.subr.bf16.mxu0 %v3335_v9  ;;  %v3342_v16 = vld [vmem:[%s4630_s0 + $0x98] sm:$0xff]   ;;  %v3346_v20 = vld [vmem:[%s4630_s0 + $0xa0] sm:$0xff]   ;;  %v3350_v24 = vld [vmem:[%s4630_s0 + $0xa8] sm:$0xff]  }
   0x9   :  { %2950 = vmatpush3.bf16.msra.mxu1 %v3334_v8  ;;  %v3351_v25 = vld [vmem:[%s4630_s0 + $0x70] sm:$0xff]   ;;  %v3355_v29 = vld [vmem:[%s4630_s0 + $0x78] sm:$0xff]   ;;  %v3362_v35 = vld [vmem:[%s4630_s0 + $0x100] sm:$0xff]  }
   0xa   :  { %2951 = vmatprep.subr.bf16.mxu1 %v3337_v11  ;;  %v3352_v26 = vld [vmem:[%s4630_s0 + $0x30] sm:$0xff]   ;;  %v3356_v30 = vld [vmem:[%s4630_s0 + $0x38] sm:$0xff]   ;;  %v3646_v36 = vld [vmem:[%s4631_s1 + $0xc] ss:$20 sps:$4 sm:$0xff]  }
   0xb   :  { %2912 = vmatpush3.bf16.msra.mxu0 %v3336_v10  ;;  %v3353_v27 = vld [vmem:[%s4630_s0 + $0xf0] sm:$0xff]   ;;  %v3357_v31 = vld [vmem:[%s4630_s0 + $0xf8] sm:$0xff]   ;;  %v3366_v38 = vld [vmem:[%s4630_s0 + $0x160] sm:$0xff]   ;;  %585 = vmatprep.mubr.bf16.mxu1 %v3646_v36 }
   0xc   :  { %2913 = vmatprep.subr.bf16.mxu0 %v3339_v13  ;;  %v3354_v28 = vld [vmem:[%s4630_s0 + $0xb0] sm:$0xff]   ;;  %v3628_v32 = vld [vmem:[%s4631_s1 + $0x4] ss:$20 sps:$4 sm:$0xff]   ;;  %v3651_v37 = vld [vmem:[%s4631_s1 + $0x8] ss:$20 sps:$4 sm:$0xff]  }
   0xd   :  { %2952 = vmatpush3.bf16.msra.mxu1 %v3338_v12  ;;  %v3360_v33 = vld [vmem:[%s4630_s0 + $0xb8] sm:$0xff]   ;;  %520 = vmatprep.mubr.bf16.mxu0 %v3628_v32  ;;  %v3637_v34 = vld [vmem:[%s4631_s1] ss:$20 sps:$4 sm:$0xff]   ;;  %v3368_v40 = vld [vmem:[%s4630_s0 + $0x168] sm:$0xff]  }
   0xe   :  { %2953 = vmatprep.subr.bf16.mxu1 %v3341_v15  ;;  %v3367_v39 = vld [vmem:[%s4630_s0 + $0x120] sm:$0xff]   ;;  %v3371_v42 = vld [vmem:[%s4630_s0 + $0x128] sm:$0xff]   ;;  %v3377_v47 = vld [vmem:[%s4630_s0 + $0x170] sm:$0xff]  }
   0xf   :  { %2914 = vmatpush3.bf16.msra.mxu0 %v3340_v14  ;;  %v3667_v41 = vld [vmem:[%s4631_s1 + $0x2c] ss:$20 sps:$4 sm:$0xff]   ;;  %v3675_v43 = vld [vmem:[%s4631_s1 + $0x28] ss:$20 sps:$4 sm:$0xff]   ;;  %v3690_v46 = vld [vmem:[%s4631_s1 + $0x30] ss:$20 sps:$4 sm:$0xff]  }
  0x10   :  { %2915 = vmatprep.subr.bf16.mxu0 %v3343_v17  ;;  %v3373_v44 = vld [vmem:[%s4630_s0 + $0x108] sm:$0xff]   ;;  %v3378_v48 = vld [vmem:[%s4630_s0 + $0x130] sm:$0xff]   ;;  %v3379_v49 = vld [vmem:[%s4630_s0 + $0x178] sm:$0xff]  }
  0x11   :  { %2954 = vmatpush3.bf16.msra.mxu1 %v3342_v16  ;;  %v3684_v45 = vld [vmem:[%s4631_s1 + $0x34] ss:$20 sps:$4 sm:$0xff]   ;;  %v3382_v51 = vld [vmem:[%s4630_s0 + $0x138] sm:$0xff]   ;;  %v3714_v52 = vld [vmem:[%s4631_s1 + $0x50] ss:$20 sps:$4 sm:$0xff]  }
  0x12   :  { %2955 = vmatprep.subr.bf16.mxu1 %v3345_v19  ;;  %v3706_v50 = vld [vmem:[%s4631_s1 + $0x54] ss:$20 sps:$4 sm:$0xff]   ;;  %v3723_v54 = vld [vmem:[%s4631_s1 + $0x5c] ss:$20 sps:$4 sm:$0xff]   ;;  %v3728_v55 = vld [vmem:[%s4631_s1 + $0x58] ss:$20 sps:$4 sm:$0xff]  }
  0x13   :  { %2916 = vmatpush3.bf16.msra.mxu0 %v3344_v18  ;;  %v3384_v53 = vld [vmem:[%s4630_s0 + $0x110] sm:$0xff]   ;;  %v3388_v56 = vld [vmem:[%s4630_s0 + $0x180] sm:$0xff]   ;;  %v3390_v58 = vld [vmem:[%s4630_s0 + $0x188] sm:$0xff]  }
  0x14   :  { %2917 = vmatprep.subr.bf16.mxu0 %v3347_v21  ;;  %v3389_v57 = vld [vmem:[%s4630_s0 + $0x140] sm:$0xff]   ;;  %v3745_v59 = vld [vmem:[%s4631_s1 + $0x7c] ss:$20 sps:$4 sm:$0xff]   ;;  %v3393_v60 = vld [vmem:[%s4630_s0 + $0x148] sm:$0xff]  }
  0x15   :  { %2956 = vmatpush3.bf16.msra.mxu1 %v3346_v20  ;;  %v3754_v61 = vld [vmem:[%s4631_s1 + $0x78] ss:$20 sps:$4 sm:$0xff]   ;;  %v3767_v0 = vld [vmem:[%s4631_s1 + $0x80] ss:$20 sps:$4 sm:$0xff]   ;;  %v3784_v4 = vld [vmem:[%s4631_s1 + $0x10] ss:$20 sps:$4 sm:$0xff]  }
  0x16   :  { %2957 = vmatprep.subr.bf16.mxu1 %v3349_v23  ;;  %v3395_v62 = vld [vmem:[%s4630_s0 + $0x118] sm:$0xff]   ;;  %v3399_v1 = vld [vmem:[%s4630_s0 + $0x190] sm:$0xff]   ;;  %v3404_v6 = vld [vmem:[%s4630_s0 + $0x1e0] sm:$0xff]  }
  0x17   :  { %2918 = vmatpush3.bf16.msra.mxu0 %v3348_v22  ;;  %v3762_v63 = vld [vmem:[%s4631_s1 + $0x84] ss:$20 sps:$4 sm:$0xff]   ;;  %v3400_v2 = vld [vmem:[%s4630_s0 + $0x150] sm:$0xff]   ;;  %v3407_v9 = vld [vmem:[%s4630_s0 + $0x1e8] sm:$0xff]  }
  0x18   :  { %2919 = vmatprep.subr.bf16.mxu0 %v3351_v25  ;;  %v3401_v3 = vld [vmem:[%s4630_s0 + $0x198] sm:$0xff]   ;;  %v3406_v8 = vld [vmem:[%s4630_s0 + $0x1a0] sm:$0xff]   ;;  %v3408_v10 = vld [vmem:[%s4630_s0 + $0x1a8] sm:$0xff]  }
  0x19   :  { %2958 = vmatpush3.bf16.msra.mxu1 %v3350_v24  ;;  %v3403_v5 = vld [vmem:[%s4630_s0 + $0x158] sm:$0xff]   ;;  %v3814_v11 = vld [vmem:[%s4631_s1 + $0x60] ss:$20 sps:$4 sm:$0xff]   ;;  %v3420_v20 = vld [vmem:[%s4630_s0 + $0x228] sm:$0xff]  }
  0x1a   :  { %2959 = vmatprep.subr.bf16.mxu1 %v3353_v27  ;;  %v3798_v7 = vld [vmem:[%s4631_s1 + $0x38] ss:$20 sps:$4 sm:$0xff]   ;;  %v3410_v12 = vld [vmem:[%s4630_s0 + $0x1f0] sm:$0xff]   ;;  %v3825_v13 = vld [vmem:[%s4631_s1 + $0x88] ss:$20 sps:$4 sm:$0xff]  }
  0x1b   :  { %2920 = vmatpush3.bf16.msra.mxu0 %v3352_v26  ;;  %v3412_v14 = vld [vmem:[%s4630_s0 + $0x1b0] sm:$0xff]   ;;  %v3413_v15 = vld [vmem:[%s4630_s0 + $0x1f8] sm:$0xff]   ;;  %v3415_v17 = vld [vmem:[%s4630_s0 + $0x200] sm:$0xff]  }
  0x1c   :  { %2921 = vmatprep.subr.bf16.mxu0 %v3355_v29  ;;  %v3414_v16 = vld [vmem:[%s4630_s0 + $0x1b8] sm:$0xff]   ;;  %v3417_v18 = vld [vmem:[%s4630_s0 + $0x220] sm:$0xff]   ;;  %v3418_v21 = vld [vmem:[%s4630_s0 + $0x208] sm:$0xff]  }
  0x1d   :  { %2960 = vmatpush3.bf16.msra.mxu1 %v3354_v28  ;;  %v3416_v19 = vld [vmem:[%s4630_s0 + $0x1c0] sm:$0xff]   ;;  %v3423_v22 = vld [vmem:[%s4630_s0 + $0x230] sm:$0xff]   ;;  %v3419_v23 = vld [vmem:[%s4630_s0 + $0x1c8] sm:$0xff]  }
  0x1e   :  { %2961 = vmatprep.subr.bf16.mxu1 %v3357_v31  ;;  %v3421_v24 = vld [vmem:[%s4630_s0 + $0x210] sm:$0xff]   ;;  %v3426_v25 = vld [vmem:[%s4630_s0 + $0x238] sm:$0xff]   ;;  %v3429_v28 = vld [vmem:[%s4630_s0 + $0x300] sm:$0xff]  }
  0x1f   :  { %2922 = vmatpush3.bf16.msra.mxu0 %v3356_v30  ;;  %v3422_v26 = vld [vmem:[%s4630_s0 + $0x1d0] sm:$0xff]   ;;  %v3424_v27 = vld [vmem:[%s4630_s0 + $0x218] sm:$0xff]   ;;  %v3427_v30 = vld [vmem:[%s4630_s0 + $0x280] sm:$0xff]  }
  0x20   :  { %3259 = vmatprep.subr.bf16.mxu0 %v3362_v35  ;;  %v3425_v29 = vld [vmem:[%s4630_s0 + $0x1d8] sm:$0xff]   ;;  %v3428_v31 = vld [vmem:[%s4630_s0 + $0x240] sm:$0xff]  }
  0x21   :  { %2962 = vmatpush3.bf16.msra.mxu1 %v3360_v33  ;;  %v3431_v33 = vld [vmem:[%s4630_s0 + $0x288] sm:$0xff]  }
  0x22   :  { %521 = vmatmul.mubr.bf16.vlgmr.msra.gmra.mrb[0].mxu0 %v3637_v34  ;;  %2995 = vmatprep.subr.bf16.mxu1 %v3366_v38  ;;  %v3432_v38 = vld [vmem:[%s4630_s0 + $0x248] sm:$0xff]  }
  0x23   :  { %3260 = vmatpush3.bf16.msra.mxu0 %v3362_v35  ;;  %528 = vmatprep.mubr.bf16.mxu0 %v3667_v41  ;;  %v3430_v35 = vld [vmem:[%s4630_s0 + $0x2c0] sm:$0xff]  }
  0x24   :  { %586 = vmatmul.mubr.bf16.vlgmr.msra.gmra.mrb[0].mxu1 %v3651_v37  ;;  %3261 = vmatprep.subr.bf16.mxu0 %v3373_v44 }
  0x25   :  { %2996 = vmatpush3.bf16.msra.mxu1 %v3367_v39  ;;  %593 = vmatprep.mubr.bf16.mxu1 %v3684_v45  ;;  %v3433_v39 = vld [vmem:[%s4630_s0 + $0x308] sm:$0xff]  }
  0x26   :  { %2997 = vmatprep.subr.bf16.mxu1 %v3368_v40  ;;  %v3435_v40 = vld [vmem:[%s4630_s0 + $0x290] sm:$0xff]  }
  0x27   :  { %3262 = vmatpush3.bf16.msra.mxu0 %v3373_v44  ;;  %v3436_v44 = vld [vmem:[%s4630_s0 + $0x250] sm:$0xff]  }
  0x28   :  { %3263 = vmatprep.subr.bf16.mxu0 %v3384_v53 }
  0x29   :  { %2998 = vmatpush3.bf16.msra.mxu1 %v3371_v42  ;;  %v3434_v42 = vld [vmem:[%s4630_s0 + $0x2c8] sm:$0xff]  }
  0x2a   :  { %529 = vmatmul.mubr.bf16.gmra.mrb[4].mxu0 %v3675_v43  ;;  %2999 = vmatprep.subr.bf16.mxu1 %v3377_v47  ;;  %v3437_v47 = vld [vmem:[%s4630_s0 + $0x310] sm:$0xff]  }
  0x2b   :  { %536 = vmatprep.mubr.bf16.mxu0 %v3706_v50  ;;  %3264 = vmatpush3.bf16.msra.mxu0 %v3384_v53  ;;  %v3441_v53 = vld [vmem:[%s4630_s0 + $0x318] sm:$0xff]  }
  0x2c   :  { %594 = vmatmul.mubr.bf16.gmra.mrb[4].mxu1 %v3690_v46  ;;  %3265 = vmatprep.subr.bf16.mxu0 %v3395_v62 }
  0x2d   :  { %3000 = vmatpush3.bf16.msra.mxu1 %v3378_v48  ;;  %601 = vmatprep.mubr.bf16.mxu1 %v3723_v54  ;;  %v3439_v48 = vld [vmem:[%s4630_s0 + $0x298] sm:$0xff]  }
  0x2e   :  { %3001 = vmatprep.subr.bf16.mxu1 %v3379_v49  ;;  %v3438_v49 = vld [vmem:[%s4630_s0 + $0x2d0] sm:$0xff]  }
  0x2f   :  { %3266 = vmatpush3.bf16.msra.mxu0 %v3395_v62  ;;  %v3445_v62 = vld [vmem:[%s4630_s0 + $0x320] sm:$0xff]  }
  0x30   :  { %3035 = vmatprep.subr.bf16.mxu0 %v3404_v6  ;;  %v3451_v6 = vld [vmem:[%s4630_s0 + $0x2b0] sm:$0xff]  }
  0x31   :  { %3002 = vmatpush3.bf16.msra.mxu1 %v3382_v51  ;;  %v3440_v51 = vld [vmem:[%s4630_s0 + $0x258] sm:$0xff]  }
  0x32   :  { %537 = vmatmul.mubr.bf16.gmra.mrb[8].mxu0 %v3714_v52  ;;  %3003 = vmatprep.subr.bf16.mxu1 %v3388_v56  ;;  %v39_v56 = vld [vmem:[%s4632_s2] sm:$0xff] }
  0x33   :  { %544 = vmatprep.mubr.bf16.mxu0 %v3745_v59  ;;  %49 = vperm.xlu0 %3325, %v39_v56   ;;  %v3484_v56 = vld [vmem:[%s4630_s0 + $0x3f0] sm:$0xff]  }
  0x34   :  { %602 = vmatmul.mubr.bf16.gmra.mrb[8].mxu1 %v3728_v55 }
  0x35   :  { %3004 = vmatpush3.bf16.msra.mxu1 %v3389_v57  ;;  %609 = vmatprep.mubr.bf16.mxu1 %v3762_v63  ;;  %v3442_v57 = vld [vmem:[%s4630_s0 + $0x2d8] sm:$0xff]  }
  0x36   :  { %3005 = vmatprep.subr.bf16.mxu1 %v3390_v58  ;;  %v3443_v58 = vld [vmem:[%s4630_s0 + $0x2a0] sm:$0xff]  }
  0x39   :  { %3006 = vmatpush3.bf16.msra.mxu1 %v3393_v60  ;;  %v3444_v60 = vld [vmem:[%s4630_s0 + $0x260] sm:$0xff]  }
  0x3a   :  { %545 = vmatmul.mubr.bf16.gmra.mrb[12].mxu0 %v3754_v61  ;;  %3007 = vmatprep.subr.bf16.mxu1 %v3399_v1  ;;  %v3447_v1 = vld [vmem:[%s4630_s0 + $0x2a8] sm:$0xff]  }
  0x3b   :  { %3267 = vmatprep.mubr.msk.bf16.mxu0 %vm475_vm0, %v3784_v4 }
  0x3c   :  { %610 = vmatmul.mubr.bf16.gmra.mrb[12].mxu1 %v3767_v0 }
  0x3d   :  { %3008 = vmatpush3.bf16.msra.mxu1 %v3400_v2  ;;  %1077 = vmatprep.mubr.bf16.mxu1 %v3628_v32  ;;  %v40_v2 = vld [vmem:[%s4632_s2 + $0x8] sm:$0xff] }
  0x3e   :  { %3009 = vmatprep.subr.bf16.mxu1 %v3401_v3  ;;  %v3446_v3 = vld [vmem:[%s4630_s0 + $0x2e0] sm:$0xff]   ;;  %54 = vperm.xlu0 %3325, %v40_v2  }
  0x3f   :  { %v3502_v2 = vld [vmem:[%s4631_s1 + $0xc] ss:$20 sps:$4 sm:$0xff]  }
  0x41   :  { %3010 = vmatpush3.bf16.msra.mxu1 %v3403_v5  ;;  %v3449_v5 = vld [vmem:[%s4630_s0 + $0x328] sm:$0xff]  }
  0x42   :  { %3268 = vmatmul.mubr.msk.bf16.vlgmr.msra.gmra.mrb[16].mxu0 %vm475_vm0, %v3798_v7  ;;  %3275 = vmatprep.subr.bf16.mxu1 %v3417_v18 }
  0x43   :  { %3036 = vmatpush3.bf16.msra.mxu0 %v3406_v8  ;;  %3271 = vmatprep.mubr.msk.bf16.mxu0 %vm475_vm0, %v3814_v11  ;;  %v41_v8 = vld [vmem:[%s4632_s2 + $0x10] sm:$0xff] }
  0x44   :  { %3037 = vmatprep.subr.bf16.mxu0 %v3407_v9  ;;  %1078 = vmatmul.mubr.bf16.vlgmr.msra.gmra.mrb[16].mxu1 %v3637_v34  ;;  %v3450_v9 = vld [vmem:[%s4630_s0 + $0x2e8] sm:$0xff]  }
  0x45   :  { %1085 = vmatprep.mubr.bf16.mxu1 %v3667_v41  ;;  %3276 = vmatpush3.bf16.msra.mxu1 %v3417_v18  ;;  %v3457_v18 = vld [vmem:[%s4630_s0 + $0x338] sm:$0xff]  }
  0x46   :  { %3277 = vmatprep.subr.bf16.mxu1 %v3420_v20  ;;  %59 = vperm.xlu1 %3326, %v41_v8   ;;  %v3504_v8 = vld [vmem:[%s4631_s1 + $0x50] ss:$20 sps:$4 sm:$0xff]  }
  0x47   :  { %3038 = vmatpush3.bf16.msra.mxu0 %v3408_v10  ;;  %v3452_v10 = vld [vmem:[%s4630_s0 + $0x270] sm:$0xff]  }
  0x48   :  { %3039 = vmatprep.subr.bf16.mxu0 %v3410_v12  ;;  %v3453_v12 = vld [vmem:[%s4630_s0 + $0x330] sm:$0xff]  }
  0x49   :  { %3278 = vmatpush3.bf16.msra.mxu1 %v3420_v20  ;;  %v3459_v20 = vld [vmem:[%s4630_s0 + $0x340] sm:$0xff]  }
  0x4a   :  { %3272 = vmatmul.mubr.msk.bf16.gmra.mrb[20].mxu0 %vm475_vm0, %v3825_v13  ;;  %3279 = vmatprep.subr.bf16.mxu1 %v3423_v22 }
  0x4b   :  { %3040 = vmatpush3.bf16.msra.mxu0 %v3412_v14  ;;  %1142 = vmatprep.mubr.bf16.mxu0 %v3646_v36  ;;  %v42_v14 = vld [vmem:[%s4632_s2 + $0x18] sm:$0xff] }
  0x4c   :  { %3041 = vmatprep.subr.bf16.mxu0 %v3413_v15  ;;  %1086 = vmatmul.mubr.bf16.gmra.mrb[20].mxu1 %v3675_v43  ;;  %v3454_v15 = vld [vmem:[%s4630_s0 + $0x2f0] sm:$0xff]  }
  0x4d   :  { %1093 = vmatprep.mubr.bf16.mxu1 %v3706_v50  ;;  %3280 = vmatpush3.bf16.msra.mxu1 %v3423_v22  ;;  %v3458_v22 = vld [vmem:[%s4630_s0 + $0x2f8] sm:$0xff]  }
  0x4e   :  { %3281 = vmatprep.subr.bf16.mxu1 %v3426_v25  ;;  %64 = vperm.xlu1 %3326, %v42_v14   ;;  %v3506_v14 = vld [vmem:[%s4631_s1 + $0x34] ss:$20 sps:$4 sm:$0xff]  }
  0x4f   :  { %3042 = vmatpush3.bf16.msra.mxu0 %v3414_v16  ;;  %v3455_v16 = vld [vmem:[%s4630_s0 + $0x2b8] sm:$0xff]  }
  0x50   :  { %3043 = vmatprep.subr.bf16.mxu0 %v3415_v17  ;;  %v3456_v17 = vld [vmem:[%s4630_s0 + $0x278] sm:$0xff]  }
  0x51   :  { %3282 = vmatpush3.bf16.msra.mxu1 %v3426_v25  ;;  %v3461_v25 = vld [vmem:[%s4630_s0 + $0x360] sm:$0xff]  }
  0x52   :  { %3123 = vmatprep.subr.bf16.mxu1 %v3429_v28  ;;  %v3468_v28 = vld [vmem:[%s4630_s0 + $0x350] sm:$0xff]  }
  0x53   :  { %3044 = vmatpush3.bf16.msra.mxu0 %v3416_v19  ;;  %v43_v19 = vld [vmem:[%s4632_s2 + $0x20] sm:$0xff] }
  0x54   :  { %3045 = vmatprep.subr.bf16.mxu0 %v3418_v21  ;;  %1094 = vmatmul.mubr.bf16.gmra.mrb[24].mxu1 %v3714_v52  ;;  %v44_v21 = vld [vmem:[%s4632_s2 + $0x28] sm:$0xff] }
  0x55   :  { %1101 = vmatprep.mubr.bf16.mxu1 %v3745_v59  ;;  %69 = vperm.xlu0 %3325, %v43_v19  }
  0x56   :  { %74 = vperm.xlu1 %3326, %v44_v21  }
  0x57   :  { %3046 = vmatpush3.bf16.msra.mxu0 %v3419_v23  ;;  %v3463_v23 = vld [vmem:[%s4630_s0 + $0x348] sm:$0xff]  }
  0x58   :  { %3047 = vmatprep.subr.bf16.mxu0 %v3421_v24  ;;  %v45_v24 = vld [vmem:[%s4632_s2 + $0x30] sm:$0xff] }
  0x59   :  { %79 = vperm.xlu0 %3325, %v45_v24  }
  0x5b   :  { %3048 = vmatpush3.bf16.msra.mxu0 %v3422_v26  ;;  %v3462_v26 = vld [vmem:[%s4630_s0 + $0x3a8] sm:$0xff]  }
  0x5c   :  { %3049 = vmatprep.subr.bf16.mxu0 %v3424_v27  ;;  %1102 = vmatmul.mubr.bf16.gmra.mrb[28].mxu1 %v3754_v61  ;;  %v46_v27 = vld [vmem:[%s4632_s2 + $0x38] sm:$0xff] }
  0x5d   :  { %3283 = vmatprep.mubr.msk.bf16.mxu1 %vm475_vm0, %v3784_v4  ;;  %84 = vperm.xlu1 %3326, %v46_v27  }
  0x5f   :  { %3050 = vmatpush3.bf16.msra.mxu0 %v3425_v29  ;;  %v3473_v29 = vld [vmem:[%s4630_s0 + $0x358] sm:$0xff]  }
  0x60   :  { %3083 = vmatprep.subr.bf16.mxu0 %v3427_v30  ;;  %v3469_v30 = vld [vmem:[%s4630_s0 + $0x378] sm:$0xff]  }
  0x62   :  { %1143 = vmatmul.mubr.bf16.vlgmr.msra.gmra.mrb[24].mxu0 %v3651_v37 }
  0x63   :  { %3084 = vmatpush3.bf16.msra.mxu0 %v3428_v31  ;;  %1150 = vmatprep.mubr.bf16.mxu0 %v3684_v45  ;;  %v3470_v31 = vld [vmem:[%s4630_s0 + $0x3c0] sm:$0xff]  }
  0x64   :  { %3085 = vmatprep.subr.bf16.mxu0 %v3431_v33  ;;  %3284 = vmatmul.mubr.msk.bf16.vlgmr.msra.gmra.mrb[32].mxu1 %vm475_vm0, %v3798_v7  ;;  %v3474_v33 = vld [vmem:[%s4630_s0 + $0x388] sm:$0xff]  }
  0x65   :  { %3124 = vmatpush3.bf16.msra.mxu1 %v3430_v35  ;;  %3287 = vmatprep.mubr.msk.bf16.mxu1 %vm475_vm0, %v3814_v11  ;;  %v3476_v35 = vld [vmem:[%s4630_s0 + $0x390] sm:$0xff]  }
  0x66   :  { %3125 = vmatprep.subr.bf16.mxu1 %v3433_v39  ;;  %v3499_v39 = vld [vmem:[%s4631_s1 + $0x4] ss:$20 sps:$4 sm:$0xff]  }
  0x67   :  { %3086 = vmatpush3.bf16.msra.mxu0 %v3432_v38  ;;  %v3479_v38 = vld [vmem:[%s4630_s0 + $0x398] sm:$0xff]  }
  0x68   :  { %3087 = vmatprep.subr.bf16.mxu0 %v3435_v40  ;;  %v3480_v40 = vld [vmem:[%s4630_s0 + $0x3e0] sm:$0xff]  }
  0x69   :  { %3126 = vmatpush3.bf16.msra.mxu1 %v3434_v42  ;;  %v3481_v42 = vld [vmem:[%s4630_s0 + $0x428] sm:$0xff]  }
  0x6a   :  { %1151 = vmatmul.mubr.bf16.gmra.mrb[28].mxu0 %v3690_v46  ;;  %3127 = vmatprep.subr.bf16.mxu1 %v3437_v47  ;;  %v3482_v47 = vld [vmem:[%s4630_s0 + $0x3e8] sm:$0xff]  }
  0x6b   :  { %3088 = vmatpush3.bf16.msra.mxu0 %v3436_v44  ;;  %1158 = vmatprep.mubr.bf16.mxu0 %v3723_v54  ;;  %v3490_v44 = vld [vmem:[%s4630_s0 + $0x460] sm:$0xff]  }
  0x6c   :  { %3089 = vmatprep.subr.bf16.mxu0 %v3439_v48  ;;  %3288 = vmatmul.mubr.msk.bf16.gmra.mrb[36].mxu1 %vm475_vm0, %v3825_v13  ;;  %v3493_v48 = vld [vmem:[%s4630_s0 + $0x468] sm:$0xff]  }
  0x6d   :  { %3128 = vmatpush3.bf16.msra.mxu1 %v3438_v49  ;;  %1699 = vmatprep.mubr.bf16.mxu1 %v3646_v36  ;;  %v3448_v36 = vld [vmem:[%s4630_s0 + $0x268] sm:$0xff]   ;;  %v3483_v49 = vld [vmem:[%s4630_s0 + $0x430] sm:$0xff]  }
  0x6e   :  { %3129 = vmatprep.subr.bf16.mxu1 %v3441_v53  ;;  %v3501_v53 = vld [vmem:[%s4631_s1 + $0x2c] ss:$20 sps:$4 sm:$0xff]  }
  0x6f   :  { %3090 = vmatpush3.bf16.msra.mxu0 %v3440_v51  ;;  %v3500_v51 = vld [vmem:[%s4631_s1] ss:$20 sps:$4 sm:$0xff]  }
  0x70   :  { %3091 = vmatprep.subr.bf16.mxu0 %v3443_v58  ;;  %v3485_v58 = vld [vmem:[%s4630_s0 + $0x438] sm:$0xff]  }
  0x71   :  { %3130 = vmatpush3.bf16.msra.mxu1 %v3442_v57  ;;  %v3496_v57 = vld [vmem:[%s4630_s0 + $0x470] sm:$0xff]  }
  0x72   :  { %1159 = vmatmul.mubr.bf16.gmra.mrb[32].mxu0 %v3728_v55  ;;  %3131 = vmatprep.subr.bf16.mxu1 %v3445_v62  ;;  %v3498_v62 = vld [vmem:[%s4630_s0 + $0x478] sm:$0xff]  }
  0x73   :  { %3092 = vmatpush3.bf16.msra.mxu0 %v3444_v60  ;;  %1166 = vmatprep.mubr.bf16.mxu0 %v3762_v63  ;;  %v3486_v60 = vld [vmem:[%s4630_s0 + $0x3f8] sm:$0xff]  }
  0x74   :  { %3093 = vmatprep.subr.bf16.mxu0 %v3447_v1  ;;  %v3487_v1 = vld [vmem:[%s4630_s0 + $0x440] sm:$0xff]  }
  0x75   :  { %3132 = vmatpush3.bf16.msra.mxu1 %v3446_v3  ;;  %v3503_v3 = vld [vmem:[%s4631_s1 + $0x28] ss:$20 sps:$4 sm:$0xff]  }
  0x76   :  { %3133 = vmatprep.subr.bf16.mxu1 %v3449_v5  ;;  %v3489_v5 = vld [vmem:[%s4630_s0 + $0x448] sm:$0xff]  }
  0x77   :  { %3094 = vmatpush3.bf16.msra.mxu0 %v3448_v36  ;;  %v3488_v36 = vld [vmem:[%s4630_s0 + $0x400] sm:$0xff]  }
  0x78   :  { %3095 = vmatprep.subr.bf16.mxu0 %v3451_v6  ;;  %v3491_v6 = vld [vmem:[%s4630_s0 + $0x408] sm:$0xff]  }
  0x79   :  { %3134 = vmatpush3.bf16.msra.mxu1 %v3450_v9  ;;  %v3494_v9 = vld [vmem:[%s4630_s0 + $0x410] sm:$0xff]  }
  0x7a   :  { %1167 = vmatmul.mubr.bf16.gmra.mrb[36].mxu0 %v3767_v0  ;;  %3135 = vmatprep.subr.bf16.mxu1 %v3453_v12  ;;  %v3497_v12 = vld [vmem:[%s4630_s0 + $0x418] sm:$0xff]  }
  0x7b   :  { %3096 = vmatpush3.bf16.msra.mxu0 %v3452_v10  ;;  %1634 = vmatprep.mubr.bf16.mxu0 %v3628_v32  ;;  %v3460_v32 = vld [vmem:[%s4630_s0 + $0x3a0] sm:$0xff]   ;;  %v3495_v10 = vld [vmem:[%s4630_s0 + $0x458] sm:$0xff]  }
  0x7c   :  { %3097 = vmatprep.subr.bf16.mxu0 %v3455_v16 }
  0x7d   :  { %3136 = vmatpush3.bf16.msra.mxu1 %v3454_v15 }
  0x7e   :  { %3137 = vmatprep.subr.bf16.mxu1 %v3457_v18 }
  0x7f   :  { %3098 = vmatpush3.bf16.msra.mxu0 %v3456_v17 }
  0x80   :  { %3291 = vmatprep.subr.bf16.mxu0 %v3459_v20 }
  0x81   :  { %3138 = vmatpush3.bf16.msra.mxu1 %v3458_v22 }
  0x82   :  { %1635 = vmatmul.mubr.bf16.vlgmr.msra.gmra.mrb[40].mxu0 %v3637_v34  ;;  %3171 = vmatprep.subr.bf16.mxu1 %v3460_v32  ;;  %v3464_v34 = vld [vmem:[%s4630_s0 + $0x368] sm:$0xff]  }
  0x83   :  { %3292 = vmatpush3.bf16.msra.mxu0 %v3459_v20  ;;  %1642 = vmatprep.mubr.bf16.mxu0 %v3667_v41  ;;  %v3465_v41 = vld [vmem:[%s4630_s0 + $0x3b0] sm:$0xff]  }
  0x84   :  { %3293 = vmatprep.subr.bf16.mxu0 %v3463_v23  ;;  %1700 = vmatmul.mubr.bf16.vlgmr.msra.gmra.mrb[40].mxu1 %v3651_v37  ;;  %v3466_v37 = vld [vmem:[%s4630_s0 + $0x370] sm:$0xff]  }
  0x85   :  { %3172 = vmatpush3.bf16.msra.mxu1 %v3461_v25  ;;  %1707 = vmatprep.mubr.bf16.mxu1 %v3684_v45  ;;  %v3467_v45 = vld [vmem:[%s4630_s0 + $0x3b8] sm:$0xff]  }
  0x86   :  { %3173 = vmatprep.subr.bf16.mxu1 %v3462_v26 }
  0x87   :  { %3294 = vmatpush3.bf16.msra.mxu0 %v3463_v23 }
  0x88   :  { %3295 = vmatprep.subr.bf16.mxu0 %v3468_v28 }
  0x89   :  { %3174 = vmatpush3.bf16.msra.mxu1 %v3464_v34 }
  0x8a   :  { %1643 = vmatmul.mubr.bf16.gmra.mrb[44].mxu0 %v3675_v43  ;;  %3175 = vmatprep.subr.bf16.mxu1 %v3465_v41  ;;  %v3478_v43 = vld [vmem:[%s4630_s0 + $0x420] sm:$0xff]  }
  0x8b   :  { %1650 = vmatprep.mubr.bf16.mxu0 %v3706_v50  ;;  %3296 = vmatpush3.bf16.msra.mxu0 %v3468_v28 }
  0x8c   :  { %1708 = vmatmul.mubr.bf16.gmra.mrb[44].mxu1 %v3690_v46  ;;  %3297 = vmatprep.subr.bf16.mxu0 %v3473_v29  ;;  %v3471_v46 = vld [vmem:[%s4630_s0 + $0x380] sm:$0xff]  }
  0x8d   :  { %3176 = vmatpush3.bf16.msra.mxu1 %v3466_v37  ;;  %1715 = vmatprep.mubr.bf16.mxu1 %v3723_v54  ;;  %v3472_v54 = vld [vmem:[%s4630_s0 + $0x3c8] sm:$0xff]  }
  0x8e   :  { %3177 = vmatprep.subr.bf16.mxu1 %v3467_v45 }
  0x8f   :  { %3298 = vmatpush3.bf16.msra.mxu0 %v3473_v29 }
  0x90   :  { %3211 = vmatprep.subr.bf16.mxu0 %v3478_v43 }
  0x91   :  { %3178 = vmatpush3.bf16.msra.mxu1 %v3469_v30 }
  0x92   :  { %1651 = vmatmul.mubr.bf16.gmra.mrb[48].mxu0 %v3714_v52  ;;  %3179 = vmatprep.subr.bf16.mxu1 %v3470_v31  ;;  %v3475_v52 = vld [vmem:[%s4630_s0 + $0x3d0] sm:$0xff]  }
  0x93   :  { %1658 = vmatprep.mubr.bf16.mxu0 %v3745_v59 }
  0x94   :  { %1716 = vmatmul.mubr.bf16.gmra.mrb[48].mxu1 %v3728_v55  ;;  %v3477_v55 = vld [vmem:[%s4630_s0 + $0x3d8] sm:$0xff]  }
  0x95   :  { %3180 = vmatpush3.bf16.msra.mxu1 %v3471_v46  ;;  %1723 = vmatprep.mubr.bf16.mxu1 %v3762_v63 }
  0x96   :  { %3181 = vmatprep.subr.bf16.mxu1 %v3472_v54 }
  0x99   :  { %3182 = vmatpush3.bf16.msra.mxu1 %v3474_v33 }
  0x9a   :  { %1659 = vmatmul.mubr.bf16.gmra.mrb[52].mxu0 %v3754_v61  ;;  %3183 = vmatprep.subr.bf16.mxu1 %v3475_v52 }
  0x9b   :  { %3299 = vmatprep.mubr.msk.bf16.mxu0 %vm475_vm0, %v3784_v4 }
  0x9c   :  { %1724 = vmatmul.mubr.bf16.gmra.mrb[52].mxu1 %v3767_v0 }
  0x9d   :  { %3184 = vmatpush3.bf16.msra.mxu1 %v3476_v35  ;;  %2191 = vmatprep.mubr.bf16.mxu1 %v3499_v39 }
  0x9e   :  { %3185 = vmatprep.subr.bf16.mxu1 %v3477_v55 }
  0xa1   :  { %3186 = vmatpush3.bf16.msra.mxu1 %v3479_v38 }
  0xa2   :  { %3300 = vmatmul.mubr.msk.bf16.vlgmr.msra.gmra.mrb[56].mxu0 %vm475_vm0, %v3798_v7  ;;  %3307 = vmatprep.subr.bf16.mxu1 %v3490_v44 }
  0xa3   :  { %3212 = vmatpush3.bf16.msra.mxu0 %v3480_v40  ;;  %3303 = vmatprep.mubr.msk.bf16.mxu0 %vm475_vm0, %v3814_v11 }
  0xa4   :  { %3213 = vmatprep.subr.bf16.mxu0 %v3481_v42  ;;  %2192 = vmatmul.mubr.bf16.vlgmr.msra.gmra.mrb[56].mxu1 %v3500_v51 }
  0xa5   :  { %2199 = vmatprep.mubr.bf16.mxu1 %v3501_v53  ;;  %3308 = vmatpush3.bf16.msra.mxu1 %v3490_v44 }
  0xa6   :  { %3309 = vmatprep.subr.bf16.mxu1 %v3493_v48 }
  0xa7   :  { %3214 = vmatpush3.bf16.msra.mxu0 %v3482_v47 }
  0xa8   :  { %3215 = vmatprep.subr.bf16.mxu0 %v3483_v49 }
  0xa9   :  { %3310 = vmatpush3.bf16.msra.mxu1 %v3493_v48 }
  0xaa   :  { %3304 = vmatmul.mubr.msk.bf16.gmra.mrb[60].mxu0 %vm475_vm0, %v3825_v13  ;;  %3311 = vmatprep.subr.bf16.mxu1 %v3496_v57 }
  0xab   :  { %3216 = vmatpush3.bf16.msra.mxu0 %v3484_v56  ;;  %2256 = vmatprep.mubr.bf16.mxu0 %v3502_v2 }
  0xac   :  { %3217 = vmatprep.subr.bf16.mxu0 %v3485_v58  ;;  %2200 = vmatmul.mubr.bf16.gmra.mrb[60].mxu1 %v3503_v3 }
  0xad   :  { %2207 = vmatprep.mubr.bf16.mxu1 %v3706_v50  ;;  %3312 = vmatpush3.bf16.msra.mxu1 %v3496_v57  ;;  %v3492_v50 = vld [vmem:[%s4630_s0 + $0x450] sm:$0xff]  }
  0xae   :  { %3313 = vmatprep.subr.bf16.mxu1 %v3498_v62 }
  0xaf   :  { %3218 = vmatpush3.bf16.msra.mxu0 %v3486_v60 }
  0xb0   :  { %3219 = vmatprep.subr.bf16.mxu0 %v3487_v1 }
  0xb1   :  { %3314 = vmatpush3.bf16.msra.mxu1 %v3498_v62 }
  0xb3   :  { %3220 = vmatpush3.bf16.msra.mxu0 %v3488_v36 }
  0xb4   :  { %3221 = vmatprep.subr.bf16.mxu0 %v3489_v5  ;;  %2208 = vmatmul.mubr.bf16.gmra.mrb[64].mxu1 %v3504_v8 }
  0xb5   :  { %2215 = vmatprep.mubr.bf16.mxu1 %v3745_v59  ;;  %v3505_v59 = vld [vmem:[%s4631_s1 + $0x8] ss:$20 sps:$4 sm:$0xff]  }
  0xb7   :  { %3222 = vmatpush3.bf16.msra.mxu0 %v3491_v6 }
  0xb8   :  { %3223 = vmatprep.subr.bf16.mxu0 %v3492_v50 }
  0xbb   :  { %3224 = vmatpush3.bf16.msra.mxu0 %v3494_v9 }
  0xbc   :  { %3225 = vmatprep.subr.bf16.mxu0 %v3495_v10  ;;  %2216 = vmatmul.mubr.bf16.gmra.mrb[68].mxu1 %v3754_v61  ;;  %v3507_v61 = vld [vmem:[%s4631_s1 + $0x30] ss:$20 sps:$4 sm:$0xff]  }
  0xbd   :  { %3315 = vmatprep.mubr.msk.bf16.mxu1 %vm475_vm0, %v3784_v4  ;;  %v3508_v4 = vld [vmem:[%s4631_s1 + $0x5c] ss:$20 sps:$4 sm:$0xff]  }
  0xbf   :  { %3226 = vmatpush3.bf16.msra.mxu0 %v3497_v12 }
  0xc2   :  { %2257 = vmatmul.mubr.bf16.vlgmr.msra.gmra.mrb[64].mxu0 %v3505_v59 }
  0xc3   :  { %2264 = vmatprep.mubr.bf16.mxu0 %v3506_v14 }
  0xc4   :  { %3316 = vmatmul.mubr.msk.bf16.vlgmr.msra.gmra.mrb[72].mxu1 %vm475_vm0, %v3798_v7  ;;  %v3509_v7 = vld [vmem:[%s4631_s1 + $0x58] ss:$20 sps:$4 sm:$0xff]  }
  0xc5   :  { %3319 = vmatprep.mubr.msk.bf16.mxu1 %vm475_vm0, %v3814_v11  ;;  %v4206_v11 = vpop.permute.xlu0 %49  ;;  %v4211_v23 = vpop.permute.xlu1 %59 }
  0xc9   :  { %v4208_v19 = vpop.permute.xlu0 %54 }
  0xca   :  { %2265 = vmatmul.mubr.bf16.gmra.mrb[68].mxu0 %v3507_v61 }
  0xcb   :  { %2272 = vmatprep.mubr.bf16.mxu0 %v3508_v4 }
  0xcc   :  { %3320 = vmatmul.mubr.msk.bf16.gmra.mrb[76].mxu1 %vm475_vm0, %v3825_v13 }
  0xcd   :  { %v4216_v45 = vpop.permute.xlu1 %64 }
  0xd2   :  { %2273 = vmatmul.mubr.bf16.gmra.mrb[72].mxu0 %v3509_v7 }
  0xd3   :  { %2280 = vmatprep.mubr.bf16.mxu0 %v3762_v63 }
  0xd4   :  { %v4220_v44 = vpop.permute.xlu0 %69 }
  0xd5   :  { %v4222_v51 = vpop.permute.xlu1 %74 }
  0xd8   :  { %v4226_v8 = vpop.permute.xlu0 %79 }
  0xda   :  { %2281 = vmatmul.mubr.bf16.gmra.mrb[76].mxu0 %v3767_v0 }
  0xdc   :  { %v4228_v59 = vpop.permute.xlu1 %84 }
  0xf5   :  { %v2923_v15 = vpop.f32.mrb[0].mxu0 }
  0xf6   :  { %v2924_v16 = vpop.f32.mrb[1].mxu0 }
  0xf7   :  { %v2925_v17 = vadd.f32 %v2924_v16, %v2923_v15  ;;  %v2926_v18 = vpop.f32.mrb[2].mxu0  ;;  %v2963_v20 = vpop.f32.mrb[0].mxu1 }
  0xf8   :  { %v2927_v21 = vpop.f32.mrb[3].mxu0  ;;  %v2964_v32 = vpop.f32.mrb[1].mxu1 }
  0xf9   :  { %v523_v13 = vadd.f32 %v2925_v17, %v4206_v11  ;;  %v2928_v22 = vadd.f32 %v2927_v21, %v2926_v18  ;;  %v2965_v24 = vadd.f32 %v2964_v32, %v2963_v20  ;;  %v2966_v63 = vpop.f32.mrb[2].mxu1 }
  0xfa   :  { %v2967_v25 = vpop.f32.mrb[3].mxu1 }
  0xfb   :  { %v526_v0 = vadd.f32 %v2928_v22, %v4208_v19  ;;  %v2968_v26 = vadd.f32 %v2967_v25, %v2966_v63  ;;  %v588_v27 = vadd.f32 %v2965_v24, %v523_v13 }
  0xfd   :  { %v2929_v28 = vpop.f32.mrb[4].mxu0  ;;  %v4214_v41 = vadd.f32 %v2968_v26, %v526_v0 }
  0xfe   :  { %v2930_v34 = vpop.f32.mrb[5].mxu0 }
  0xff   :  { %v2931_v29 = vadd.f32 %v2930_v34, %v2929_v28  ;;  %v2932_v37 = vpop.f32.mrb[6].mxu0  ;;  %v2969_v43 = vpop.f32.mrb[4].mxu1 }
 0x100   :  { %v2933_v30 = vpop.f32.mrb[7].mxu0  ;;  %v2970_v54 = vpop.f32.mrb[5].mxu1 }
 0x101   :  { %v531_v31 = vadd.f32 %v2931_v29, %v4211_v23  ;;  %v2934_v46 = vadd.f32 %v2933_v30, %v2932_v37  ;;  %v2971_v33 = vadd.f32 %v2970_v54, %v2969_v43  ;;  %v2972_v52 = vpop.f32.mrb[6].mxu1  ;;  %v3511_v29 = vmov 0.0  }
 0x102   :  { %v2973_v35 = vpop.f32.mrb[7].mxu1 }
 0x103   :  { %v534_v55 = vadd.f32 %v2934_v46, %v4216_v45  ;;  %v2974_v38 = vadd.f32 %v2973_v35, %v2972_v52  ;;  %v596_v39 = vadd.f32 %v2971_v33, %v531_v31 }
 0x105   :  { %v2935_v40 = vpop.f32.mrb[8].mxu0  ;;  %v599_v47 = vadd.f32 %v2974_v38, %v534_v55 }
 0x106   :  { %v2936_v42 = vpop.f32.mrb[9].mxu0 }
 0x107   :  { %v2937_v48 = vadd.f32 %v2936_v42, %v2935_v40  ;;  %v2938_v49 = vpop.f32.mrb[10].mxu0  ;;  %v2975_v53 = vpop.f32.mrb[8].mxu1 }
 0x108   :  { %v2939_v56 = vpop.f32.mrb[11].mxu0  ;;  %v2976_v58 = vpop.f32.mrb[9].mxu1 }
 0x109   :  { %v2940_v57 = vadd.f32 %v2939_v56, %v2938_v49  ;;  %v539_v60 = vadd.f32 %v2937_v48, %v4220_v44  ;;  %v2977_v62 = vadd.f32 %v2976_v58, %v2975_v53  ;;  %v2978_v1 = vpop.f32.mrb[10].mxu1 }
 0x10a   :  { %v2979_v2 = vpop.f32.mrb[11].mxu1 }
 0x10b   :  { %v542_v3 = vadd.f32 %v2940_v57, %v4222_v51  ;;  %v2980_v36 = vadd.f32 %v2979_v2, %v2978_v1  ;;  %v604_v5 = vadd.f32 %v2977_v62, %v539_v60 }
 0x10d   :  { %v2941_v6 = vpop.f32.mrb[12].mxu0  ;;  %v607_v9 = vadd.f32 %v2980_v36, %v542_v3 }
 0x10e   :  { %v2942_v50 = vpop.f32.mrb[13].mxu0 }
 0x10f   :  { %v2943_v10 = vadd.f32 %v2942_v50, %v2941_v6  ;;  %v2944_v12 = vpop.f32.mrb[14].mxu0  ;;  %v2981_v14 = vpop.f32.mrb[12].mxu1 }
 0x110   :  { %v2945_v61 = vpop.f32.mrb[15].mxu0  ;;  %v2982_v15 = vpop.f32.mrb[13].mxu1 }
 0x111   :  { %v547_v4 = vadd.f32 %v2943_v10, %v4226_v8  ;;  %v2946_v7 = vadd.f32 %v2945_v61, %v2944_v12  ;;  %v2983_v16 = vadd.f32 %v2982_v15, %v2981_v14  ;;  %v2984_v17 = vpop.f32.mrb[14].mxu1 }
 0x112   :  { %v2985_v20 = vpop.f32.mrb[15].mxu1 }
 0x113   :  { %v550_v18 = vadd.f32 %v2946_v7, %v4228_v59  ;;  %v2986_v21 = vadd.f32 %v2985_v20, %v2984_v17  ;;  %v612_v13 = vadd.f32 %v2983_v16, %v547_v4 }
 0x115   :  { %v3269_v22 = vpop.f32.mrb[16].mxu0  ;;  %v615_v63 = vadd.f32 %v2986_v21, %v550_v18 }
 0x116   :  { %v4232_v32 = vadd.f32 %v3269_v22, %v596_v39  ;;  %v652_v24 = vpop.f32.mrb[17].mxu0 }
 0x117   :  { %v4234_v25 = vadd.f32 %v652_v24, %v588_v27  ;;  %v3270_v0 = vpop.f32.mrb[18].mxu0  ;;  %v3011_v34 = vpop.f32.mrb[16].mxu1 }
 0x118   :  { %vm693_vm1 = vcmp.ge.f32.partialorder %v4232_v32, 1.0  ;;  %v4237_v26 = vadd.f32 %v3270_v0, %v599_v47  ;;  %v655_v28 = vpop.f32.mrb[19].mxu0  ;;  %v3012_v27 = vpop.f32.mrb[17].mxu1 }
 0x119   :  { %v701_v37 = vsel %vm693_vm1, 1.0, %v3511_v29  ;;  %vm691_vm3 = vcmp.ge.f32.partialorder %v4234_v25, 1.0  ;;  %v4244_v43 = vadd.f32 %v655_v28, %v4214_v41  ;;  %v3014_v46 = vpop.f32.mrb[18].mxu1  ;;  %v3013_v55 = vadd.f32 %v3012_v27, %v3011_v34 }
 0x11a   :  { %v2877_v30 = vpack.c.bf16 %v701_v37, %v701_v37  ;;  %v699_v31 = vsel %vm691_vm3, 1.0, %v3511_v29  ;;  %vm694_vm4 = vcmp.ge.f32.partialorder %v4237_v26, 1.0  ;;  %v3015_v52 = vpop.f32.mrb[19].mxu1 }
 0x11b   :  { %v2875_v54 = vpack.c.bf16 %v699_v31, %v699_v31  ;;  %v702_v33 = vsel %vm694_vm4, 1.0, %v3511_v29  ;;  %vm692_vm5 = vcmp.ge.f32.partialorder %v4244_v43, 1.0  ;;  %v3016_v40 = vadd.f32 %v3015_v52, %v3014_v46 }
 0x11c   :  { %742 = vst.msk [vmem:[%s4633_s3 + $0x8] sm:$0xf] %vm739_vm2, %v2877_v30  ;;  %v2878_v41 = vpack.c.bf16 %v702_v33, %v702_v33  ;;  %v700_v35 = vsel %vm692_vm5, 1.0, %v3511_v29  ;;  %v1080_v28 = vadd.f32 %v3013_v55, %v4206_v11 }
 0x11d   :  { %740 = vst.msk [vmem:[%s4633_s3] sm:$0xf] %vm739_vm2, %v2875_v54  ;;  %v2876_v38 = vpack.c.bf16 %v700_v35, %v700_v35  ;;  %v3273_v39 = vpop.f32.mrb[20].mxu0  ;;  %v1083_v31 = vadd.f32 %v3016_v40, %v4208_v19 }
 0x11e   :  { %743 = vst.msk [vmem:[%s4633_s3 + $0xc] sm:$0xf] %vm739_vm2, %v2878_v41  ;;  %v4269_v42 = vadd.f32 %v3273_v39, %v612_v13  ;;  %v668_v47 = vpop.f32.mrb[21].mxu0  ;;  %v748_v39 = vsel %vm691_vm3, 0.0, %v4234_v25 }
 0x11f   :  { %741 = vst.msk [vmem:[%s4633_s3 + $0x4] sm:$0xf] %vm739_vm2, %v2876_v38  ;;  %v4275_v48 = vadd.f32 %v668_v47, %v604_v5  ;;  %v3274_v49 = vpop.f32.mrb[22].mxu0  ;;  %v3017_v57 = vpop.f32.mrb[20].mxu1 }
 0x120   :  { %vm697_vm6 = vcmp.ge.f32.partialorder %v4269_v42, 1.0  ;;  %v4278_v53 = vadd.f32 %v3274_v49, %v615_v63  ;;  %v671_v56 = vpop.f32.mrb[23].mxu0  ;;  %v3018_v62 = vpop.f32.mrb[21].mxu1 }
 0x121   :  { %v705_v58 = vsel %vm697_vm6, 1.0, %v3511_v29  ;;  %vm695_vm7 = vcmp.ge.f32.partialorder %v4275_v48, 1.0  ;;  %v4284_v60 = vadd.f32 %v671_v56, %v607_v9  ;;  %v3020_v3 = vpop.f32.mrb[22].mxu1  ;;  %v3019_v10 = vadd.f32 %v3018_v62, %v3017_v57 }
 0x122   :  { %v2881_v1 = vpack.c.bf16 %v705_v58, %v705_v58  ;;  %v703_v2 = vsel %vm695_vm7, 1.0, %v3511_v29  ;;  %vm698_vm8 = vcmp.ge.f32.partialorder %v4278_v53, 1.0  ;;  %v3021_v6 = vpop.f32.mrb[23].mxu1  ;;  %v749_v56 = vsel %vm692_vm5, 0.0, %v4244_v43 }
 0x123   :  { %v2879_v36 = vpack.c.bf16 %v703_v2, %v703_v2  ;;  %v706_v5 = vsel %vm698_vm8, 1.0, %v3511_v29  ;;  %vm696_vm9 = vcmp.ge.f32.partialorder %v4284_v60, 1.0  ;;  %v3022_v14 = vadd.f32 %v3021_v6, %v3020_v3 }
 0x124   :  { %746 = vst.msk [vmem:[%s4633_s3 + $0x18] sm:$0xf] %vm739_vm2, %v2881_v1  ;;  %v2882_v50 = vpack.c.bf16 %v706_v5, %v706_v5  ;;  %v704_v9 = vsel %vm696_vm9, 1.0, %v3511_v29  ;;  %v1088_v57 = vadd.f32 %v3019_v10, %v4211_v23 }
 0x125   :  { %744 = vst.msk [vmem:[%s4633_s3 + $0x10] sm:$0xf] %vm739_vm2, %v2879_v36  ;;  %v2880_v12 = vpack.c.bf16 %v704_v9, %v704_v9  ;;  %v1091_v2 = vadd.f32 %v3022_v14, %v4216_v45 }
 0x126   :  { %747 = vst.msk [vmem:[%s4633_s3 + $0x1c] sm:$0xf] %vm739_vm2, %v2882_v50 }
 0x127   :  { %745 = vst.msk [vmem:[%s4633_s3 + $0x14] sm:$0xf] %vm739_vm2, %v2880_v12  ;;  %v3023_v61 = vpop.f32.mrb[24].mxu1 }
 0x128   :  { %v3024_v4 = vpop.f32.mrb[25].mxu1 }
 0x129   :  { %v3025_v7 = vadd.f32 %v3024_v4, %v3023_v61  ;;  %v3026_v15 = vpop.f32.mrb[26].mxu1 }
 0x12a   :  { %v3027_v16 = vpop.f32.mrb[27].mxu1 }
 0x12b   :  { %v3028_v17 = vadd.f32 %v3027_v16, %v3026_v15  ;;  %v750_v15 = vsel %vm693_vm1, 0.0, %v4232_v32 }
 0x12f   :  { %v3029_v18 = vpop.f32.mrb[28].mxu1 }
 0x130   :  { %v3030_v20 = vpop.f32.mrb[29].mxu1 }
 0x131   :  { %v4313_v21 = vadd.f32 %v3030_v20, %v3029_v18  ;;  %v3032_v13 = vpop.f32.mrb[30].mxu1 }
 0x132   :  { %v3033_v22 = vpop.f32.mrb[31].mxu1 }
 0x133   :  { %v4315_v24 = vadd.f32 %v3033_v22, %v3032_v13  ;;  %v751_v13 = vsel %vm694_vm4, 0.0, %v4237_v26 }
 0x135   :  { %v3051_v63 = vpop.f32.mrb[24].mxu0 }
 0x136   :  { %v3052_v0 = vpop.f32.mrb[25].mxu0 }
 0x137   :  { %v3053_v34 = vadd.f32 %v3052_v0, %v3051_v63  ;;  %v3054_v37 = vpop.f32.mrb[26].mxu0  ;;  %v3285_v30 = vpop.f32.mrb[32].mxu1  ;;  %v1096_v63 = vadd.f32 %v3025_v7, %v4220_v44 }
 0x138   :  { %v3055_v27 = vpop.f32.mrb[27].mxu0  ;;  %v1209_v33 = vpop.f32.mrb[33].mxu1 }
 0x139   :  { %v3056_v46 = vadd.f32 %v3055_v27, %v3054_v37  ;;  %v1145_v54 = vadd.f32 %v3053_v34, %v1080_v28  ;;  %v3286_v52 = vpop.f32.mrb[34].mxu1  ;;  %v1099_v34 = vadd.f32 %v3028_v17, %v4222_v51 }
 0x13a   :  { %v1212_v38 = vpop.f32.mrb[35].mxu1 }
 0x13b   :  { %v1210_v41 = vadd.f32 %v1209_v33, %v1145_v54  ;;  %v1148_v35 = vadd.f32 %v3056_v46, %v1083_v31  ;;  %v752_v33 = vsel %vm695_vm7, 0.0, %v4275_v48 }
 0x13d   :  { %v4322_v47 = vadd.f32 %v1210_v41, %v748_v39  ;;  %v1213_v55 = vadd.f32 %v1212_v38, %v1148_v35  ;;  %v3057_v49 = vpop.f32.mrb[28].mxu0  ;;  %v753_v38 = vsel %vm696_vm9, 0.0, %v4284_v60 }
 0x13e   :  { %v3058_v40 = vpop.f32.mrb[29].mxu0 }
 0x13f   :  { %v4328_v58 = vadd.f32 %v1213_v55, %v749_v56  ;;  %v3059_v62 = vadd.f32 %v3058_v40, %v3057_v49  ;;  %v3060_v1 = vpop.f32.mrb[30].mxu0  ;;  %vm1248_vm10 = vcmp.ge.f32.partialorder %v4322_v47, 1.0  ;;  %v3289_v3 = vpop.f32.mrb[36].mxu1  ;;  %v1104_v55 = vadd.f32 %v4313_v21, %v4226_v8 }
 0x140   :  { %v3061_v25 = vpop.f32.mrb[31].mxu0  ;;  %v1256_v36 = vsel %vm1248_vm10, 1.0, %v3511_v29  ;;  %v1225_v43 = vpop.f32.mrb[37].mxu1  ;;  %v1107_v40 = vadd.f32 %v4315_v24, %v4228_v59 }
 0x141   :  { %v1153_v5 = vadd.f32 %v3059_v62, %v1088_v57  ;;  %v3062_v6 = vadd.f32 %v3061_v25, %v3060_v1  ;;  %v2883_v50 = vpack.c.bf16 %v1256_v36, %v1256_v36  ;;  %vm1249_vm11 = vcmp.ge.f32.partialorder %v4328_v58, 1.0  ;;  %v3290_v9 = vpop.f32.mrb[38].mxu1 }
 0x142   :  { %v1257_v10 = vsel %vm1249_vm11, 1.0, %v3511_v29  ;;  %v1228_v14 = vpop.f32.mrb[39].mxu1 }
 0x143   :  { %v1218_v12 = vadd.f32 %v3285_v30, %v1153_v5  ;;  %v1156_v61 = vadd.f32 %v3062_v6, %v1091_v2  ;;  %2611 = vst.msk [vmem:[%s4633_s3 + $0x20] sm:$0xf] %vm739_vm2, %v2883_v50  ;;  %v2884_v4 = vpack.c.bf16 %v1257_v10, %v1257_v10  ;;  %v754_v5 = vsel %vm697_vm6, 0.0, %v4269_v42 }
 0x145   :  { %v1221_v16 = vadd.f32 %v3286_v52, %v1156_v61  ;;  %v3063_v18 = vpop.f32.mrb[32].mxu0  ;;  %v4346_v20 = vadd.f32 %v1218_v12, %v750_v15  ;;  %2612 = vst.msk [vmem:[%s4633_s3 + $0x24] sm:$0xf] %vm739_vm2, %v2884_v4 }
 0x146   :  { %v3064_v22 = vpop.f32.mrb[33].mxu0 }
 0x147   :  { %v3065_v0 = vadd.f32 %v3064_v22, %v3063_v18  ;;  %v3066_v28 = vpop.f32.mrb[34].mxu0  ;;  %vm1250_vm12 = vcmp.ge.f32.partialorder %v4346_v20, 1.0  ;;  %v4357_v32 = vadd.f32 %v1221_v16, %v751_v13 }
 0x148   :  { %v3067_v37 = vpop.f32.mrb[35].mxu0  ;;  %v1258_v27 = vsel %vm1250_vm12, 1.0, %v3511_v29 }
 0x149   :  { %v3068_v30 = vadd.f32 %v3067_v37, %v3066_v28  ;;  %v1161_v31 = vadd.f32 %v3065_v0, %v1096_v63  ;;  %v2885_v46 = vpack.c.bf16 %v1258_v27, %v1258_v27  ;;  %vm1251_vm13 = vcmp.ge.f32.partialorder %v4357_v32, 1.0 }
 0x14a   :  { %v1259_v26 = vsel %vm1251_vm13, 1.0, %v3511_v29 }
 0x14b   :  { %v1226_v7 = vadd.f32 %v1225_v43, %v1161_v31  ;;  %v1164_v54 = vadd.f32 %v3068_v30, %v1099_v34  ;;  %2613 = vst.msk [vmem:[%s4633_s3 + $0x28] sm:$0xf] %vm739_vm2, %v2885_v46  ;;  %v2886_v17 = vpack.c.bf16 %v1259_v26, %v1259_v26 }
 0x14d   :  { %v4374_v52 = vadd.f32 %v1226_v7, %v752_v33  ;;  %v1229_v41 = vadd.f32 %v1228_v14, %v1164_v54  ;;  %v3069_v35 = vpop.f32.mrb[36].mxu0  ;;  %2614 = vst.msk [vmem:[%s4633_s3 + $0x2c] sm:$0xf] %vm739_vm2, %v2886_v17 }
 0x14e   :  { %v3070_v39 = vpop.f32.mrb[37].mxu0 }
 0x14f   :  { %v4385_v49 = vadd.f32 %v1229_v41, %v753_v38  ;;  %v3071_v48 = vadd.f32 %v3070_v39, %v3069_v35  ;;  %v3072_v56 = vpop.f32.mrb[38].mxu0  ;;  %vm1252_vm14 = vcmp.ge.f32.partialorder %v4374_v52, 1.0 }
 0x150   :  { %v3073_v57 = vpop.f32.mrb[39].mxu0  ;;  %v1260_v62 = vsel %vm1252_vm14, 1.0, %v3511_v29 }
 0x151   :  { %v1169_v1 = vadd.f32 %v3071_v48, %v1104_v55  ;;  %v3074_v60 = vadd.f32 %v3073_v57, %v3072_v56  ;;  %v2887_v2 = vpack.c.bf16 %v1260_v62, %v1260_v62  ;;  %vm1253_vm15 = vcmp.ge.f32.partialorder %v4385_v49, 1.0 }
 0x152   :  { %v1261_v21 = vsel %vm1253_vm15, 1.0, %v3511_v29 }
 0x153   :  { %v1234_v25 = vadd.f32 %v3289_v3, %v1169_v1  ;;  %v1172_v36 = vadd.f32 %v3074_v60, %v1107_v40  ;;  %2615 = vst.msk [vmem:[%s4633_s3 + $0x30] sm:$0xf] %vm739_vm2, %v2887_v2  ;;  %v2888_v24 = vpack.c.bf16 %v1261_v21, %v1261_v21  ;;  %v755_v3 = vsel %vm698_vm8, 0.0, %v4278_v53 }
 0x155   :  { %v1237_v6 = vadd.f32 %v3290_v9, %v1172_v36  ;;  %v3099_v43 = vpop.f32.mrb[40].mxu0  ;;  %v4404_v50 = vadd.f32 %v1234_v25, %v754_v5  ;;  %2616 = vst.msk [vmem:[%s4633_s3 + $0x34] sm:$0xf] %vm739_vm2, %v2888_v24 }
 0x156   :  { %v3100_v10 = vpop.f32.mrb[41].mxu0 }
 0x157   :  { %v3101_v12 = vadd.f32 %v3100_v10, %v3099_v43  ;;  %v3102_v61 = vpop.f32.mrb[42].mxu0  ;;  %vm1254_vm0 = vcmp.ge.f32.partialorder %v4404_v50, 1.0  ;;  %v4414_v14 = vadd.f32 %v1237_v6, %v755_v3  ;;  %v3139_v42 = vpop.f32.mrb[40].mxu1 }
 0x158   :  { %v3103_v9 = vpop.f32.mrb[43].mxu0  ;;  %v1262_v4 = vsel %vm1254_vm0, 1.0, %v3511_v29  ;;  %v3140_v18 = vpop.f32.mrb[41].mxu1 }
 0x159   :  { %v1637_v15 = vadd.f32 %v3101_v12, %v4206_v11  ;;  %v3104_v16 = vadd.f32 %v3103_v9, %v3102_v61  ;;  %v2889_v13 = vpack.c.bf16 %v1262_v4, %v1262_v4  ;;  %vm1255_vm1 = vcmp.ge.f32.partialorder %v4414_v14, 1.0  ;;  %v3142_v22 = vpop.f32.mrb[42].mxu1 }
 0x15a   :  { %v3141_v53 = vadd.f32 %v3140_v18, %v3139_v42  ;;  %v1263_v63 = vsel %vm1255_vm1, 1.0, %v3511_v29  ;;  %v3143_v28 = vpop.f32.mrb[43].mxu1 }
 0x15b   :  { %v1640_v0 = vadd.f32 %v3104_v16, %v4208_v19  ;;  %2617 = vst.msk [vmem:[%s4633_s3 + $0x38] sm:$0xf] %vm739_vm2, %v2889_v13  ;;  %v2890_v34 = vpack.c.bf16 %v1263_v63, %v1263_v63  ;;  %v3144_v37 = vadd.f32 %v3143_v28, %v3142_v22 }
 0x15c   :  { %v1702_v27 = vadd.f32 %v3141_v53, %v1637_v15 }
 0x15d   :  { %v3105_v30 = vpop.f32.mrb[44].mxu0  ;;  %2618 = vst.msk [vmem:[%s4633_s3 + $0x3c] sm:$0xf] %vm739_vm2, %v2890_v34  ;;  %v1705_v46 = vadd.f32 %v3144_v37, %v1640_v0 }
 0x15e   :  { %v3106_v31 = vpop.f32.mrb[45].mxu0 }
 0x15f   :  { %v3107_v26 = vadd.f32 %v3106_v31, %v3105_v30  ;;  %v3108_v7 = vpop.f32.mrb[46].mxu0  ;;  %v3145_v54 = vpop.f32.mrb[44].mxu1 }
 0x160   :  { %v3109_v17 = vpop.f32.mrb[47].mxu0  ;;  %v3146_v35 = vpop.f32.mrb[45].mxu1 }
 0x161   :  { %v1645_v33 = vadd.f32 %v3107_v26, %v4211_v23  ;;  %v3110_v41 = vadd.f32 %v3109_v17, %v3108_v7  ;;  %v3147_v38 = vadd.f32 %v3146_v35, %v3145_v54  ;;  %v3148_v39 = vpop.f32.mrb[46].mxu1 }
 0x162   :  { %v3149_v48 = vpop.f32.mrb[47].mxu1 }
 0x163   :  { %v1648_v55 = vadd.f32 %v3110_v41, %v4216_v45  ;;  %v3150_v56 = vadd.f32 %v3149_v48, %v3148_v39  ;;  %v1710_v40 = vadd.f32 %v3147_v38, %v1645_v33  ;;  %v1307_v33 = vsel %vm1250_vm12, 0.0, %v4346_v20 }
 0x164   :  { %v1305_v39 = vsel %vm1248_vm10, 0.0, %v4322_v47 }
 0x165   :  { %v3111_v57 = vpop.f32.mrb[48].mxu0  ;;  %v1713_v1 = vadd.f32 %v3150_v56, %v1648_v55 }
 0x166   :  { %v3112_v62 = vpop.f32.mrb[49].mxu0 }
 0x167   :  { %v3113_v60 = vadd.f32 %v3112_v62, %v3111_v57  ;;  %v3114_v2 = vpop.f32.mrb[50].mxu0  ;;  %v3151_v21 = vpop.f32.mrb[48].mxu1 }
 0x168   :  { %v3115_v25 = vpop.f32.mrb[51].mxu0  ;;  %v3152_v5 = vpop.f32.mrb[49].mxu1 }
 0x169   :  { %v1653_v36 = vadd.f32 %v3113_v60, %v4220_v44  ;;  %v3116_v24 = vadd.f32 %v3115_v25, %v3114_v2  ;;  %v3153_v6 = vadd.f32 %v3152_v5, %v3151_v21  ;;  %v3154_v43 = vpop.f32.mrb[50].mxu1 }
 0x16a   :  { %v3155_v10 = vpop.f32.mrb[51].mxu1 }
 0x16b   :  { %v1656_v3 = vadd.f32 %v3116_v24, %v4222_v51  ;;  %v3156_v12 = vadd.f32 %v3155_v10, %v3154_v43  ;;  %v1718_v61 = vadd.f32 %v3153_v6, %v1653_v36  ;;  %v1311_v10 = vsel %vm1254_vm0, 0.0, %v4404_v50 }
 0x16d   :  { %v3117_v42 = vpop.f32.mrb[52].mxu0  ;;  %v4437_v4 = vadd.f32 %v3156_v12, %v1656_v3 }
 0x16e   :  { %v3118_v9 = vpop.f32.mrb[53].mxu0 }
 0x16f   :  { %v3119_v15 = vadd.f32 %v3118_v9, %v3117_v42  ;;  %v3120_v16 = vpop.f32.mrb[54].mxu0  ;;  %v3157_v18 = vpop.f32.mrb[52].mxu1 }
 0x170   :  { %v3121_v13 = vpop.f32.mrb[55].mxu0  ;;  %v3158_v63 = vpop.f32.mrb[53].mxu1 }
 0x171   :  { %v1661_v53 = vadd.f32 %v3119_v15, %v4226_v8  ;;  %v3122_v22 = vadd.f32 %v3121_v13, %v3120_v16  ;;  %v3159_v0 = vadd.f32 %v3158_v63, %v3157_v18  ;;  %v3160_v28 = vpop.f32.mrb[54].mxu1  ;;  %v1309_v15 = vsel %vm1252_vm14, 0.0, %v4374_v52 }
 0x172   :  { %v3161_v37 = vpop.f32.mrb[55].mxu1 }
 0x173   :  { %v1664_v34 = vadd.f32 %v3122_v22, %v4228_v59  ;;  %v3162_v30 = vadd.f32 %v3161_v37, %v3160_v28  ;;  %v1726_v31 = vadd.f32 %v3159_v0, %v1661_v53  ;;  %v1312_v53 = vsel %vm1255_vm1, 0.0, %v4414_v14 }
 0x174   :  { %v1310_v28 = vsel %vm1253_vm15, 0.0, %v4385_v49 }
 0x175   :  { %v3301_v26 = vpop.f32.mrb[56].mxu0  ;;  %v1729_v17 = vadd.f32 %v3162_v30, %v1664_v34 }
 0x176   :  { %v1775_v7 = vadd.f32 %v3301_v26, %v1710_v40  ;;  %v1766_v54 = vpop.f32.mrb[57].mxu0  ;;  %v1308_v40 = vsel %vm1251_vm13, 0.0, %v4357_v32 }
 0x177   :  { %v1767_v41 = vadd.f32 %v1766_v54, %v1702_v27  ;;  %v3302_v35 = vpop.f32.mrb[58].mxu0  ;;  %v3187_v56 = vpop.f32.mrb[56].mxu1  ;;  %v1306_v27 = vsel %vm1249_vm11, 0.0, %v4328_v58 }
 0x178   :  { %v4444_v38 = vadd.f32 %v1775_v7, %v1307_v33  ;;  %v1778_v55 = vadd.f32 %v3302_v35, %v1713_v1  ;;  %v1769_v48 = vpop.f32.mrb[59].mxu0  ;;  %v3188_v60 = vpop.f32.mrb[57].mxu1 }
 0x179   :  { %v4449_v57 = vadd.f32 %v1767_v41, %v1305_v39  ;;  %v1770_v62 = vadd.f32 %v1769_v48, %v1705_v46  ;;  %v4460_v47 = vadd.f32 %v3188_v60, %v3187_v56  ;;  %v3190_v1 = vpop.f32.mrb[58].mxu1 }
 0x17a   :  { %vm1807_vm3 = vcmp.ge.f32.partialorder %v4444_v38, 1.0  ;;  %v4455_v20 = vadd.f32 %v1778_v55, %v1308_v40  ;;  %v3191_v32 = vpop.f32.mrb[59].mxu1 }
 0x17b   :  { %v1815_v2 = vsel %vm1807_vm3, 1.0, %v3511_v29  ;;  %v4465_v21 = vadd.f32 %v1770_v62, %v1306_v27  ;;  %vm1805_vm4 = vcmp.ge.f32.partialorder %v4449_v57, 1.0  ;;  %v4469_v25 = vadd.f32 %v3191_v32, %v3190_v1 }
 0x17c   :  { %v2893_v46 = vpack.c.bf16 %v1815_v2, %v1815_v2  ;;  %vm1808_vm5 = vcmp.ge.f32.partialorder %v4455_v20, 1.0  ;;  %v1813_v24 = vsel %vm1805_vm4, 1.0, %v3511_v29 }
 0x17d   :  { %v1816_v58 = vsel %vm1808_vm5, 1.0, %v3511_v29  ;;  %v3305_v36 = vpop.f32.mrb[60].mxu0  ;;  %v2891_v3 = vpack.c.bf16 %v1813_v24, %v1813_v24  ;;  %vm1806_vm6 = vcmp.ge.f32.partialorder %v4465_v21, 1.0 }
 0x17e   :  { %2741 = vst.msk [vmem:[%s4633_s3 + $0x48] sm:$0xf] %vm739_vm2, %v2893_v46  ;;  %v2894_v5 = vpack.c.bf16 %v1816_v58, %v1816_v58  ;;  %v1791_v6 = vadd.f32 %v3305_v36, %v1726_v31  ;;  %v1782_v43 = vpop.f32.mrb[61].mxu0  ;;  %v1814_v50 = vsel %vm1806_vm6, 1.0, %v3511_v29  ;;  %v2194_v36 = vadd.f32 %v4460_v47, %v4206_v11 }
 0x17f   :  { %v1783_v12 = vadd.f32 %v1782_v43, %v1718_v61  ;;  %v3306_v42 = vpop.f32.mrb[62].mxu0  ;;  %v3193_v13 = vpop.f32.mrb[60].mxu1  ;;  %2739 = vst.msk [vmem:[%s4633_s3 + $0x40] sm:$0xf] %vm739_vm2, %v2891_v3  ;;  %v2892_v63 = vpack.c.bf16 %v1814_v50, %v1814_v50  ;;  %v2197_v3 = vadd.f32 %v4469_v25, %v4208_v19  ;;  %v1862_v50 = vsel %vm1805_vm4, 0.0, %v4449_v57 }
 0x180   :  { %2742 = vst.msk [vmem:[%s4633_s3 + $0x4c] sm:$0xf] %vm739_vm2, %v2894_v5  ;;  %v4489_v9 = vadd.f32 %v1791_v6, %v1311_v10  ;;  %v1794_v16 = vadd.f32 %v3306_v42, %v1729_v17  ;;  %v1785_v18 = vpop.f32.mrb[63].mxu0  ;;  %v3194_v22 = vpop.f32.mrb[61].mxu1 }
 0x181   :  { %v4501_v61 = vadd.f32 %v1783_v12, %v1309_v15  ;;  %v1786_v52 = vadd.f32 %v1785_v18, %v4437_v4  ;;  %v3195_v34 = vadd.f32 %v3194_v22, %v3193_v13  ;;  %v3196_v37 = vpop.f32.mrb[62].mxu1  ;;  %2740 = vst.msk [vmem:[%s4633_s3 + $0x44] sm:$0xf] %vm739_vm2, %v2892_v63 }
 0x182   :  { %vm1811_vm7 = vcmp.ge.f32.partialorder %v4489_v9, 1.0  ;;  %v4508_v0 = vadd.f32 %v1794_v16, %v1312_v53  ;;  %v3197_v14 = vpop.f32.mrb[63].mxu1 }
 0x183   :  { %v1819_v30 = vsel %vm1811_vm7, 1.0, %v3511_v29  ;;  %v4516_v31 = vadd.f32 %v1786_v52, %v1310_v28  ;;  %vm1809_vm8 = vcmp.ge.f32.partialorder %v4501_v61, 1.0  ;;  %v3198_v49 = vadd.f32 %v3197_v14, %v3196_v37 }
 0x184   :  { %v2897_v4 = vpack.c.bf16 %v1819_v30, %v1819_v30  ;;  %vm1812_vm9 = vcmp.ge.f32.partialorder %v4508_v0, 1.0  ;;  %v1817_v7 = vsel %vm1809_vm8, 1.0, %v3511_v29  ;;  %v1863_v52 = vsel %vm1806_vm6, 0.0, %v4465_v21 }
 0x185   :  { %v1820_v26 = vsel %vm1812_vm9, 1.0, %v3511_v29  ;;  %v2895_v17 = vpack.c.bf16 %v1817_v7, %v1817_v7  ;;  %vm1810_vm10 = vcmp.ge.f32.partialorder %v4516_v31, 1.0  ;;  %v2202_v19 = vadd.f32 %v3195_v34, %v4211_v23 }
 0x186   :  { %2745 = vst.msk [vmem:[%s4633_s3 + $0x58] sm:$0xf] %vm739_vm2, %v2897_v4  ;;  %v2898_v54 = vpack.c.bf16 %v1820_v26, %v1820_v26  ;;  %v1818_v33 = vsel %vm1810_vm10, 1.0, %v3511_v29  ;;  %v2205_v37 = vadd.f32 %v3198_v49, %v4216_v45 }
 0x187   :  { %v3199_v41 = vpop.f32.mrb[64].mxu1  ;;  %2743 = vst.msk [vmem:[%s4633_s3 + $0x50] sm:$0xf] %vm739_vm2, %v2895_v17  ;;  %v2896_v35 = vpack.c.bf16 %v1818_v33, %v1818_v33  ;;  %v1864_v33 = vsel %vm1807_vm3, 0.0, %v4444_v38 }
 0x188   :  { %2746 = vst.msk [vmem:[%s4633_s3 + $0x5c] sm:$0xf] %vm739_vm2, %v2898_v54  ;;  %v3200_v39 = vpop.f32.mrb[65].mxu1 }
 0x189   :  { %v3201_v55 = vadd.f32 %v3200_v39, %v3199_v41  ;;  %v3202_v48 = vpop.f32.mrb[66].mxu1  ;;  %2744 = vst.msk [vmem:[%s4633_s3 + $0x54] sm:$0xf] %vm739_vm2, %v2896_v35 }
 0x18a   :  { %v3203_v56 = vpop.f32.mrb[67].mxu1 }
 0x18b   :  { %v3204_v40 = vadd.f32 %v3203_v56, %v3202_v48  ;;  %v1865_v48 = vsel %vm1808_vm5, 0.0, %v4455_v20 }
 0x18d   :  { %v2213_v38 = vadd.f32 %v3204_v40, %v4222_v51  ;;  %v1866_v51 = vsel %vm1809_vm8, 0.0, %v4501_v61 }
 0x18f   :  { %v3205_v62 = vpop.f32.mrb[68].mxu1 }
 0x190   :  { %v3206_v60 = vpop.f32.mrb[69].mxu1 }
 0x191   :  { %v4550_v27 = vadd.f32 %v3206_v60, %v3205_v62  ;;  %v3208_v1 = vpop.f32.mrb[70].mxu1  ;;  %v2210_v62 = vadd.f32 %v3201_v55, %v4220_v44 }
 0x192   :  { %v3209_v2 = vpop.f32.mrb[71].mxu1 }
 0x193   :  { %v4552_v32 = vadd.f32 %v3209_v2, %v3208_v1 }
 0x195   :  { %v3227_v46 = vpop.f32.mrb[64].mxu0 }
 0x196   :  { %v3228_v58 = vpop.f32.mrb[65].mxu0 }
 0x197   :  { %v3229_v24 = vadd.f32 %v3228_v58, %v3227_v46  ;;  %v3230_v5 = vpop.f32.mrb[66].mxu0  ;;  %v3317_v43 = vpop.f32.mrb[72].mxu1 }
 0x198   :  { %v3231_v6 = vpop.f32.mrb[67].mxu0  ;;  %v2323_v42 = vpop.f32.mrb[73].mxu1 }
 0x199   :  { %v3232_v10 = vadd.f32 %v3231_v6, %v3230_v5  ;;  %v2259_v12 = vadd.f32 %v3229_v24, %v2194_v36  ;;  %v3318_v15 = vpop.f32.mrb[74].mxu1 }
 0x19a   :  { %v2326_v13 = vpop.f32.mrb[75].mxu1 }
 0x19b   :  { %v2324_v16 = vadd.f32 %v2323_v42, %v2259_v12  ;;  %v2262_v18 = vadd.f32 %v3232_v10, %v2197_v3  ;;  %v1867_v10 = vsel %vm1810_vm10, 0.0, %v4516_v31  ;;  %v2218_v42 = vadd.f32 %v4550_v27, %v4226_v8 }
 0x19d   :  { %v2354_v53 = vadd.f32 %v2324_v16, %v1862_v50  ;;  %v2327_v11 = vadd.f32 %v2326_v13, %v2262_v18  ;;  %v3233_v47 = vpop.f32.mrb[68].mxu0  ;;  %v2221_v18 = vadd.f32 %v4552_v32, %v4228_v59  ;;  %v1868_v59 = vsel %vm1811_vm7, 0.0, %v4489_v9 }
 0x19e   :  { %v3234_v22 = vpop.f32.mrb[69].mxu0 }
 0x19f   :  { %vm2362_vm11 = vcmp.ge.f32.partialorder %v2354_v53, 1.0  ;;  %v2355_v25 = vadd.f32 %v2327_v11, %v1863_v52  ;;  %v3235_v63 = vadd.f32 %v3234_v22, %v3233_v47  ;;  %v3236_v28 = vpop.f32.mrb[70].mxu0  ;;  %v3321_v57 = vpop.f32.mrb[76].mxu1 }
 0x1a0   :  { %v2370_v30 = vsel %vm2362_vm11, 1.0, %v3511_v29  ;;  %v3237_v14 = vpop.f32.mrb[71].mxu0  ;;  %v2339_v54 = vpop.f32.mrb[77].mxu1 }
 0x1a1   :  { %v2899_v4 = vpack.c.bf16 %v2370_v30, %v2370_v30  ;;  %vm2363_vm12 = vcmp.ge.f32.partialorder %v2355_v25, 1.0  ;;  %v2267_v26 = vadd.f32 %v3235_v63, %v2202_v19  ;;  %v3238_v7 = vadd.f32 %v3237_v14, %v3236_v28  ;;  %v3322_v17 = vpop.f32.mrb[78].mxu1 }
 0x1a2   :  { %v2371_v21 = vsel %vm2363_vm12, 1.0, %v3511_v29  ;;  %v2342_v49 = vpop.f32.mrb[79].mxu1  ;;  %v1869_v19 = vsel %vm1812_vm9, 0.0, %v4508_v0 }
 0x1a3   :  { %2867 = vst.msk [vmem:[%s4633_s3 + $0x60] sm:$0xf] %vm739_vm2, %v2899_v4  ;;  %v2900_v23 = vpack.c.bf16 %v2371_v21, %v2371_v21  ;;  %v2332_v34 = vadd.f32 %v3317_v43, %v2267_v26  ;;  %v2270_v45 = vadd.f32 %v3238_v7, %v2205_v37 }
 0x1a5   :  { %2868 = vst.msk [vmem:[%s4633_s3 + $0x64] sm:$0xf] %vm739_vm2, %v2900_v23  ;;  %v2356_v41 = vadd.f32 %v2332_v34, %v1864_v33  ;;  %v2335_v35 = vadd.f32 %v3318_v15, %v2270_v45  ;;  %v3239_v39 = vpop.f32.mrb[72].mxu0 }
 0x1a6   :  { %v3240_v56 = vpop.f32.mrb[73].mxu0 }
 0x1a7   :  { %vm2364_vm13 = vcmp.ge.f32.partialorder %v2356_v41, 1.0  ;;  %v2357_v60 = vadd.f32 %v2335_v35, %v1865_v48  ;;  %v3241_v1 = vadd.f32 %v3240_v56, %v3239_v39  ;;  %v3242_v2 = vpop.f32.mrb[74].mxu0 }
 0x1a8   :  { %v2372_v46 = vsel %vm2364_vm13, 1.0, %v3511_v29  ;;  %v3243_v58 = vpop.f32.mrb[75].mxu0 }
 0x1a9   :  { %v2901_v36 = vpack.c.bf16 %v2372_v46, %v2372_v46  ;;  %vm2365_vm14 = vcmp.ge.f32.partialorder %v2357_v60, 1.0  ;;  %v3244_v24 = vadd.f32 %v3243_v58, %v3242_v2  ;;  %v2275_v5 = vadd.f32 %v3241_v1, %v2210_v62 }
 0x1aa   :  { %v2373_v6 = vsel %vm2365_vm14, 1.0, %v3511_v29 }
 0x1ab   :  { %2869 = vst.msk [vmem:[%s4633_s3 + $0x68] sm:$0xf] %vm739_vm2, %v2901_v36  ;;  %v2902_v44 = vpack.c.bf16 %v2373_v6, %v2373_v6  ;;  %v2340_v20 = vadd.f32 %v2339_v54, %v2275_v5  ;;  %v2278_v55 = vadd.f32 %v3244_v24, %v2213_v38 }
 0x1ad   :  { %2870 = vst.msk [vmem:[%s4633_s3 + $0x6c] sm:$0xf] %vm739_vm2, %v2902_v44  ;;  %v2358_v40 = vadd.f32 %v2340_v20, %v1866_v51  ;;  %v2343_v43 = vadd.f32 %v2342_v49, %v2278_v55  ;;  %v3245_v3 = vpop.f32.mrb[76].mxu0 }
 0x1ae   :  { %v3246_v12 = vpop.f32.mrb[77].mxu0 }
 0x1af   :  { %vm2366_vm15 = vcmp.ge.f32.partialorder %v2358_v40, 1.0  ;;  %v2359_v15 = vadd.f32 %v2343_v43, %v1867_v10  ;;  %v3247_v16 = vadd.f32 %v3246_v12, %v3245_v3  ;;  %v3248_v61 = vpop.f32.mrb[78].mxu0 }
 0x1b0   :  { %v2374_v13 = vsel %vm2366_vm15, 1.0, %v3511_v29  ;;  %v3249_v50 = vpop.f32.mrb[79].mxu0 }
 0x1b1   :  { %v2903_v53 = vpack.c.bf16 %v2374_v13, %v2374_v13  ;;  %vm2367_vm0 = vcmp.ge.f32.partialorder %v2359_v15, 1.0  ;;  %v2283_v11 = vadd.f32 %v3247_v16, %v2218_v42  ;;  %v3250_v47 = vadd.f32 %v3249_v50, %v3248_v61 }
 0x1b2   :  { %v2375_v31 = vsel %vm2367_vm0, 1.0, %v3511_v29 }
 0x1b3   :  { %2871 = vst.msk [vmem:[%s4633_s3 + $0x70] sm:$0xf] %vm739_vm2, %v2903_v53  ;;  %v2904_v8 = vpack.c.bf16 %v2375_v31, %v2375_v31  ;;  %v2348_v27 = vadd.f32 %v3321_v57, %v2283_v11  ;;  %v2286_v52 = vadd.f32 %v3250_v47, %v2221_v18 }
 0x1b5   :  { %2872 = vst.msk [vmem:[%s4633_s3 + $0x74] sm:$0xf] %vm739_vm2, %v2904_v8  ;;  %v2360_v32 = vadd.f32 %v2348_v27, %v1868_v59  ;;  %v2351_v22 = vadd.f32 %v3322_v17, %v2286_v52 }
 0x1b7   :  { %vm2368_vm1 = vcmp.ge.f32.partialorder %v2360_v32, 1.0  ;;  %v2361_v25 = vadd.f32 %v2351_v22, %v1869_v19 }
 0x1b8   :  { %v2376_v63 = vsel %vm2368_vm1, 1.0, %v3511_v29 }
 0x1b9   :  { %v2905_v28 = vpack.c.bf16 %v2376_v63, %v2376_v63  ;;  %vm2369_vm3 = vcmp.ge.f32.partialorder %v2361_v25, 1.0 }
 0x1ba   :  { %v2377_v37 = vsel %vm2369_vm3, 1.0, %v3511_v29 }
 0x1bb   :  { %2873 = vst.msk [vmem:[%s4633_s3 + $0x78] sm:$0xf] %vm739_vm2, %v2905_v28  ;;  %v2906_v9 = vpack.c.bf16 %v2377_v37, %v2377_v37 }
 0x1bd   :  { %2874 = vst.msk [vmem:[%s4633_s3 + $0x7c] sm:$0xf] %vm739_vm2, %v2906_v9 }

</bundles_post_ra>
